<compile_context>
chip_gen: v7x
topology: tpu7x:2x2x1
jax: 0.10.0
libtpu: 0.0.40
codegen_flags: <defaults>
</compile_context>

<pallas_src>
import functools

import numpy as np
import jax
import jax.numpy as jnp
from jax import lax
from jax.experimental import pallas as pl
from jax.experimental.pallas import tpu as pltpu

EPS = 1e-5


def _fused_recurrent_kernel(xs_ref, w_ref, bias_ref, gamma_ref, beta_ref,
                            mask_ref, gmat_ref, o_ref,
                            cur_ref, buf_ref,
                            *, n_apps, hp, row_pad, lanes, inv_count):
    """Fused RecurrentBlock forward on the lane-dense slab layout.

    xs_ref   : (R + 2*row_pad, L)  zero-extended, zero-padded x slab
    w_ref    : (9*L, L)            block-banded conv weights ((kd,kh) stacked)
    bias_ref : (1, L)              conv bias replicated across w-groups
    gamma_ref: (1, L)              BN gamma replicated across w-groups
    beta_ref : (1, L)              BN beta replicated across w-groups
    mask_ref : (R, L)              1.0 at interior (n,d,h,w,c) positions
    gmat_ref : (L, L)              per-channel "sum & broadcast" matrix
    o_ref    : (R, L)              output slab
    cur_ref  : (R + 2*row_pad, L)  scratch: current conv-input slab
    buf_ref  : (R, L)              scratch: conv accumulator / centered values
    """
    R = o_ref.shape[0]

    # Conv input #1 is x itself (zero borders + zero extension rows).
    cur_ref[...] = xs_ref[...]

    def conv_bn_relu():
        # (1) Conv3d: 9 (kd,kh) row-shifted MXU contractions, K = 128 each.
        #     kw taps and the Cin contraction are folded into each banded
        #     128x128 weight block, so no per-tap lane shifts are needed.
        for kd in range(3):
            for kh in range(3):
                tap = kd * 3 + kh
                start = row_pad + (kd - 1) * hp + (kh - 1)
                part = jnp.dot(cur_ref[start:start + R, :],
                               w_ref[tap * lanes:(tap + 1) * lanes, :],
                               preferred_element_type=jnp.float32)
                if tap == 0:
                    buf_ref[...] = part
                else:
                    buf_ref[...] += part

        # (2) BatchNorm3d (training mode, biased variance) + ReLU, in-layout.
        mask = mask_ref[...]
        buf_ref[...] = (buf_ref[...] + bias_ref[...]) * mask    # 0 outside interior
        col_sum = jnp.sum(buf_ref[...], axis=0, keepdims=True)          # (1, L)
        mean = jnp.dot(col_sum, gmat_ref[...],
                       preferred_element_type=jnp.float32) * inv_count
        buf_ref[...] = (buf_ref[...] - mean) * mask             # centered, 0 outside
        sq_sum = jnp.sum(buf_ref[...] * buf_ref[...], axis=0, keepdims=True)
        var = jnp.dot(sq_sum, gmat_ref[...],
                      preferred_element_type=jnp.float32) * inv_count
        scale = lax.rsqrt(var + EPS) * gamma_ref[...]           # (1, L) row
        y = buf_ref[...] * scale + beta_ref[...]
        return jnp.maximum(y, 0.0) * mask                       # keep borders zero

    y = None
    for app in range(n_apps):
        y = conv_bn_relu()
        if app < n_apps - 1:
            # Next conv input is x + x1 on the interior rows; extension rows
            # and all border rows/lanes remain zero (= the conv padding).
            cur_ref[row_pad:row_pad + R, :] = xs_ref[row_pad:row_pad + R, :] + y
    o_ref[...] = y


def _interior_mask(N, D, H, W, C, wp):
    rows = np.zeros((N, D + 2, H + 2), np.float32)
    rows[:, 1:D + 1, 1:H + 1] = 1.0
    lane_col = np.zeros((wp, C), np.float32)
    lane_col[1:W + 1, :] = 1.0
    return rows.reshape(-1, 1) * lane_col.reshape(1, -1)        # (R, wp*C)


def _band_weights(w27, C, W, wp):
    """Fold kw taps + Cin contraction into a block-banded (9*L, L) matrix."""
    lanes = wp * C
    shift = np.zeros((3, wp, wp), np.float32)
    for kw in range(3):
        for wo in range(1, W + 1):                 # output w_pad positions 1..W
            shift[kw, wo + kw - 1, wo] = 1.0       # reads input w_pad = wo+kw-1
    blocks = []
    for kd in range(3):
        for kh in range(3):
            b = jnp.zeros((lanes, lanes), jnp.float32)
            for kw in range(3):
                b = b + jnp.kron(jnp.asarray(shift[kw]),
                                 w27[kd * 9 + kh * 3 + kw])     # [Cin, Cout] block
            blocks.append(b)
    return jnp.concatenate(blocks, axis=0)         # (9*lanes, lanes)


@functools.partial(jax.jit, static_argnames=("t",))
def recurrent_block(x_ncdhw, w27, bias, gamma, beta, t=2):
    """Exact forward of RecurrentBlock.  x_ncdhw: (N, C, D, H, W) float32."""
    assert t >= 1
    N, C, D, H, W = x_ncdhw.shape
    assert 128 % C == 0, "channel count must divide 128 for the fused lane layout"

    wp = pl.cdiv((W + 2) * C, 128) * 128 // C       # padded W extent (lane-dense)
    lanes = wp * C                                  # multiple of 128
    hp = H + 2
    R = N * (D + 2) * (H + 2)
    row_pad = pl.cdiv(hp + 1, 8) * 8                # row slack for (kd,kh) shifts

    # Glue: NCDHW -> zero-padded lane-dense slab, built ONCE per forward.
    x_ndhwc = jnp.transpose(x_ncdhw, (0, 2, 3, 4, 1)).astype(jnp.float32)
    xp = jnp.pad(x_ndhwc, ((0, 0), (1, 1), (1, 1), (1, wp - W - 1), (0, 0)))
    xs = jnp.pad(xp.reshape(R, lanes), ((row_pad, row_pad), (0, 0)))

    wband = _band_weights(w27.astype(jnp.float32), C, W, wp)
    gmat = jnp.asarray(np.kron(np.ones((wp, wp), np.float32),
                               np.eye(C, dtype=np.float32)))    # (lanes, lanes)
    mask = jnp.asarray(_interior_mask(N, D, H, W, C, wp))
    rep = lambda v: jnp.tile(v.reshape(1, C).astype(jnp.float32), (1, wp))

    kernel = functools.partial(
        _fused_recurrent_kernel, n_apps=t + 1, hp=hp, row_pad=row_pad,
        lanes=lanes, inv_count=1.0 / float(N * D * H * W))

    vmem = pl.BlockSpec(memory_space=pltpu.MemorySpace.VMEM)
    o_slab = pl.pallas_call(
        kernel,
        out_shape=jax.ShapeDtypeStruct((R, lanes), jnp.float32),
        in_specs=[vmem] * 7,
        out_specs=vmem,
        scratch_shapes=[
            pltpu.VMEM((R + 2 * row_pad, lanes), jnp.float32),  # current slab
            pltpu.VMEM((R, lanes), jnp.float32),                # conv/centered buf
        ],
    )(xs, wband, rep(bias), rep(gamma), rep(beta), mask, gmat)

    out = o_slab.reshape(N, D + 2, H + 2, wp, C)[:, 1:D + 1, 1:H + 1, 1:W + 1, :]
    return jnp.transpose(out, (0, 4, 1, 2, 3))                  # -> NCDHW


# ---------------------------------------------------------------------------
# Pure-JAX reference (correctness check only).
# ---------------------------------------------------------------------------
def _ref_conv_bn_relu(x, w27, bias, gamma, beta):
    C = x.shape[1]
    w_oidhw = jnp.transpose(w27.reshape(3, 3, 3, C, C), (4, 3, 0, 1, 2))
    y = lax.conv_general_dilated(
        x, w_oidhw, window_strides=(1, 1, 1),
        padding=((1, 1), (1, 1), (1, 1)),
        dimension_numbers=("NCDHW", "OIDHW", "NCDHW"))
    y = y + bias.reshape(1, C, 1, 1, 1)
    mean = jnp.mean(y, axis=(0, 2, 3, 4), keepdims=True)
    var = jnp.mean(jnp.square(y - mean), axis=(0, 2, 3, 4), keepdims=True)
    y = (y - mean) * lax.rsqrt(var + EPS)
    y = y * gamma.reshape(1, C, 1, 1, 1) + beta.reshape(1, C, 1, 1, 1)
    return jnp.maximum(y, 0.0)


def _ref_recurrent_block(x, w27, bias, gamma, beta, t=2):
    x1 = None
    for i in range(t):
        if i == 0:
            x1 = _ref_conv_bn_relu(x, w27, bias, gamma, beta)
        x1 = _ref_conv_bn_relu(x + x1, w27, bias, gamma, beta)
    return x1


def make_params(ch_out, key):
    """Synthetic params matching nn.Conv3d / nn.BatchNorm3d shapes."""
    k_w, k_b, k_g, k_e = jax.random.split(key, 4)
    fan_in = ch_out * 27
    bound = 1.0 / np.sqrt(fan_in)
    w = jax.random.uniform(k_w, (3, 3, 3, ch_out, ch_out), jnp.float32,
                           -bound, bound)
    w27 = w.reshape(27, ch_out, ch_out)            # (kd*9+kh*3+kw, Cin, Cout)
    bias = jax.random.uniform(k_b, (ch_out,), jnp.float32, -bound, bound)
    gamma = jax.random.uniform(k_g, (ch_out,), jnp.float32, 0.5, 1.5)
    beta = jax.random.uniform(k_e, (ch_out,), jnp.float32, -0.5, 0.5)
    return w27, bias, gamma, beta


if __name__ == "__main__":
    N, C, D, H, W = 2, 8, 8, 8, 8
    t = 2

    key = jax.random.PRNGKey(0)
    k_x, k_p = jax.random.split(key)
    x = jax.random.normal(k_x, (N, C, D, H, W), jnp.float32)
    w27, bias, gamma, beta = make_params(C, k_p)

    out = recurrent_block(x, w27, bias, gamma, beta, t=t)
    out = jax.block_until_ready(out)
    assert out.shape == (N, C, D, H, W) and out.dtype == jnp.float32

    ref = jax.block_until_ready(
        _ref_recurrent_block(x, w27, bias, gamma, beta, t=t))
    err = float(jnp.max(jnp.abs(out - ref)))
    assert jnp.allclose(out, ref, atol=2e-3, rtol=2e-3), err

    print("KERNEL_OK")
</pallas_src>

<mosaic_0001>
module attributes {stable_mosaic.version = 11 : i64} {
  func.func @_fused_recurrent_kernel(%arg0: memref<232x128xf32, #tpu.memory_space<vmem>>, %arg1: memref<1152x128xf32, #tpu.memory_space<vmem>>, %arg2: memref<1x128xf32, #tpu.memory_space<vmem>>, %arg3: memref<1x128xf32, #tpu.memory_space<vmem>>, %arg4: memref<1x128xf32, #tpu.memory_space<vmem>>, %arg5: memref<200x128xf32, #tpu.memory_space<vmem>>, %arg6: memref<128x128xf32, #tpu.memory_space<vmem>>, %arg7: memref<200x128xf32, #tpu.memory_space<vmem>>, %arg8: memref<232x128xf32, #tpu.memory_space<vmem>>, %arg9: memref<200x128xf32, #tpu.memory_space<vmem>>) attributes {dimension_semantics = [], scalar_prefetch = 0 : i64, scratch_operands = 2 : i64, tpu.core_type = #tpu.core_type<tc>} {
    %c0 = arith.constant 0 : index
    %c0_0 = arith.constant 0 : index
    %0 = vector.load %arg0[%c0, %c0_0] : memref<232x128xf32, #tpu.memory_space<vmem>>, vector<232x128xf32>
    %c0_1 = arith.constant 0 : index
    %c0_2 = arith.constant 0 : index
    %1 = vector.load %arg8[%c0_1, %c0_2] : memref<232x128xf32, #tpu.memory_space<vmem>>, vector<232x128xf32>
    tpu.vector_store %arg8[%c0_1, %c0_2], %0 {strides = array<i32>} : memref<232x128xf32, #tpu.memory_space<vmem>>, vector<232x128xf32>,
    %c5 = arith.constant 5 : index
    %c0_3 = arith.constant 0 : index
    %2 = vector.load %arg8[%c5, %c0_3] : memref<232x128xf32, #tpu.memory_space<vmem>>, vector<200x128xf32>
    %c0_4 = arith.constant 0 : index
    %c0_5 = arith.constant 0 : index
    %3 = vector.load %arg1[%c0_4, %c0_5] : memref<1152x128xf32, #tpu.memory_space<vmem>>, vector<128x128xf32>
    %cst = arith.constant dense<0.000000e+00> : vector<200x128xf32>
    %4 = tpu.matmul %2, %3, %cst {dimension_numbers = #tpu.dot_dimension_numbers<[1], [0], [0], [1], [0, 0, 1, 1], [], []>} : vector<200x128xf32>, vector<128x128xf32>, vector<200x128xf32> -> vector<200x128xf32>
    %c0_6 = arith.constant 0 : index
    %c0_7 = arith.constant 0 : index
    %5 = vector.load %arg9[%c0_6, %c0_7] : memref<200x128xf32, #tpu.memory_space<vmem>>, vector<200x128xf32>
    tpu.vector_store %arg9[%c0_6, %c0_7], %4 {strides = array<i32>} : memref<200x128xf32, #tpu.memory_space<vmem>>, vector<200x128xf32>,
    %c6 = arith.constant 6 : index
    %c0_8 = arith.constant 0 : index
    %6 = vector.load %arg8[%c6, %c0_8] : memref<232x128xf32, #tpu.memory_space<vmem>>, vector<200x128xf32>
    %c128 = arith.constant 128 : index
    %c0_9 = arith.constant 0 : index
    %7 = vector.load %arg1[%c128, %c0_9] : memref<1152x128xf32, #tpu.memory_space<vmem>>, vector<128x128xf32>
    %cst_10 = arith.constant dense<0.000000e+00> : vector<200x128xf32>
    %8 = tpu.matmul %6, %7, %cst_10 {dimension_numbers = #tpu.dot_dimension_numbers<[1], [0], [0], [1], [0, 0, 1, 1], [], []>} : vector<200x128xf32>, vector<128x128xf32>, vector<200x128xf32> -> vector<200x128xf32>
    %c0_11 = arith.constant 0 : index
    %c0_12 = arith.constant 0 : index
    %9 = vector.load %arg9[%c0_11, %c0_12] : memref<200x128xf32, #tpu.memory_space<vmem>>, vector<200x128xf32>
    %10 = arith.addf %9, %8 : vector<200x128xf32>
    %c0_13 = arith.constant 0 : index
    %c0_14 = arith.constant 0 : index
    %11 = vector.load %arg9[%c0_13, %c0_14] : memref<200x128xf32, #tpu.memory_space<vmem>>, vector<200x128xf32>
    tpu.vector_store %arg9[%c0_13, %c0_14], %10 {strides = array<i32>} : memref<200x128xf32, #tpu.memory_space<vmem>>, vector<200x128xf32>,
    %c7 = arith.constant 7 : index
    %c0_15 = arith.constant 0 : index
    %12 = vector.load %arg8[%c7, %c0_15] : memref<232x128xf32, #tpu.memory_space<vmem>>, vector<200x128xf32>
    %c256 = arith.constant 256 : index
    %c0_16 = arith.constant 0 : index
    %13 = vector.load %arg1[%c256, %c0_16] : memref<1152x128xf32, #tpu.memory_space<vmem>>, vector<128x128xf32>
    %cst_17 = arith.constant dense<0.000000e+00> : vector<200x128xf32>
    %14 = tpu.matmul %12, %13, %cst_17 {dimension_numbers = #tpu.dot_dimension_numbers<[1], [0], [0], [1], [0, 0, 1, 1], [], []>} : vector<200x128xf32>, vector<128x128xf32>, vector<200x128xf32> -> vector<200x128xf32>
    %c0_18 = arith.constant 0 : index
    %c0_19 = arith.constant 0 : index
    %15 = vector.load %arg9[%c0_18, %c0_19] : memref<200x128xf32, #tpu.memory_space<vmem>>, vector<200x128xf32>
    %16 = arith.addf %15, %14 : vector<200x128xf32>
    %c0_20 = arith.constant 0 : index
    %c0_21 = arith.constant 0 : index
    %17 = vector.load %arg9[%c0_20, %c0_21] : memref<200x128xf32, #tpu.memory_space<vmem>>, vector<200x128xf32>
    tpu.vector_store %arg9[%c0_20, %c0_21], %16 {strides = array<i32>} : memref<200x128xf32, #tpu.memory_space<vmem>>, vector<200x128xf32>,
    %c15 = arith.constant 15 : index
    %c0_22 = arith.constant 0 : index
    %18 = vector.load %arg8[%c15, %c0_22] : memref<232x128xf32, #tpu.memory_space<vmem>>, vector<200x128xf32>
    %c384 = arith.constant 384 : index
    %c0_23 = arith.constant 0 : index
    %19 = vector.load %arg1[%c384, %c0_23] : memref<1152x128xf32, #tpu.memory_space<vmem>>, vector<128x128xf32>
    %cst_24 = arith.constant dense<0.000000e+00> : vector<200x128xf32>
    %20 = tpu.matmul %18, %19, %cst_24 {dimension_numbers = #tpu.dot_dimension_numbers<[1], [0], [0], [1], [0, 0, 1, 1], [], []>} : vector<200x128xf32>, vector<128x128xf32>, vector<200x128xf32> -> vector<200x128xf32>
    %c0_25 = arith.constant 0 : index
    %c0_26 = arith.constant 0 : index
    %21 = vector.load %arg9[%c0_25, %c0_26] : memref<200x128xf32, #tpu.memory_space<vmem>>, vector<200x128xf32>
    %22 = arith.addf %21, %20 : vector<200x128xf32>
    %c0_27 = arith.constant 0 : index
    %c0_28 = arith.constant 0 : index
    %23 = vector.load %arg9[%c0_27, %c0_28] : memref<200x128xf32, #tpu.memory_space<vmem>>, vector<200x128xf32>
    tpu.vector_store %arg9[%c0_27, %c0_28], %22 {strides = array<i32>} : memref<200x128xf32, #tpu.memory_space<vmem>>, vector<200x128xf32>,
    %c16 = arith.constant 16 : index
    %c0_29 = arith.constant 0 : index
    %24 = vector.load %arg8[%c16, %c0_29] : memref<232x128xf32, #tpu.memory_space<vmem>>, vector<200x128xf32>
    %c512 = arith.constant 512 : index
    %c0_30 = arith.constant 0 : index
    %25 = vector.load %arg1[%c512, %c0_30] : memref<1152x128xf32, #tpu.memory_space<vmem>>, vector<128x128xf32>
    %cst_31 = arith.constant dense<0.000000e+00> : vector<200x128xf32>
    %26 = tpu.matmul %24, %25, %cst_31 {dimension_numbers = #tpu.dot_dimension_numbers<[1], [0], [0], [1], [0, 0, 1, 1], [], []>} : vector<200x128xf32>, vector<128x128xf32>, vector<200x128xf32> -> vector<200x128xf32>
    %c0_32 = arith.constant 0 : index
    %c0_33 = arith.constant 0 : index
    %27 = vector.load %arg9[%c0_32, %c0_33] : memref<200x128xf32, #tpu.memory_space<vmem>>, vector<200x128xf32>
    %28 = arith.addf %27, %26 : vector<200x128xf32>
    %c0_34 = arith.constant 0 : index
    %c0_35 = arith.constant 0 : index
    %29 = vector.load %arg9[%c0_34, %c0_35] : memref<200x128xf32, #tpu.memory_space<vmem>>, vector<200x128xf32>
    tpu.vector_store %arg9[%c0_34, %c0_35], %28 {strides = array<i32>} : memref<200x128xf32, #tpu.memory_space<vmem>>, vector<200x128xf32>,
    %c17 = arith.constant 17 : index
    %c0_36 = arith.constant 0 : index
    %30 = vector.load %arg8[%c17, %c0_36] : memref<232x128xf32, #tpu.memory_space<vmem>>, vector<200x128xf32>
    %c640 = arith.constant 640 : index
    %c0_37 = arith.constant 0 : index
    %31 = vector.load %arg1[%c640, %c0_37] : memref<1152x128xf32, #tpu.memory_space<vmem>>, vector<128x128xf32>
    %cst_38 = arith.constant dense<0.000000e+00> : vector<200x128xf32>
    %32 = tpu.matmul %30, %31, %cst_38 {dimension_numbers = #tpu.dot_dimension_numbers<[1], [0], [0], [1], [0, 0, 1, 1], [], []>} : vector<200x128xf32>, vector<128x128xf32>, vector<200x128xf32> -> vector<200x128xf32>
    %c0_39 = arith.constant 0 : index
    %c0_40 = arith.constant 0 : index
    %33 = vector.load %arg9[%c0_39, %c0_40] : memref<200x128xf32, #tpu.memory_space<vmem>>, vector<200x128xf32>
    %34 = arith.addf %33, %32 : vector<200x128xf32>
    %c0_41 = arith.constant 0 : index
    %c0_42 = arith.constant 0 : index
    %35 = vector.load %arg9[%c0_41, %c0_42] : memref<200x128xf32, #tpu.memory_space<vmem>>, vector<200x128xf32>
    tpu.vector_store %arg9[%c0_41, %c0_42], %34 {strides = array<i32>} : memref<200x128xf32, #tpu.memory_space<vmem>>, vector<200x128xf32>,
    %c25 = arith.constant 25 : index
    %c0_43 = arith.constant 0 : index
    %36 = vector.load %arg8[%c25, %c0_43] : memref<232x128xf32, #tpu.memory_space<vmem>>, vector<200x128xf32>
    %c768 = arith.constant 768 : index
    %c0_44 = arith.constant 0 : index
    %37 = vector.load %arg1[%c768, %c0_44] : memref<1152x128xf32, #tpu.memory_space<vmem>>, vector<128x128xf32>
    %cst_45 = arith.constant dense<0.000000e+00> : vector<200x128xf32>
    %38 = tpu.matmul %36, %37, %cst_45 {dimension_numbers = #tpu.dot_dimension_numbers<[1], [0], [0], [1], [0, 0, 1, 1], [], []>} : vector<200x128xf32>, vector<128x128xf32>, vector<200x128xf32> -> vector<200x128xf32>
    %c0_46 = arith.constant 0 : index
    %c0_47 = arith.constant 0 : index
    %39 = vector.load %arg9[%c0_46, %c0_47] : memref<200x128xf32, #tpu.memory_space<vmem>>, vector<200x128xf32>
    %40 = arith.addf %39, %38 : vector<200x128xf32>
    %c0_48 = arith.constant 0 : index
    %c0_49 = arith.constant 0 : index
    %41 = vector.load %arg9[%c0_48, %c0_49] : memref<200x128xf32, #tpu.memory_space<vmem>>, vector<200x128xf32>
    tpu.vector_store %arg9[%c0_48, %c0_49], %40 {strides = array<i32>} : memref<200x128xf32, #tpu.memory_space<vmem>>, vector<200x128xf32>,
    %c26 = arith.constant 26 : index
    %c0_50 = arith.constant 0 : index
    %42 = vector.load %arg8[%c26, %c0_50] : memref<232x128xf32, #tpu.memory_space<vmem>>, vector<200x128xf32>
    %c896 = arith.constant 896 : index
    %c0_51 = arith.constant 0 : index
    %43 = vector.load %arg1[%c896, %c0_51] : memref<1152x128xf32, #tpu.memory_space<vmem>>, vector<128x128xf32>
    %cst_52 = arith.constant dense<0.000000e+00> : vector<200x128xf32>
    %44 = tpu.matmul %42, %43, %cst_52 {dimension_numbers = #tpu.dot_dimension_numbers<[1], [0], [0], [1], [0, 0, 1, 1], [], []>} : vector<200x128xf32>, vector<128x128xf32>, vector<200x128xf32> -> vector<200x128xf32>
    %c0_53 = arith.constant 0 : index
    %c0_54 = arith.constant 0 : index
    %45 = vector.load %arg9[%c0_53, %c0_54] : memref<200x128xf32, #tpu.memory_space<vmem>>, vector<200x128xf32>
    %46 = arith.addf %45, %44 : vector<200x128xf32>
    %c0_55 = arith.constant 0 : index
    %c0_56 = arith.constant 0 : index
    %47 = vector.load %arg9[%c0_55, %c0_56] : memref<200x128xf32, #tpu.memory_space<vmem>>, vector<200x128xf32>
    tpu.vector_store %arg9[%c0_55, %c0_56], %46 {strides = array<i32>} : memref<200x128xf32, #tpu.memory_space<vmem>>, vector<200x128xf32>,
    %c27 = arith.constant 27 : index
    %c0_57 = arith.constant 0 : index
    %48 = vector.load %arg8[%c27, %c0_57] : memref<232x128xf32, #tpu.memory_space<vmem>>, vector<200x128xf32>
    %c1024 = arith.constant 1024 : index
    %c0_58 = arith.constant 0 : index
    %49 = vector.load %arg1[%c1024, %c0_58] : memref<1152x128xf32, #tpu.memory_space<vmem>>, vector<128x128xf32>
    %cst_59 = arith.constant dense<0.000000e+00> : vector<200x128xf32>
    %50 = tpu.matmul %48, %49, %cst_59 {dimension_numbers = #tpu.dot_dimension_numbers<[1], [0], [0], [1], [0, 0, 1, 1], [], []>} : vector<200x128xf32>, vector<128x128xf32>, vector<200x128xf32> -> vector<200x128xf32>
    %c0_60 = arith.constant 0 : index
    %c0_61 = arith.constant 0 : index
    %51 = vector.load %arg9[%c0_60, %c0_61] : memref<200x128xf32, #tpu.memory_space<vmem>>, vector<200x128xf32>
    %52 = arith.addf %51, %50 : vector<200x128xf32>
    %c0_62 = arith.constant 0 : index
    %c0_63 = arith.constant 0 : index
    %53 = vector.load %arg9[%c0_62, %c0_63] : memref<200x128xf32, #tpu.memory_space<vmem>>, vector<200x128xf32>
    tpu.vector_store %arg9[%c0_62, %c0_63], %52 {strides = array<i32>} : memref<200x128xf32, #tpu.memory_space<vmem>>, vector<200x128xf32>,
    %c0_64 = arith.constant 0 : index
    %c0_65 = arith.constant 0 : index
    %54 = vector.load %arg5[%c0_64, %c0_65] : memref<200x128xf32, #tpu.memory_space<vmem>>, vector<200x128xf32>
    %c0_66 = arith.constant 0 : index
    %c0_67 = arith.constant 0 : index
    %55 = vector.load %arg9[%c0_66, %c0_67] : memref<200x128xf32, #tpu.memory_space<vmem>>, vector<200x128xf32>
    %c0_68 = arith.constant 0 : index
    %c0_69 = arith.constant 0 : index
    %56 = vector.load %arg2[%c0_68, %c0_69] : memref<1x128xf32, #tpu.memory_space<vmem>>, vector<1x128xf32>
    %57 = vector.broadcast %56 : vector<1x128xf32> to vector<200x128xf32>
    %58 = arith.addf %55, %57 : vector<200x128xf32>
    %59 = arith.mulf %58, %54 : vector<200x128xf32>
    %c0_70 = arith.constant 0 : index
    %c0_71 = arith.constant 0 : index
    %60 = vector.load %arg9[%c0_70, %c0_71] : memref<200x128xf32, #tpu.memory_space<vmem>>, vector<200x128xf32>
    tpu.vector_store %arg9[%c0_70, %c0_71], %59 {strides = array<i32>} : memref<200x128xf32, #tpu.memory_space<vmem>>, vector<200x128xf32>,
    %c0_72 = arith.constant 0 : index
    %c0_73 = arith.constant 0 : index
    %61 = vector.load %arg9[%c0_72, %c0_73] : memref<200x128xf32, #tpu.memory_space<vmem>>, vector<200x128xf32>
    %cst_74 = arith.constant dense<0.000000e+00> : vector<128xf32>
    %62 = vector.multi_reduction <add>, %61, %cst_74 [0] : vector<200x128xf32> to vector<128xf32>
    %63 = vector.shape_cast %62 : vector<128xf32> to vector<1x128xf32>
    %c0_75 = arith.constant 0 : index
    %c0_76 = arith.constant 0 : index
    %64 = vector.load %arg6[%c0_75, %c0_76] : memref<128x128xf32, #tpu.memory_space<vmem>>, vector<128x128xf32>
    %cst_77 = arith.constant dense<0.000000e+00> : vector<1x128xf32>
    %65 = tpu.matmul %63, %64, %cst_77 {dimension_numbers = #tpu.dot_dimension_numbers<[1], [0], [0], [1], [0, 0, 1, 1], [], []>} : vector<1x128xf32>, vector<128x128xf32>, vector<1x128xf32> -> vector<1x128xf32>
    %cst_78 = arith.constant 9.765625E-4 : f32
    %66 = vector.broadcast %cst_78 : f32 to vector<1x128xf32>
    %67 = arith.mulf %65, %66 : vector<1x128xf32>
    %c0_79 = arith.constant 0 : index
    %c0_80 = arith.constant 0 : index
    %68 = vector.load %arg9[%c0_79, %c0_80] : memref<200x128xf32, #tpu.memory_space<vmem>>, vector<200x128xf32>
    %69 = vector.broadcast %67 : vector<1x128xf32> to vector<200x128xf32>
    %70 = arith.subf %68, %69 : vector<200x128xf32>
    %71 = arith.mulf %70, %54 : vector<200x128xf32>
    %c0_81 = arith.constant 0 : index
    %c0_82 = arith.constant 0 : index
    %72 = vector.load %arg9[%c0_81, %c0_82] : memref<200x128xf32, #tpu.memory_space<vmem>>, vector<200x128xf32>
    tpu.vector_store %arg9[%c0_81, %c0_82], %71 {strides = array<i32>} : memref<200x128xf32, #tpu.memory_space<vmem>>, vector<200x128xf32>,
    %c0_83 = arith.constant 0 : index
    %c0_84 = arith.constant 0 : index
    %73 = vector.load %arg9[%c0_83, %c0_84] : memref<200x128xf32, #tpu.memory_space<vmem>>, vector<200x128xf32>
    %c0_85 = arith.constant 0 : index
    %c0_86 = arith.constant 0 : index
    %74 = vector.load %arg9[%c0_85, %c0_86] : memref<200x128xf32, #tpu.memory_space<vmem>>, vector<200x128xf32>
    %75 = arith.mulf %73, %74 : vector<200x128xf32>
    %cst_87 = arith.constant dense<0.000000e+00> : vector<128xf32>
    %76 = vector.multi_reduction <add>, %75, %cst_87 [0] : vector<200x128xf32> to vector<128xf32>
    %77 = vector.shape_cast %76 : vector<128xf32> to vector<1x128xf32>
    %c0_88 = arith.constant 0 : index
    %c0_89 = arith.constant 0 : index
    %78 = vector.load %arg6[%c0_88, %c0_89] : memref<128x128xf32, #tpu.memory_space<vmem>>, vector<128x128xf32>
    %cst_90 = arith.constant dense<0.000000e+00> : vector<1x128xf32>
    %79 = tpu.matmul %77, %78, %cst_90 {dimension_numbers = #tpu.dot_dimension_numbers<[1], [0], [0], [1], [0, 0, 1, 1], [], []>} : vector<1x128xf32>, vector<128x128xf32>, vector<1x128xf32> -> vector<1x128xf32>
    %cst_91 = arith.constant 9.765625E-4 : f32
    %80 = vector.broadcast %cst_91 : f32 to vector<1x128xf32>
    %81 = arith.mulf %79, %80 : vector<1x128xf32>
    %cst_92 = arith.constant 9.99999974E-6 : f32
    %82 = vector.broadcast %cst_92 : f32 to vector<1x128xf32>
    %83 = arith.addf %81, %82 : vector<1x128xf32>
    %84 = math.rsqrt %83 : vector<1x128xf32>
    %c0_93 = arith.constant 0 : index
    %c0_94 = arith.constant 0 : index
    %85 = vector.load %arg3[%c0_93, %c0_94] : memref<1x128xf32, #tpu.memory_space<vmem>>, vector<1x128xf32>
    %86 = arith.mulf %84, %85 : vector<1x128xf32>
    %c0_95 = arith.constant 0 : index
    %c0_96 = arith.constant 0 : index
    %87 = vector.load %arg9[%c0_95, %c0_96] : memref<200x128xf32, #tpu.memory_space<vmem>>, vector<200x128xf32>
    %88 = vector.broadcast %86 : vector<1x128xf32> to vector<200x128xf32>
    %89 = arith.mulf %87, %88 : vector<200x128xf32>
    %c0_97 = arith.constant 0 : index
    %c0_98 = arith.constant 0 : index
    %90 = vector.load %arg4[%c0_97, %c0_98] : memref<1x128xf32, #tpu.memory_space<vmem>>, vector<1x128xf32>
    %91 = vector.broadcast %90 : vector<1x128xf32> to vector<200x128xf32>
    %92 = arith.addf %89, %91 : vector<200x128xf32>
    %cst_99 = arith.constant 0.000000e+00 : f32
    %93 = vector.broadcast %cst_99 : f32 to vector<200x128xf32>
    %94 = arith.maximumf %92, %93 : vector<200x128xf32>
    %95 = arith.mulf %94, %54 : vector<200x128xf32>
    %c16_100 = arith.constant 16 : index
    %c0_101 = arith.constant 0 : index
    %96 = vector.load %arg0[%c16_100, %c0_101] : memref<232x128xf32, #tpu.memory_space<vmem>>, vector<200x128xf32>
    %97 = arith.addf %96, %95 : vector<200x128xf32>
    %c16_102 = arith.constant 16 : index
    %c0_103 = arith.constant 0 : index
    %98 = vector.load %arg8[%c16_102, %c0_103] : memref<232x128xf32, #tpu.memory_space<vmem>>, vector<200x128xf32>
    tpu.vector_store %arg8[%c16_102, %c0_103], %97 {strides = array<i32>} : memref<232x128xf32, #tpu.memory_space<vmem>>, vector<200x128xf32>,
    %c5_104 = arith.constant 5 : index
    %c0_105 = arith.constant 0 : index
    %99 = vector.load %arg8[%c5_104, %c0_105] : memref<232x128xf32, #tpu.memory_space<vmem>>, vector<200x128xf32>
    %c0_106 = arith.constant 0 : index
    %c0_107 = arith.constant 0 : index
    %100 = vector.load %arg1[%c0_106, %c0_107] : memref<1152x128xf32, #tpu.memory_space<vmem>>, vector<128x128xf32>
    %cst_108 = arith.constant dense<0.000000e+00> : vector<200x128xf32>
    %101 = tpu.matmul %99, %100, %cst_108 {dimension_numbers = #tpu.dot_dimension_numbers<[1], [0], [0], [1], [0, 0, 1, 1], [], []>} : vector<200x128xf32>, vector<128x128xf32>, vector<200x128xf32> -> vector<200x128xf32>
    %c0_109 = arith.constant 0 : index
    %c0_110 = arith.constant 0 : index
    %102 = vector.load %arg9[%c0_109, %c0_110] : memref<200x128xf32, #tpu.memory_space<vmem>>, vector<200x128xf32>
    tpu.vector_store %arg9[%c0_109, %c0_110], %101 {strides = array<i32>} : memref<200x128xf32, #tpu.memory_space<vmem>>, vector<200x128xf32>,
    %c6_111 = arith.constant 6 : index
    %c0_112 = arith.constant 0 : index
    %103 = vector.load %arg8[%c6_111, %c0_112] : memref<232x128xf32, #tpu.memory_space<vmem>>, vector<200x128xf32>
    %c128_113 = arith.constant 128 : index
    %c0_114 = arith.constant 0 : index
    %104 = vector.load %arg1[%c128_113, %c0_114] : memref<1152x128xf32, #tpu.memory_space<vmem>>, vector<128x128xf32>
    %cst_115 = arith.constant dense<0.000000e+00> : vector<200x128xf32>
    %105 = tpu.matmul %103, %104, %cst_115 {dimension_numbers = #tpu.dot_dimension_numbers<[1], [0], [0], [1], [0, 0, 1, 1], [], []>} : vector<200x128xf32>, vector<128x128xf32>, vector<200x128xf32> -> vector<200x128xf32>
    %c0_116 = arith.constant 0 : index
    %c0_117 = arith.constant 0 : index
    %106 = vector.load %arg9[%c0_116, %c0_117] : memref<200x128xf32, #tpu.memory_space<vmem>>, vector<200x128xf32>
    %107 = arith.addf %106, %105 : vector<200x128xf32>
    %c0_118 = arith.constant 0 : index
    %c0_119 = arith.constant 0 : index
    %108 = vector.load %arg9[%c0_118, %c0_119] : memref<200x128xf32, #tpu.memory_space<vmem>>, vector<200x128xf32>
    tpu.vector_store %arg9[%c0_118, %c0_119], %107 {strides = array<i32>} : memref<200x128xf32, #tpu.memory_space<vmem>>, vector<200x128xf32>,
    %c7_120 = arith.constant 7 : index
    %c0_121 = arith.constant 0 : index
    %109 = vector.load %arg8[%c7_120, %c0_121] : memref<232x128xf32, #tpu.memory_space<vmem>>, vector<200x128xf32>
    %c256_122 = arith.constant 256 : index
    %c0_123 = arith.constant 0 : index
    %110 = vector.load %arg1[%c256_122, %c0_123] : memref<1152x128xf32, #tpu.memory_space<vmem>>, vector<128x128xf32>
    %cst_124 = arith.constant dense<0.000000e+00> : vector<200x128xf32>
    %111 = tpu.matmul %109, %110, %cst_124 {dimension_numbers = #tpu.dot_dimension_numbers<[1], [0], [0], [1], [0, 0, 1, 1], [], []>} : vector<200x128xf32>, vector<128x128xf32>, vector<200x128xf32> -> vector<200x128xf32>
    %c0_125 = arith.constant 0 : index
    %c0_126 = arith.constant 0 : index
    %112 = vector.load %arg9[%c0_125, %c0_126] : memref<200x128xf32, #tpu.memory_space<vmem>>, vector<200x128xf32>
    %113 = arith.addf %112, %111 : vector<200x128xf32>
    %c0_127 = arith.constant 0 : index
    %c0_128 = arith.constant 0 : index
    %114 = vector.load %arg9[%c0_127, %c0_128] : memref<200x128xf32, #tpu.memory_space<vmem>>, vector<200x128xf32>
    tpu.vector_store %arg9[%c0_127, %c0_128], %113 {strides = array<i32>} : memref<200x128xf32, #tpu.memory_space<vmem>>, vector<200x128xf32>,
    %c15_129 = arith.constant 15 : index
    %c0_130 = arith.constant 0 : index
    %115 = vector.load %arg8[%c15_129, %c0_130] : memref<232x128xf32, #tpu.memory_space<vmem>>, vector<200x128xf32>
    %c384_131 = arith.constant 384 : index
    %c0_132 = arith.constant 0 : index
    %116 = vector.load %arg1[%c384_131, %c0_132] : memref<1152x128xf32, #tpu.memory_space<vmem>>, vector<128x128xf32>
    %cst_133 = arith.constant dense<0.000000e+00> : vector<200x128xf32>
    %117 = tpu.matmul %115, %116, %cst_133 {dimension_numbers = #tpu.dot_dimension_numbers<[1], [0], [0], [1], [0, 0, 1, 1], [], []>} : vector<200x128xf32>, vector<128x128xf32>, vector<200x128xf32> -> vector<200x128xf32>
    %c0_134 = arith.constant 0 : index
    %c0_135 = arith.constant 0 : index
    %118 = vector.load %arg9[%c0_134, %c0_135] : memref<200x128xf32, #tpu.memory_space<vmem>>, vector<200x128xf32>
    %119 = arith.addf %118, %117 : vector<200x128xf32>
    %c0_136 = arith.constant 0 : index
    %c0_137 = arith.constant 0 : index
    %120 = vector.load %arg9[%c0_136, %c0_137] : memref<200x128xf32, #tpu.memory_space<vmem>>, vector<200x128xf32>
    tpu.vector_store %arg9[%c0_136, %c0_137], %119 {strides = array<i32>} : memref<200x128xf32, #tpu.memory_space<vmem>>, vector<200x128xf32>,
    %c16_138 = arith.constant 16 : index
    %c0_139 = arith.constant 0 : index
    %121 = vector.load %arg8[%c16_138, %c0_139] : memref<232x128xf32, #tpu.memory_space<vmem>>, vector<200x128xf32>
    %c512_140 = arith.constant 512 : index
    %c0_141 = arith.constant 0 : index
    %122 = vector.load %arg1[%c512_140, %c0_141] : memref<1152x128xf32, #tpu.memory_space<vmem>>, vector<128x128xf32>
    %cst_142 = arith.constant dense<0.000000e+00> : vector<200x128xf32>
    %123 = tpu.matmul %121, %122, %cst_142 {dimension_numbers = #tpu.dot_dimension_numbers<[1], [0], [0], [1], [0, 0, 1, 1], [], []>} : vector<200x128xf32>, vector<128x128xf32>, vector<200x128xf32> -> vector<200x128xf32>
    %c0_143 = arith.constant 0 : index
    %c0_144 = arith.constant 0 : index
    %124 = vector.load %arg9[%c0_143, %c0_144] : memref<200x128xf32, #tpu.memory_space<vmem>>, vector<200x128xf32>
    %125 = arith.addf %124, %123 : vector<200x128xf32>
    %c0_145 = arith.constant 0 : index
    %c0_146 = arith.constant 0 : index
    %126 = vector.load %arg9[%c0_145, %c0_146] : memref<200x128xf32, #tpu.memory_space<vmem>>, vector<200x128xf32>
    tpu.vector_store %arg9[%c0_145, %c0_146], %125 {strides = array<i32>} : memref<200x128xf32, #tpu.memory_space<vmem>>, vector<200x128xf32>,
    %c17_147 = arith.constant 17 : index
    %c0_148 = arith.constant 0 : index
    %127 = vector.load %arg8[%c17_147, %c0_148] : memref<232x128xf32, #tpu.memory_space<vmem>>, vector<200x128xf32>
    %c640_149 = arith.constant 640 : index
    %c0_150 = arith.constant 0 : index
    %128 = vector.load %arg1[%c640_149, %c0_150] : memref<1152x128xf32, #tpu.memory_space<vmem>>, vector<128x128xf32>
    %cst_151 = arith.constant dense<0.000000e+00> : vector<200x128xf32>
    %129 = tpu.matmul %127, %128, %cst_151 {dimension_numbers = #tpu.dot_dimension_numbers<[1], [0], [0], [1], [0, 0, 1, 1], [], []>} : vector<200x128xf32>, vector<128x128xf32>, vector<200x128xf32> -> vector<200x128xf32>
    %c0_152 = arith.constant 0 : index
    %c0_153 = arith.constant 0 : index
    %130 = vector.load %arg9[%c0_152, %c0_153] : memref<200x128xf32, #tpu.memory_space<vmem>>, vector<200x128xf32>
    %131 = arith.addf %130, %129 : vector<200x128xf32>
    %c0_154 = arith.constant 0 : index
    %c0_155 = arith.constant 0 : index
    %132 = vector.load %arg9[%c0_154, %c0_155] : memref<200x128xf32, #tpu.memory_space<vmem>>, vector<200x128xf32>
    tpu.vector_store %arg9[%c0_154, %c0_155], %131 {strides = array<i32>} : memref<200x128xf32, #tpu.memory_space<vmem>>, vector<200x128xf32>,
    %c25_156 = arith.constant 25 : index
    %c0_157 = arith.constant 0 : index
    %133 = vector.load %arg8[%c25_156, %c0_157] : memref<232x128xf32, #tpu.memory_space<vmem>>, vector<200x128xf32>
    %c768_158 = arith.constant 768 : index
    %c0_159 = arith.constant 0 : index
    %134 = vector.load %arg1[%c768_158, %c0_159] : memref<1152x128xf32, #tpu.memory_space<vmem>>, vector<128x128xf32>
    %cst_160 = arith.constant dense<0.000000e+00> : vector<200x128xf32>
    %135 = tpu.matmul %133, %134, %cst_160 {dimension_numbers = #tpu.dot_dimension_numbers<[1], [0], [0], [1], [0, 0, 1, 1], [], []>} : vector<200x128xf32>, vector<128x128xf32>, vector<200x128xf32> -> vector<200x128xf32>
    %c0_161 = arith.constant 0 : index
    %c0_162 = arith.constant 0 : index
    %136 = vector.load %arg9[%c0_161, %c0_162] : memref<200x128xf32, #tpu.memory_space<vmem>>, vector<200x128xf32>
    %137 = arith.addf %136, %135 : vector<200x128xf32>
    %c0_163 = arith.constant 0 : index
    %c0_164 = arith.constant 0 : index
    %138 = vector.load %arg9[%c0_163, %c0_164] : memref<200x128xf32, #tpu.memory_space<vmem>>, vector<200x128xf32>
    tpu.vector_store %arg9[%c0_163, %c0_164], %137 {strides = array<i32>} : memref<200x128xf32, #tpu.memory_space<vmem>>, vector<200x128xf32>,
    %c26_165 = arith.constant 26 : index
    %c0_166 = arith.constant 0 : index
    %139 = vector.load %arg8[%c26_165, %c0_166] : memref<232x128xf32, #tpu.memory_space<vmem>>, vector<200x128xf32>
    %c896_167 = arith.constant 896 : index
    %c0_168 = arith.constant 0 : index
    %140 = vector.load %arg1[%c896_167, %c0_168] : memref<1152x128xf32, #tpu.memory_space<vmem>>, vector<128x128xf32>
    %cst_169 = arith.constant dense<0.000000e+00> : vector<200x128xf32>
    %141 = tpu.matmul %139, %140, %cst_169 {dimension_numbers = #tpu.dot_dimension_numbers<[1], [0], [0], [1], [0, 0, 1, 1], [], []>} : vector<200x128xf32>, vector<128x128xf32>, vector<200x128xf32> -> vector<200x128xf32>
    %c0_170 = arith.constant 0 : index
    %c0_171 = arith.constant 0 : index
    %142 = vector.load %arg9[%c0_170, %c0_171] : memref<200x128xf32, #tpu.memory_space<vmem>>, vector<200x128xf32>
    %143 = arith.addf %142, %141 : vector<200x128xf32>
    %c0_172 = arith.constant 0 : index
    %c0_173 = arith.constant 0 : index
    %144 = vector.load %arg9[%c0_172, %c0_173] : memref<200x128xf32, #tpu.memory_space<vmem>>, vector<200x128xf32>
    tpu.vector_store %arg9[%c0_172, %c0_173], %143 {strides = array<i32>} : memref<200x128xf32, #tpu.memory_space<vmem>>, vector<200x128xf32>,
    %c27_174 = arith.constant 27 : index
    %c0_175 = arith.constant 0 : index
    %145 = vector.load %arg8[%c27_174, %c0_175] : memref<232x128xf32, #tpu.memory_space<vmem>>, vector<200x128xf32>
    %c1024_176 = arith.constant 1024 : index
    %c0_177 = arith.constant 0 : index
    %146 = vector.load %arg1[%c1024_176, %c0_177] : memref<1152x128xf32, #tpu.memory_space<vmem>>, vector<128x128xf32>
    %cst_178 = arith.constant dense<0.000000e+00> : vector<200x128xf32>
    %147 = tpu.matmul %145, %146, %cst_178 {dimension_numbers = #tpu.dot_dimension_numbers<[1], [0], [0], [1], [0, 0, 1, 1], [], []>} : vector<200x128xf32>, vector<128x128xf32>, vector<200x128xf32> -> vector<200x128xf32>
    %c0_179 = arith.constant 0 : index
    %c0_180 = arith.constant 0 : index
    %148 = vector.load %arg9[%c0_179, %c0_180] : memref<200x128xf32, #tpu.memory_space<vmem>>, vector<200x128xf32>
    %149 = arith.addf %148, %147 : vector<200x128xf32>
    %c0_181 = arith.constant 0 : index
    %c0_182 = arith.constant 0 : index
    %150 = vector.load %arg9[%c0_181, %c0_182] : memref<200x128xf32, #tpu.memory_space<vmem>>, vector<200x128xf32>
    tpu.vector_store %arg9[%c0_181, %c0_182], %149 {strides = array<i32>} : memref<200x128xf32, #tpu.memory_space<vmem>>, vector<200x128xf32>,
    %c0_183 = arith.constant 0 : index
    %c0_184 = arith.constant 0 : index
    %151 = vector.load %arg5[%c0_183, %c0_184] : memref<200x128xf32, #tpu.memory_space<vmem>>, vector<200x128xf32>
    %c0_185 = arith.constant 0 : index
    %c0_186 = arith.constant 0 : index
    %152 = vector.load %arg9[%c0_185, %c0_186] : memref<200x128xf32, #tpu.memory_space<vmem>>, vector<200x128xf32>
    %c0_187 = arith.constant 0 : index
    %c0_188 = arith.constant 0 : index
    %153 = vector.load %arg2[%c0_187, %c0_188] : memref<1x128xf32, #tpu.memory_space<vmem>>, vector<1x128xf32>
    %154 = vector.broadcast %153 : vector<1x128xf32> to vector<200x128xf32>
    %155 = arith.addf %152, %154 : vector<200x128xf32>
    %156 = arith.mulf %155, %151 : vector<200x128xf32>
    %c0_189 = arith.constant 0 : index
    %c0_190 = arith.constant 0 : index
    %157 = vector.load %arg9[%c0_189, %c0_190] : memref<200x128xf32, #tpu.memory_space<vmem>>, vector<200x128xf32>
    tpu.vector_store %arg9[%c0_189, %c0_190], %156 {strides = array<i32>} : memref<200x128xf32, #tpu.memory_space<vmem>>, vector<200x128xf32>,
    %c0_191 = arith.constant 0 : index
    %c0_192 = arith.constant 0 : index
    %158 = vector.load %arg9[%c0_191, %c0_192] : memref<200x128xf32, #tpu.memory_space<vmem>>, vector<200x128xf32>
    %cst_193 = arith.constant dense<0.000000e+00> : vector<128xf32>
    %159 = vector.multi_reduction <add>, %158, %cst_193 [0] : vector<200x128xf32> to vector<128xf32>
    %160 = vector.shape_cast %159 : vector<128xf32> to vector<1x128xf32>
    %c0_194 = arith.constant 0 : index
    %c0_195 = arith.constant 0 : index
    %161 = vector.load %arg6[%c0_194, %c0_195] : memref<128x128xf32, #tpu.memory_space<vmem>>, vector<128x128xf32>
    %cst_196 = arith.constant dense<0.000000e+00> : vector<1x128xf32>
    %162 = tpu.matmul %160, %161, %cst_196 {dimension_numbers = #tpu.dot_dimension_numbers<[1], [0], [0], [1], [0, 0, 1, 1], [], []>} : vector<1x128xf32>, vector<128x128xf32>, vector<1x128xf32> -> vector<1x128xf32>
    %cst_197 = arith.constant 9.765625E-4 : f32
    %163 = vector.broadcast %cst_197 : f32 to vector<1x128xf32>
    %164 = arith.mulf %162, %163 : vector<1x128xf32>
    %c0_198 = arith.constant 0 : index
    %c0_199 = arith.constant 0 : index
    %165 = vector.load %arg9[%c0_198, %c0_199] : memref<200x128xf32, #tpu.memory_space<vmem>>, vector<200x128xf32>
    %166 = vector.broadcast %164 : vector<1x128xf32> to vector<200x128xf32>
    %167 = arith.subf %165, %166 : vector<200x128xf32>
    %168 = arith.mulf %167, %151 : vector<200x128xf32>
    %c0_200 = arith.constant 0 : index
    %c0_201 = arith.constant 0 : index
    %169 = vector.load %arg9[%c0_200, %c0_201] : memref<200x128xf32, #tpu.memory_space<vmem>>, vector<200x128xf32>
    tpu.vector_store %arg9[%c0_200, %c0_201], %168 {strides = array<i32>} : memref<200x128xf32, #tpu.memory_space<vmem>>, vector<200x128xf32>,
    %c0_202 = arith.constant 0 : index
    %c0_203 = arith.constant 0 : index
    %170 = vector.load %arg9[%c0_202, %c0_203] : memref<200x128xf32, #tpu.memory_space<vmem>>, vector<200x128xf32>
    %c0_204 = arith.constant 0 : index
    %c0_205 = arith.constant 0 : index
    %171 = vector.load %arg9[%c0_204, %c0_205] : memref<200x128xf32, #tpu.memory_space<vmem>>, vector<200x128xf32>
    %172 = arith.mulf %170, %171 : vector<200x128xf32>
    %cst_206 = arith.constant dense<0.000000e+00> : vector<128xf32>
    %173 = vector.multi_reduction <add>, %172, %cst_206 [0] : vector<200x128xf32> to vector<128xf32>
    %174 = vector.shape_cast %173 : vector<128xf32> to vector<1x128xf32>
    %c0_207 = arith.constant 0 : index
    %c0_208 = arith.constant 0 : index
    %175 = vector.load %arg6[%c0_207, %c0_208] : memref<128x128xf32, #tpu.memory_space<vmem>>, vector<128x128xf32>
    %cst_209 = arith.constant dense<0.000000e+00> : vector<1x128xf32>
    %176 = tpu.matmul %174, %175, %cst_209 {dimension_numbers = #tpu.dot_dimension_numbers<[1], [0], [0], [1], [0, 0, 1, 1], [], []>} : vector<1x128xf32>, vector<128x128xf32>, vector<1x128xf32> -> vector<1x128xf32>
    %cst_210 = arith.constant 9.765625E-4 : f32
    %177 = vector.broadcast %cst_210 : f32 to vector<1x128xf32>
    %178 = arith.mulf %176, %177 : vector<1x128xf32>
    %cst_211 = arith.constant 9.99999974E-6 : f32
    %179 = vector.broadcast %cst_211 : f32 to vector<1x128xf32>
    %180 = arith.addf %178, %179 : vector<1x128xf32>
    %181 = math.rsqrt %180 : vector<1x128xf32>
    %c0_212 = arith.constant 0 : index
    %c0_213 = arith.constant 0 : index
    %182 = vector.load %arg3[%c0_212, %c0_213] : memref<1x128xf32, #tpu.memory_space<vmem>>, vector<1x128xf32>
    %183 = arith.mulf %181, %182 : vector<1x128xf32>
    %c0_214 = arith.constant 0 : index
    %c0_215 = arith.constant 0 : index
    %184 = vector.load %arg9[%c0_214, %c0_215] : memref<200x128xf32, #tpu.memory_space<vmem>>, vector<200x128xf32>
    %185 = vector.broadcast %183 : vector<1x128xf32> to vector<200x128xf32>
    %186 = arith.mulf %184, %185 : vector<200x128xf32>
    %c0_216 = arith.constant 0 : index
    %c0_217 = arith.constant 0 : index
    %187 = vector.load %arg4[%c0_216, %c0_217] : memref<1x128xf32, #tpu.memory_space<vmem>>, vector<1x128xf32>
    %188 = vector.broadcast %187 : vector<1x128xf32> to vector<200x128xf32>
    %189 = arith.addf %186, %188 : vector<200x128xf32>
    %cst_218 = arith.constant 0.000000e+00 : f32
    %190 = vector.broadcast %cst_218 : f32 to vector<200x128xf32>
    %191 = arith.maximumf %189, %190 : vector<200x128xf32>
    %192 = arith.mulf %191, %151 : vector<200x128xf32>
    %c16_219 = arith.constant 16 : index
    %c0_220 = arith.constant 0 : index
    %193 = vector.load %arg0[%c16_219, %c0_220] : memref<232x128xf32, #tpu.memory_space<vmem>>, vector<200x128xf32>
    %194 = arith.addf %193, %192 : vector<200x128xf32>
    %c16_221 = arith.constant 16 : index
    %c0_222 = arith.constant 0 : index
    %195 = vector.load %arg8[%c16_221, %c0_222] : memref<232x128xf32, #tpu.memory_space<vmem>>, vector<200x128xf32>
    tpu.vector_store %arg8[%c16_221, %c0_222], %194 {strides = array<i32>} : memref<232x128xf32, #tpu.memory_space<vmem>>, vector<200x128xf32>,
    %c5_223 = arith.constant 5 : index
    %c0_224 = arith.constant 0 : index
    %196 = vector.load %arg8[%c5_223, %c0_224] : memref<232x128xf32, #tpu.memory_space<vmem>>, vector<200x128xf32>
    %c0_225 = arith.constant 0 : index
    %c0_226 = arith.constant 0 : index
    %197 = vector.load %arg1[%c0_225, %c0_226] : memref<1152x128xf32, #tpu.memory_space<vmem>>, vector<128x128xf32>
    %cst_227 = arith.constant dense<0.000000e+00> : vector<200x128xf32>
    %198 = tpu.matmul %196, %197, %cst_227 {dimension_numbers = #tpu.dot_dimension_numbers<[1], [0], [0], [1], [0, 0, 1, 1], [], []>} : vector<200x128xf32>, vector<128x128xf32>, vector<200x128xf32> -> vector<200x128xf32>
    %c0_228 = arith.constant 0 : index
    %c0_229 = arith.constant 0 : index
    %199 = vector.load %arg9[%c0_228, %c0_229] : memref<200x128xf32, #tpu.memory_space<vmem>>, vector<200x128xf32>
    tpu.vector_store %arg9[%c0_228, %c0_229], %198 {strides = array<i32>} : memref<200x128xf32, #tpu.memory_space<vmem>>, vector<200x128xf32>,
    %c6_230 = arith.constant 6 : index
    %c0_231 = arith.constant 0 : index
    %200 = vector.load %arg8[%c6_230, %c0_231] : memref<232x128xf32, #tpu.memory_space<vmem>>, vector<200x128xf32>
    %c128_232 = arith.constant 128 : index
    %c0_233 = arith.constant 0 : index
    %201 = vector.load %arg1[%c128_232, %c0_233] : memref<1152x128xf32, #tpu.memory_space<vmem>>, vector<128x128xf32>
    %cst_234 = arith.constant dense<0.000000e+00> : vector<200x128xf32>
    %202 = tpu.matmul %200, %201, %cst_234 {dimension_numbers = #tpu.dot_dimension_numbers<[1], [0], [0], [1], [0, 0, 1, 1], [], []>} : vector<200x128xf32>, vector<128x128xf32>, vector<200x128xf32> -> vector<200x128xf32>
    %c0_235 = arith.constant 0 : index
    %c0_236 = arith.constant 0 : index
    %203 = vector.load %arg9[%c0_235, %c0_236] : memref<200x128xf32, #tpu.memory_space<vmem>>, vector<200x128xf32>
    %204 = arith.addf %203, %202 : vector<200x128xf32>
    %c0_237 = arith.constant 0 : index
    %c0_238 = arith.constant 0 : index
    %205 = vector.load %arg9[%c0_237, %c0_238] : memref<200x128xf32, #tpu.memory_space<vmem>>, vector<200x128xf32>
    tpu.vector_store %arg9[%c0_237, %c0_238], %204 {strides = array<i32>} : memref<200x128xf32, #tpu.memory_space<vmem>>, vector<200x128xf32>,
    %c7_239 = arith.constant 7 : index
    %c0_240 = arith.constant 0 : index
    %206 = vector.load %arg8[%c7_239, %c0_240] : memref<232x128xf32, #tpu.memory_space<vmem>>, vector<200x128xf32>
    %c256_241 = arith.constant 256 : index
    %c0_242 = arith.constant 0 : index
    %207 = vector.load %arg1[%c256_241, %c0_242] : memref<1152x128xf32, #tpu.memory_space<vmem>>, vector<128x128xf32>
    %cst_243 = arith.constant dense<0.000000e+00> : vector<200x128xf32>
    %208 = tpu.matmul %206, %207, %cst_243 {dimension_numbers = #tpu.dot_dimension_numbers<[1], [0], [0], [1], [0, 0, 1, 1], [], []>} : vector<200x128xf32>, vector<128x128xf32>, vector<200x128xf32> -> vector<200x128xf32>
    %c0_244 = arith.constant 0 : index
    %c0_245 = arith.constant 0 : index
    %209 = vector.load %arg9[%c0_244, %c0_245] : memref<200x128xf32, #tpu.memory_space<vmem>>, vector<200x128xf32>
    %210 = arith.addf %209, %208 : vector<200x128xf32>
    %c0_246 = arith.constant 0 : index
    %c0_247 = arith.constant 0 : index
    %211 = vector.load %arg9[%c0_246, %c0_247] : memref<200x128xf32, #tpu.memory_space<vmem>>, vector<200x128xf32>
    tpu.vector_store %arg9[%c0_246, %c0_247], %210 {strides = array<i32>} : memref<200x128xf32, #tpu.memory_space<vmem>>, vector<200x128xf32>,
    %c15_248 = arith.constant 15 : index
    %c0_249 = arith.constant 0 : index
    %212 = vector.load %arg8[%c15_248, %c0_249] : memref<232x128xf32, #tpu.memory_space<vmem>>, vector<200x128xf32>
    %c384_250 = arith.constant 384 : index
    %c0_251 = arith.constant 0 : index
    %213 = vector.load %arg1[%c384_250, %c0_251] : memref<1152x128xf32, #tpu.memory_space<vmem>>, vector<128x128xf32>
    %cst_252 = arith.constant dense<0.000000e+00> : vector<200x128xf32>
    %214 = tpu.matmul %212, %213, %cst_252 {dimension_numbers = #tpu.dot_dimension_numbers<[1], [0], [0], [1], [0, 0, 1, 1], [], []>} : vector<200x128xf32>, vector<128x128xf32>, vector<200x128xf32> -> vector<200x128xf32>
    %c0_253 = arith.constant 0 : index
    %c0_254 = arith.constant 0 : index
    %215 = vector.load %arg9[%c0_253, %c0_254] : memref<200x128xf32, #tpu.memory_space<vmem>>, vector<200x128xf32>
    %216 = arith.addf %215, %214 : vector<200x128xf32>
    %c0_255 = arith.constant 0 : index
    %c0_256 = arith.constant 0 : index
    %217 = vector.load %arg9[%c0_255, %c0_256] : memref<200x128xf32, #tpu.memory_space<vmem>>, vector<200x128xf32>
    tpu.vector_store %arg9[%c0_255, %c0_256], %216 {strides = array<i32>} : memref<200x128xf32, #tpu.memory_space<vmem>>, vector<200x128xf32>,
    %c16_257 = arith.constant 16 : index
    %c0_258 = arith.constant 0 : index
    %218 = vector.load %arg8[%c16_257, %c0_258] : memref<232x128xf32, #tpu.memory_space<vmem>>, vector<200x128xf32>
    %c512_259 = arith.constant 512 : index
    %c0_260 = arith.constant 0 : index
    %219 = vector.load %arg1[%c512_259, %c0_260] : memref<1152x128xf32, #tpu.memory_space<vmem>>, vector<128x128xf32>
    %cst_261 = arith.constant dense<0.000000e+00> : vector<200x128xf32>
    %220 = tpu.matmul %218, %219, %cst_261 {dimension_numbers = #tpu.dot_dimension_numbers<[1], [0], [0], [1], [0, 0, 1, 1], [], []>} : vector<200x128xf32>, vector<128x128xf32>, vector<200x128xf32> -> vector<200x128xf32>
    %c0_262 = arith.constant 0 : index
    %c0_263 = arith.constant 0 : index
    %221 = vector.load %arg9[%c0_262, %c0_263] : memref<200x128xf32, #tpu.memory_space<vmem>>, vector<200x128xf32>
    %222 = arith.addf %221, %220 : vector<200x128xf32>
    %c0_264 = arith.constant 0 : index
    %c0_265 = arith.constant 0 : index
    %223 = vector.load %arg9[%c0_264, %c0_265] : memref<200x128xf32, #tpu.memory_space<vmem>>, vector<200x128xf32>
    tpu.vector_store %arg9[%c0_264, %c0_265], %222 {strides = array<i32>} : memref<200x128xf32, #tpu.memory_space<vmem>>, vector<200x128xf32>,
    %c17_266 = arith.constant 17 : index
    %c0_267 = arith.constant 0 : index
    %224 = vector.load %arg8[%c17_266, %c0_267] : memref<232x128xf32, #tpu.memory_space<vmem>>, vector<200x128xf32>
    %c640_268 = arith.constant 640 : index
    %c0_269 = arith.constant 0 : index
    %225 = vector.load %arg1[%c640_268, %c0_269] : memref<1152x128xf32, #tpu.memory_space<vmem>>, vector<128x128xf32>
    %cst_270 = arith.constant dense<0.000000e+00> : vector<200x128xf32>
    %226 = tpu.matmul %224, %225, %cst_270 {dimension_numbers = #tpu.dot_dimension_numbers<[1], [0], [0], [1], [0, 0, 1, 1], [], []>} : vector<200x128xf32>, vector<128x128xf32>, vector<200x128xf32> -> vector<200x128xf32>
    %c0_271 = arith.constant 0 : index
    %c0_272 = arith.constant 0 : index
    %227 = vector.load %arg9[%c0_271, %c0_272] : memref<200x128xf32, #tpu.memory_space<vmem>>, vector<200x128xf32>
    %228 = arith.addf %227, %226 : vector<200x128xf32>
    %c0_273 = arith.constant 0 : index
    %c0_274 = arith.constant 0 : index
    %229 = vector.load %arg9[%c0_273, %c0_274] : memref<200x128xf32, #tpu.memory_space<vmem>>, vector<200x128xf32>
    tpu.vector_store %arg9[%c0_273, %c0_274], %228 {strides = array<i32>} : memref<200x128xf32, #tpu.memory_space<vmem>>, vector<200x128xf32>,
    %c25_275 = arith.constant 25 : index
    %c0_276 = arith.constant 0 : index
    %230 = vector.load %arg8[%c25_275, %c0_276] : memref<232x128xf32, #tpu.memory_space<vmem>>, vector<200x128xf32>
    %c768_277 = arith.constant 768 : index
    %c0_278 = arith.constant 0 : index
    %231 = vector.load %arg1[%c768_277, %c0_278] : memref<1152x128xf32, #tpu.memory_space<vmem>>, vector<128x128xf32>
    %cst_279 = arith.constant dense<0.000000e+00> : vector<200x128xf32>
    %232 = tpu.matmul %230, %231, %cst_279 {dimension_numbers = #tpu.dot_dimension_numbers<[1], [0], [0], [1], [0, 0, 1, 1], [], []>} : vector<200x128xf32>, vector<128x128xf32>, vector<200x128xf32> -> vector<200x128xf32>
    %c0_280 = arith.constant 0 : index
    %c0_281 = arith.constant 0 : index
    %233 = vector.load %arg9[%c0_280, %c0_281] : memref<200x128xf32, #tpu.memory_space<vmem>>, vector<200x128xf32>
    %234 = arith.addf %233, %232 : vector<200x128xf32>
    %c0_282 = arith.constant 0 : index
    %c0_283 = arith.constant 0 : index
    %235 = vector.load %arg9[%c0_282, %c0_283] : memref<200x128xf32, #tpu.memory_space<vmem>>, vector<200x128xf32>
    tpu.vector_store %arg9[%c0_282, %c0_283], %234 {strides = array<i32>} : memref<200x128xf32, #tpu.memory_space<vmem>>, vector<200x128xf32>,
    %c26_284 = arith.constant 26 : index
    %c0_285 = arith.constant 0 : index
    %236 = vector.load %arg8[%c26_284, %c0_285] : memref<232x128xf32, #tpu.memory_space<vmem>>, vector<200x128xf32>
    %c896_286 = arith.constant 896 : index
    %c0_287 = arith.constant 0 : index
    %237 = vector.load %arg1[%c896_286, %c0_287] : memref<1152x128xf32, #tpu.memory_space<vmem>>, vector<128x128xf32>
    %cst_288 = arith.constant dense<0.000000e+00> : vector<200x128xf32>
    %238 = tpu.matmul %236, %237, %cst_288 {dimension_numbers = #tpu.dot_dimension_numbers<[1], [0], [0], [1], [0, 0, 1, 1], [], []>} : vector<200x128xf32>, vector<128x128xf32>, vector<200x128xf32> -> vector<200x128xf32>
    %c0_289 = arith.constant 0 : index
    %c0_290 = arith.constant 0 : index
    %239 = vector.load %arg9[%c0_289, %c0_290] : memref<200x128xf32, #tpu.memory_space<vmem>>, vector<200x128xf32>
    %240 = arith.addf %239, %238 : vector<200x128xf32>
    %c0_291 = arith.constant 0 : index
    %c0_292 = arith.constant 0 : index
    %241 = vector.load %arg9[%c0_291, %c0_292] : memref<200x128xf32, #tpu.memory_space<vmem>>, vector<200x128xf32>
    tpu.vector_store %arg9[%c0_291, %c0_292], %240 {strides = array<i32>} : memref<200x128xf32, #tpu.memory_space<vmem>>, vector<200x128xf32>,
    %c27_293 = arith.constant 27 : index
    %c0_294 = arith.constant 0 : index
    %242 = vector.load %arg8[%c27_293, %c0_294] : memref<232x128xf32, #tpu.memory_space<vmem>>, vector<200x128xf32>
    %c1024_295 = arith.constant 1024 : index
    %c0_296 = arith.constant 0 : index
    %243 = vector.load %arg1[%c1024_295, %c0_296] : memref<1152x128xf32, #tpu.memory_space<vmem>>, vector<128x128xf32>
    %cst_297 = arith.constant dense<0.000000e+00> : vector<200x128xf32>
    %244 = tpu.matmul %242, %243, %cst_297 {dimension_numbers = #tpu.dot_dimension_numbers<[1], [0], [0], [1], [0, 0, 1, 1], [], []>} : vector<200x128xf32>, vector<128x128xf32>, vector<200x128xf32> -> vector<200x128xf32>
    %c0_298 = arith.constant 0 : index
    %c0_299 = arith.constant 0 : index
    %245 = vector.load %arg9[%c0_298, %c0_299] : memref<200x128xf32, #tpu.memory_space<vmem>>, vector<200x128xf32>
    %246 = arith.addf %245, %244 : vector<200x128xf32>
    %c0_300 = arith.constant 0 : index
    %c0_301 = arith.constant 0 : index
    %247 = vector.load %arg9[%c0_300, %c0_301] : memref<200x128xf32, #tpu.memory_space<vmem>>, vector<200x128xf32>
    tpu.vector_store %arg9[%c0_300, %c0_301], %246 {strides = array<i32>} : memref<200x128xf32, #tpu.memory_space<vmem>>, vector<200x128xf32>,
    %c0_302 = arith.constant 0 : index
    %c0_303 = arith.constant 0 : index
    %248 = vector.load %arg5[%c0_302, %c0_303] : memref<200x128xf32, #tpu.memory_space<vmem>>, vector<200x128xf32>
    %c0_304 = arith.constant 0 : index
    %c0_305 = arith.constant 0 : index
    %249 = vector.load %arg9[%c0_304, %c0_305] : memref<200x128xf32, #tpu.memory_space<vmem>>, vector<200x128xf32>
    %c0_306 = arith.constant 0 : index
    %c0_307 = arith.constant 0 : index
    %250 = vector.load %arg2[%c0_306, %c0_307] : memref<1x128xf32, #tpu.memory_space<vmem>>, vector<1x128xf32>
    %251 = vector.broadcast %250 : vector<1x128xf32> to vector<200x128xf32>
    %252 = arith.addf %249, %251 : vector<200x128xf32>
    %253 = arith.mulf %252, %248 : vector<200x128xf32>
    %c0_308 = arith.constant 0 : index
    %c0_309 = arith.constant 0 : index
    %254 = vector.load %arg9[%c0_308, %c0_309] : memref<200x128xf32, #tpu.memory_space<vmem>>, vector<200x128xf32>
    tpu.vector_store %arg9[%c0_308, %c0_309], %253 {strides = array<i32>} : memref<200x128xf32, #tpu.memory_space<vmem>>, vector<200x128xf32>,
    %c0_310 = arith.constant 0 : index
    %c0_311 = arith.constant 0 : index
    %255 = vector.load %arg9[%c0_310, %c0_311] : memref<200x128xf32, #tpu.memory_space<vmem>>, vector<200x128xf32>
    %cst_312 = arith.constant dense<0.000000e+00> : vector<128xf32>
    %256 = vector.multi_reduction <add>, %255, %cst_312 [0] : vector<200x128xf32> to vector<128xf32>
    %257 = vector.shape_cast %256 : vector<128xf32> to vector<1x128xf32>
    %c0_313 = arith.constant 0 : index
    %c0_314 = arith.constant 0 : index
    %258 = vector.load %arg6[%c0_313, %c0_314] : memref<128x128xf32, #tpu.memory_space<vmem>>, vector<128x128xf32>
    %cst_315 = arith.constant dense<0.000000e+00> : vector<1x128xf32>
    %259 = tpu.matmul %257, %258, %cst_315 {dimension_numbers = #tpu.dot_dimension_numbers<[1], [0], [0], [1], [0, 0, 1, 1], [], []>} : vector<1x128xf32>, vector<128x128xf32>, vector<1x128xf32> -> vector<1x128xf32>
    %cst_316 = arith.constant 9.765625E-4 : f32
    %260 = vector.broadcast %cst_316 : f32 to vector<1x128xf32>
    %261 = arith.mulf %259, %260 : vector<1x128xf32>
    %c0_317 = arith.constant 0 : index
    %c0_318 = arith.constant 0 : index
    %262 = vector.load %arg9[%c0_317, %c0_318] : memref<200x128xf32, #tpu.memory_space<vmem>>, vector<200x128xf32>
    %263 = vector.broadcast %261 : vector<1x128xf32> to vector<200x128xf32>
    %264 = arith.subf %262, %263 : vector<200x128xf32>
    %265 = arith.mulf %264, %248 : vector<200x128xf32>
    %c0_319 = arith.constant 0 : index
    %c0_320 = arith.constant 0 : index
    %266 = vector.load %arg9[%c0_319, %c0_320] : memref<200x128xf32, #tpu.memory_space<vmem>>, vector<200x128xf32>
    tpu.vector_store %arg9[%c0_319, %c0_320], %265 {strides = array<i32>} : memref<200x128xf32, #tpu.memory_space<vmem>>, vector<200x128xf32>,
    %c0_321 = arith.constant 0 : index
    %c0_322 = arith.constant 0 : index
    %267 = vector.load %arg9[%c0_321, %c0_322] : memref<200x128xf32, #tpu.memory_space<vmem>>, vector<200x128xf32>
    %c0_323 = arith.constant 0 : index
    %c0_324 = arith.constant 0 : index
    %268 = vector.load %arg9[%c0_323, %c0_324] : memref<200x128xf32, #tpu.memory_space<vmem>>, vector<200x128xf32>
    %269 = arith.mulf %267, %268 : vector<200x128xf32>
    %cst_325 = arith.constant dense<0.000000e+00> : vector<128xf32>
    %270 = vector.multi_reduction <add>, %269, %cst_325 [0] : vector<200x128xf32> to vector<128xf32>
    %271 = vector.shape_cast %270 : vector<128xf32> to vector<1x128xf32>
    %c0_326 = arith.constant 0 : index
    %c0_327 = arith.constant 0 : index
    %272 = vector.load %arg6[%c0_326, %c0_327] : memref<128x128xf32, #tpu.memory_space<vmem>>, vector<128x128xf32>
    %cst_328 = arith.constant dense<0.000000e+00> : vector<1x128xf32>
    %273 = tpu.matmul %271, %272, %cst_328 {dimension_numbers = #tpu.dot_dimension_numbers<[1], [0], [0], [1], [0, 0, 1, 1], [], []>} : vector<1x128xf32>, vector<128x128xf32>, vector<1x128xf32> -> vector<1x128xf32>
    %cst_329 = arith.constant 9.765625E-4 : f32
    %274 = vector.broadcast %cst_329 : f32 to vector<1x128xf32>
    %275 = arith.mulf %273, %274 : vector<1x128xf32>
    %cst_330 = arith.constant 9.99999974E-6 : f32
    %276 = vector.broadcast %cst_330 : f32 to vector<1x128xf32>
    %277 = arith.addf %275, %276 : vector<1x128xf32>
    %278 = math.rsqrt %277 : vector<1x128xf32>
    %c0_331 = arith.constant 0 : index
    %c0_332 = arith.constant 0 : index
    %279 = vector.load %arg3[%c0_331, %c0_332] : memref<1x128xf32, #tpu.memory_space<vmem>>, vector<1x128xf32>
    %280 = arith.mulf %278, %279 : vector<1x128xf32>
    %c0_333 = arith.constant 0 : index
    %c0_334 = arith.constant 0 : index
    %281 = vector.load %arg9[%c0_333, %c0_334] : memref<200x128xf32, #tpu.memory_space<vmem>>, vector<200x128xf32>
    %282 = vector.broadcast %280 : vector<1x128xf32> to vector<200x128xf32>
    %283 = arith.mulf %281, %282 : vector<200x128xf32>
    %c0_335 = arith.constant 0 : index
    %c0_336 = arith.constant 0 : index
    %284 = vector.load %arg4[%c0_335, %c0_336] : memref<1x128xf32, #tpu.memory_space<vmem>>, vector<1x128xf32>
    %285 = vector.broadcast %284 : vector<1x128xf32> to vector<200x128xf32>
    %286 = arith.addf %283, %285 : vector<200x128xf32>
    %cst_337 = arith.constant 0.000000e+00 : f32
    %287 = vector.broadcast %cst_337 : f32 to vector<200x128xf32>
    %288 = arith.maximumf %286, %287 : vector<200x128xf32>
    %289 = arith.mulf %288, %248 : vector<200x128xf32>
    %c0_338 = arith.constant 0 : index
    %c0_339 = arith.constant 0 : index
    %290 = vector.load %arg7[%c0_338, %c0_339] : memref<200x128xf32, #tpu.memory_space<vmem>>, vector<200x128xf32>
    tpu.vector_store %arg7[%c0_338, %c0_339], %289 {strides = array<i32>} : memref<200x128xf32, #tpu.memory_space<vmem>>, vector<200x128xf32>,
    return
  }
}

</mosaic_0001>

<bundles_post_ra>
// kernel: recurrent_block.1
= control target key start
LH: loop header
LB: loop body
LE: loop exit
PB: predicated region body
PF: predicated region fallthrough
CT: control target
= control target key end

     0   :  { %v22144_v0 = vmov 0.0|0.0   ;;  %vm15438_vm0 = vmmov 0   ;;  %v22146_v6 = vmov 0.0   ;;  %s22136_s1 = inlined_call_operand.vmem [shape: f32[1152,128], index: 1, kind: input, shape index: {}]   ;;  %s22137_s0 = inlined_call_operand.vmem [shape: f32[232,128], index: 0, kind: input, shape index: {}]   ;;  %s22138_s6 = inlined_call_operand.vmem [shape: f32[128,128], index: 6, kind: input, shape index: {}]   ;;  %s22139_s2 = inlined_call_operand.vmem [shape: f32[1,128], index: 2, kind: input, shape index: {}]   ;;  %s22140_s5 = inlined_call_operand.vmem [shape: f32[200,128], index: 5, kind: input, shape index: {}]   ;;  %s22141_s3 = inlined_call_operand.vmem [shape: f32[1,128], index: 3, kind: input, shape index: {}]   ;;  %s22142_s4 = inlined_call_operand.vmem [shape: f32[1,128], index: 4, kind: input, shape index: {}]   ;;  %s22143_s7 = inlined_call_operand.vmem [shape: f32[200,128], index: 7, kind: output, shape index: {}]  }
   0x1   :  { %14594 = vmatprep.subr.bf16.mxu0 %v22144_v0  ;;  %15386 = vmatprep.subr.bf16.mxu1 %v22144_v0  ;;  %v109_v1 = vld [vmem:[%s22136_s1] sm:$0xff]  ;;  %v110_v2 = vld [vmem:[%s22136_s1 + $0x8] sm:$0xff]  ;;  %v111_v3 = vld [vmem:[%s22136_s1 + $0x10] sm:$0xff] }
   0x2   :  { %v14595_v4 = vpack.c.bf16 %v110_v2, %v109_v1  ;;  %v112_v5 = vld [vmem:[%s22136_s1 + $0x18] sm:$0xff]  ;;  %11527 = vmatprep.mubr.msk.f32.mxu0 %vm15438_vm0, %v22146_v6  ;;  %11578 = vmatprep.mubr.msk.f32.mxu1 %vm15438_vm0, %v22146_v6  ;;  %v113_v8 = vld [vmem:[%s22136_s1 + $0x20] sm:$0xff]  ;;  %v114_v9 = vld [vmem:[%s22136_s1 + $0x28] sm:$0xff] }
   0x3   :  { %v14598_v7 = vpack.c.bf16 %v112_v5, %v111_v3  ;;  %v26_v10 = vld [vmem:[%s22137_s0] sm:$0xff]  ;;  %v27_v11 = vld [vmem:[%s22137_s0 + $0x8] sm:$0xff]  ;;  %v44_v13 = vld [vmem:[%s22137_s0 + $0x90] sm:$0xff]  ;;  %v14601_v14 = vpack.c.bf16 %v114_v9, %v113_v8 }
   0x4   :  { %14596 = vmatpush3.bf16.msra.mxu0 %v14595_v4  ;;  %15394 = vmatpush3.bf16.msra.mxu1 %v14595_v4  ;;  %55 = vst [vmem:[#allocation2] sm:$0xff] %v26_v10  ;;  %56 = vst [vmem:[#allocation2 + $0x8] sm:$0xff] %v27_v11  ;;  %v43_v12 = vld [vmem:[%s22137_s0 + $0x88] sm:$0xff]  ;;  %v115_v15 = vld [vmem:[%s22136_s1 + $0x30] sm:$0xff] }
   0x5   :  { %14597 = vmatprep.subr.bf16.mxu0 %v22144_v0  ;;  %15387 = vmatprep.subr.bf16.mxu1 %v22144_v0  ;;  %72 = vst [vmem:[#allocation2 + $0x88] sm:$0xff] %v43_v12  ;;  %73 = vst [vmem:[#allocation2 + $0x90] sm:$0xff] %v44_v13  ;;  %v116_v16 = vld [vmem:[%s22136_s1 + $0x38] sm:$0xff]  ;;  %v28_v17 = vld [vmem:[%s22137_s0 + $0x10] sm:$0xff] }
   0x6   :  { %v45_v18 = vld [vmem:[%s22137_s0 + $0x98] sm:$0xff]  ;;  %57 = vst [vmem:[#allocation2 + $0x10] sm:$0xff] %v28_v17  ;;  %v46_v20 = vld [vmem:[%s22137_s0 + $0xa0] sm:$0xff]  ;;  %v14604_v21 = vpack.c.bf16 %v116_v16, %v115_v15  ;;  %v47_v23 = vld [vmem:[%s22137_s0 + $0xa8] sm:$0xff] }
   0x7   :  { %74 = vst [vmem:[#allocation2 + $0x98] sm:$0xff] %v45_v18  ;;  %v29_v19 = vld [vmem:[%s22137_s0 + $0x18] sm:$0xff]  ;;  %75 = vst [vmem:[#allocation2 + $0xa0] sm:$0xff] %v46_v20  ;;  %v30_v22 = vld [vmem:[%s22137_s0 + $0x20] sm:$0xff] }
   0x8   :  { %14599 = vmatpush3.bf16.msra.mxu0 %v14598_v7  ;;  %15395 = vmatpush3.bf16.msra.mxu1 %v14598_v7  ;;  %58 = vst [vmem:[#allocation2 + $0x18] sm:$0xff] %v29_v19  ;;  %v117_v24 = vld [vmem:[%s22136_s1 + $0x40] sm:$0xff]  ;;  %v118_v25 = vld [vmem:[%s22136_s1 + $0x48] sm:$0xff]  ;;  %59 = vst [vmem:[#allocation2 + $0x20] sm:$0xff] %v30_v22 }
   0x9   :  { %14600 = vmatprep.subr.bf16.mxu0 %v22144_v0  ;;  %15388 = vmatprep.subr.bf16.mxu1 %v22144_v0  ;;  %76 = vst [vmem:[#allocation2 + $0xa8] sm:$0xff] %v47_v23  ;;  %v31_v26 = vld [vmem:[%s22137_s0 + $0x28] sm:$0xff]  ;;  %v48_v27 = vld [vmem:[%s22137_s0 + $0xb0] sm:$0xff]  ;;  %v14607_v28 = vpack.c.bf16 %v118_v25, %v117_v24  ;;  %v49_v30 = vld [vmem:[%s22137_s0 + $0xb8] sm:$0xff] }
   0xa   :  { %60 = vst [vmem:[#allocation2 + $0x28] sm:$0xff] %v31_v26  ;;  %77 = vst [vmem:[#allocation2 + $0xb0] sm:$0xff] %v48_v27  ;;  %v32_v29 = vld [vmem:[%s22137_s0 + $0x30] sm:$0xff]  ;;  %v120_v32 = vld [vmem:[%s22136_s1 + $0x58] sm:$0xff] }
   0xb   :  { %v119_v31 = vld [vmem:[%s22136_s1 + $0x50] sm:$0xff]  ;;  %61 = vst [vmem:[#allocation2 + $0x30] sm:$0xff] %v32_v29  ;;  %78 = vst [vmem:[#allocation2 + $0xb8] sm:$0xff] %v49_v30  ;;  %v33_v33 = vld [vmem:[%s22137_s0 + $0x38] sm:$0xff] }
   0xc   :  { %14602 = vmatpush3.bf16.msra.mxu0 %v14601_v14  ;;  %15396 = vmatpush3.bf16.msra.mxu1 %v14601_v14  ;;  %v50_v34 = vld [vmem:[%s22137_s0 + $0xc0] sm:$0xff]  ;;  %v14610_v35 = vpack.c.bf16 %v120_v32, %v119_v31  ;;  %62 = vst [vmem:[#allocation2 + $0x38] sm:$0xff] %v33_v33  ;;  %v122_v37 = vld [vmem:[%s22136_s1 + $0x68] sm:$0xff]  ;;  %v123_v42 = vld [vmem:[%s22136_s1 + $0x70] sm:$0xff] }
   0xd   :  { %14603 = vmatprep.subr.bf16.mxu0 %v22144_v0  ;;  %15389 = vmatprep.subr.bf16.mxu1 %v22144_v0  ;;  %79 = vst [vmem:[#allocation2 + $0xc0] sm:$0xff] %v50_v34  ;;  %v121_v36 = vld [vmem:[%s22136_s1 + $0x60] sm:$0xff]  ;;  %v51_v39 = vld [vmem:[%s22137_s0 + $0xc8] sm:$0xff]  ;;  %v124_v43 = vld [vmem:[%s22136_s1 + $0x78] sm:$0xff] }
   0xe   :  { %v34_v38 = vld [vmem:[%s22137_s0 + $0x40] sm:$0xff]  ;;  %80 = vst [vmem:[#allocation2 + $0xc8] sm:$0xff] %v51_v39  ;;  %v35_v40 = vld [vmem:[%s22137_s0 + $0x48] sm:$0xff]  ;;  %v14613_v41 = vpack.c.bf16 %v122_v37, %v121_v36  ;;  %v36_v44 = vld [vmem:[%s22137_s0 + $0x50] sm:$0xff]  ;;  %v14616_v47 = vpack.c.bf16 %v124_v43, %v123_v42 }
   0xf   :  { %63 = vst [vmem:[#allocation2 + $0x40] sm:$0xff] %v34_v38  ;;  %64 = vst [vmem:[#allocation2 + $0x48] sm:$0xff] %v35_v40  ;;  %v37_v45 = vld [vmem:[%s22137_s0 + $0x58] sm:$0xff]  ;;  %v38_v46 = vld [vmem:[%s22137_s0 + $0x60] sm:$0xff] }
  0x10   :  { %14605 = vmatpush3.bf16.msra.mxu0 %v14604_v21  ;;  %15397 = vmatpush3.bf16.msra.mxu1 %v14604_v21  ;;  %65 = vst [vmem:[#allocation2 + $0x50] sm:$0xff] %v36_v44  ;;  %66 = vst [vmem:[#allocation2 + $0x58] sm:$0xff] %v37_v45  ;;  %v365_v48 = vld [vmem:[%s22136_s1 + $0x80] sm:$0xff]  ;;  %v366_v49 = vld [vmem:[%s22136_s1 + $0x88] sm:$0xff] }
  0x11   :  { %14606 = vmatprep.subr.bf16.mxu0 %v22144_v0  ;;  %15390 = vmatprep.subr.bf16.mxu1 %v22144_v0  ;;  %v671_v50 = vld [vmem:[%s22136_s1 + $0x100] sm:$0xff]  ;;  %67 = vst [vmem:[#allocation2 + $0x60] sm:$0xff] %v38_v46  ;;  %v672_v51 = vld [vmem:[%s22136_s1 + $0x108] sm:$0xff]  ;;  %v40_v53 = vld [vmem:[%s22137_s0 + $0x70] sm:$0xff]  ;;  %v14619_v56 = vpack.c.bf16 %v366_v49, %v365_v48 }
  0x12   :  { %v39_v52 = vld [vmem:[%s22137_s0 + $0x68] sm:$0xff]  ;;  %69 = vst [vmem:[#allocation2 + $0x70] sm:$0xff] %v40_v53  ;;  %v14643_v57 = vpack.c.bf16 %v672_v51, %v671_v50  ;;  %v41_v58 = vld [vmem:[%s22137_s0 + $0x78] sm:$0xff]  ;;  %v42_v59 = vld [vmem:[%s22137_s0 + $0x80] sm:$0xff] }
  0x13   :  { %68 = vst [vmem:[#allocation2 + $0x68] sm:$0xff] %v39_v52  ;;  %v84_v54 = vld [vmem:[#allocation2 + $0x5] sm:$0xff]  ;;  %v101_v55 = vld [vmem:[#allocation2 + $0x8d] sm:$0xff]  ;;  %v368_v61 = vld [vmem:[%s22136_s1 + $0x98] sm:$0xff] }
  0x14   :  { %14608 = vmatpush3.bf16.msra.mxu0 %v14607_v28  ;;  %15398 = vmatpush3.bf16.msra.mxu1 %v14607_v28  ;;  %v367_v60 = vld [vmem:[%s22136_s1 + $0x90] sm:$0xff]  ;;  %70 = vst [vmem:[#allocation2 + $0x78] sm:$0xff] %v41_v58  ;;  %71 = vst [vmem:[#allocation2 + $0x80] sm:$0xff] %v42_v59  ;;  %v674_v63 = vld [vmem:[%s22136_s1 + $0x118] sm:$0xff] }
  0x15   :  { %14609 = vmatprep.subr.bf16.mxu0 %v22144_v0  ;;  %15391 = vmatprep.subr.bf16.mxu1 %v22144_v0  ;;  %v673_v62 = vld [vmem:[%s22136_s1 + $0x110] sm:$0xff]  ;;  %v14622_v3 = vpack.c.bf16 %v368_v61, %v367_v60  ;;  %v369_v4 = vld [vmem:[%s22136_s1 + $0xa0] sm:$0xff]  ;;  %v370_v5 = vld [vmem:[%s22136_s1 + $0xa8] sm:$0xff] }
  0x16   :  { %v85_v1 = vld [vmem:[#allocation2 + $0xd] sm:$0xff]  ;;  %v102_v2 = vld [vmem:[#allocation2 + $0x95] sm:$0xff]  ;;  %v14646_v7 = vpack.c.bf16 %v674_v63, %v673_v62  ;;  %v103_v9 = vld [vmem:[#allocation2 + $0x9d] sm:$0xff]  ;;  %v14625_v10 = vpack.c.bf16 %v370_v5, %v369_v4 }
  0x17   :  { %v86_v8 = vld [vmem:[#allocation2 + $0x15] sm:$0xff]  ;;  %v675_v13 = vld [vmem:[%s22136_s1 + $0x120] sm:$0xff]  ;;  %v676_v14 = vld [vmem:[%s22136_s1 + $0x128] sm:$0xff] }
  0x18   :  { %14611 = vmatpush3.bf16.msra.mxu0 %v14610_v35  ;;  %15399 = vmatpush3.bf16.msra.mxu1 %v14610_v35  ;;  %v371_v11 = vld [vmem:[%s22136_s1 + $0xb0] sm:$0xff]  ;;  %v372_v12 = vld [vmem:[%s22136_s1 + $0xb8] sm:$0xff]  ;;  %v104_v16 = vld [vmem:[#allocation2 + $0xa5] sm:$0xff]  ;;  %v14649_v20 = vpack.c.bf16 %v676_v14, %v675_v13 }
  0x19   :  { %14612 = vmatprep.subr.bf16.mxu0 %v22144_v0  ;;  %15392 = vmatprep.subr.bf16.mxu1 %v22144_v0  ;;  %v87_v15 = vld [vmem:[#allocation2 + $0x1d] sm:$0xff]  ;;  %v14628_v17 = vpack.c.bf16 %v372_v12, %v371_v11  ;;  %v374_v19 = vld [vmem:[%s22136_s1 + $0xc8] sm:$0xff]  ;;  %v375_v24 = vld [vmem:[%s22136_s1 + $0xd0] sm:$0xff] }
  0x1a   :  { %v373_v18 = vld [vmem:[%s22136_s1 + $0xc0] sm:$0xff]  ;;  %v105_v22 = vld [vmem:[#allocation2 + $0xad] sm:$0xff]  ;;  %v376_v25 = vld [vmem:[%s22136_s1 + $0xd8] sm:$0xff] }
  0x1b   :  { %v88_v21 = vld [vmem:[#allocation2 + $0x25] sm:$0xff]  ;;  %v14631_v23 = vpack.c.bf16 %v374_v19, %v373_v18  ;;  %v677_v26 = vld [vmem:[%s22136_s1 + $0x130] sm:$0xff]  ;;  %v678_v27 = vld [vmem:[%s22136_s1 + $0x138] sm:$0xff]  ;;  %v14634_v30 = vpack.c.bf16 %v376_v25, %v375_v24 }
  0x1c   :  { %14614 = vmatpush3.bf16.msra.mxu0 %v14613_v41  ;;  %15400 = vmatpush3.bf16.msra.mxu1 %v14613_v41  ;;  %v89_v28 = vld [vmem:[#allocation2 + $0x2d] sm:$0xff]  ;;  %v106_v29 = vld [vmem:[#allocation2 + $0xb5] sm:$0xff]  ;;  %v377_v31 = vld [vmem:[%s22136_s1 + $0xe0] sm:$0xff]  ;;  %v14652_v33 = vpack.c.bf16 %v678_v27, %v677_v26 }
  0x1d   :  { %14615 = vmatprep.subr.bf16.mxu0 %v22144_v0  ;;  %15393 = vmatprep.subr.bf16.mxu1 %v22144_v0  ;;  %v378_v32 = vld [vmem:[%s22136_s1 + $0xe8] sm:$0xff]  ;;  %v90_v34 = vld [vmem:[#allocation2 + $0x35] sm:$0xff]  ;;  %v107_v35 = vld [vmem:[#allocation2 + $0xbd] sm:$0xff] }
  0x1e   :  { %v14637_v36 = vpack.c.bf16 %v378_v32, %v377_v31  ;;  %v379_v37 = vld [vmem:[%s22136_s1 + $0xf0] sm:$0xff]  ;;  %v380_v38 = vld [vmem:[%s22136_s1 + $0xf8] sm:$0xff]  ;;  %v679_v39 = vld [vmem:[%s22136_s1 + $0x140] sm:$0xff] }
  0x1f   :  { %v680_v40 = vld [vmem:[%s22136_s1 + $0x148] sm:$0xff]  ;;  %v91_v41 = vld [vmem:[#allocation2 + $0x3d] sm:$0xff]  ;;  %v14640_v43 = vpack.c.bf16 %v380_v38, %v379_v37  ;;  %v681_v45 = vld [vmem:[%s22136_s1 + $0x150] sm:$0xff] }
  0x20   :  { %14617 = vmatpush3.bf16.msra.mxu0 %v14616_v47  ;;  %15401 = vmatpush3.bf16.msra.mxu1 %v14616_v47  ;;  %v108_v42 = vld [vmem:[#allocation2 + $0xc5] sm:$0xff]  ;;  %v14655_v44 = vpack.c.bf16 %v680_v40, %v679_v39  ;;  %v682_v46 = vld [vmem:[%s22136_s1 + $0x158] sm:$0xff]  ;;  %v341_v58 = vld [vmem:[#allocation2 + $0xe] sm:$0xff] }
  0x21   :  { %14618 = vmatprep.subr.bf16.mxu1 %v22144_v0  ;;  %14642 = vmatprep.subr.bf16.mxu0 %v22144_v0  ;;  %v977_v47 = vld [vmem:[%s22136_s1 + $0x180] sm:$0xff]  ;;  %v978_v48 = vld [vmem:[%s22136_s1 + $0x188] sm:$0xff]  ;;  %v14658_v51 = vpack.c.bf16 %v682_v46, %v681_v45  ;;  %v685_v60 = vld [vmem:[%s22136_s1 + $0x170] sm:$0xff] }
  0x22   :  { %v92_v49 = vld [vmem:[#allocation2 + $0x45] sm:$0xff]  ;;  %v14667_v53 = vpack.c.bf16 %v978_v48, %v977_v47  ;;  %v686_v62 = vld [vmem:[%s22136_s1 + $0x178] sm:$0xff]  ;;  %v97_v19 = vld [vmem:[#allocation2 + $0x6d] sm:$0xff] }
  0x23   :  { %11528 = vmatmul.mubr.f32.vlgmr.msra.gmra.mrb[0].mxu0 %v84_v54  ;;  %11579 = vmatmul.mubr.f32.vlgmr.msra.gmra.mrb[0].mxu1 %v101_v55  ;;  %v340_v50 = vld [vmem:[#allocation2 + $0x6] sm:$0xff]  ;;  %v979_v55 = vld [vmem:[%s22136_s1 + $0x190] sm:$0xff]  ;;  %v14664_v4 = vpack.c.bf16 %v686_v62, %v685_v60  ;;  %v988_v18 = vld [vmem:[%s22136_s1 + $0x1d8] sm:$0xff] }
  0x24   :  { %14620 = vmatpush3.bf16.msra.mxu1 %v14619_v56  ;;  %14644 = vmatpush3.bf16.msra.mxu0 %v14643_v57  ;;  %v683_v52 = vld [vmem:[%s22136_s1 + $0x160] sm:$0xff]  ;;  %v684_v54 = vld [vmem:[%s22136_s1 + $0x168] sm:$0xff]  ;;  %v980_v56 = vld [vmem:[%s22136_s1 + $0x198] sm:$0xff] }
  0x25   :  { %11530 = vmatprep.mubr.msk.f32.mxu0 %vm15438_vm0, %v22146_v6  ;;  %11581 = vmatprep.mubr.msk.f32.mxu1 %vm15438_vm0, %v22146_v6  ;;  %v93_v57 = vld [vmem:[#allocation2 + $0x4d] sm:$0xff]  ;;  %v14661_v59 = vpack.c.bf16 %v684_v54, %v683_v52  ;;  %v14670_v61 = vpack.c.bf16 %v980_v56, %v979_v55  ;;  %v981_v63 = vld [vmem:[%s22136_s1 + $0x1a0] sm:$0xff]  ;;  %v98_v24 = vld [vmem:[#allocation2 + $0x75] sm:$0xff] }
  0x26   :  { %14621 = vmatprep.subr.bf16.mxu1 %v22144_v0  ;;  %14645 = vmatprep.subr.bf16.mxu0 %v22144_v0  ;;  %v985_v12 = vld [vmem:[%s22136_s1 + $0x1c0] sm:$0xff]  ;;  %v986_v13 = vld [vmem:[%s22136_s1 + $0x1c8] sm:$0xff]  ;;  %v346_v25 = vld [vmem:[#allocation2 + $0x36] sm:$0xff] }
  0x27   :  { %11531 = vmatmul.mubr.f32.gmra.mrb[2].mxu0 %v85_v1  ;;  %11582 = vmatmul.mubr.f32.gmra.mrb[2].mxu1 %v102_v2  ;;  %v982_v1 = vld [vmem:[%s22136_s1 + $0x1a8] sm:$0xff]  ;;  %v94_v2 = vld [vmem:[#allocation2 + $0x55] sm:$0xff]  ;;  %v351_v46 = vld [vmem:[#allocation2 + $0x5e] sm:$0xff] }
  0x28   :  { %14623 = vmatpush3.bf16.msra.mxu1 %v14622_v3  ;;  %11533 = vmatprep.mubr.msk.f32.mxu0 %vm15438_vm0, %v22146_v6  ;;  %v342_v3 = vld [vmem:[#allocation2 + $0x16] sm:$0xff]  ;;  %v14673_v5 = vpack.c.bf16 %v982_v1, %v981_v63  ;;  %v96_v14 = vld [vmem:[#allocation2 + $0x65] sm:$0xff]  ;;  %v353_v56 = vld [vmem:[#allocation2 + $0x6e] sm:$0xff] }
  0x29   :  { %11584 = vmatprep.mubr.msk.f32.mxu1 %vm15438_vm0, %v22146_v6  ;;  %14624 = vmatprep.subr.bf16.mxu1 %v22144_v0  ;;  %v991_v27 = vld [vmem:[%s22136_s1 + $0x1f0] sm:$0xff]  ;;  %v100_v32 = vld [vmem:[#allocation2 + $0x85] sm:$0xff]  ;;  %v1286_v40 = vld [vmem:[%s22136_s1 + $0x218] sm:$0xff] }
  0x2a   :  { %14647 = vmatpush3.bf16.msra.mxu0 %v14646_v7  ;;  %v983_v7 = vld [vmem:[%s22136_s1 + $0x1b0] sm:$0xff]  ;;  %v646_v37 = vld [vmem:[#allocation2 + $0x7] sm:$0xff]  ;;  %v15908_v52 = vld [vmem:[#allocation2 + $0x1f] sm:$0xff] }
  0x2b   :  { %11534 = vmatmul.mubr.f32.gmra.mrb[4].mxu0 %v86_v8  ;;  %11585 = vmatmul.mubr.f32.gmra.mrb[4].mxu1 %v103_v9  ;;  %v984_v8 = vld [vmem:[%s22136_s1 + $0x1b8] sm:$0xff]  ;;  %v1285_v39 = vld [vmem:[%s22136_s1 + $0x210] sm:$0xff]  ;;  %v1288_v45 = vld [vmem:[%s22136_s1 + $0x228] sm:$0xff] }
  0x2c   :  { %14626 = vmatpush3.bf16.msra.mxu1 %v14625_v10  ;;  %11536 = vmatprep.mubr.msk.f32.mxu0 %vm15438_vm0, %v22146_v6  ;;  %v95_v9 = vld [vmem:[#allocation2 + $0x5d] sm:$0xff]  ;;  %v14676_v11 = vpack.c.bf16 %v984_v8, %v983_v7  ;;  %v1292_v55 = vld [vmem:[%s22136_s1 + $0x248] sm:$0xff]  ;;  %v1297_v7 = vld [vmem:[%s22136_s1 + $0x270] sm:$0xff] }
  0x2d   :  { %11587 = vmatprep.mubr.msk.f32.mxu1 %vm15438_vm0, %v22146_v6  ;;  %14627 = vmatprep.subr.bf16.mxu1 %v22144_v0  ;;  %v343_v10 = vld [vmem:[#allocation2 + $0x1e] sm:$0xff]  ;;  %v15936_v62 = vld [vmem:[#allocation2 + $0x2f] sm:$0xff] }
  0x2e   :  { %14648 = vmatprep.subr.bf16.mxu0 %v22144_v0  ;;  %v15894_v47 = vld [vmem:[#allocation2 + $0x17] sm:$0xff]  ;;  %v1291_v54 = vld [vmem:[%s22136_s1 + $0x240] sm:$0xff] }
  0x2f   :  { %11537 = vmatmul.mubr.f32.gmra.mrb[6].mxu0 %v87_v15  ;;  %11588 = vmatmul.mubr.f32.gmra.mrb[6].mxu1 %v104_v16  ;;  %v344_v15 = vld [vmem:[#allocation2 + $0x26] sm:$0xff]  ;;  %v14679_v16 = vpack.c.bf16 %v986_v13, %v985_v12  ;;  %v1294_v60 = vld [vmem:[%s22136_s1 + $0x258] sm:$0xff]  ;;  %v357_v13 = vld [vmem:[#allocation2 + $0x8e] sm:$0xff] }
  0x30   :  { %14629 = vmatpush3.bf16.msra.mxu1 %v14628_v17  ;;  %11539 = vmatprep.mubr.msk.f32.mxu0 %vm15438_vm0, %v22146_v6  ;;  %v987_v17 = vld [vmem:[%s22136_s1 + $0x1d0] sm:$0xff]  ;;  %v1295_v1 = vld [vmem:[%s22136_s1 + $0x260] sm:$0xff]  ;;  %v1298_v8 = vld [vmem:[%s22136_s1 + $0x278] sm:$0xff] }
  0x31   :  { %11590 = vmatprep.mubr.msk.f32.mxu1 %vm15438_vm0, %v22146_v6  ;;  %14630 = vmatprep.subr.bf16.mxu1 %v22144_v0  ;;  %v14712_v12 = vpack.c.bf16 %v1298_v8, %v1297_v7  ;;  %v1899_v7 = vld [vmem:[%s22136_s1 + $0x320] sm:$0xff]  ;;  %v1900_v8 = vld [vmem:[%s22136_s1 + $0x328] sm:$0xff] }
  0x32   :  { %14650 = vmatpush3.bf16.msra.mxu0 %v14649_v20  ;;  %v345_v20 = vld [vmem:[#allocation2 + $0x2e] sm:$0xff] }
  0x33   :  { %11540 = vmatmul.mubr.f32.gmra.mrb[8].mxu0 %v88_v21  ;;  %11591 = vmatmul.mubr.f32.gmra.mrb[8].mxu1 %v105_v22  ;;  %v14682_v21 = vpack.c.bf16 %v988_v18, %v987_v17  ;;  %v989_v22 = vld [vmem:[%s22136_s1 + $0x1e0] sm:$0xff]  ;;  %v15993_v18 = vld [vmem:[#allocation2 + $0x57] sm:$0xff] }
  0x34   :  { %14632 = vmatpush3.bf16.msra.mxu1 %v14631_v23  ;;  %11542 = vmatprep.mubr.msk.f32.mxu0 %vm15438_vm0, %v22146_v6  ;;  %v990_v23 = vld [vmem:[%s22136_s1 + $0x1e8] sm:$0xff]  ;;  %v359_v17 = vld [vmem:[#allocation2 + $0x9e] sm:$0xff] }
  0x35   :  { %11593 = vmatprep.mubr.msk.f32.mxu1 %vm15438_vm0, %v22146_v6  ;;  %14633 = vmatprep.subr.bf16.mxu1 %v22144_v0  ;;  %v14685_v26 = vpack.c.bf16 %v990_v23, %v989_v22  ;;  %v16007_v22 = vld [vmem:[#allocation2 + $0x67] sm:$0xff]  ;;  %v362_v23 = vld [vmem:[#allocation2 + $0xb6] sm:$0xff] }
  0x36   :  { %14651 = vmatprep.subr.bf16.mxu0 %v22144_v0 }
  0x37   :  { %11543 = vmatmul.mubr.f32.gmra.mrb[10].mxu0 %v89_v28  ;;  %11594 = vmatmul.mubr.f32.gmra.mrb[10].mxu1 %v106_v29  ;;  %v992_v28 = vld [vmem:[%s22136_s1 + $0x1f8] sm:$0xff] }
  0x38   :  { %14635 = vmatpush3.bf16.msra.mxu1 %v14634_v30  ;;  %11545 = vmatprep.mubr.msk.f32.mxu0 %vm15438_vm0, %v22146_v6  ;;  %v99_v29 = vld [vmem:[#allocation2 + $0x7d] sm:$0xff]  ;;  %v14688_v31 = vpack.c.bf16 %v992_v28, %v991_v27  ;;  %v364_v27 = vld [vmem:[#allocation2 + $0xc6] sm:$0xff] }
  0x39   :  { %11596 = vmatprep.mubr.msk.f32.mxu1 %vm15438_vm0, %v22146_v6  ;;  %14636 = vmatprep.subr.bf16.mxu1 %v22144_v0  ;;  %v347_v30 = vld [vmem:[#allocation2 + $0x3e] sm:$0xff] }
  0x3a   :  { %14653 = vmatpush3.bf16.msra.mxu0 %v14652_v33  ;;  %v348_v33 = vld [vmem:[#allocation2 + $0x46] sm:$0xff] }
  0x3b   :  { %11546 = vmatmul.mubr.f32.gmra.mrb[12].mxu0 %v90_v34  ;;  %11597 = vmatmul.mubr.f32.gmra.mrb[12].mxu1 %v107_v35  ;;  %v1283_v34 = vld [vmem:[%s22136_s1 + $0x200] sm:$0xff]  ;;  %v1284_v35 = vld [vmem:[%s22136_s1 + $0x208] sm:$0xff] }
  0x3c   :  { %14638 = vmatpush3.bf16.msra.mxu1 %v14637_v36  ;;  %11548 = vmatprep.mubr.msk.f32.mxu0 %vm15438_vm0, %v22146_v6  ;;  %v349_v36 = vld [vmem:[#allocation2 + $0x4e] sm:$0xff]  ;;  %v14691_v38 = vpack.c.bf16 %v1284_v35, %v1283_v34  ;;  %v16028_v28 = vld [vmem:[#allocation2 + $0x7f] sm:$0xff] }
  0x3d   :  { %11599 = vmatprep.mubr.msk.f32.mxu1 %vm15438_vm0, %v22146_v6  ;;  %14639 = vmatprep.subr.bf16.mxu1 %v22144_v0  ;;  %v1592_v34 = vld [vmem:[%s22136_s1 + $0x298] sm:$0xff]  ;;  %v16055_v35 = vld [vmem:[#allocation2 + $0x8f] sm:$0xff] }
  0x3e   :  { %14654 = vmatprep.subr.bf16.mxu0 %v22144_v0 }
  0x3f   :  { %11549 = vmatmul.mubr.f32.gmra.mrb[14].mxu0 %v91_v41  ;;  %11600 = vmatmul.mubr.f32.gmra.mrb[14].mxu1 %v108_v42  ;;  %v350_v41 = vld [vmem:[#allocation2 + $0x56] sm:$0xff] }
  0x40   :  { %14641 = vmatpush3.bf16.msra.mxu1 %v14640_v43  ;;  %11551 = vmatprep.mubr.msk.f32.mxu0 %vm15438_vm0, %v22146_v6  ;;  %v15878_v42 = vld [vmem:[#allocation2 + $0xf] sm:$0xff]  ;;  %v14694_v43 = vpack.c.bf16 %v1286_v40, %v1285_v39  ;;  %v16070_v39 = vld [vmem:[#allocation2 + $0x97] sm:$0xff] }
  0x41   :  { %11634 = vmatprep.mubr.msk.f32.mxu1 %vm15438_vm0, %v22146_v6  ;;  %14656 = vmatpush3.bf16.msra.mxu0 %v14655_v44  ;;  %v1287_v44 = vld [vmem:[%s22136_s1 + $0x220] sm:$0xff] }
  0x42   :  { %14657 = vmatprep.subr.bf16.mxu0 %v22144_v0  ;;  %14666 = vmatprep.subr.bf16.mxu1 %v22144_v0  ;;  %v14697_v48 = vpack.c.bf16 %v1288_v45, %v1287_v44  ;;  %v1597_v45 = vld [vmem:[%s22136_s1 + $0x2c0] sm:$0xff] }
  0x43   :  { %11552 = vmatmul.mubr.f32.gmra.mrb[16].mxu0 %v92_v49  ;;  %11635 = vmatmul.mubr.f32.vlgmr.msra.gmra.mrb[16].mxu1 %v340_v50  ;;  %v1289_v49 = vld [vmem:[%s22136_s1 + $0x230] sm:$0xff]  ;;  %v1290_v50 = vld [vmem:[%s22136_s1 + $0x238] sm:$0xff] }
  0x44   :  { %11554 = vmatprep.mubr.msk.f32.mxu0 %vm15438_vm0, %v22146_v6  ;;  %11637 = vmatprep.mubr.msk.f32.mxu1 %vm15438_vm0, %v22146_v6 }
  0x45   :  { %14659 = vmatpush3.bf16.msra.mxu0 %v14658_v51  ;;  %14668 = vmatpush3.bf16.msra.mxu1 %v14667_v53  ;;  %v352_v51 = vld [vmem:[#allocation2 + $0x66] sm:$0xff]  ;;  %v14700_v53 = vpack.c.bf16 %v1290_v50, %v1289_v49  ;;  %v1599_v49 = vld [vmem:[%s22136_s1 + $0x2d0] sm:$0xff]  ;;  %v1600_v50 = vld [vmem:[%s22136_s1 + $0x2d8] sm:$0xff] }
  0x46   :  { %14660 = vmatprep.subr.bf16.mxu0 %v22144_v0  ;;  %14669 = vmatprep.subr.bf16.mxu1 %v22144_v0 }
  0x47   :  { %11555 = vmatmul.mubr.f32.gmra.mrb[18].mxu0 %v93_v57  ;;  %11638 = vmatmul.mubr.f32.gmra.mrb[18].mxu1 %v341_v58  ;;  %v15922_v57 = vld [vmem:[#allocation2 + $0x27] sm:$0xff]  ;;  %v14703_v58 = vpack.c.bf16 %v1292_v55, %v1291_v54  ;;  %v16130_v55 = vld [vmem:[#allocation2 + $0xb7] sm:$0xff] }
  0x48   :  { %11557 = vmatprep.mubr.msk.f32.mxu0 %vm15438_vm0, %v22146_v6  ;;  %11640 = vmatprep.mubr.msk.f32.mxu1 %vm15438_vm0, %v22146_v6  ;;  %v1602_v54 = vld [vmem:[%s22136_s1 + $0x2e8] sm:$0xff] }
  0x49   :  { %14662 = vmatpush3.bf16.msra.mxu0 %v14661_v59  ;;  %14671 = vmatpush3.bf16.msra.mxu1 %v14670_v61  ;;  %v1293_v59 = vld [vmem:[%s22136_s1 + $0x250] sm:$0xff] }
  0x4a   :  { %14663 = vmatprep.subr.bf16.mxu0 %v22144_v0  ;;  %14672 = vmatprep.subr.bf16.mxu1 %v22144_v0  ;;  %v354_v61 = vld [vmem:[#allocation2 + $0x76] sm:$0xff]  ;;  %v14706_v63 = vpack.c.bf16 %v1294_v60, %v1293_v59  ;;  %v16145_v59 = vld [vmem:[#allocation2 + $0xbf] sm:$0xff] }
  0x4b   :  { %11558 = vmatmul.mubr.f32.gmra.mrb[20].mxu0 %v94_v2  ;;  %11641 = vmatmul.mubr.f32.gmra.mrb[20].mxu1 %v342_v3  ;;  %v1296_v2 = vld [vmem:[%s22136_s1 + $0x268] sm:$0xff]  ;;  %v355_v3 = vld [vmem:[#allocation2 + $0x7e] sm:$0xff] }
  0x4c   :  { %11560 = vmatprep.mubr.msk.f32.mxu0 %vm15438_vm0, %v22146_v6  ;;  %11643 = vmatprep.mubr.msk.f32.mxu1 %vm15438_vm0, %v22146_v6 }
  0x4d   :  { %14665 = vmatpush3.bf16.msra.mxu0 %v14664_v4  ;;  %14674 = vmatpush3.bf16.msra.mxu1 %v14673_v5  ;;  %v15950_v4 = vld [vmem:[#allocation2 + $0x37] sm:$0xff]  ;;  %v14709_v5 = vpack.c.bf16 %v1296_v2, %v1295_v1 }
  0x4e   :  { %14690 = vmatprep.subr.bf16.mxu0 %v22144_v0  ;;  %14675 = vmatprep.subr.bf16.mxu1 %v22144_v0  ;;  %v1897_v2 = vld [vmem:[%s22136_s1 + $0x310] sm:$0xff] }
  0x4f   :  { %11561 = vmatmul.mubr.f32.gmra.mrb[22].mxu0 %v95_v9  ;;  %11644 = vmatmul.mubr.f32.gmra.mrb[22].mxu1 %v343_v10  ;;  %v15962_v9 = vld [vmem:[%s22137_s0 + $0xd0] sm:$0xff]  ;;  %v356_v10 = vld [vmem:[#allocation2 + $0x86] sm:$0xff] }
  0x50   :  { %11563 = vmatprep.mubr.msk.f32.mxu0 %vm15438_vm0, %v22146_v6  ;;  %11646 = vmatprep.mubr.msk.f32.mxu1 %vm15438_vm0, %v22146_v6  ;;  %81 = vst [vmem:[#allocation2 + $0xd0] sm:$0xff] %v15962_v9 }
  0x51   :  { %14677 = vmatpush3.bf16.msra.mxu1 %v14676_v11  ;;  %v15970_v11 = vld [vmem:[#allocation2 + $0x3f] sm:$0xff] }
  0x52   :  { %14678 = vmatprep.subr.bf16.mxu1 %v22144_v0 }
  0x53   :  { %11564 = vmatmul.mubr.f32.gmra.mrb[24].mxu0 %v96_v14  ;;  %11647 = vmatmul.mubr.f32.gmra.mrb[24].mxu1 %v344_v15  ;;  %v15978_v14 = vld [vmem:[#allocation2 + $0x47] sm:$0xff]  ;;  %v358_v15 = vld [vmem:[#allocation2 + $0x96] sm:$0xff] }
  0x54   :  { %11566 = vmatprep.mubr.msk.f32.mxu0 %vm15438_vm0, %v22146_v6  ;;  %11649 = vmatprep.mubr.msk.f32.mxu1 %vm15438_vm0, %v22146_v6 }
  0x55   :  { %14680 = vmatpush3.bf16.msra.mxu1 %v14679_v16  ;;  %v15986_v16 = vld [vmem:[#allocation2 + $0x4f] sm:$0xff] }
  0x56   :  { %14681 = vmatprep.subr.bf16.mxu1 %v22144_v0 }
  0x57   :  { %11567 = vmatmul.mubr.f32.gmra.mrb[26].mxu0 %v97_v19  ;;  %11650 = vmatmul.mubr.f32.gmra.mrb[26].mxu1 %v345_v20  ;;  %v360_v19 = vld [vmem:[#allocation2 + $0xa6] sm:$0xff] }
  0x58   :  { %11569 = vmatprep.mubr.msk.f32.mxu0 %vm15438_vm0, %v22146_v6  ;;  %11652 = vmatprep.mubr.msk.f32.mxu1 %vm15438_vm0, %v22146_v6  ;;  %v16000_v20 = vld [vmem:[#allocation2 + $0x5f] sm:$0xff] }
  0x59   :  { %14683 = vmatpush3.bf16.msra.mxu1 %v14682_v21  ;;  %v361_v21 = vld [vmem:[#allocation2 + $0xae] sm:$0xff] }
  0x5a   :  { %14684 = vmatprep.subr.bf16.mxu1 %v22144_v0 }
  0x5b   :  { %11570 = vmatmul.mubr.f32.gmra.mrb[28].mxu0 %v98_v24  ;;  %11653 = vmatmul.mubr.f32.gmra.mrb[28].mxu1 %v346_v25  ;;  %v16014_v24 = vld [vmem:[#allocation2 + $0x6f] sm:$0xff]  ;;  %v363_v25 = vld [vmem:[#allocation2 + $0xbe] sm:$0xff] }
  0x5c   :  { %11572 = vmatprep.mubr.msk.f32.mxu0 %vm15438_vm0, %v22146_v6  ;;  %11655 = vmatprep.mubr.msk.f32.mxu1 %vm15438_vm0, %v22146_v6 }
  0x5d   :  { %14686 = vmatpush3.bf16.msra.mxu1 %v14685_v26  ;;  %v16021_v26 = vld [vmem:[#allocation2 + $0x77] sm:$0xff] }
  0x5e   :  { %14687 = vmatprep.subr.bf16.mxu1 %v22144_v0 }
  0x5f   :  { %11573 = vmatmul.mubr.f32.gmra.mrb[30].mxu0 %v99_v29  ;;  %11656 = vmatmul.mubr.f32.gmra.mrb[30].mxu1 %v347_v30  ;;  %v1589_v29 = vld [vmem:[%s22136_s1 + $0x280] sm:$0xff]  ;;  %v1590_v30 = vld [vmem:[%s22136_s1 + $0x288] sm:$0xff] }
  0x60   :  { %11575 = vmatprep.mubr.msk.f32.mxu0 %vm15438_vm0, %v22146_v6  ;;  %11658 = vmatprep.mubr.msk.f32.mxu1 %vm15438_vm0, %v22146_v6 }
  0x61   :  { %14689 = vmatpush3.bf16.msra.mxu1 %v14688_v31  ;;  %v16041_v31 = vld [vmem:[#allocation2 + $0x87] sm:$0xff] }
  0x62   :  { %14714 = vmatprep.subr.bf16.mxu1 %v22144_v0 }
  0x63   :  { %11576 = vmatmul.mubr.f32.gmra.mrb[32].mxu0 %v100_v32  ;;  %11659 = vmatmul.mubr.f32.gmra.mrb[32].mxu1 %v348_v33  ;;  %v14715_v32 = vpack.c.bf16 %v1590_v30, %v1589_v29  ;;  %v1591_v33 = vld [vmem:[%s22136_s1 + $0x290] sm:$0xff]  ;;  %v53_v30 = vld [vmem:[%s22137_s0 + $0xd8] sm:$0xff] }
  0x64   :  { %11661 = vmatprep.mubr.msk.f32.mxu1 %vm15438_vm0, %v22146_v6  ;;  %11741 = vmatprep.mubr.msk.f32.mxu0 %vm15438_vm0, %v22146_v6  ;;  %v1909_v29 = vld [vmem:[%s22136_s1 + $0x370] sm:$0xff]  ;;  %82 = vst [vmem:[#allocation2 + $0xd8] sm:$0xff] %v53_v30 }
  0x67   :  { %11662 = vmatmul.mubr.f32.gmra.mrb[34].mxu1 %v349_v36  ;;  %11742 = vmatmul.mubr.f32.vlgmr.msra.gmra.mrb[34].mxu0 %v646_v37  ;;  %v14718_v36 = vpack.c.bf16 %v1592_v34, %v1591_v33  ;;  %v1593_v37 = vld [vmem:[%s22136_s1 + $0x2a0] sm:$0xff]  ;;  %v15418_v34 = vld [vmem:[#allocation2 + $0x48] sm:$0xff] }
  0x68   :  { %14692 = vmatpush3.bf16.msra.mxu0 %v14691_v38  ;;  %11664 = vmatprep.mubr.msk.f32.mxu1 %vm15438_vm0, %v22146_v6  ;;  %v1594_v38 = vld [vmem:[%s22136_s1 + $0x2a8] sm:$0xff] }
  0x69   :  { %11744 = vmatprep.mubr.msk.f32.mxu0 %vm15438_vm0, %v22146_v6  ;;  %14693 = vmatprep.subr.bf16.mxu0 %v22144_v0  ;;  %v14721_v40 = vpack.c.bf16 %v1594_v38, %v1593_v37 }
  0x6b   :  { %11665 = vmatmul.mubr.f32.gmra.mrb[36].mxu1 %v350_v41  ;;  %11745 = vmatmul.mubr.f32.gmra.mrb[36].mxu0 %v15878_v42  ;;  %v1595_v41 = vld [vmem:[%s22136_s1 + $0x2b0] sm:$0xff] }
  0x6c   :  { %11667 = vmatprep.mubr.msk.f32.mxu1 %vm15438_vm0, %v22146_v6  ;;  %11747 = vmatprep.mubr.msk.f32.mxu0 %vm15438_vm0, %v22146_v6 }
  0x6d   :  { %14695 = vmatpush3.bf16.msra.mxu0 %v14694_v43  ;;  %v16085_v43 = vld [vmem:[#allocation2 + $0x9f] sm:$0xff] }
  0x6e   :  { %14696 = vmatprep.subr.bf16.mxu0 %v22144_v0 }
  0x6f   :  { %11668 = vmatmul.mubr.f32.gmra.mrb[38].mxu1 %v351_v46  ;;  %11748 = vmatmul.mubr.f32.gmra.mrb[38].mxu0 %v15894_v47  ;;  %v1598_v46 = vld [vmem:[%s22136_s1 + $0x2c8] sm:$0xff] }
  0x70   :  { %11670 = vmatprep.mubr.msk.f32.mxu1 %vm15438_vm0, %v22146_v6  ;;  %11750 = vmatprep.mubr.msk.f32.mxu0 %vm15438_vm0, %v22146_v6 }
  0x71   :  { %14698 = vmatpush3.bf16.msra.mxu0 %v14697_v48  ;;  %v14727_v48 = vpack.c.bf16 %v1598_v46, %v1597_v45  ;;  %v15423_v45 = vld [vmem:[#allocation2 + $0x70] sm:$0xff] }
  0x72   :  { %14699 = vmatprep.subr.bf16.mxu0 %v22144_v0 }
  0x73   :  { %11671 = vmatmul.mubr.f32.gmra.mrb[40].mxu1 %v352_v51  ;;  %11751 = vmatmul.mubr.f32.gmra.mrb[40].mxu0 %v15908_v52  ;;  %v16115_v51 = vld [vmem:[#allocation2 + $0xaf] sm:$0xff] }
  0x74   :  { %11673 = vmatprep.mubr.msk.f32.mxu1 %vm15438_vm0, %v22146_v6  ;;  %11753 = vmatprep.mubr.msk.f32.mxu0 %vm15438_vm0, %v22146_v6 }
  0x75   :  { %14701 = vmatpush3.bf16.msra.mxu0 %v14700_v53  ;;  %v1601_v53 = vld [vmem:[%s22136_s1 + $0x2e0] sm:$0xff] }
  0x76   :  { %14702 = vmatprep.subr.bf16.mxu0 %v22144_v0 }
  0x77   :  { %11674 = vmatmul.mubr.f32.gmra.mrb[42].mxu1 %v353_v56  ;;  %11754 = vmatmul.mubr.f32.gmra.mrb[42].mxu0 %v15922_v57  ;;  %v14733_v56 = vpack.c.bf16 %v1602_v54, %v1601_v53 }
  0x78   :  { %11676 = vmatprep.mubr.msk.f32.mxu1 %vm15438_vm0, %v22146_v6  ;;  %11756 = vmatprep.mubr.msk.f32.mxu0 %vm15438_vm0, %v22146_v6 }
  0x79   :  { %14704 = vmatpush3.bf16.msra.mxu0 %v14703_v58  ;;  %v1604_v58 = vld [vmem:[%s22136_s1 + $0x2f8] sm:$0xff] }
  0x7a   :  { %14705 = vmatprep.subr.bf16.mxu0 %v22144_v0 }
  0x7b   :  { %11677 = vmatmul.mubr.f32.gmra.mrb[44].mxu1 %v354_v61  ;;  %11757 = vmatmul.mubr.f32.gmra.mrb[44].mxu0 %v15936_v62  ;;  %v16154_v61 = vld [vmem:[#allocation2 + $0xc7] sm:$0xff] }
  0x7c   :  { %11679 = vmatprep.mubr.msk.f32.mxu1 %vm15438_vm0, %v22146_v6  ;;  %11759 = vmatprep.mubr.msk.f32.mxu0 %vm15438_vm0, %v22146_v6 }
  0x7d   :  { %14707 = vmatpush3.bf16.msra.mxu0 %v14706_v63  ;;  %v1896_v63 = vld [vmem:[%s22136_s1 + $0x308] sm:$0xff] }
  0x7e   :  { %14708 = vmatprep.subr.bf16.mxu0 %v22144_v0 }
  0x7f   :  { %11680 = vmatmul.mubr.f32.gmra.mrb[46].mxu1 %v355_v3  ;;  %11760 = vmatmul.mubr.f32.gmra.mrb[46].mxu0 %v15950_v4  ;;  %v1898_v3 = vld [vmem:[%s22136_s1 + $0x318] sm:$0xff] }
  0x80   :  { %11682 = vmatprep.mubr.msk.f32.mxu1 %vm15438_vm0, %v22146_v6  ;;  %11762 = vmatprep.mubr.msk.f32.mxu0 %vm15438_vm0, %v22146_v6 }
  0x81   :  { %14710 = vmatpush3.bf16.msra.mxu0 %v14709_v5  ;;  %v14742_v5 = vpack.c.bf16 %v1898_v3, %v1897_v2  ;;  %v1274_v3 = vld [vmem:[#allocation2 + $0x90] sm:$0xff] }
  0x82   :  { %14711 = vmatprep.subr.bf16.mxu0 %v22144_v0 }
  0x83   :  { %11683 = vmatmul.mubr.f32.gmra.mrb[48].mxu1 %v356_v10  ;;  %11763 = vmatmul.mubr.f32.gmra.mrb[48].mxu0 %v15970_v11  ;;  %v15412_v10 = vld [vmem:[#allocation2 + $0x18] sm:$0xff] }
  0x84   :  { %11685 = vmatprep.mubr.msk.f32.mxu1 %vm15438_vm0, %v22146_v6  ;;  %11765 = vmatprep.mubr.msk.f32.mxu0 %vm15438_vm0, %v22146_v6 }
  0x85   :  { %14713 = vmatpush3.bf16.msra.mxu0 %v14712_v12  ;;  %v1901_v12 = vld [vmem:[%s22136_s1 + $0x330] sm:$0xff] }
  0x86   :  { %14738 = vmatprep.subr.bf16.mxu0 %v22144_v0 }
  0x87   :  { %11686 = vmatmul.mubr.f32.gmra.mrb[50].mxu1 %v357_v13  ;;  %11766 = vmatmul.mubr.f32.gmra.mrb[50].mxu0 %v15978_v14  ;;  %v1902_v13 = vld [vmem:[%s22136_s1 + $0x338] sm:$0xff] }
  0x88   :  { %11688 = vmatprep.mubr.msk.f32.mxu1 %vm15438_vm0, %v22146_v6  ;;  %11768 = vmatprep.mubr.msk.f32.mxu0 %vm15438_vm0, %v22146_v6 }
  0x8b   :  { %11689 = vmatmul.mubr.f32.gmra.mrb[52].mxu1 %v358_v15  ;;  %11769 = vmatmul.mubr.f32.gmra.mrb[52].mxu0 %v15986_v16  ;;  %v14748_v15 = vpack.c.bf16 %v1902_v13, %v1901_v12 }
  0x8c   :  { %11691 = vmatprep.mubr.msk.f32.mxu1 %vm15438_vm0, %v22146_v6  ;;  %11771 = vmatprep.mubr.msk.f32.mxu0 %vm15438_vm0, %v22146_v6 }
  0x8f   :  { %11692 = vmatmul.mubr.f32.gmra.mrb[54].mxu1 %v359_v17  ;;  %11772 = vmatmul.mubr.f32.gmra.mrb[54].mxu0 %v15993_v18  ;;  %v1904_v17 = vld [vmem:[%s22136_s1 + $0x348] sm:$0xff] }
  0x90   :  { %11694 = vmatprep.mubr.msk.f32.mxu1 %vm15438_vm0, %v22146_v6  ;;  %11774 = vmatprep.mubr.msk.f32.mxu0 %vm15438_vm0, %v22146_v6 }
  0x93   :  { %11695 = vmatmul.mubr.f32.gmra.mrb[56].mxu1 %v360_v19  ;;  %11775 = vmatmul.mubr.f32.gmra.mrb[56].mxu0 %v16000_v20 }
  0x94   :  { %11697 = vmatprep.mubr.msk.f32.mxu1 %vm15438_vm0, %v22146_v6  ;;  %11777 = vmatprep.mubr.msk.f32.mxu0 %vm15438_vm0, %v22146_v6 }
  0x97   :  { %11698 = vmatmul.mubr.f32.gmra.mrb[58].mxu1 %v361_v21  ;;  %11778 = vmatmul.mubr.f32.gmra.mrb[58].mxu0 %v16007_v22  ;;  %v1906_v21 = vld [vmem:[%s22136_s1 + $0x358] sm:$0xff] }
  0x98   :  { %11700 = vmatprep.mubr.msk.f32.mxu1 %vm15438_vm0, %v22146_v6  ;;  %11780 = vmatprep.mubr.msk.f32.mxu0 %vm15438_vm0, %v22146_v6 }
  0x9b   :  { %11701 = vmatmul.mubr.f32.gmra.mrb[60].mxu1 %v362_v23  ;;  %11781 = vmatmul.mubr.f32.gmra.mrb[60].mxu0 %v16014_v24 }
  0x9c   :  { %11703 = vmatprep.mubr.msk.f32.mxu1 %vm15438_vm0, %v22146_v6  ;;  %11783 = vmatprep.mubr.msk.f32.mxu0 %vm15438_vm0, %v22146_v6 }
  0x9f   :  { %11704 = vmatmul.mubr.f32.gmra.mrb[62].mxu1 %v363_v25  ;;  %11784 = vmatmul.mubr.f32.gmra.mrb[62].mxu0 %v16021_v26  ;;  %v1908_v25 = vld [vmem:[%s22136_s1 + $0x368] sm:$0xff] }
  0xa0   :  { %11706 = vmatprep.mubr.msk.f32.mxu1 %vm15438_vm0, %v22146_v6  ;;  %11786 = vmatprep.mubr.msk.f32.mxu0 %vm15438_vm0, %v22146_v6 }
  0xa3   :  { %11707 = vmatmul.mubr.f32.gmra.mrb[64].mxu1 %v364_v27  ;;  %11787 = vmatmul.mubr.f32.gmra.mrb[64].mxu0 %v16028_v28 }
  0xa4   :  { %11789 = vmatprep.mubr.msk.f32.mxu0 %vm15438_vm0, %v22146_v6  ;;  %11848 = vmatprep.mubr.msk.f32.mxu1 %vm15438_vm0, %v22146_v6 }
  0xa7   :  { %11790 = vmatmul.mubr.f32.gmra.mrb[66].mxu0 %v16041_v31  ;;  %11849 = vmatmul.mubr.f32.vlgmr.msra.gmra.mrb[66].mxu1 %v15878_v42  ;;  %v1596_v42 = vld [vmem:[%s22136_s1 + $0x2b8] sm:$0xff] }
  0xa8   :  { %11792 = vmatprep.mubr.msk.f32.mxu0 %vm15438_vm0, %v22146_v6  ;;  %11851 = vmatprep.mubr.msk.f32.mxu1 %vm15438_vm0, %v22146_v6  ;;  %v14724_v44 = vpack.c.bf16 %v1596_v42, %v1595_v41 }
  0xa9   :  { %14716 = vmatpush3.bf16.msra.mxu1 %v14715_v32  ;;  %v15417_v32 = vld [vmem:[#allocation2 + $0x40] sm:$0xff] }
  0xaa   :  { %14717 = vmatprep.subr.bf16.mxu1 %v22144_v0 }
  0xab   :  { %11793 = vmatmul.mubr.f32.gmra.mrb[68].mxu0 %v16055_v35  ;;  %11852 = vmatmul.mubr.f32.gmra.mrb[68].mxu1 %v15894_v47  ;;  %v16100_v47 = vld [vmem:[#allocation2 + $0xa7] sm:$0xff] }
  0xac   :  { %11795 = vmatprep.mubr.msk.f32.mxu0 %vm15438_vm0, %v22146_v6  ;;  %11854 = vmatprep.mubr.msk.f32.mxu1 %vm15438_vm0, %v22146_v6 }
  0xad   :  { %14719 = vmatpush3.bf16.msra.mxu1 %v14718_v36  ;;  %v15421_v36 = vld [vmem:[#allocation2 + $0x60] sm:$0xff] }
  0xae   :  { %14720 = vmatprep.subr.bf16.mxu1 %v22144_v0 }
  0xaf   :  { %11796 = vmatmul.mubr.f32.gmra.mrb[70].mxu0 %v16070_v39  ;;  %11855 = vmatmul.mubr.f32.gmra.mrb[70].mxu1 %v15908_v52  ;;  %v14730_v52 = vpack.c.bf16 %v1600_v50, %v1599_v49  ;;  %v15424_v50 = vld [vmem:[#allocation2 + $0x78] sm:$0xff] }
  0xb0   :  { %11798 = vmatprep.mubr.msk.f32.mxu0 %vm15438_vm0, %v22146_v6  ;;  %11857 = vmatprep.mubr.msk.f32.mxu1 %vm15438_vm0, %v22146_v6 }
  0xb1   :  { %14722 = vmatpush3.bf16.msra.mxu1 %v14721_v40  ;;  %v15422_v40 = vld [vmem:[#allocation2 + $0x68] sm:$0xff] }
  0xb2   :  { %14723 = vmatprep.subr.bf16.mxu1 %v22144_v0 }
  0xb3   :  { %11799 = vmatmul.mubr.f32.gmra.mrb[72].mxu0 %v16085_v43  ;;  %11858 = vmatmul.mubr.f32.gmra.mrb[72].mxu1 %v15922_v57  ;;  %v1603_v57 = vld [vmem:[%s22136_s1 + $0x2f0] sm:$0xff] }
  0xb4   :  { %11801 = vmatprep.mubr.msk.f32.mxu0 %vm15438_vm0, %v22146_v6  ;;  %11860 = vmatprep.mubr.msk.f32.mxu1 %vm15438_vm0, %v22146_v6  ;;  %v14736_v60 = vpack.c.bf16 %v1604_v58, %v1603_v57  ;;  %v976_v57 = vld [vmem:[#allocation2 + $0xcf] sm:$0xff] }
  0xb5   :  { %14725 = vmatpush3.bf16.msra.mxu1 %v14724_v44  ;;  %v1273_v58 = vld [vmem:[#allocation2 + $0x88] sm:$0xff] }
  0xb6   :  { %14726 = vmatprep.subr.bf16.mxu1 %v22144_v0 }
  0xb7   :  { %11802 = vmatmul.mubr.f32.gmra.mrb[74].mxu0 %v16100_v47  ;;  %11861 = vmatmul.mubr.f32.gmra.mrb[74].mxu1 %v15936_v62  ;;  %v1895_v62 = vld [vmem:[%s22136_s1 + $0x300] sm:$0xff] }
  0xb8   :  { %11804 = vmatprep.mubr.msk.f32.mxu0 %vm15438_vm0, %v22146_v6  ;;  %11863 = vmatprep.mubr.msk.f32.mxu1 %vm15438_vm0, %v22146_v6  ;;  %v14739_v1 = vpack.c.bf16 %v1896_v63, %v1895_v62  ;;  %v2201_v62 = vld [vmem:[%s22136_s1 + $0x380] sm:$0xff] }
  0xb9   :  { %14728 = vmatpush3.bf16.msra.mxu1 %v14727_v48  ;;  %v54_v63 = vld [vmem:[%s22137_s0 + $0xe0] sm:$0xff] }
  0xba   :  { %14729 = vmatprep.subr.bf16.mxu1 %v22144_v0  ;;  %83 = vst [vmem:[#allocation2 + $0xe0] sm:$0xff] %v54_v63 }
  0xbb   :  { %11805 = vmatmul.mubr.f32.gmra.mrb[76].mxu0 %v16115_v51  ;;  %11864 = vmatmul.mubr.f32.gmra.mrb[76].mxu1 %v15950_v4  ;;  %v15411_v4 = vld [vmem:[#allocation2 + $0x10] sm:$0xff] }
  0xbc   :  { %11807 = vmatprep.mubr.msk.f32.mxu0 %vm15438_vm0, %v22146_v6  ;;  %11866 = vmatprep.mubr.msk.f32.mxu1 %vm15438_vm0, %v22146_v6 }
  0xbd   :  { %14731 = vmatpush3.bf16.msra.mxu1 %v14730_v52 }
  0xbe   :  { %14732 = vmatprep.subr.bf16.mxu1 %v22144_v0 }
  0xbf   :  { %11808 = vmatmul.mubr.f32.gmra.mrb[78].mxu0 %v16130_v55  ;;  %11867 = vmatmul.mubr.f32.gmra.mrb[78].mxu1 %v15970_v11  ;;  %v14745_v11 = vpack.c.bf16 %v1900_v8, %v1899_v7 }
  0xc0   :  { %11810 = vmatprep.mubr.msk.f32.mxu0 %vm15438_vm0, %v22146_v6  ;;  %11869 = vmatprep.mubr.msk.f32.mxu1 %vm15438_vm0, %v22146_v6 }
  0xc1   :  { %14734 = vmatpush3.bf16.msra.mxu1 %v14733_v56 }
  0xc2   :  { %14735 = vmatprep.subr.bf16.mxu1 %v22144_v0 }
  0xc3   :  { %11811 = vmatmul.mubr.f32.gmra.mrb[80].mxu0 %v16145_v59  ;;  %11870 = vmatmul.mubr.f32.gmra.mrb[80].mxu1 %v15978_v14  ;;  %v15413_v14 = vld [vmem:[#allocation2 + $0x20] sm:$0xff] }
  0xc4   :  { %11813 = vmatprep.mubr.msk.f32.mxu0 %vm15438_vm0, %v22146_v6  ;;  %11872 = vmatprep.mubr.msk.f32.mxu1 %vm15438_vm0, %v22146_v6 }
  0xc5   :  { %14737 = vmatpush3.bf16.msra.mxu1 %v14736_v60 }
  0xc6   :  { %14762 = vmatprep.subr.bf16.mxu1 %v22144_v0 }
  0xc7   :  { %11814 = vmatmul.mubr.f32.gmra.mrb[82].mxu0 %v16154_v61  ;;  %11873 = vmatmul.mubr.f32.gmra.mrb[82].mxu1 %v15986_v16  ;;  %v1903_v16 = vld [vmem:[%s22136_s1 + $0x340] sm:$0xff] }
  0xc8   :  { %11875 = vmatprep.mubr.msk.f32.mxu1 %vm15438_vm0, %v22146_v6  ;;  %11955 = vmatprep.mubr.msk.f32.mxu0 %vm15438_vm0, %v22146_v6  ;;  %v14751_v19 = vpack.c.bf16 %v1904_v17, %v1903_v16 }
  0xcb   :  { %11876 = vmatmul.mubr.f32.gmra.mrb[84].mxu1 %v15993_v18  ;;  %11956 = vmatmul.mubr.f32.vlgmr.msra.gmra.mrb[84].mxu0 %v15411_v4  ;;  %v15414_v18 = vld [vmem:[#allocation2 + $0x28] sm:$0xff]  ;;  %v1564_v4 = vld [vmem:[#allocation2 + $0x11] sm:$0xff] }
  0xcc   :  { %14740 = vmatpush3.bf16.msra.mxu0 %v14739_v1  ;;  %11878 = vmatprep.mubr.msk.f32.mxu1 %vm15438_vm0, %v22146_v6 }
  0xcd   :  { %11958 = vmatprep.mubr.msk.f32.mxu0 %vm15438_vm0, %v22146_v6  ;;  %14741 = vmatprep.subr.bf16.mxu0 %v22144_v0 }
  0xcf   :  { %11879 = vmatmul.mubr.f32.gmra.mrb[86].mxu1 %v16000_v20  ;;  %11959 = vmatmul.mubr.f32.gmra.mrb[86].mxu0 %v15412_v10  ;;  %v1905_v20 = vld [vmem:[%s22136_s1 + $0x350] sm:$0xff] }
  0xd0   :  { %11881 = vmatprep.mubr.msk.f32.mxu1 %vm15438_vm0, %v22146_v6  ;;  %11961 = vmatprep.mubr.msk.f32.mxu0 %vm15438_vm0, %v22146_v6  ;;  %v14754_v23 = vpack.c.bf16 %v1906_v21, %v1905_v20  ;;  %v2203_v10 = vld [vmem:[%s22136_s1 + $0x390] sm:$0xff]  ;;  %v2206_v20 = vld [vmem:[%s22136_s1 + $0x3a8] sm:$0xff] }
  0xd1   :  { %14743 = vmatpush3.bf16.msra.mxu0 %v14742_v5 }
  0xd2   :  { %14744 = vmatprep.subr.bf16.mxu0 %v22144_v0 }
  0xd3   :  { %11882 = vmatmul.mubr.f32.gmra.mrb[88].mxu1 %v16007_v22  ;;  %11962 = vmatmul.mubr.f32.gmra.mrb[88].mxu0 %v15413_v14  ;;  %v15415_v22 = vld [vmem:[#allocation2 + $0x30] sm:$0xff]  ;;  %v1275_v14 = vld [vmem:[#allocation2 + $0x98] sm:$0xff] }
  0xd4   :  { %11884 = vmatprep.mubr.msk.f32.mxu1 %vm15438_vm0, %v22146_v6  ;;  %11964 = vmatprep.mubr.msk.f32.mxu0 %vm15438_vm0, %v22146_v6 }
  0xd5   :  { %14746 = vmatpush3.bf16.msra.mxu0 %v14745_v11  ;;  %v2204_v11 = vld [vmem:[%s22136_s1 + $0x398] sm:$0xff] }
  0xd6   :  { %14747 = vmatprep.subr.bf16.mxu0 %v22144_v0  ;;  %v14766_v16 = vpack.c.bf16 %v2204_v11, %v2203_v10  ;;  %v1280_v11 = vld [vmem:[#allocation2 + $0xc0] sm:$0xff] }
  0xd7   :  { %11885 = vmatmul.mubr.f32.gmra.mrb[90].mxu1 %v16014_v24  ;;  %11965 = vmatmul.mubr.f32.gmra.mrb[90].mxu0 %v15414_v18  ;;  %v1907_v24 = vld [vmem:[%s22136_s1 + $0x360] sm:$0xff] }
  0xd8   :  { %11887 = vmatprep.mubr.msk.f32.mxu1 %vm15438_vm0, %v22146_v6  ;;  %11967 = vmatprep.mubr.msk.f32.mxu0 %vm15438_vm0, %v22146_v6  ;;  %v14757_v27 = vpack.c.bf16 %v1908_v25, %v1907_v24  ;;  %v16362_v24 = vld [vmem:[#allocation2 + $0x21] sm:$0xff] }
  0xd9   :  { %14749 = vmatpush3.bf16.msra.mxu0 %v14748_v15  ;;  %v16344_v15 = vld [vmem:[#allocation2 + $0x19] sm:$0xff] }
  0xda   :  { %14750 = vmatprep.subr.bf16.mxu0 %v22144_v0 }
  0xdb   :  { %11888 = vmatmul.mubr.f32.gmra.mrb[92].mxu1 %v16021_v26  ;;  %11968 = vmatmul.mubr.f32.gmra.mrb[92].mxu0 %v15415_v22  ;;  %v15416_v26 = vld [vmem:[#allocation2 + $0x38] sm:$0xff] }
  0xdc   :  { %11890 = vmatprep.mubr.msk.f32.mxu1 %vm15438_vm0, %v22146_v6  ;;  %11970 = vmatprep.mubr.msk.f32.mxu0 %vm15438_vm0, %v22146_v6 }
  0xdd   :  { %14752 = vmatpush3.bf16.msra.mxu0 %v14751_v19  ;;  %v2205_v19 = vld [vmem:[%s22136_s1 + $0x3a0] sm:$0xff] }
  0xde   :  { %14753 = vmatprep.subr.bf16.mxu0 %v22144_v0  ;;  %v14769_v25 = vpack.c.bf16 %v2206_v20, %v2205_v19  ;;  %v2216_v19 = vld [vmem:[%s22136_s1 + $0x3f8] sm:$0xff] }
  0xdf   :  { %11891 = vmatmul.mubr.f32.gmra.mrb[94].mxu1 %v16028_v28  ;;  %11971 = vmatmul.mubr.f32.gmra.mrb[94].mxu0 %v15416_v26  ;;  %v1910_v28 = vld [vmem:[%s22136_s1 + $0x378] sm:$0xff] }
  0xe0   :  { %11893 = vmatprep.mubr.msk.f32.mxu1 %vm15438_vm0, %v22146_v6  ;;  %11973 = vmatprep.mubr.msk.f32.mxu0 %vm15438_vm0, %v22146_v6  ;;  %v14760_v33 = vpack.c.bf16 %v1910_v28, %v1909_v29  ;;  %v2207_v29 = vld [vmem:[%s22136_s1 + $0x3b0] sm:$0xff]  ;;  %v2208_v28 = vld [vmem:[%s22136_s1 + $0x3b8] sm:$0xff] }
  0xe1   :  { %14755 = vmatpush3.bf16.msra.mxu0 %v14754_v23  ;;  %v1276_v23 = vld [vmem:[#allocation2 + $0xa0] sm:$0xff] }
  0xe2   :  { %14756 = vmatprep.subr.bf16.mxu0 %v22144_v0 }
  0xe3   :  { %11894 = vmatmul.mubr.f32.gmra.mrb[96].mxu1 %v16041_v31  ;;  %11974 = vmatmul.mubr.f32.gmra.mrb[96].mxu0 %v15417_v32  ;;  %v15419_v31 = vld [vmem:[#allocation2 + $0x50] sm:$0xff] }
  0xe4   :  { %11896 = vmatprep.mubr.msk.f32.mxu1 %vm15438_vm0, %v22146_v6  ;;  %11976 = vmatprep.mubr.msk.f32.mxu0 %vm15438_vm0, %v22146_v6 }
  0xe5   :  { %14758 = vmatpush3.bf16.msra.mxu0 %v14757_v27 }
  0xe6   :  { %14759 = vmatprep.subr.bf16.mxu0 %v22144_v0 }
  0xe7   :  { %11897 = vmatmul.mubr.f32.gmra.mrb[98].mxu1 %v16055_v35  ;;  %11977 = vmatmul.mubr.f32.gmra.mrb[98].mxu0 %v15418_v34  ;;  %v15420_v35 = vld [vmem:[#allocation2 + $0x58] sm:$0xff]  ;;  %v16380_v34 = vld [vmem:[#allocation2 + $0x29] sm:$0xff] }
  0xe8   :  { %11899 = vmatprep.mubr.msk.f32.mxu1 %vm15438_vm0, %v22146_v6  ;;  %11979 = vmatprep.mubr.msk.f32.mxu0 %vm15438_vm0, %v22146_v6 }
  0xe9   :  { %14761 = vmatpush3.bf16.msra.mxu0 %v14760_v33  ;;  %v1277_v33 = vld [vmem:[#allocation2 + $0xa8] sm:$0xff] }
  0xea   :  { %14786 = vmatprep.subr.bf16.mxu0 %v22144_v0 }
  0xeb   :  { %11900 = vmatmul.mubr.f32.gmra.mrb[100].mxu1 %v16070_v39  ;;  %11980 = vmatmul.mubr.f32.gmra.mrb[100].mxu0 %v15419_v31  ;;  %v14772_v31 = vpack.c.bf16 %v2208_v28, %v2207_v29 }
  0xec   :  { %11902 = vmatprep.mubr.msk.f32.mxu1 %vm15438_vm0, %v22146_v6  ;;  %11982 = vmatprep.mubr.msk.f32.mxu0 %vm15438_vm0, %v22146_v6 }
  0xef   :  { %11903 = vmatmul.mubr.f32.gmra.mrb[102].mxu1 %v16085_v43  ;;  %11983 = vmatmul.mubr.f32.gmra.mrb[102].mxu0 %v15420_v35 }
  0xf0   :  { %11905 = vmatprep.mubr.msk.f32.mxu1 %vm15438_vm0, %v22146_v6  ;;  %11985 = vmatprep.mubr.msk.f32.mxu0 %vm15438_vm0, %v22146_v6 }
  0xf3   :  { %11906 = vmatmul.mubr.f32.gmra.mrb[104].mxu1 %v16100_v47  ;;  %11986 = vmatmul.mubr.f32.gmra.mrb[104].mxu0 %v15421_v36 }
  0xf4   :  { %11908 = vmatprep.mubr.msk.f32.mxu1 %vm15438_vm0, %v22146_v6  ;;  %11988 = vmatprep.mubr.msk.f32.mxu0 %vm15438_vm0, %v22146_v6 }
  0xf6   :  { %v16277_v37 = vpop.f32.mrb[0].mxu0  ;;  %v16279_v38 = vpop.f32.mrb[0].mxu1 }
  0xf7   :  { %v11529_v39 = vpop.f32.mrb[1].mxu0  ;;  %11909 = vmatmul.mubr.f32.gmra.mrb[106].mxu1 %v16115_v51  ;;  %11989 = vmatmul.mubr.f32.gmra.mrb[106].mxu0 %v15422_v40  ;;  %v11580_v41 = vpop.f32.mrb[1].mxu1  ;;  %v2210_v40 = vld [vmem:[%s22136_s1 + $0x3c8] sm:$0xff] }
  0xf8   :  { %11911 = vmatprep.mubr.msk.f32.mxu1 %vm15438_vm0, %v22146_v6  ;;  %11991 = vmatprep.mubr.msk.f32.mxu0 %vm15438_vm0, %v22146_v6  ;;  %v2209_v39 = vld [vmem:[%s22136_s1 + $0x3c0] sm:$0xff] }
  0xfa   :  { %v16286_v42 = vpop.f32.mrb[2].mxu0  ;;  %v16288_v43 = vpop.f32.mrb[2].mxu1 }
  0xfb   :  { %v11532_v44 = vpop.f32.mrb[3].mxu0  ;;  %11912 = vmatmul.mubr.f32.gmra.mrb[108].mxu1 %v16130_v55  ;;  %11992 = vmatmul.mubr.f32.gmra.mrb[108].mxu0 %v15423_v45  ;;  %v11583_v46 = vpop.f32.mrb[3].mxu1  ;;  %v15425_v55 = vld [vmem:[#allocation2 + $0x80] sm:$0xff] }
  0xfc   :  { %11914 = vmatprep.mubr.msk.f32.mxu1 %vm15438_vm0, %v22146_v6  ;;  %11994 = vmatprep.mubr.msk.f32.mxu0 %vm15438_vm0, %v22146_v6  ;;  %v1278_v46 = vld [vmem:[#allocation2 + $0xb0] sm:$0xff] }
  0xfe   :  { %v16295_v47 = vpop.f32.mrb[4].mxu0  ;;  %v16297_v48 = vpop.f32.mrb[4].mxu1 }
  0xff   :  { %v11535_v49 = vpop.f32.mrb[5].mxu0  ;;  %11915 = vmatmul.mubr.f32.gmra.mrb[110].mxu1 %v16145_v59  ;;  %11995 = vmatmul.mubr.f32.gmra.mrb[110].mxu0 %v15424_v50  ;;  %v11586_v51 = vpop.f32.mrb[5].mxu1  ;;  %v14775_v50 = vpack.c.bf16 %v2210_v40, %v2209_v39 }
 0x100   :  { %11917 = vmatprep.mubr.msk.f32.mxu1 %vm15438_vm0, %v22146_v6  ;;  %11997 = vmatprep.mubr.msk.f32.mxu0 %vm15438_vm0, %v22146_v6  ;;  %v16399_v49 = vld [vmem:[#allocation2 + $0x31] sm:$0xff] }
 0x102   :  { %v16304_v52 = vpop.f32.mrb[6].mxu0  ;;  %v16306_v53 = vpop.f32.mrb[6].mxu1 }
 0x103   :  { %v11538_v54 = vpop.f32.mrb[7].mxu0  ;;  %11918 = vmatmul.mubr.f32.gmra.mrb[112].mxu1 %v16154_v61  ;;  %11998 = vmatmul.mubr.f32.gmra.mrb[112].mxu0 %v15425_v55  ;;  %v11589_v56 = vpop.f32.mrb[7].mxu1  ;;  %v2202_v61 = vld [vmem:[%s22136_s1 + $0x388] sm:$0xff]  ;;  %v2212_v55 = vld [vmem:[%s22136_s1 + $0x3d8] sm:$0xff] }
 0x104   :  { %11920 = vmatprep.mubr.msk.f32.mxu1 %vm15438_vm0, %v22146_v6  ;;  %12000 = vmatprep.mubr.msk.f32.mxu0 %vm15438_vm0, %v22146_v6  ;;  %v14763_v5 = vpack.c.bf16 %v2202_v61, %v2201_v62  ;;  %v2211_v54 = vld [vmem:[%s22136_s1 + $0x3d0] sm:$0xff]  ;;  %v1279_v62 = vld [vmem:[#allocation2 + $0xb8] sm:$0xff] }
 0x105   :  { %v16418_v61 = vld [vmem:[#allocation2 + $0x39] sm:$0xff]  ;;  %v14778_v63 = vpack.c.bf16 %v2212_v55, %v2211_v54 }
 0x106   :  { %v16313_v59 = vpop.f32.mrb[8].mxu0  ;;  %v16315_v60 = vpop.f32.mrb[8].mxu1 }
 0x107   :  { %v11541_v1 = vpop.f32.mrb[9].mxu0  ;;  %11921 = vmatmul.mubr.f32.gmra.mrb[114].mxu1 %v976_v57  ;;  %12001 = vmatmul.mubr.f32.gmra.mrb[114].mxu0 %v1273_v58  ;;  %v11592_v2 = vpop.f32.mrb[9].mxu1 }
 0x108   :  { %12003 = vmatprep.mubr.msk.f32.mxu0 %vm15438_vm0, %v22146_v6  ;;  %12062 = vmatprep.mubr.msk.f32.mxu1 %vm15438_vm0, %v22146_v6  ;;  %v2213_v2 = vld [vmem:[%s22136_s1 + $0x3e0] sm:$0xff] }
 0x10a   :  { %v16330_v7 = vpop.f32.mrb[10].mxu0  ;;  %v16332_v8 = vpop.f32.mrb[10].mxu1 }
 0x10b   :  { %v11544_v12 = vpop.f32.mrb[11].mxu0  ;;  %12004 = vmatmul.mubr.f32.gmra.mrb[116].mxu0 %v1274_v3  ;;  %12063 = vmatmul.mubr.f32.vlgmr.msra.gmra.mrb[116].mxu1 %v1564_v4  ;;  %v11595_v13 = vpop.f32.mrb[11].mxu1  ;;  %v2214_v3 = vld [vmem:[%s22136_s1 + $0x3e8] sm:$0xff] }
 0x10c   :  { %12006 = vmatprep.mubr.msk.f32.mxu0 %vm15438_vm0, %v22146_v6  ;;  %12065 = vmatprep.mubr.msk.f32.mxu1 %vm15438_vm0, %v22146_v6  ;;  %v16437_v12 = vld [vmem:[#allocation2 + $0x41] sm:$0xff]  ;;  %v14781_v13 = vpack.c.bf16 %v2214_v3, %v2213_v2 }
 0x10d   :  { %14764 = vmatpush3.bf16.msra.mxu1 %v14763_v5  ;;  %v2512_v3 = vld [vmem:[%s22136_s1 + $0x428] sm:$0xff] }
 0x10e   :  { %v16346_v17 = vpop.f32.mrb[12].mxu0  ;;  %v16348_v18 = vpop.f32.mrb[12].mxu1  ;;  %14765 = vmatprep.subr.bf16.mxu1 %v22144_v0 }
 0x10f   :  { %v11547_v21 = vpop.f32.mrb[13].mxu0  ;;  %12007 = vmatmul.mubr.f32.gmra.mrb[118].mxu0 %v1275_v14  ;;  %12066 = vmatmul.mubr.f32.gmra.mrb[118].mxu1 %v16344_v15  ;;  %v11598_v22 = vpop.f32.mrb[13].mxu1 }
 0x110   :  { %12009 = vmatprep.mubr.msk.f32.mxu0 %vm15438_vm0, %v22146_v6  ;;  %12068 = vmatprep.mubr.msk.f32.mxu1 %vm15438_vm0, %v22146_v6 }
 0x111   :  { %14767 = vmatpush3.bf16.msra.mxu1 %v14766_v16  ;;  %v2215_v16 = vld [vmem:[%s22136_s1 + $0x3f0] sm:$0xff] }
 0x112   :  { %v16364_v26 = vpop.f32.mrb[14].mxu0  ;;  %v16366_v27 = vpop.f32.mrb[14].mxu1  ;;  %14768 = vmatprep.subr.bf16.mxu1 %v22144_v0  ;;  %v14784_v29 = vpack.c.bf16 %v2216_v19, %v2215_v16  ;;  %v2514_v19 = vld [vmem:[%s22136_s1 + $0x438] sm:$0xff] }
 0x113   :  { %v11550_v30 = vpop.f32.mrb[15].mxu0  ;;  %12010 = vmatmul.mubr.f32.gmra.mrb[120].mxu0 %v1276_v23  ;;  %12069 = vmatmul.mubr.f32.gmra.mrb[120].mxu1 %v16362_v24  ;;  %v11601_v32 = vpop.f32.mrb[15].mxu1  ;;  %v1281_v23 = vld [vmem:[#allocation2 + $0xc8] sm:$0xff] }
 0x114   :  { %12012 = vmatprep.mubr.msk.f32.mxu0 %vm15438_vm0, %v22146_v6  ;;  %12071 = vmatprep.mubr.msk.f32.mxu1 %vm15438_vm0, %v22146_v6 }
 0x115   :  { %14770 = vmatpush3.bf16.msra.mxu1 %v14769_v25  ;;  %v16456_v25 = vld [vmem:[#allocation2 + $0x49] sm:$0xff] }
 0x116   :  { %v16382_v35 = vpop.f32.mrb[16].mxu0  ;;  %v447_v36 = vpop.f32.mrb[16].mxu1  ;;  %14771 = vmatprep.subr.bf16.mxu1 %v22144_v0 }
 0x117   :  { %v16392_v41 = vadd.f32 %v447_v36, %v16277_v37  ;;  %v11553_v44 = vpop.f32.mrb[17].mxu0  ;;  %12013 = vmatmul.mubr.f32.gmra.mrb[122].mxu0 %v1277_v33  ;;  %12072 = vmatmul.mubr.f32.gmra.mrb[122].mxu1 %v16380_v34  ;;  %v11636_v45 = vpop.f32.mrb[17].mxu1  ;;  %v2507_v36 = vld [vmem:[%s22136_s1 + $0x400] sm:$0xff] }
 0x118   :  { %12015 = vmatprep.mubr.msk.f32.mxu0 %vm15438_vm0, %v22146_v6  ;;  %12074 = vmatprep.mubr.msk.f32.mxu1 %vm15438_vm0, %v22146_v6 }
 0x119   :  { %14773 = vmatpush3.bf16.msra.mxu1 %v14772_v31  ;;  %v16469_v31 = vld [vmem:[#allocation2 + $0x51] sm:$0xff] }
 0x11a   :  { %v16401_v51 = vpop.f32.mrb[18].mxu0  ;;  %v452_v37 = vpop.f32.mrb[18].mxu1  ;;  %14774 = vmatprep.subr.bf16.mxu1 %v22144_v0 }
 0x11b   :  { %v16411_v56 = vadd.f32 %v452_v37, %v16286_v42  ;;  %v11556_v57 = vpop.f32.mrb[19].mxu0  ;;  %12016 = vmatmul.mubr.f32.gmra.mrb[124].mxu0 %v1278_v46  ;;  %12075 = vmatmul.mubr.f32.gmra.mrb[124].mxu1 %v16399_v49  ;;  %v11639_v58 = vpop.f32.mrb[19].mxu1 }
 0x11c   :  { %12018 = vmatprep.mubr.msk.f32.mxu0 %vm15438_vm0, %v22146_v6  ;;  %12077 = vmatprep.mubr.msk.f32.mxu1 %vm15438_vm0, %v22146_v6 }
 0x11d   :  { %14776 = vmatpush3.bf16.msra.mxu1 %v14775_v50  ;;  %v16489_v50 = vld [vmem:[#allocation2 + $0x59] sm:$0xff] }
 0x11e   :  { %v16420_v1 = vpop.f32.mrb[20].mxu0  ;;  %v457_v42 = vpop.f32.mrb[20].mxu1  ;;  %14777 = vmatprep.subr.bf16.mxu1 %v22144_v0 }
 0x11f   :  { %v16430_v4 = vadd.f32 %v457_v42, %v16295_v47  ;;  %v11559_v5 = vpop.f32.mrb[21].mxu0  ;;  %12019 = vmatmul.mubr.f32.gmra.mrb[126].mxu0 %v1279_v62  ;;  %12078 = vmatmul.mubr.f32.gmra.mrb[126].mxu1 %v16418_v61  ;;  %v11642_v10 = vpop.f32.mrb[21].mxu1 }
 0x120   :  { %12021 = vmatprep.mubr.msk.f32.mxu0 %vm15438_vm0, %v22146_v6  ;;  %12080 = vmatprep.mubr.msk.f32.mxu1 %vm15438_vm0, %v22146_v6 }
 0x121   :  { %14779 = vmatpush3.bf16.msra.mxu1 %v14778_v63  ;;  %v16506_v63 = vld [vmem:[#allocation2 + $0x61] sm:$0xff] }
 0x122   :  { %v16439_v14 = vpop.f32.mrb[22].mxu0  ;;  %v462_v47 = vpop.f32.mrb[22].mxu1  ;;  %14780 = vmatprep.subr.bf16.mxu1 %v22144_v0 }
 0x123   :  { %v16449_v20 = vadd.f32 %v462_v47, %v16304_v52  ;;  %v11562_v21 = vpop.f32.mrb[23].mxu0  ;;  %12022 = vmatmul.mubr.f32.gmra.mrb[128].mxu0 %v1280_v11  ;;  %12081 = vmatmul.mubr.f32.gmra.mrb[128].mxu1 %v16437_v12  ;;  %v11645_v22 = vpop.f32.mrb[23].mxu1 }
 0x124   :  { %12024 = vmatprep.mubr.msk.f32.mxu0 %vm15438_vm0, %v22146_v6  ;;  %12083 = vmatprep.mubr.msk.f32.mxu1 %vm15438_vm0, %v22146_v6 }
 0x125   :  { %14782 = vmatpush3.bf16.msra.mxu1 %v14781_v13  ;;  %v16528_v13 = vld [vmem:[#allocation2 + $0x69] sm:$0xff] }
 0x126   :  { %v16458_v28 = vpop.f32.mrb[24].mxu0  ;;  %v467_v52 = vpop.f32.mrb[24].mxu1  ;;  %14783 = vmatprep.subr.bf16.mxu1 %v22144_v0 }
 0x127   :  { %v16462_v30 = vadd.f32 %v467_v52, %v16313_v59  ;;  %v11565_v32 = vpop.f32.mrb[25].mxu0  ;;  %12025 = vmatmul.mubr.f32.gmra.mrb[130].mxu0 %v1281_v23  ;;  %12084 = vmatmul.mubr.f32.gmra.mrb[130].mxu1 %v16456_v25  ;;  %v11648_v33 = vpop.f32.mrb[25].mxu1  ;;  %v2508_v59 = vld [vmem:[%s22136_s1 + $0x408] sm:$0xff] }
 0x128   :  { %12027 = vmatprep.mubr.msk.f32.mxu0 %vm15438_vm0, %v22146_v6  ;;  %12086 = vmatprep.mubr.msk.f32.mxu1 %vm15438_vm0, %v22146_v6  ;;  %v14787_v37 = vpack.c.bf16 %v2508_v59, %v2507_v36 }
 0x129   :  { %14785 = vmatpush3.bf16.msra.mxu1 %v14784_v29  ;;  %v16548_v29 = vld [vmem:[#allocation2 + $0x71] sm:$0xff] }
 0x12a   :  { %v16477_v39 = vpop.f32.mrb[26].mxu0  ;;  %v472_v40 = vpop.f32.mrb[26].mxu1  ;;  %14810 = vmatprep.subr.bf16.mxu1 %v22144_v0 }
 0x12b   :  { %v16481_v44 = vadd.f32 %v472_v40, %v16330_v7  ;;  %v11568_v45 = vpop.f32.mrb[27].mxu0  ;;  %12028 = vmatmul.mubr.f32.gmra.mrb[132].mxu0 %v15962_v9  ;;  %12087 = vmatmul.mubr.f32.gmra.mrb[132].mxu1 %v16469_v31  ;;  %v11651_v46 = vpop.f32.mrb[27].mxu1  ;;  %v2509_v7 = vld [vmem:[%s22136_s1 + $0x410] sm:$0xff]  ;;  %v2510_v9 = vld [vmem:[%s22136_s1 + $0x418] sm:$0xff] }
 0x12c   :  { %12089 = vmatprep.mubr.msk.f32.mxu1 %vm15438_vm0, %v22146_v6  ;;  %12169 = vmatprep.mubr.msk.f32.mxu0 %vm15438_vm0, %v22146_v6  ;;  %v14790_v42 = vpack.c.bf16 %v2510_v9, %v2509_v7  ;;  %v16569_v46 = vld [vmem:[#allocation2 + $0x79] sm:$0xff] }
 0x12e   :  { %v16491_v54 = vpop.f32.mrb[28].mxu0  ;;  %v477_v55 = vpop.f32.mrb[28].mxu1 }
 0x12f   :  { %v16500_v57 = vadd.f32 %v477_v55, %v16346_v17  ;;  %v11571_v58 = vpop.f32.mrb[29].mxu0  ;;  %12090 = vmatmul.mubr.f32.gmra.mrb[134].mxu1 %v16489_v50  ;;  %12170 = vmatmul.mubr.f32.vlgmr.msra.gmra.mrb[134].mxu0 %v16344_v15  ;;  %v11654_v62 = vpop.f32.mrb[29].mxu1  ;;  %v2511_v15 = vld [vmem:[%s22136_s1 + $0x420] sm:$0xff] }
 0x130   :  { %14788 = vmatpush3.bf16.msra.mxu0 %v14787_v37  ;;  %12092 = vmatprep.mubr.msk.f32.mxu1 %vm15438_vm0, %v22146_v6  ;;  %v14793_v47 = vpack.c.bf16 %v2512_v3, %v2511_v15 }
 0x131   :  { %12172 = vmatprep.mubr.msk.f32.mxu0 %vm15438_vm0, %v22146_v6  ;;  %14789 = vmatprep.subr.bf16.mxu0 %v22144_v0 }
 0x132   :  { %v16511_v17 = vpop.f32.mrb[30].mxu0  ;;  %v482_v2 = vpop.f32.mrb[30].mxu1 }
 0x133   :  { %v16520_v5 = vadd.f32 %v482_v2, %v16364_v26  ;;  %v11574_v10 = vpop.f32.mrb[31].mxu0  ;;  %12093 = vmatmul.mubr.f32.gmra.mrb[136].mxu1 %v16506_v63  ;;  %12173 = vmatmul.mubr.f32.gmra.mrb[136].mxu0 %v16362_v24  ;;  %v11657_v11 = vpop.f32.mrb[31].mxu1  ;;  %v2513_v24 = vld [vmem:[%s22136_s1 + $0x430] sm:$0xff] }
 0x134   :  { %12095 = vmatprep.mubr.msk.f32.mxu1 %vm15438_vm0, %v22146_v6  ;;  %12175 = vmatprep.mubr.msk.f32.mxu0 %vm15438_vm0, %v22146_v6  ;;  %v14796_v52 = vpack.c.bf16 %v2514_v19, %v2513_v24 }
 0x135   :  { %14791 = vmatpush3.bf16.msra.mxu0 %v14790_v42  ;;  %v16590_v42 = vld [vmem:[#allocation2 + $0x81] sm:$0xff] }
 0x136   :  { %v16530_v16 = vpop.f32.mrb[32].mxu0  ;;  %v487_v26 = vpop.f32.mrb[32].mxu1  ;;  %14792 = vmatprep.subr.bf16.mxu0 %v22144_v0 }
 0x137   :  { %v16540_v21 = vadd.f32 %v487_v26, %v16382_v35  ;;  %v11577_v22 = vpop.f32.mrb[33].mxu0  ;;  %12096 = vmatmul.mubr.f32.gmra.mrb[138].mxu1 %v16528_v13  ;;  %12176 = vmatmul.mubr.f32.gmra.mrb[138].mxu0 %v16380_v34  ;;  %v11660_v23 = vpop.f32.mrb[33].mxu1  ;;  %v2515_v35 = vld [vmem:[%s22136_s1 + $0x440] sm:$0xff]  ;;  %v2516_v34 = vld [vmem:[%s22136_s1 + $0x448] sm:$0xff] }
 0x138   :  { %12098 = vmatprep.mubr.msk.f32.mxu1 %vm15438_vm0, %v22146_v6  ;;  %12178 = vmatprep.mubr.msk.f32.mxu0 %vm15438_vm0, %v22146_v6  ;;  %v16611_v26 = vld [vmem:[#allocation2 + $0x89] sm:$0xff] }
 0x139   :  { %14794 = vmatpush3.bf16.msra.mxu0 %v14793_v47 }
 0x13a   :  { %v492_v32 = vpop.f32.mrb[34].mxu1  ;;  %v753_v33 = vpop.f32.mrb[34].mxu0  ;;  %14795 = vmatprep.subr.bf16.mxu0 %v22144_v0 }
 0x13b   :  { %v16558_v36 = vadd.f32 %v492_v32, %v16401_v51  ;;  %v16561_v59 = vadd.f32 %v753_v33, %v16392_v41  ;;  %v11743_v40 = vpop.f32.mrb[35].mxu0  ;;  %12099 = vmatmul.mubr.f32.gmra.mrb[140].mxu1 %v16548_v29  ;;  %12179 = vmatmul.mubr.f32.gmra.mrb[140].mxu0 %v16399_v49  ;;  %v11663_v45 = vpop.f32.mrb[35].mxu1  ;;  %v14799_v51 = vpack.c.bf16 %v2516_v34, %v2515_v35  ;;  %v2517_v41 = vld [vmem:[%s22136_s1 + $0x450] sm:$0xff]  ;;  %v2518_v49 = vld [vmem:[%s22136_s1 + $0x458] sm:$0xff] }
 0x13c   :  { %12101 = vmatprep.mubr.msk.f32.mxu1 %vm15438_vm0, %v22146_v6  ;;  %12181 = vmatprep.mubr.msk.f32.mxu0 %vm15438_vm0, %v22146_v6  ;;  %v16632_v33 = vld [vmem:[#allocation2 + $0x91] sm:$0xff] }
 0x13d   :  { %14797 = vmatpush3.bf16.msra.mxu0 %v14796_v52 }
 0x13e   :  { %v497_v37 = vpop.f32.mrb[36].mxu1  ;;  %v758_v55 = vpop.f32.mrb[36].mxu0  ;;  %14798 = vmatprep.subr.bf16.mxu0 %v22144_v0 }
 0x13f   :  { %v16579_v7 = vadd.f32 %v497_v37, %v16420_v1  ;;  %v16582_v9 = vadd.f32 %v758_v55, %v16411_v56  ;;  %v11746_v58 = vpop.f32.mrb[37].mxu0  ;;  %12102 = vmatmul.mubr.f32.gmra.mrb[142].mxu1 %v16569_v46  ;;  %12182 = vmatmul.mubr.f32.gmra.mrb[142].mxu0 %v16418_v61  ;;  %v11666_v62 = vpop.f32.mrb[37].mxu1  ;;  %v14802_v1 = vpack.c.bf16 %v2518_v49, %v2517_v41  ;;  %v2519_v56 = vld [vmem:[%s22136_s1 + $0x460] sm:$0xff]  ;;  %v2520_v61 = vld [vmem:[%s22136_s1 + $0x468] sm:$0xff] }
 0x140   :  { %12104 = vmatprep.mubr.msk.f32.mxu1 %vm15438_vm0, %v22146_v6  ;;  %12184 = vmatprep.mubr.msk.f32.mxu0 %vm15438_vm0, %v22146_v6  ;;  %v16662_v49 = vld [vmem:[#allocation2 + $0xa1] sm:$0xff] }
 0x141   :  { %14800 = vmatpush3.bf16.msra.mxu0 %v14799_v51  ;;  %v16647_v51 = vld [vmem:[#allocation2 + $0x99] sm:$0xff] }
 0x142   :  { %v502_v2 = vpop.f32.mrb[38].mxu1  ;;  %v763_v15 = vpop.f32.mrb[38].mxu0  ;;  %14801 = vmatprep.subr.bf16.mxu0 %v22144_v0 }
 0x143   :  { %v16600_v3 = vadd.f32 %v502_v2, %v16439_v14  ;;  %v16603_v10 = vadd.f32 %v763_v15, %v16430_v4  ;;  %v11749_v11 = vpop.f32.mrb[39].mxu0  ;;  %12105 = vmatmul.mubr.f32.gmra.mrb[144].mxu1 %v16590_v42  ;;  %12185 = vmatmul.mubr.f32.gmra.mrb[144].mxu0 %v16437_v12  ;;  %v11669_v47 = vpop.f32.mrb[39].mxu1  ;;  %v14805_v14 = vpack.c.bf16 %v2520_v61, %v2519_v56  ;;  %v2521_v4 = vld [vmem:[%s22136_s1 + $0x470] sm:$0xff]  ;;  %v2522_v12 = vld [vmem:[%s22136_s1 + $0x478] sm:$0xff] }
 0x144   :  { %12107 = vmatprep.mubr.msk.f32.mxu1 %vm15438_vm0, %v22146_v6  ;;  %12187 = vmatprep.mubr.msk.f32.mxu0 %vm15438_vm0, %v22146_v6  ;;  %v16676_v2 = vld [vmem:[#allocation2 + $0xa9] sm:$0xff]  ;;  %v16690_v11 = vld [vmem:[#allocation2 + $0xb1] sm:$0xff] }
 0x145   :  { %14803 = vmatpush3.bf16.msra.mxu0 %v14802_v1 }
 0x146   :  { %v507_v24 = vpop.f32.mrb[40].mxu1  ;;  %v768_v19 = vpop.f32.mrb[40].mxu0  ;;  %14804 = vmatprep.subr.bf16.mxu0 %v22144_v0 }
 0x147   :  { %v16621_v22 = vadd.f32 %v507_v24, %v16458_v28  ;;  %v16624_v23 = vadd.f32 %v768_v19, %v16449_v20  ;;  %v11752_v52 = vpop.f32.mrb[41].mxu0  ;;  %12108 = vmatmul.mubr.f32.gmra.mrb[146].mxu1 %v16611_v26  ;;  %12188 = vmatmul.mubr.f32.gmra.mrb[146].mxu0 %v16456_v25  ;;  %v11672_v32 = vpop.f32.mrb[41].mxu1  ;;  %v14808_v28 = vpack.c.bf16 %v2522_v12, %v2521_v4  ;;  %v16704_v19 = vld [vmem:[#allocation2 + $0xb9] sm:$0xff] }
 0x148   :  { %12110 = vmatprep.mubr.msk.f32.mxu1 %vm15438_vm0, %v22146_v6  ;;  %12190 = vmatprep.mubr.msk.f32.mxu0 %vm15438_vm0, %v22146_v6  ;;  %v16718_v32 = vld [vmem:[#allocation2 + $0xc1] sm:$0xff] }
 0x149   :  { %14806 = vmatpush3.bf16.msra.mxu0 %v14805_v14 }
 0x14a   :  { %v512_v35 = vpop.f32.mrb[42].mxu1  ;;  %v773_v34 = vpop.f32.mrb[42].mxu0  ;;  %14807 = vmatprep.subr.bf16.mxu0 %v22144_v0 }
 0x14b   :  { %v16636_v20 = vadd.f32 %v512_v35, %v16477_v39  ;;  %v16639_v25 = vadd.f32 %v773_v34, %v16462_v30  ;;  %v11755_v40 = vpop.f32.mrb[43].mxu0  ;;  %12111 = vmatmul.mubr.f32.gmra.mrb[148].mxu1 %v16632_v33  ;;  %12191 = vmatmul.mubr.f32.gmra.mrb[148].mxu0 %v16469_v31  ;;  %v11675_v45 = vpop.f32.mrb[43].mxu1 }
 0x14c   :  { %12113 = vmatprep.mubr.msk.f32.mxu1 %vm15438_vm0, %v22146_v6  ;;  %12193 = vmatprep.mubr.msk.f32.mxu0 %vm15438_vm0, %v22146_v6  ;;  %v16732_v40 = vld [vmem:[#allocation2 + $0xc9] sm:$0xff] }
 0x14d   :  { %14809 = vmatpush3.bf16.msra.mxu0 %v14808_v28 }
 0x14e   :  { %v517_v39 = vpop.f32.mrb[44].mxu1  ;;  %v778_v37 = vpop.f32.mrb[44].mxu0  ;;  %14882 = vmatprep.subr.bf16.mxu0 %v22144_v0 }
 0x14f   :  { %v16651_v30 = vadd.f32 %v517_v39, %v16491_v54  ;;  %v16654_v55 = vadd.f32 %v778_v37, %v16481_v44  ;;  %v11758_v31 = vpop.f32.mrb[45].mxu0  ;;  %12114 = vmatmul.mubr.f32.gmra.mrb[150].mxu1 %v16647_v51  ;;  %12194 = vmatmul.mubr.f32.gmra.mrb[150].mxu0 %v16489_v50  ;;  %v11678_v41 = vpop.f32.mrb[45].mxu1 }
 0x150   :  { %12116 = vmatprep.mubr.msk.f32.mxu1 %vm15438_vm0, %v22146_v6  ;;  %12196 = vmatprep.mubr.msk.f32.mxu0 %vm15438_vm0, %v22146_v6  ;;  %v16746_v31 = vld [vmem:[#allocation2 + $0xd1] sm:$0xff] }
 0x152   :  { %v522_v58 = vpop.f32.mrb[46].mxu1  ;;  %v783_v54 = vpop.f32.mrb[46].mxu0 }
 0x153   :  { %v16665_v62 = vadd.f32 %v522_v58, %v16511_v17  ;;  %v16668_v44 = vadd.f32 %v783_v54, %v16500_v57  ;;  %v11761_v1 = vpop.f32.mrb[47].mxu0  ;;  %12117 = vmatmul.mubr.f32.gmra.mrb[152].mxu1 %v16662_v49  ;;  %12197 = vmatmul.mubr.f32.gmra.mrb[152].mxu0 %v16506_v63  ;;  %v11681_v50 = vpop.f32.mrb[47].mxu1 }
 0x154   :  { %12119 = vmatprep.mubr.msk.f32.mxu1 %vm15438_vm0, %v22146_v6  ;;  %12199 = vmatprep.mubr.msk.f32.mxu0 %vm15438_vm0, %v22146_v6  ;;  %v2176_v1 = vld [vmem:[#allocation2 + $0x1a] sm:$0xff] }
 0x156   :  { %v527_v15 = vpop.f32.mrb[48].mxu1  ;;  %v788_v17 = vpop.f32.mrb[48].mxu0 }
 0x157   :  { %v16679_v56 = vadd.f32 %v527_v15, %v16530_v16  ;;  %v16682_v57 = vadd.f32 %v788_v17, %v16520_v5  ;;  %v11764_v61 = vpop.f32.mrb[49].mxu0  ;;  %12120 = vmatmul.mubr.f32.gmra.mrb[154].mxu1 %v16676_v2  ;;  %12200 = vmatmul.mubr.f32.gmra.mrb[154].mxu0 %v16528_v13  ;;  %v11684_v63 = vpop.f32.mrb[49].mxu1 }
 0x158   :  { %12122 = vmatprep.mubr.msk.f32.mxu1 %vm15438_vm0, %v22146_v6  ;;  %12202 = vmatprep.mubr.msk.f32.mxu0 %vm15438_vm0, %v22146_v6  ;;  %v2177_v61 = vld [vmem:[#allocation2 + $0x22] sm:$0xff] }
 0x15a   :  { %v532_v47 = vpop.f32.mrb[50].mxu1  ;;  %v793_v16 = vpop.f32.mrb[50].mxu0 }
 0x15b   :  { %v16693_v14 = vadd.f32 %v532_v47, %v16279_v38  ;;  %v16696_v5 = vadd.f32 %v793_v16, %v16540_v21  ;;  %v11767_v24 = vpop.f32.mrb[51].mxu0  ;;  %12123 = vmatmul.mubr.f32.gmra.mrb[156].mxu1 %v16690_v11  ;;  %12203 = vmatmul.mubr.f32.gmra.mrb[156].mxu0 %v16548_v29  ;;  %v11687_v13 = vpop.f32.mrb[51].mxu1 }
 0x15c   :  { %12125 = vmatprep.mubr.msk.f32.mxu1 %vm15438_vm0, %v22146_v6  ;;  %12205 = vmatprep.mubr.msk.f32.mxu0 %vm15438_vm0, %v22146_v6  ;;  %v2178_v24 = vld [vmem:[#allocation2 + $0x2a] sm:$0xff] }
 0x15e   :  { %v537_v4 = vpop.f32.mrb[52].mxu1  ;;  %v798_v38 = vpop.f32.mrb[52].mxu0 }
 0x15f   :  { %v16707_v12 = vadd.f32 %v537_v4, %v16288_v43  ;;  %v16710_v21 = vadd.f32 %v798_v38, %v16558_v36  ;;  %v11770_v52 = vpop.f32.mrb[53].mxu0  ;;  %12126 = vmatmul.mubr.f32.gmra.mrb[158].mxu1 %v16704_v19  ;;  %12206 = vmatmul.mubr.f32.gmra.mrb[158].mxu0 %v16569_v46  ;;  %v11690_v29 = vpop.f32.mrb[53].mxu1 }
 0x160   :  { %12128 = vmatprep.mubr.msk.f32.mxu1 %vm15438_vm0, %v22146_v6  ;;  %12208 = vmatprep.mubr.msk.f32.mxu0 %vm15438_vm0, %v22146_v6  ;;  %v2179_v52 = vld [vmem:[#allocation2 + $0x32] sm:$0xff] }
 0x162   :  { %v542_v28 = vpop.f32.mrb[54].mxu1  ;;  %v803_v43 = vpop.f32.mrb[54].mxu0 }
 0x163   :  { %v16721_v35 = vadd.f32 %v542_v28, %v16297_v48  ;;  %v16724_v36 = vadd.f32 %v803_v43, %v16579_v7  ;;  %v11773_v34 = vpop.f32.mrb[55].mxu0  ;;  %12129 = vmatmul.mubr.f32.gmra.mrb[160].mxu1 %v16718_v32  ;;  %12209 = vmatmul.mubr.f32.gmra.mrb[160].mxu0 %v16590_v42  ;;  %v11693_v46 = vpop.f32.mrb[55].mxu1 }
 0x164   :  { %12131 = vmatprep.mubr.msk.f32.mxu1 %vm15438_vm0, %v22146_v6  ;;  %12211 = vmatprep.mubr.msk.f32.mxu0 %vm15438_vm0, %v22146_v6  ;;  %v2180_v34 = vld [vmem:[#allocation2 + $0x3a] sm:$0xff] }
 0x166   :  { %v547_v45 = vpop.f32.mrb[56].mxu1  ;;  %v808_v48 = vpop.f32.mrb[56].mxu0 }
 0x167   :  { %v16735_v39 = vadd.f32 %v547_v45, %v16306_v53  ;;  %v16738_v7 = vadd.f32 %v808_v48, %v16600_v3  ;;  %v11776_v37 = vpop.f32.mrb[57].mxu0  ;;  %12132 = vmatmul.mubr.f32.gmra.mrb[162].mxu1 %v16732_v40  ;;  %12212 = vmatmul.mubr.f32.gmra.mrb[162].mxu0 %v16611_v26  ;;  %v11696_v42 = vpop.f32.mrb[57].mxu1 }
 0x168   :  { %12134 = vmatprep.mubr.msk.f32.mxu1 %vm15438_vm0, %v22146_v6  ;;  %12214 = vmatprep.mubr.msk.f32.mxu0 %vm15438_vm0, %v22146_v6  ;;  %v2181_v37 = vld [vmem:[#allocation2 + $0x42] sm:$0xff] }
 0x16a   :  { %v552_v41 = vpop.f32.mrb[58].mxu1  ;;  %v813_v53 = vpop.f32.mrb[58].mxu0 }
 0x16b   :  { %v16749_v58 = vadd.f32 %v552_v41, %v16315_v60  ;;  %v16752_v3 = vadd.f32 %v813_v53, %v16621_v22  ;;  %v11779_v54 = vpop.f32.mrb[59].mxu0  ;;  %12135 = vmatmul.mubr.f32.gmra.mrb[164].mxu1 %v16746_v31  ;;  %12215 = vmatmul.mubr.f32.gmra.mrb[164].mxu0 %v16632_v33  ;;  %v11699_v26 = vpop.f32.mrb[59].mxu1 }
 0x16c   :  { %12217 = vmatprep.mubr.msk.f32.mxu0 %vm15438_vm0, %v22146_v6  ;;  %12276 = vmatprep.mubr.msk.f32.mxu1 %vm15438_vm0, %v22146_v6  ;;  %v2182_v54 = vld [vmem:[#allocation2 + $0x4a] sm:$0xff] }
 0x16e   :  { %v557_v50 = vpop.f32.mrb[60].mxu1  ;;  %v818_v15 = vpop.f32.mrb[60].mxu0 }
 0x16f   :  { %v16761_v60 = vadd.f32 %v557_v50, %v16332_v8  ;;  %v16764_v22 = vadd.f32 %v818_v15, %v16636_v20  ;;  %v11782_v17 = vpop.f32.mrb[61].mxu0  ;;  %12218 = vmatmul.mubr.f32.gmra.mrb[166].mxu0 %v16647_v51  ;;  %12277 = vmatmul.mubr.f32.vlgmr.msra.gmra.mrb[166].mxu1 %v2176_v1  ;;  %v11702_v33 = vpop.f32.mrb[61].mxu1  ;;  %v2183_v15 = vld [vmem:[#allocation2 + $0x52] sm:$0xff] }
 0x170   :  { %12220 = vmatprep.mubr.msk.f32.mxu0 %vm15438_vm0, %v22146_v6  ;;  %12279 = vmatprep.mubr.msk.f32.mxu1 %vm15438_vm0, %v22146_v6 }
 0x172   :  { %v562_v63 = vpop.f32.mrb[62].mxu1  ;;  %v823_v47 = vpop.f32.mrb[62].mxu0 }
 0x173   :  { %v16772_v8 = vadd.f32 %v562_v63, %v16348_v18  ;;  %v16775_v20 = vadd.f32 %v823_v47, %v16651_v30  ;;  %v11785_v16 = vpop.f32.mrb[63].mxu0  ;;  %12221 = vmatmul.mubr.f32.gmra.mrb[168].mxu0 %v16662_v49  ;;  %12280 = vmatmul.mubr.f32.gmra.mrb[168].mxu1 %v2177_v61  ;;  %v11705_v51 = vpop.f32.mrb[63].mxu1  ;;  %v1894_v63 = vld [vmem:[#allocation2 + $0xd9] sm:$0xff] }
 0x174   :  { %12223 = vmatprep.mubr.msk.f32.mxu0 %vm15438_vm0, %v22146_v6  ;;  %12282 = vmatprep.mubr.msk.f32.mxu1 %vm15438_vm0, %v22146_v6  ;;  %v2184_v47 = vld [vmem:[#allocation2 + $0x5a] sm:$0xff] }
 0x176   :  { %v567_v13 = vpop.f32.mrb[64].mxu1  ;;  %v828_v4 = vpop.f32.mrb[64].mxu0 }
 0x177   :  { %v16783_v18 = vadd.f32 %v567_v13, %v16366_v27  ;;  %v16786_v30 = vadd.f32 %v828_v4, %v16665_v62  ;;  %v11788_v38 = vpop.f32.mrb[65].mxu0  ;;  %12224 = vmatmul.mubr.f32.gmra.mrb[170].mxu0 %v16676_v2  ;;  %12283 = vmatmul.mubr.f32.gmra.mrb[170].mxu1 %v2178_v24  ;;  %v11708_v49 = vpop.f32.mrb[65].mxu1  ;;  %v2185_v13 = vld [vmem:[#allocation2 + $0x62] sm:$0xff] }
 0x178   :  { %12226 = vmatprep.mubr.msk.f32.mxu0 %vm15438_vm0, %v22146_v6  ;;  %12285 = vmatprep.mubr.msk.f32.mxu1 %vm15438_vm0, %v22146_v6  ;;  %v2482_v4 = vld [vmem:[#allocation2 + $0x1b] sm:$0xff] }
 0x17a   :  { %v833_v29 = vpop.f32.mrb[66].mxu0  ;;  %v1059_v28 = vpop.f32.mrb[66].mxu1 }
 0x17b   :  { %v16794_v27 = vadd.f32 %v833_v29, %v16679_v56  ;;  %v16797_v62 = vadd.f32 %v1059_v28, %v16561_v59  ;;  %v11791_v43 = vpop.f32.mrb[67].mxu0  ;;  %12227 = vmatmul.mubr.f32.gmra.mrb[172].mxu0 %v16690_v11  ;;  %12286 = vmatmul.mubr.f32.gmra.mrb[172].mxu1 %v2179_v52  ;;  %v11850_v2 = vpop.f32.mrb[67].mxu1  ;;  %v2186_v28 = vld [vmem:[#allocation2 + $0x6a] sm:$0xff] }
 0x17c   :  { %12229 = vmatprep.mubr.msk.f32.mxu0 %vm15438_vm0, %v22146_v6  ;;  %12288 = vmatprep.mubr.msk.f32.mxu1 %vm15438_vm0, %v22146_v6  ;;  %v2483_v43 = vld [vmem:[#allocation2 + $0x23] sm:$0xff] }
 0x17e   :  { %v838_v46 = vpop.f32.mrb[68].mxu0  ;;  %v1064_v45 = vpop.f32.mrb[68].mxu1 }
 0x17f   :  { %v16805_v56 = vadd.f32 %v838_v46, %v16693_v14  ;;  %v16808_v59 = vadd.f32 %v1064_v45, %v16582_v9  ;;  %v11794_v48 = vpop.f32.mrb[69].mxu0  ;;  %12230 = vmatmul.mubr.f32.gmra.mrb[174].mxu0 %v16704_v19  ;;  %12289 = vmatmul.mubr.f32.gmra.mrb[174].mxu1 %v2180_v34  ;;  %v11853_v11 = vpop.f32.mrb[69].mxu1 }
 0x180   :  { %12232 = vmatprep.mubr.msk.f32.mxu0 %vm15438_vm0, %v22146_v6  ;;  %12291 = vmatprep.mubr.msk.f32.mxu1 %vm15438_vm0, %v22146_v6  ;;  %v2187_v48 = vld [vmem:[#allocation2 + $0x72] sm:$0xff] }
 0x181   :  { %v2484_v11 = vld [vmem:[#allocation2 + $0x2b] sm:$0xff] }
 0x182   :  { %v843_v42 = vpop.f32.mrb[70].mxu0  ;;  %v1069_v41 = vpop.f32.mrb[70].mxu1 }
 0x183   :  { %v16816_v14 = vadd.f32 %v843_v42, %v16707_v12  ;;  %v16819_v9 = vadd.f32 %v1069_v41, %v16603_v10  ;;  %v11797_v53 = vpop.f32.mrb[71].mxu0  ;;  %12233 = vmatmul.mubr.f32.gmra.mrb[176].mxu0 %v16718_v32  ;;  %12292 = vmatmul.mubr.f32.gmra.mrb[176].mxu1 %v2181_v37  ;;  %v11856_v19 = vpop.f32.mrb[71].mxu1 }
 0x184   :  { %12235 = vmatprep.mubr.msk.f32.mxu0 %vm15438_vm0, %v22146_v6  ;;  %12294 = vmatprep.mubr.msk.f32.mxu1 %vm15438_vm0, %v22146_v6  ;;  %v2188_v19 = vld [vmem:[#allocation2 + $0x7a] sm:$0xff] }
 0x186   :  { %v848_v26 = vpop.f32.mrb[72].mxu0  ;;  %v1074_v1 = vpop.f32.mrb[72].mxu1 }
 0x187   :  { %v16827_v12 = vadd.f32 %v848_v26, %v16721_v35  ;;  %v16830_v10 = vadd.f32 %v1074_v1, %v16624_v23  ;;  %v11800_v50 = vpop.f32.mrb[73].mxu0  ;;  %12236 = vmatmul.mubr.f32.gmra.mrb[178].mxu0 %v16732_v40  ;;  %12295 = vmatmul.mubr.f32.gmra.mrb[178].mxu1 %v2182_v54  ;;  %v11859_v32 = vpop.f32.mrb[73].mxu1  ;;  %v2485_v54 = vld [vmem:[#allocation2 + $0x33] sm:$0xff] }
 0x188   :  { %12238 = vmatprep.mubr.msk.f32.mxu0 %vm15438_vm0, %v22146_v6  ;;  %12297 = vmatprep.mubr.msk.f32.mxu1 %vm15438_vm0, %v22146_v6 }
 0x18a   :  { %v853_v17 = vpop.f32.mrb[74].mxu0  ;;  %v1079_v33 = vpop.f32.mrb[74].mxu1 }
 0x18b   :  { %v16838_v35 = vadd.f32 %v853_v17, %v16735_v39  ;;  %v16841_v23 = vadd.f32 %v1079_v33, %v16639_v25  ;;  %v11803_v61 = vpop.f32.mrb[75].mxu0  ;;  %12239 = vmatmul.mubr.f32.gmra.mrb[180].mxu0 %v16746_v31  ;;  %12298 = vmatmul.mubr.f32.gmra.mrb[180].mxu1 %v2183_v15  ;;  %v11862_v40 = vpop.f32.mrb[75].mxu1  ;;  %v2189_v15 = vld [vmem:[#allocation2 + $0x82] sm:$0xff] }
 0x18c   :  { %12241 = vmatprep.mubr.msk.f32.mxu0 %vm15438_vm0, %v22146_v6  ;;  %12300 = vmatprep.mubr.msk.f32.mxu1 %vm15438_vm0, %v22146_v6  ;;  %v2486_v17 = vld [vmem:[#allocation2 + $0x3b] sm:$0xff] }
 0x18e   :  { %v858_v16 = vpop.f32.mrb[76].mxu0  ;;  %v1084_v51 = vpop.f32.mrb[76].mxu1 }
 0x18f   :  { %v16849_v39 = vadd.f32 %v858_v16, %v16749_v58  ;;  %v16852_v25 = vadd.f32 %v1084_v51, %v16654_v55  ;;  %v11806_v24 = vpop.f32.mrb[77].mxu0  ;;  %12242 = vmatmul.mubr.f32.gmra.mrb[182].mxu0 %v1894_v63  ;;  %12301 = vmatmul.mubr.f32.gmra.mrb[182].mxu1 %v2184_v47  ;;  %v11865_v31 = vpop.f32.mrb[77].mxu1  ;;  %v2190_v47 = vld [vmem:[#allocation2 + $0x8a] sm:$0xff] }
 0x190   :  { %12303 = vmatprep.mubr.msk.f32.mxu1 %vm15438_vm0, %v22146_v6  ;;  %12383 = vmatprep.mubr.msk.f32.mxu0 %vm15438_vm0, %v22146_v6  ;;  %v2487_v16 = vld [vmem:[#allocation2 + $0x43] sm:$0xff] }
 0x192   :  { %v863_v38 = vpop.f32.mrb[78].mxu0  ;;  %v1089_v49 = vpop.f32.mrb[78].mxu1 }
 0x193   :  { %v16859_v58 = vadd.f32 %v863_v38, %v16761_v60  ;;  %v16862_v55 = vadd.f32 %v1089_v49, %v16668_v44  ;;  %v11809_v52 = vpop.f32.mrb[79].mxu0  ;;  %12304 = vmatmul.mubr.f32.gmra.mrb[184].mxu1 %v2185_v13  ;;  %12384 = vmatmul.mubr.f32.vlgmr.msra.gmra.mrb[184].mxu0 %v2482_v4  ;;  %v11868_v29 = vpop.f32.mrb[79].mxu1  ;;  %v2191_v4 = vld [vmem:[#allocation2 + $0x92] sm:$0xff] }
 0x194   :  { %12306 = vmatprep.mubr.msk.f32.mxu1 %vm15438_vm0, %v22146_v6  ;;  %12386 = vmatprep.mubr.msk.f32.mxu0 %vm15438_vm0, %v22146_v6  ;;  %v2488_v38 = vld [vmem:[#allocation2 + $0x4b] sm:$0xff] }
 0x196   :  { %v868_v2 = vpop.f32.mrb[80].mxu0  ;;  %v1094_v34 = vpop.f32.mrb[80].mxu1 }
 0x197   :  { %v16869_v60 = vadd.f32 %v868_v2, %v16772_v8  ;;  %v16872_v44 = vadd.f32 %v1094_v34, %v16682_v57  ;;  %v11812_v46 = vpop.f32.mrb[81].mxu0  ;;  %12307 = vmatmul.mubr.f32.gmra.mrb[186].mxu1 %v2186_v28  ;;  %12387 = vmatmul.mubr.f32.gmra.mrb[186].mxu0 %v2483_v43  ;;  %v11871_v45 = vpop.f32.mrb[81].mxu1  ;;  %v2192_v43 = vld [vmem:[#allocation2 + $0x9a] sm:$0xff] }
 0x198   :  { %12309 = vmatprep.mubr.msk.f32.mxu1 %vm15438_vm0, %v22146_v6  ;;  %12389 = vmatprep.mubr.msk.f32.mxu0 %vm15438_vm0, %v22146_v6  ;;  %v2489_v2 = vld [vmem:[#allocation2 + $0x53] sm:$0xff] }
 0x19a   :  { %v873_v37 = vpop.f32.mrb[82].mxu0  ;;  %v1099_v42 = vpop.f32.mrb[82].mxu1 }
 0x19b   :  { %v16879_v8 = vadd.f32 %v873_v37, %v16783_v18  ;;  %v16882_v57 = vadd.f32 %v1099_v42, %v16696_v5  ;;  %v11815_v41 = vpop.f32.mrb[83].mxu0  ;;  %12310 = vmatmul.mubr.f32.gmra.mrb[188].mxu1 %v2187_v48  ;;  %12390 = vmatmul.mubr.f32.gmra.mrb[188].mxu0 %v2484_v11  ;;  %v11874_v53 = vpop.f32.mrb[83].mxu1  ;;  %v2193_v11 = vld [vmem:[#allocation2 + $0xa2] sm:$0xff] }
 0x19c   :  { %12312 = vmatprep.mubr.msk.f32.mxu1 %vm15438_vm0, %v22146_v6  ;;  %12392 = vmatprep.mubr.msk.f32.mxu0 %vm15438_vm0, %v22146_v6  ;;  %v2490_v37 = vld [vmem:[#allocation2 + $0x5b] sm:$0xff] }
 0x19e   :  { %v1104_v26 = vpop.f32.mrb[84].mxu1  ;;  %v1365_v1 = vpop.f32.mrb[84].mxu0 }
 0x19f   :  { %v16889_v18 = vadd.f32 %v1104_v26, %v16710_v21  ;;  %v16892_v5 = vadd.f32 %v1365_v1, %v16797_v62  ;;  %v11957_v50 = vpop.f32.mrb[85].mxu0  ;;  %12313 = vmatmul.mubr.f32.gmra.mrb[190].mxu1 %v2188_v19  ;;  %12393 = vmatmul.mubr.f32.gmra.mrb[190].mxu0 %v2485_v54  ;;  %v11877_v32 = vpop.f32.mrb[85].mxu1  ;;  %v2194_v54 = vld [vmem:[#allocation2 + $0xaa] sm:$0xff] }
 0x1a0   :  { %12315 = vmatprep.mubr.msk.f32.mxu1 %vm15438_vm0, %v22146_v6  ;;  %12395 = vmatprep.mubr.msk.f32.mxu0 %vm15438_vm0, %v22146_v6  ;;  %v2491_v26 = vld [vmem:[#allocation2 + $0x63] sm:$0xff] }
 0x1a2   :  { %v1109_v33 = vpop.f32.mrb[86].mxu1  ;;  %v1370_v61 = vpop.f32.mrb[86].mxu0 }
 0x1a3   :  { %v16899_v21 = vadd.f32 %v1109_v33, %v16724_v36  ;;  %v16902_v62 = vadd.f32 %v1370_v61, %v16808_v59  ;;  %v11960_v40 = vpop.f32.mrb[87].mxu0  ;;  %12316 = vmatmul.mubr.f32.gmra.mrb[192].mxu1 %v2189_v15  ;;  %12396 = vmatmul.mubr.f32.gmra.mrb[192].mxu0 %v2486_v17  ;;  %v11880_v63 = vpop.f32.mrb[87].mxu1  ;;  %v2195_v17 = vld [vmem:[#allocation2 + $0xb2] sm:$0xff] }
 0x1a4   :  { %12318 = vmatprep.mubr.msk.f32.mxu1 %vm15438_vm0, %v22146_v6  ;;  %12398 = vmatprep.mubr.msk.f32.mxu0 %vm15438_vm0, %v22146_v6  ;;  %v2492_v33 = vld [vmem:[#allocation2 + $0x6b] sm:$0xff] }
 0x1a6   :  { %v1114_v51 = vpop.f32.mrb[88].mxu1  ;;  %v1375_v24 = vpop.f32.mrb[88].mxu0 }
 0x1a7   :  { %v16909_v36 = vadd.f32 %v1114_v51, %v16738_v7  ;;  %v16912_v59 = vadd.f32 %v1375_v24, %v16819_v9  ;;  %v11963_v31 = vpop.f32.mrb[89].mxu0  ;;  %12319 = vmatmul.mubr.f32.gmra.mrb[194].mxu1 %v2190_v47  ;;  %12399 = vmatmul.mubr.f32.gmra.mrb[194].mxu0 %v2487_v16  ;;  %v11883_v13 = vpop.f32.mrb[89].mxu1  ;;  %v2196_v16 = vld [vmem:[#allocation2 + $0xba] sm:$0xff] }
 0x1a8   :  { %12321 = vmatprep.mubr.msk.f32.mxu1 %vm15438_vm0, %v22146_v6  ;;  %12401 = vmatprep.mubr.msk.f32.mxu0 %vm15438_vm0, %v22146_v6  ;;  %v2493_v51 = vld [vmem:[#allocation2 + $0x73] sm:$0xff] }
 0x1aa   :  { %v1119_v49 = vpop.f32.mrb[90].mxu1  ;;  %v1380_v52 = vpop.f32.mrb[90].mxu0 }
 0x1ab   :  { %v16919_v7 = vadd.f32 %v1119_v49, %v16752_v3  ;;  %v16922_v9 = vadd.f32 %v1380_v52, %v16830_v10  ;;  %v11966_v29 = vpop.f32.mrb[91].mxu0  ;;  %12322 = vmatmul.mubr.f32.gmra.mrb[196].mxu1 %v2191_v4  ;;  %12402 = vmatmul.mubr.f32.gmra.mrb[196].mxu0 %v2488_v38  ;;  %v11886_v28 = vpop.f32.mrb[91].mxu1  ;;  %v2197_v38 = vld [vmem:[#allocation2 + $0xc2] sm:$0xff] }
 0x1ac   :  { %12324 = vmatprep.mubr.msk.f32.mxu1 %vm15438_vm0, %v22146_v6  ;;  %12404 = vmatprep.mubr.msk.f32.mxu0 %vm15438_vm0, %v22146_v6  ;;  %v2494_v49 = vld [vmem:[#allocation2 + $0x7b] sm:$0xff] }
 0x1ae   :  { %v1124_v34 = vpop.f32.mrb[92].mxu1  ;;  %v1385_v46 = vpop.f32.mrb[92].mxu0 }
 0x1af   :  { %v16929_v3 = vadd.f32 %v1124_v34, %v16764_v22  ;;  %v16932_v10 = vadd.f32 %v1385_v46, %v16841_v23  ;;  %v11969_v45 = vpop.f32.mrb[93].mxu0  ;;  %12325 = vmatmul.mubr.f32.gmra.mrb[198].mxu1 %v2192_v43  ;;  %12405 = vmatmul.mubr.f32.gmra.mrb[198].mxu0 %v2489_v2  ;;  %v11889_v48 = vpop.f32.mrb[93].mxu1  ;;  %v2198_v2 = vld [vmem:[#allocation2 + $0xca] sm:$0xff] }
 0x1b0   :  { %12327 = vmatprep.mubr.msk.f32.mxu1 %vm15438_vm0, %v22146_v6  ;;  %12407 = vmatprep.mubr.msk.f32.mxu0 %vm15438_vm0, %v22146_v6  ;;  %v2495_v34 = vld [vmem:[#allocation2 + $0x83] sm:$0xff] }
 0x1b2   :  { %v1129_v42 = vpop.f32.mrb[94].mxu1  ;;  %v1390_v41 = vpop.f32.mrb[94].mxu0 }
 0x1b3   :  { %v16939_v22 = vadd.f32 %v1129_v42, %v16775_v20  ;;  %v16942_v23 = vadd.f32 %v1390_v41, %v16852_v25  ;;  %v11972_v53 = vpop.f32.mrb[95].mxu0  ;;  %12328 = vmatmul.mubr.f32.gmra.mrb[200].mxu1 %v2193_v11  ;;  %12408 = vmatmul.mubr.f32.gmra.mrb[200].mxu0 %v2490_v37  ;;  %v11892_v19 = vpop.f32.mrb[95].mxu1  ;;  %v2199_v37 = vld [vmem:[#allocation2 + $0xd2] sm:$0xff] }
 0x1b4   :  { %12330 = vmatprep.mubr.msk.f32.mxu1 %vm15438_vm0, %v22146_v6  ;;  %12410 = vmatprep.mubr.msk.f32.mxu0 %vm15438_vm0, %v22146_v6  ;;  %v2496_v42 = vld [vmem:[#allocation2 + $0x8b] sm:$0xff] }
 0x1b6   :  { %v1134_v1 = vpop.f32.mrb[96].mxu1  ;;  %v1395_v50 = vpop.f32.mrb[96].mxu0 }
 0x1b7   :  { %v16949_v20 = vadd.f32 %v1134_v1, %v16786_v30  ;;  %v16952_v25 = vadd.f32 %v1395_v50, %v16862_v55  ;;  %v11975_v32 = vpop.f32.mrb[97].mxu0  ;;  %12331 = vmatmul.mubr.f32.gmra.mrb[202].mxu1 %v2194_v54  ;;  %12411 = vmatmul.mubr.f32.gmra.mrb[202].mxu0 %v2491_v26  ;;  %v11895_v15 = vpop.f32.mrb[97].mxu1  ;;  %v2200_v26 = vld [vmem:[#allocation2 + $0xda] sm:$0xff] }
 0x1b8   :  { %12333 = vmatprep.mubr.msk.f32.mxu1 %vm15438_vm0, %v22146_v6  ;;  %12413 = vmatprep.mubr.msk.f32.mxu0 %vm15438_vm0, %v22146_v6  ;;  %v2497_v1 = vld [vmem:[#allocation2 + $0x93] sm:$0xff] }
 0x1ba   :  { %v1139_v61 = vpop.f32.mrb[98].mxu1  ;;  %v1400_v40 = vpop.f32.mrb[98].mxu0 }
 0x1bb   :  { %v16959_v30 = vadd.f32 %v1139_v61, %v16794_v27  ;;  %v16962_v55 = vadd.f32 %v1400_v40, %v16872_v44  ;;  %v11978_v63 = vpop.f32.mrb[99].mxu0  ;;  %12334 = vmatmul.mubr.f32.gmra.mrb[204].mxu1 %v2195_v17  ;;  %12414 = vmatmul.mubr.f32.gmra.mrb[204].mxu0 %v2492_v33  ;;  %v11898_v47 = vpop.f32.mrb[99].mxu1  ;;  %v2498_v33 = vld [vmem:[#allocation2 + $0x9b] sm:$0xff] }
 0x1bc   :  { %12336 = vmatprep.mubr.msk.f32.mxu1 %vm15438_vm0, %v22146_v6  ;;  %12416 = vmatprep.mubr.msk.f32.mxu0 %vm15438_vm0, %v22146_v6 }
 0x1be   :  { %v1144_v24 = vpop.f32.mrb[100].mxu1  ;;  %v1405_v31 = vpop.f32.mrb[100].mxu0 }
 0x1bf   :  { %v16969_v27 = vadd.f32 %v1144_v24, %v16805_v56  ;;  %v16972_v44 = vadd.f32 %v1405_v31, %v16882_v57  ;;  %v11981_v13 = vpop.f32.mrb[101].mxu0  ;;  %12337 = vmatmul.mubr.f32.gmra.mrb[206].mxu1 %v2196_v16  ;;  %12417 = vmatmul.mubr.f32.gmra.mrb[206].mxu0 %v2493_v51  ;;  %v11901_v4 = vpop.f32.mrb[101].mxu1  ;;  %v2499_v16 = vld [vmem:[#allocation2 + $0xa3] sm:$0xff] }
 0x1c0   :  { %12339 = vmatprep.mubr.msk.f32.mxu1 %vm15438_vm0, %v22146_v6  ;;  %12419 = vmatprep.mubr.msk.f32.mxu0 %vm15438_vm0, %v22146_v6 }
 0x1c2   :  { %v1149_v52 = vpop.f32.mrb[102].mxu1  ;;  %v1410_v29 = vpop.f32.mrb[102].mxu0 }
 0x1c3   :  { %v16979_v56 = vadd.f32 %v1149_v52, %v16816_v14  ;;  %v16982_v57 = vadd.f32 %v1410_v29, %v16889_v18  ;;  %v11984_v28 = vpop.f32.mrb[103].mxu0  ;;  %12340 = vmatmul.mubr.f32.gmra.mrb[208].mxu1 %v2197_v38  ;;  %12420 = vmatmul.mubr.f32.gmra.mrb[208].mxu0 %v2494_v49  ;;  %v11904_v43 = vpop.f32.mrb[103].mxu1 }
 0x1c4   :  { %12342 = vmatprep.mubr.msk.f32.mxu1 %vm15438_vm0, %v22146_v6  ;;  %12422 = vmatprep.mubr.msk.f32.mxu0 %vm15438_vm0, %v22146_v6 }
 0x1c6   :  { %v1154_v46 = vpop.f32.mrb[104].mxu1  ;;  %v1415_v45 = vpop.f32.mrb[104].mxu0 }
 0x1c7   :  { %v16989_v14 = vadd.f32 %v1154_v46, %v16827_v12  ;;  %v16992_v18 = vadd.f32 %v1415_v45, %v16899_v21  ;;  %v11987_v48 = vpop.f32.mrb[105].mxu0  ;;  %12343 = vmatmul.mubr.f32.gmra.mrb[210].mxu1 %v2198_v2  ;;  %12423 = vmatmul.mubr.f32.gmra.mrb[210].mxu0 %v2495_v34  ;;  %v11907_v11 = vpop.f32.mrb[105].mxu1 }
 0x1c8   :  { %12345 = vmatprep.mubr.msk.f32.mxu1 %vm15438_vm0, %v22146_v6  ;;  %12425 = vmatprep.mubr.msk.f32.mxu0 %vm15438_vm0, %v22146_v6 }
 0x1ca   :  { %v1159_v41 = vpop.f32.mrb[106].mxu1  ;;  %v1420_v53 = vpop.f32.mrb[106].mxu0 }
 0x1cb   :  { %v16999_v12 = vadd.f32 %v1159_v41, %v16838_v35  ;;  %v17002_v21 = vadd.f32 %v1420_v53, %v16909_v36  ;;  %v11990_v19 = vpop.f32.mrb[107].mxu0  ;;  %12346 = vmatmul.mubr.f32.gmra.mrb[212].mxu1 %v2199_v37  ;;  %12426 = vmatmul.mubr.f32.gmra.mrb[212].mxu0 %v2496_v42  ;;  %v11910_v54 = vpop.f32.mrb[107].mxu1 }
 0x1cc   :  { %12348 = vmatprep.mubr.msk.f32.mxu1 %vm15438_vm0, %v22146_v6  ;;  %12428 = vmatprep.mubr.msk.f32.mxu0 %vm15438_vm0, %v22146_v6 }
 0x1ce   :  { %v1164_v50 = vpop.f32.mrb[108].mxu1  ;;  %v1425_v32 = vpop.f32.mrb[108].mxu0 }
 0x1cf   :  { %v17009_v35 = vadd.f32 %v1164_v50, %v16849_v39  ;;  %v17012_v36 = vadd.f32 %v1425_v32, %v16919_v7  ;;  %v11993_v15 = vpop.f32.mrb[109].mxu0  ;;  %12349 = vmatmul.mubr.f32.gmra.mrb[214].mxu1 %v2200_v26  ;;  %12429 = vmatmul.mubr.f32.gmra.mrb[214].mxu0 %v2497_v1  ;;  %v11913_v17 = vpop.f32.mrb[109].mxu1 }
 0x1d0   :  { %12431 = vmatprep.mubr.msk.f32.mxu0 %vm15438_vm0, %v22146_v6  ;;  %12490 = vmatprep.mubr.msk.f32.mxu1 %vm15438_vm0, %v22146_v6 }
 0x1d2   :  { %v1169_v61 = vpop.f32.mrb[110].mxu1  ;;  %v1430_v40 = vpop.f32.mrb[110].mxu0 }
 0x1d3   :  { %v17019_v63 = vadd.f32 %v1169_v61, %v16859_v58  ;;  %v17022_v39 = vadd.f32 %v1430_v40, %v16929_v3  ;;  %v11996_v7 = vpop.f32.mrb[111].mxu0  ;;  %12432 = vmatmul.mubr.f32.gmra.mrb[216].mxu0 %v2498_v33  ;;  %v11916_v47 = vpop.f32.mrb[111].mxu1  ;;  %v2500_v3 = vld [vmem:[#allocation2 + $0xab] sm:$0xff] }
 0x1d4   :  { %12434 = vmatprep.mubr.msk.f32.mxu0 %vm15438_vm0, %v22146_v6 }
 0x1d6   :  { %v1174_v51 = vpop.f32.mrb[112].mxu1  ;;  %v1435_v24 = vpop.f32.mrb[112].mxu0 }
 0x1d7   :  { %v17027_v31 = vadd.f32 %v1174_v51, %v16869_v60  ;;  %v17030_v13 = vadd.f32 %v1435_v24, %v16939_v22  ;;  %v11999_v58 = vpop.f32.mrb[113].mxu0  ;;  %12435 = vmatmul.mubr.f32.gmra.mrb[218].mxu0 %v2499_v16  ;;  %v11919_v4 = vpop.f32.mrb[113].mxu1  ;;  %v2501_v22 = vld [vmem:[#allocation2 + $0xb3] sm:$0xff] }
 0x1d8   :  { %12437 = vmatprep.mubr.msk.f32.mxu0 %vm15438_vm0, %v22146_v6 }
 0x1da   :  { %v1179_v38 = vpop.f32.mrb[114].mxu1  ;;  %v1440_v49 = vpop.f32.mrb[114].mxu0 }
 0x1db   :  { %v17035_v52 = vadd.f32 %v1179_v38, %v16879_v8  ;;  %v17038_v29 = vadd.f32 %v1440_v49, %v16949_v20  ;;  %v12002_v60 = vpop.f32.mrb[115].mxu0  ;;  %12438 = vmatmul.mubr.f32.gmra.mrb[220].mxu0 %v2500_v3  ;;  %v11922_v28 = vpop.f32.mrb[115].mxu1  ;;  %v2502_v20 = vld [vmem:[#allocation2 + $0xbb] sm:$0xff] }
 0x1dc   :  { %12440 = vmatprep.mubr.msk.f32.mxu0 %vm15438_vm0, %v22146_v6 }
 0x1de   :  { %v1445_v43 = vpop.f32.mrb[116].mxu0  ;;  %v1671_v2 = vpop.f32.mrb[116].mxu1 }
 0x1df   :  { %v17043_v34 = vadd.f32 %v1445_v43, %v16959_v30  ;;  %v17046_v46 = vadd.f32 %v1671_v2, %v16892_v5  ;;  %v12005_v8 = vpop.f32.mrb[117].mxu0  ;;  %12441 = vmatmul.mubr.f32.gmra.mrb[222].mxu0 %v2501_v22  ;;  %v12064_v45 = vpop.f32.mrb[117].mxu1  ;;  %v2503_v5 = vld [vmem:[#allocation2 + $0xc3] sm:$0xff] }
 0x1e0   :  { %12443 = vmatprep.mubr.msk.f32.mxu0 %vm15438_vm0, %v22146_v6 }
 0x1e2   :  { %v1450_v48 = vpop.f32.mrb[118].mxu0  ;;  %v1676_v11 = vpop.f32.mrb[118].mxu1 }
 0x1e3   :  { %v17051_v37 = vadd.f32 %v1450_v48, %v16969_v27  ;;  %v17054_v42 = vadd.f32 %v1676_v11, %v16902_v62  ;;  %v12008_v30 = vpop.f32.mrb[119].mxu0  ;;  %12444 = vmatmul.mubr.f32.gmra.mrb[224].mxu0 %v2502_v20  ;;  %v12067_v41 = vpop.f32.mrb[119].mxu1  ;;  %v2504_v62 = vld [vmem:[#allocation2 + $0xcb] sm:$0xff] }
 0x1e4   :  { %12446 = vmatprep.mubr.msk.f32.mxu0 %vm15438_vm0, %v22146_v6 }
 0x1e6   :  { %v1455_v53 = vpop.f32.mrb[120].mxu0  ;;  %v1681_v19 = vpop.f32.mrb[120].mxu1 }
 0x1e7   :  { %v17059_v54 = vadd.f32 %v1455_v53, %v16979_v56  ;;  %v17062_v26 = vadd.f32 %v1681_v19, %v16912_v59  ;;  %v12011_v27 = vpop.f32.mrb[121].mxu0  ;;  %12447 = vmatmul.mubr.f32.gmra.mrb[226].mxu0 %v2503_v5  ;;  %v12070_v1 = vpop.f32.mrb[121].mxu1  ;;  %v2505_v59 = vld [vmem:[#allocation2 + $0xd3] sm:$0xff] }
 0x1e8   :  { %12449 = vmatprep.mubr.msk.f32.mxu0 %vm15438_vm0, %v22146_v6 }
 0x1ea   :  { %v1460_v50 = vpop.f32.mrb[122].mxu0  ;;  %v1686_v32 = vpop.f32.mrb[122].mxu1 }
 0x1eb   :  { %v17067_v15 = vadd.f32 %v1460_v50, %v16989_v14  ;;  %v17070_v17 = vadd.f32 %v1686_v32, %v16922_v9  ;;  %v12014_v56 = vpop.f32.mrb[123].mxu0  ;;  %12450 = vmatmul.mubr.f32.gmra.mrb[228].mxu0 %v2504_v62  ;;  %v12073_v33 = vpop.f32.mrb[123].mxu1  ;;  %v2506_v9 = vld [vmem:[#allocation2 + $0xdb] sm:$0xff] }
 0x1ec   :  { %12452 = vmatprep.mubr.msk.f32.mxu0 %vm15438_vm0, %v22146_v6 }
 0x1ee   :  { %v1465_v61 = vpop.f32.mrb[124].mxu0  ;;  %v1691_v40 = vpop.f32.mrb[124].mxu1 }
 0x1ef   :  { %v17075_v7 = vadd.f32 %v1465_v61, %v16999_v12  ;;  %v17078_v47 = vadd.f32 %v1691_v40, %v16932_v10  ;;  %v12017_v14 = vpop.f32.mrb[125].mxu0  ;;  %12453 = vmatmul.mubr.f32.gmra.mrb[230].mxu0 %v2505_v59  ;;  %v12076_v16 = vpop.f32.mrb[125].mxu1 }
 0x1f0   :  { %12455 = vmatprep.mubr.msk.f32.mxu0 %vm15438_vm0, %v22146_v6 }
 0x1f2   :  { %v1470_v51 = vpop.f32.mrb[126].mxu0  ;;  %v1696_v24 = vpop.f32.mrb[126].mxu1 }
 0x1f3   :  { %v17083_v58 = vadd.f32 %v1470_v51, %v17009_v35  ;;  %v17086_v4 = vadd.f32 %v1696_v24, %v16942_v23  ;;  %v12020_v12 = vpop.f32.mrb[127].mxu0  ;;  %12456 = vmatmul.mubr.f32.gmra.mrb[232].mxu0 %v2506_v9  ;;  %v12079_v3 = vpop.f32.mrb[127].mxu1 }
 0x1f4   :  { %12667 = vmatprep.mubr.msk.f32.mxu0 %vm15438_vm0, %v22146_v6 }
 0x1f6   :  { %v1475_v10 = vpop.f32.mrb[128].mxu0  ;;  %v1701_v38 = vpop.f32.mrb[128].mxu1 }
 0x1f7   :  { %v17091_v49 = vadd.f32 %v1475_v10, %v17019_v63  ;;  %v17094_v60 = vadd.f32 %v1701_v38, %v16952_v25  ;;  %v12023_v28 = vpop.f32.mrb[129].mxu0  ;;  %v12082_v35 = vpop.f32.mrb[129].mxu1  ;;  %v2975_v63 = vld [vmem:[%s22138_s6] sm:$0xff]  ;;  %v2976_v25 = vld [vmem:[%s22138_s6 + $0x8] sm:$0xff] }
 0x1f8   :  { %v17114_v41 = vpack.c.bf16 %v2976_v25, %v2975_v63 }
 0x1fa   :  { %v1480_v22 = vpop.f32.mrb[130].mxu0  ;;  %v1706_v43 = vpop.f32.mrb[130].mxu1  ;;  %14812 = vmatpush3.bf16.msra.mxu1 %v17114_v41 }
 0x1fb   :  { %v17097_v23 = vadd.f32 %v1480_v22, %v17027_v31  ;;  %v17100_v2 = vadd.f32 %v1706_v43, %v16962_v55  ;;  %v12026_v8 = vpop.f32.mrb[131].mxu0  ;;  %v12085_v45 = vpop.f32.mrb[131].mxu1  ;;  %14813 = vmatprep.subr.bf16.mxu1 %v22144_v0 }
 0x1fe   :  { %v1485_v20 = vpop.f32.mrb[132].mxu0  ;;  %v1711_v48 = vpop.f32.mrb[132].mxu1 }
 0x1ff   :  { %v17109_v11 = vadd.f32 %v1485_v20, %v17035_v52  ;;  %v17112_v31 = vadd.f32 %v1711_v48, %v16972_v44  ;;  %v12029_v55 = vpop.f32.mrb[133].mxu0  ;;  %v12088_v30 = vpop.f32.mrb[133].mxu1 }
 0x202   :  { %v1716_v5 = vpop.f32.mrb[134].mxu1  ;;  %v1977_v53 = vpop.f32.mrb[134].mxu0 }
 0x203   :  { %v17119_v19 = vadd.f32 %v1716_v5, %v16982_v57  ;;  %v17122_v27 = vadd.f32 %v1977_v53, %v17046_v46  ;;  %v12171_v52 = vpop.f32.mrb[135].mxu0  ;;  %v12091_v1 = vpop.f32.mrb[135].mxu1  ;;  %v2977_v57 = vld [vmem:[%s22138_s6 + $0x10] sm:$0xff]  ;;  %v2978_v46 = vld [vmem:[%s22138_s6 + $0x18] sm:$0xff] }
 0x204   :  { %v17136_v40 = vpack.c.bf16 %v2978_v46, %v2977_v57 }
 0x206   :  { %v1721_v44 = vpop.f32.mrb[136].mxu1  ;;  %v1982_v62 = vpop.f32.mrb[136].mxu0  ;;  %14815 = vmatpush3.bf16.msra.mxu1 %v17136_v40 }
 0x207   :  { %v17125_v50 = vadd.f32 %v1721_v44, %v16992_v18  ;;  %v17128_v32 = vadd.f32 %v1982_v62, %v17054_v42  ;;  %v12174_v56 = vpop.f32.mrb[137].mxu0  ;;  %v12094_v33 = vpop.f32.mrb[137].mxu1  ;;  %14816 = vmatprep.subr.bf16.mxu1 %v22144_v0 }
 0x20a   :  { %v1726_v59 = vpop.f32.mrb[138].mxu1  ;;  %v1987_v61 = vpop.f32.mrb[138].mxu0 }
 0x20b   :  { %v17139_v18 = vadd.f32 %v1726_v59, %v17002_v21  ;;  %v17142_v42 = vadd.f32 %v1987_v61, %v17062_v26  ;;  %v12177_v14 = vpop.f32.mrb[139].mxu0  ;;  %v12097_v16 = vpop.f32.mrb[139].mxu1 }
 0x20e   :  { %v1731_v9 = vpop.f32.mrb[140].mxu1  ;;  %v1992_v51 = vpop.f32.mrb[140].mxu0 }
 0x20f   :  { %v17147_v24 = vadd.f32 %v1731_v9, %v17012_v36  ;;  %v17150_v12 = vadd.f32 %v1992_v51, %v17070_v17  ;;  %v12180_v3 = vpop.f32.mrb[141].mxu0  ;;  %v12100_v21 = vpop.f32.mrb[141].mxu1  ;;  %v2979_v36 = vld [vmem:[%s22138_s6 + $0x20] sm:$0xff]  ;;  %v2980_v17 = vld [vmem:[%s22138_s6 + $0x28] sm:$0xff] }
 0x210   :  { %v17164_v45 = vpack.c.bf16 %v2980_v17, %v2979_v36 }
 0x212   :  { %v1736_v10 = vpop.f32.mrb[142].mxu1  ;;  %v1997_v38 = vpop.f32.mrb[142].mxu0  ;;  %14818 = vmatpush3.bf16.msra.mxu1 %v17164_v45 }
 0x213   :  { %v17153_v26 = vadd.f32 %v1736_v10, %v17022_v39  ;;  %v17156_v28 = vadd.f32 %v1997_v38, %v17078_v47  ;;  %v12183_v35 = vpop.f32.mrb[143].mxu0  ;;  %v12103_v22 = vpop.f32.mrb[143].mxu1  ;;  %14819 = vmatprep.subr.bf16.mxu1 %v22144_v0 }
 0x216   :  { %v1741_v43 = vpop.f32.mrb[144].mxu1  ;;  %v2002_v8 = vpop.f32.mrb[144].mxu0 }
 0x217   :  { %v17167_v39 = vadd.f32 %v1741_v43, %v17030_v13  ;;  %v17170_v47 = vadd.f32 %v2002_v8, %v17086_v4  ;;  %v12186_v20 = vpop.f32.mrb[145].mxu0  ;;  %v12106_v48 = vpop.f32.mrb[145].mxu1 }
 0x21a   :  { %v1746_v63 = vpop.f32.mrb[146].mxu1  ;;  %v2007_v25 = vpop.f32.mrb[146].mxu0 }
 0x21b   :  { %v17175_v55 = vadd.f32 %v1746_v63, %v17038_v29  ;;  %v17178_v30 = vadd.f32 %v2007_v25, %v17094_v60  ;;  %v12189_v5 = vpop.f32.mrb[147].mxu0  ;;  %v12109_v13 = vpop.f32.mrb[147].mxu1 }
 0x21e   :  { %v1751_v53 = vpop.f32.mrb[148].mxu1  ;;  %v2012_v52 = vpop.f32.mrb[148].mxu0 }
 0x21f   :  { %v17181_v4 = vadd.f32 %v1751_v53, %v17043_v34  ;;  %v17184_v1 = vadd.f32 %v2012_v52, %v17100_v2  ;;  %v12192_v44 = vpop.f32.mrb[149].mxu0  ;;  %v12112_v62 = vpop.f32.mrb[149].mxu1  ;;  %v2981_v34 = vld [vmem:[%s22138_s6 + $0x30] sm:$0xff]  ;;  %v2982_v2 = vld [vmem:[%s22138_s6 + $0x38] sm:$0xff] }
 0x220   :  { %v17198_v14 = vpack.c.bf16 %v2982_v2, %v2981_v34 }
 0x222   :  { %v1756_v56 = vpop.f32.mrb[150].mxu1  ;;  %v2017_v33 = vpop.f32.mrb[150].mxu0  ;;  %14821 = vmatpush3.bf16.msra.mxu1 %v17198_v14 }
 0x223   :  { %v17187_v29 = vadd.f32 %v1756_v56, %v17051_v37  ;;  %v17190_v60 = vadd.f32 %v2017_v33, %v17112_v31  ;;  %v12195_v57 = vpop.f32.mrb[151].mxu0  ;;  %v12115_v46 = vpop.f32.mrb[151].mxu1  ;;  %14822 = vmatprep.subr.bf16.mxu1 %v22144_v0 }
 0x226   :  { %v1761_v59 = vpop.f32.mrb[152].mxu1  ;;  %v2022_v61 = vpop.f32.mrb[152].mxu0 }
 0x227   :  { %v17201_v37 = vadd.f32 %v1761_v59, %v17059_v54  ;;  %v17204_v31 = vadd.f32 %v2022_v61, %v17119_v19  ;;  %v12198_v16 = vpop.f32.mrb[153].mxu0  ;;  %v12118_v9 = vpop.f32.mrb[153].mxu1 }
 0x22a   :  { %v1766_v51 = vpop.f32.mrb[154].mxu1  ;;  %v2027_v3 = vpop.f32.mrb[154].mxu0 }
 0x22b   :  { %v17209_v21 = vadd.f32 %v1766_v51, %v17067_v15  ;;  %v17212_v10 = vadd.f32 %v2027_v3, %v17125_v50  ;;  %v12201_v38 = vpop.f32.mrb[155].mxu0  ;;  %v12121_v54 = vpop.f32.mrb[155].mxu1  ;;  %v2983_v15 = vld [vmem:[%s22138_s6 + $0x40] sm:$0xff]  ;;  %v2984_v50 = vld [vmem:[%s22138_s6 + $0x48] sm:$0xff] }
 0x22c   :  { %v17226_v48 = vpack.c.bf16 %v2984_v50, %v2983_v15 }
 0x22e   :  { %v1771_v35 = vpop.f32.mrb[156].mxu1  ;;  %v2032_v22 = vpop.f32.mrb[156].mxu0  ;;  %14824 = vmatpush3.bf16.msra.mxu1 %v17226_v48 }
 0x22f   :  { %v17215_v19 = vadd.f32 %v1771_v35, %v17075_v7  ;;  %v17218_v36 = vadd.f32 %v2032_v22, %v17139_v18  ;;  %v12204_v17 = vpop.f32.mrb[157].mxu0  ;;  %v12124_v43 = vpop.f32.mrb[157].mxu1  ;;  %14825 = vmatprep.subr.bf16.mxu1 %v22144_v0 }
 0x232   :  { %v1776_v8 = vpop.f32.mrb[158].mxu1  ;;  %v2037_v20 = vpop.f32.mrb[158].mxu0 }
 0x233   :  { %v17229_v7 = vadd.f32 %v1776_v8, %v17083_v58  ;;  %v17232_v18 = vadd.f32 %v2037_v20, %v17147_v24  ;;  %v12207_v63 = vpop.f32.mrb[159].mxu0  ;;  %v12127_v25 = vpop.f32.mrb[159].mxu1 }
 0x236   :  { %v1781_v5 = vpop.f32.mrb[160].mxu1  ;;  %v2042_v13 = vpop.f32.mrb[160].mxu0 }
 0x237   :  { %v17237_v53 = vadd.f32 %v1781_v5, %v17091_v49  ;;  %v17240_v52 = vadd.f32 %v2042_v13, %v17153_v26  ;;  %v12210_v44 = vpop.f32.mrb[161].mxu0  ;;  %v12130_v58 = vpop.f32.mrb[161].mxu1  ;;  %v2985_v49 = vld [vmem:[%s22138_s6 + $0x50] sm:$0xff]  ;;  %v2986_v26 = vld [vmem:[%s22138_s6 + $0x58] sm:$0xff] }
 0x238   :  { %v17254_v59 = vpack.c.bf16 %v2986_v26, %v2985_v49 }
 0x23a   :  { %v1786_v62 = vpop.f32.mrb[162].mxu1  ;;  %v2047_v56 = vpop.f32.mrb[162].mxu0  ;;  %14827 = vmatpush3.bf16.msra.mxu1 %v17254_v59 }
 0x23b   :  { %v17243_v24 = vadd.f32 %v1786_v62, %v17097_v23  ;;  %v17246_v33 = vadd.f32 %v2047_v56, %v17167_v39  ;;  %v12213_v57 = vpop.f32.mrb[163].mxu0  ;;  %v12133_v46 = vpop.f32.mrb[163].mxu1  ;;  %14828 = vmatprep.subr.bf16.mxu1 %v22144_v0 }
 0x23e   :  { %v1791_v34 = vpop.f32.mrb[164].mxu1  ;;  %v2052_v2 = vpop.f32.mrb[164].mxu0 }
 0x23f   :  { %v17257_v23 = vadd.f32 %v1791_v34, %v17109_v11  ;;  %v17260_v39 = vadd.f32 %v2052_v2, %v17175_v55  ;;  %v12216_v61 = vpop.f32.mrb[165].mxu0  ;;  %v12136_v16 = vpop.f32.mrb[165].mxu1  ;;  %v2989_v34 = vld [vmem:[%s22138_s6 + $0x70] sm:$0xff] }
 0x242   :  { %v2057_v9 = vpop.f32.mrb[166].mxu0  ;;  %v2283_v51 = vpop.f32.mrb[166].mxu1 }
 0x243   :  { %v17265_v3 = vadd.f32 %v2057_v9, %v17181_v4  ;;  %v17268_v38 = vadd.f32 %v2283_v51, %v17122_v27  ;;  %v12219_v54 = vpop.f32.mrb[167].mxu0  ;;  %v12278_v11 = vpop.f32.mrb[167].mxu1  ;;  %v2987_v4 = vld [vmem:[%s22138_s6 + $0x60] sm:$0xff]  ;;  %v2988_v27 = vld [vmem:[%s22138_s6 + $0x68] sm:$0xff] }
 0x244   :  { %v17282_v20 = vpack.c.bf16 %v2988_v27, %v2987_v4 }
 0x246   :  { %v2062_v35 = vpop.f32.mrb[168].mxu0  ;;  %v2288_v22 = vpop.f32.mrb[168].mxu1  ;;  %14830 = vmatpush3.bf16.msra.mxu1 %v17282_v20 }
 0x247   :  { %v17271_v55 = vadd.f32 %v2062_v35, %v17187_v29  ;;  %v17274_v17 = vadd.f32 %v2288_v22, %v17128_v32  ;;  %v12222_v43 = vpop.f32.mrb[169].mxu0  ;;  %v12281_v15 = vpop.f32.mrb[169].mxu1  ;;  %14831 = vmatprep.subr.bf16.mxu1 %v22144_v0 }
 0x24a   :  { %v2067_v50 = vpop.f32.mrb[170].mxu0  ;;  %v2293_v8 = vpop.f32.mrb[170].mxu1 }
 0x24b   :  { %v17285_v29 = vadd.f32 %v2067_v50, %v17201_v37  ;;  %v2434_v32 = vadd.f32 %v2293_v8, %v17142_v42  ;;  %v12225_v63 = vpop.f32.mrb[171].mxu0  ;;  %v12284_v25 = vpop.f32.mrb[171].mxu1 }
 0x24e   :  { %v2072_v5 = vpop.f32.mrb[172].mxu0  ;;  %v2298_v13 = vpop.f32.mrb[172].mxu1 }
 0x24f   :  { %v17291_v44 = vadd.f32 %v2072_v5, %v17209_v21  ;;  %v2435_v58 = vadd.f32 %v2298_v13, %v17150_v12  ;;  %v12228_v62 = vpop.f32.mrb[173].mxu0  ;;  %v12287_v56 = vpop.f32.mrb[173].mxu1  ;;  %v2990_v21 = vld [vmem:[%s22138_s6 + $0x78] sm:$0xff] }
 0x250   :  { %v17304_v61 = vpack.c.bf16 %v2990_v21, %v2989_v34 }
 0x252   :  { %v2077_v57 = vpop.f32.mrb[174].mxu0  ;;  %v2303_v37 = vpop.f32.mrb[174].mxu1  ;;  %14833 = vmatpush3.bf16.msra.mxu1 %v17304_v61 }
 0x253   :  { %v17295_v46 = vadd.f32 %v2077_v57, %v17215_v19  ;;  %v2436_v42 = vadd.f32 %v2303_v37, %v17156_v28  ;;  %v12231_v49 = vpop.f32.mrb[175].mxu0  ;;  %v12290_v26 = vpop.f32.mrb[175].mxu1  ;;  %14834 = vmatprep.subr.bf16.mxu1 %v22144_v0 }
 0x256   :  { %v2082_v12 = vpop.f32.mrb[176].mxu0  ;;  %v2308_v2 = vpop.f32.mrb[176].mxu1 }
 0x257   :  { %v17307_v16 = vadd.f32 %v2082_v12, %v17229_v7  ;;  %v2437_v19 = vadd.f32 %v2308_v2, %v17170_v47  ;;  %v12234_v28 = vpop.f32.mrb[177].mxu0  ;;  %v12293_v9 = vpop.f32.mrb[177].mxu1 }
 0x25a   :  { %v2087_v51 = vpop.f32.mrb[178].mxu0  ;;  %v2313_v54 = vpop.f32.mrb[178].mxu1 }
 0x25b   :  { %v17313_v11 = vadd.f32 %v2087_v51, %v17237_v53  ;;  %v2438_v35 = vadd.f32 %v2313_v54, %v17178_v30  ;;  %v12237_v22 = vpop.f32.mrb[179].mxu0  ;;  %v12296_v43 = vpop.f32.mrb[179].mxu1 }
 0x25e   :  { %v2092_v15 = vpop.f32.mrb[180].mxu0  ;;  %v2318_v7 = vpop.f32.mrb[180].mxu1 }
 0x25f   :  { %v17317_v4 = vadd.f32 %v2092_v15, %v17243_v24  ;;  %v2439_v47 = vadd.f32 %v2318_v7, %v17184_v1  ;;  %v12240_v27 = vpop.f32.mrb[181].mxu0  ;;  %v12299_v50 = vpop.f32.mrb[181].mxu1 }
 0x262   :  { %v2097_v8 = vpop.f32.mrb[182].mxu0  ;;  %v2323_v63 = vpop.f32.mrb[182].mxu1 }
 0x263   :  { %v17321_v25 = vadd.f32 %v2097_v8, %v17257_v23  ;;  %v2440_v53 = vadd.f32 %v2323_v63, %v17190_v60  ;;  %v12243_v5 = vpop.f32.mrb[183].mxu0  ;;  %v12302_v30 = vpop.f32.mrb[183].mxu1 }
 0x266   :  { %v2328_v13 = vpop.f32.mrb[184].mxu1  ;;  %v2589_v62 = vpop.f32.mrb[184].mxu0 }
 0x267   :  { %v2441_v56 = vadd.f32 %v2328_v13, %v17204_v31  ;;  %v17326_v24 = vadd.f32 %v2589_v62, %v17268_v38  ;;  %v12385_v57 = vpop.f32.mrb[185].mxu0  ;;  %v12305_v1 = vpop.f32.mrb[185].mxu1 }
 0x26a   :  { %v2333_v37 = vpop.f32.mrb[186].mxu1  ;;  %v2594_v49 = vpop.f32.mrb[186].mxu0 }
 0x26b   :  { %v2442_v26 = vadd.f32 %v2333_v37, %v17212_v10  ;;  %v17330_v23 = vadd.f32 %v2594_v49, %v17274_v17  ;;  %v12388_v34 = vpop.f32.mrb[187].mxu0  ;;  %v12308_v60 = vpop.f32.mrb[187].mxu1 }
 0x26e   :  { %v2338_v21 = vpop.f32.mrb[188].mxu1  ;;  %v2599_v12 = vpop.f32.mrb[188].mxu0 }
 0x26f   :  { %v2443_v2 = vadd.f32 %v2338_v21, %v17218_v36  ;;  %v17333_v28 = vadd.f32 %v2599_v12, %v2434_v32  ;;  %v12391_v31 = vpop.f32.mrb[189].mxu0  ;;  %v12311_v38 = vpop.f32.mrb[189].mxu1 }
 0x272   :  { %v2343_v9 = vpop.f32.mrb[190].mxu1  ;;  %v2604_v51 = vpop.f32.mrb[190].mxu0 }
 0x273   :  { %v2444_v54 = vadd.f32 %v2343_v9, %v17232_v18  ;;  %v17336_v22 = vadd.f32 %v2604_v51, %v2435_v58  ;;  %v12394_v10 = vpop.f32.mrb[191].mxu0  ;;  %v12314_v43 = vpop.f32.mrb[191].mxu1 }
 0x276   :  { %v2348_v17 = vpop.f32.mrb[192].mxu1  ;;  %v2609_v15 = vpop.f32.mrb[192].mxu0 }
 0x277   :  { %v17339_v7 = vadd.f32 %v2348_v17, %v17240_v52  ;;  %v17341_v27 = vadd.f32 %v2609_v15, %v2436_v42  ;;  %v12397_v36 = vpop.f32.mrb[193].mxu0  ;;  %v12317_v32 = vpop.f32.mrb[193].mxu1 }
 0x27a   :  { %v2353_v50 = vpop.f32.mrb[194].mxu1  ;;  %v2614_v8 = vpop.f32.mrb[194].mxu0 }
 0x27b   :  { %v17344_v63 = vadd.f32 %v2353_v50, %v17246_v33  ;;  %v17346_v5 = vadd.f32 %v2614_v8, %v2437_v19  ;;  %v12400_v18 = vpop.f32.mrb[195].mxu0  ;;  %v12320_v58 = vpop.f32.mrb[195].mxu1 }
 0x27c   :  { %v17381_v58 = vld [vmem:[%s22139_s2] ss:$0 sm:$0xff] }
 0x27e   :  { %v2358_v30 = vpop.f32.mrb[196].mxu1  ;;  %v2619_v13 = vpop.f32.mrb[196].mxu0 }
 0x27f   :  { %v17349_v62 = vadd.f32 %v2358_v30, %v17260_v39  ;;  %v17351_v52 = vadd.f32 %v2619_v13, %v2438_v35  ;;  %v12403_v42 = vpop.f32.mrb[197].mxu0  ;;  %v12323_v57 = vpop.f32.mrb[197].mxu1  ;;  %v17388_v13 = vld [vmem:[%s22140_s5 + $0x8] sm:$0xff] }
 0x282   :  { %v2363_v1 = vpop.f32.mrb[198].mxu1  ;;  %v2624_v37 = vpop.f32.mrb[198].mxu0 }
 0x283   :  { %v17354_v49 = vadd.f32 %v2363_v1, %v17265_v3  ;;  %v17356_v33 = vadd.f32 %v2624_v37, %v2439_v47  ;;  %v12406_v19 = vpop.f32.mrb[199].mxu0  ;;  %v12326_v34 = vpop.f32.mrb[199].mxu1  ;;  %v2845_v1 = vadd.f32 %v17381_v58, %v17326_v24  ;;  %v17402_v37 = vld [vmem:[%s22140_s5] sm:$0xff] }
 0x284   :  { %v2848_v19 = vadd.f32 %v17381_v58, %v17336_v22  ;;  %v2849_v22 = vadd.f32 %v17381_v58, %v17341_v27 }
 0x286   :  { %v2368_v60 = vpop.f32.mrb[200].mxu1  ;;  %v2629_v21 = vpop.f32.mrb[200].mxu0 }
 0x287   :  { %v17359_v12 = vadd.f32 %v2368_v60, %v17271_v55  ;;  %v17361_v39 = vadd.f32 %v2629_v21, %v2440_v53  ;;  %v12409_v35 = vpop.f32.mrb[201].mxu0  ;;  %v12329_v31 = vpop.f32.mrb[201].mxu1 }
 0x28a   :  { %v2373_v38 = vpop.f32.mrb[202].mxu1  ;;  %v2634_v9 = vpop.f32.mrb[202].mxu0 }
 0x28b   :  { %v17364_v51 = vadd.f32 %v2373_v38, %v17285_v29  ;;  %v17366_v3 = vadd.f32 %v2634_v9, %v2441_v56  ;;  %v12412_v47 = vpop.f32.mrb[203].mxu0  ;;  %v12332_v10 = vpop.f32.mrb[203].mxu1  ;;  %v17424_v38 = vmul.f32 %v2845_v1, %v17402_v37 }
 0x28e   :  { %v2378_v43 = vpop.f32.mrb[204].mxu1  ;;  %v2639_v17 = vpop.f32.mrb[204].mxu0 }
 0x28f   :  { %v17369_v15 = vadd.f32 %v2378_v43, %v17291_v44  ;;  %v17371_v55 = vadd.f32 %v2639_v17, %v2442_v26  ;;  %v12415_v53 = vpop.f32.mrb[205].mxu0  ;;  %v12335_v36 = vpop.f32.mrb[205].mxu1  ;;  %v2846_v44 = vadd.f32 %v17381_v58, %v17330_v23  ;;  %v2847_v23 = vadd.f32 %v17381_v58, %v17333_v28  ;;  %v17417_v28 = vld [vmem:[%s22140_s5 + $0x18] sm:$0xff] }
 0x290   :  { %v17434_v10 = vmul.f32 %v2848_v19, %v17417_v28  ;;  %v2850_v17 = vadd.f32 %v17381_v58, %v17346_v5  ;;  %v2851_v5 = vadd.f32 %v17381_v58, %v17351_v52  ;;  %v17476_v19 = vld [vmem:[%s22140_s5 + $0x38] sm:$0xff] }
 0x292   :  { %v2383_v32 = vpop.f32.mrb[206].mxu1  ;;  %v2644_v50 = vpop.f32.mrb[206].mxu0 }
 0x293   :  { %v17374_v8 = vadd.f32 %v2383_v32, %v17295_v46  ;;  %v17376_v29 = vadd.f32 %v2644_v50, %v2443_v2  ;;  %v12418_v56 = vpop.f32.mrb[207].mxu0  ;;  %v12338_v18 = vpop.f32.mrb[207].mxu1 }
 0x294   :  { %v17451_v56 = vld [vmem:[%s22140_s5 + $0x28] sm:$0xff] }
 0x296   :  { %v2388_v26 = vpop.f32.mrb[208].mxu1  ;;  %v2649_v30 = vpop.f32.mrb[208].mxu0 }
 0x297   :  { %v17391_v46 = vadd.f32 %v2388_v26, %v17307_v16  ;;  %v17393_v2 = vadd.f32 %v2649_v30, %v2444_v54  ;;  %v12421_v42 = vpop.f32.mrb[209].mxu0  ;;  %v12341_v57 = vpop.f32.mrb[209].mxu1  ;;  %v17407_v16 = vld [vmem:[%s22140_s5 + $0x10] sm:$0xff]  ;;  %v17410_v54 = vmul.f32 %v2846_v44, %v17388_v13  ;;  %v17465_v30 = vmul.f32 %v2850_v17, %v17451_v56 }
 0x298   :  { %v17427_v9 = vmul.f32 %v2847_v23, %v17407_v16  ;;  %v2852_v42 = vadd.f32 %v17381_v58, %v17356_v33  ;;  %v2853_v33 = vadd.f32 %v17381_v58, %v17361_v39  ;;  %v17499_v39 = vld [vmem:[%s22140_s5 + $0x48] sm:$0xff] }
 0x299   :  { %v2945_v47 = vadd.f32 %v17410_v54, %v17424_v38 }
 0x29a   :  { %v2393_v24 = vpop.f32.mrb[210].mxu1  ;;  %v2654_v34 = vpop.f32.mrb[210].mxu0 }
 0x29b   :  { %v17420_v60 = vadd.f32 %v2393_v24, %v17313_v11  ;;  %v2751_v21 = vadd.f32 %v2654_v34, %v17339_v7  ;;  %v12424_v35 = vpop.f32.mrb[211].mxu0  ;;  %v12344_v31 = vpop.f32.mrb[211].mxu1  ;;  %v17439_v11 = vld [vmem:[%s22140_s5 + $0x20] sm:$0xff]  ;;  %v2946_v50 = vadd.f32 %v2945_v47, %v17427_v9 }
 0x29c   :  { %v17454_v18 = vmul.f32 %v2849_v22, %v17439_v11  ;;  %v17491_v31 = vmul.f32 %v2852_v42, %v17476_v19  ;;  %v2854_v22 = vadd.f32 %v17381_v58, %v17366_v3  ;;  %v17510_v3 = vld [vmem:[%s22140_s5 + $0x50] sm:$0xff] }
 0x29e   :  { %v2398_v7 = vpop.f32.mrb[212].mxu1  ;;  %v2659_v43 = vpop.f32.mrb[212].mxu0 }
 0x29f   :  { %v17444_v53 = vadd.f32 %v2398_v7, %v17317_v4  ;;  %v2752_v27 = vadd.f32 %v2659_v43, %v17344_v63  ;;  %v12427_v36 = vpop.f32.mrb[213].mxu0  ;;  %v12347_v32 = vpop.f32.mrb[213].mxu1  ;;  %v2947_v4 = vadd.f32 %v2946_v50, %v17434_v10  ;;  %v17462_v63 = vld [vmem:[%s22140_s5 + $0x30] sm:$0xff]  ;;  %v17514_v50 = vmul.f32 %v2854_v22, %v17499_v39 }
 0x2a0   :  { %v17480_v34 = vmul.f32 %v2851_v5, %v17462_v63  ;;  %v2855_v36 = vadd.f32 %v17381_v58, %v17371_v55  ;;  %v2856_v5 = vadd.f32 %v17381_v58, %v17376_v29  ;;  %v17522_v55 = vld [vmem:[%s22140_s5 + $0x58] sm:$0xff]  ;;  %v17533_v29 = vld [vmem:[%s22140_s5 + $0x60] sm:$0xff] }
 0x2a1   :  { %v2948_v24 = vadd.f32 %v2947_v4, %v17454_v18 }
 0x2a2   :  { %v2403_v44 = vpop.f32.mrb[214].mxu1  ;;  %v2664_v26 = vpop.f32.mrb[214].mxu0  ;;  %v17526_v42 = vmul.f32 %v2855_v36, %v17510_v3  ;;  %v17554_v36 = vld [vmem:[%s22140_s5 + $0x70] sm:$0xff] }
 0x2a3   :  { %v17470_v57 = vadd.f32 %v2403_v44, %v17321_v25  ;;  %v2753_v52 = vadd.f32 %v2664_v26, %v17349_v62  ;;  %v12430_v1 = vpop.f32.mrb[215].mxu0  ;;  %v12350_v23 = vpop.f32.mrb[215].mxu1  ;;  %v17487_v25 = vld [vmem:[%s22140_s5 + $0x40] sm:$0xff]  ;;  %v2949_v35 = vadd.f32 %v2948_v24, %v17465_v30  ;;  %v17537_v24 = vmul.f32 %v2856_v5, %v17522_v55 }
 0x2a4   :  { %v17503_v17 = vmul.f32 %v2853_v33, %v17487_v25  ;;  %v2857_v1 = vadd.f32 %v17381_v58, %v17393_v2  ;;  %v2858_v33 = vadd.f32 %v17381_v58, %v2751_v21  ;;  %v17544_v2 = vld [vmem:[%s22140_s5 + $0x68] sm:$0xff] }
 0x2a5   :  { %v2950_v43 = vadd.f32 %v2949_v35, %v17480_v34 }
 0x2a6   :  { %v2669_v62 = vpop.f32.mrb[216].mxu0 }
 0x2a7   :  { %v2754_v47 = vadd.f32 %v2669_v62, %v17354_v49  ;;  %v12433_v7 = vpop.f32.mrb[217].mxu0  ;;  %v2951_v32 = vadd.f32 %v2950_v43, %v17491_v31  ;;  %v2859_v43 = vadd.f32 %v17381_v58, %v2752_v27  ;;  %v17565_v27 = vld [vmem:[%s22140_s5 + $0x78] sm:$0xff] }
 0x2a8   :  { %v17548_v7 = vmul.f32 %v2857_v1, %v17533_v29 }
 0x2a9   :  { %v2952_v26 = vadd.f32 %v2951_v32, %v17503_v17  ;;  %v2860_v32 = vadd.f32 %v17381_v58, %v2753_v52  ;;  %v17569_v1 = vmul.f32 %v2859_v43, %v17554_v36 }
 0x2aa   :  { %v2674_v49 = vpop.f32.mrb[218].mxu0 }
 0x2ab   :  { %v2755_v4 = vadd.f32 %v2674_v49, %v17359_v12  ;;  %v12436_v44 = vpop.f32.mrb[219].mxu0  ;;  %v2953_v23 = vadd.f32 %v2952_v26, %v17514_v50  ;;  %v17558_v49 = vmul.f32 %v2858_v33, %v17544_v2  ;;  %v17579_v33 = vmul.f32 %v2860_v32, %v17565_v27  ;;  %v17596_v32 = vld [vmem:[%s22140_s5 + $0x90] sm:$0xff] }
 0x2ac   :  { %22205 = vst [vmem:[#allocation5_spill] sm:$0xff] %v17596_v32 }
 0x2ad   :  { %v2954_v22 = vadd.f32 %v2953_v23, %v17526_v42  ;;  %v17575_v23 = vld [vmem:[%s22140_s5 + $0x80] sm:$0xff] }
 0x2ae   :  { %v2679_v12 = vpop.f32.mrb[220].mxu0 }
 0x2af   :  { %v2756_v62 = vadd.f32 %v2679_v12, %v17364_v51  ;;  %v12439_v35 = vpop.f32.mrb[221].mxu0  ;;  %v2955_v51 = vadd.f32 %v2954_v22, %v17537_v24  ;;  %v2861_v12 = vadd.f32 %v17381_v58, %v2754_v47  ;;  %v17586_v47 = vld [vmem:[%s22140_s5 + $0x88] sm:$0xff] }
 0x2b0   :  { %v2862_v35 = vadd.f32 %v17381_v58, %v2755_v4  ;;  %22204 = vst [vmem:[#allocation4_spill] sm:$0xff] %v17586_v47 }
 0x2b1   :  { %v2956_v26 = vadd.f32 %v2955_v51, %v17548_v7  ;;  %v17590_v51 = vmul.f32 %v2861_v12, %v17575_v23 }
 0x2b2   :  { %v2684_v21 = vpop.f32.mrb[222].mxu0 }
 0x2b3   :  { %v2757_v5 = vadd.f32 %v2684_v21, %v17369_v15  ;;  %v12442_v44 = vpop.f32.mrb[223].mxu0  ;;  %v2957_v15 = vadd.f32 %v2956_v26, %v17558_v49  ;;  %v17600_v26 = vmul.f32 %v2862_v35, %v17586_v47  ;;  %v17617_v35 = vld [vmem:[%s22140_s5 + $0xa0] sm:$0xff] }
 0x2b4   :  { %v2863_v44 = vadd.f32 %v17381_v58, %v2756_v62  ;;  %v17607_v62 = vld [vmem:[%s22140_s5 + $0x98] sm:$0xff]  ;;  %22207 = vst [vmem:[#allocation7_spill] sm:$0xff] %v17617_v35 }
 0x2b5   :  { %v2958_v43 = vadd.f32 %v2957_v15, %v17569_v1  ;;  %22206 = vst [vmem:[#allocation6_spill] sm:$0xff] %v17607_v62 }
 0x2b6   :  { %v2689_v52 = vpop.f32.mrb[224].mxu0  ;;  %v17611_v0 = vmul.f32 %v2863_v44, %v17596_v32 }
 0x2b7   :  { %v2758_v22 = vadd.f32 %v2689_v52, %v17374_v8  ;;  %v12445_v21 = vpop.f32.mrb[225].mxu0  ;;  %v2959_v8 = vadd.f32 %v2958_v43, %v17579_v33  ;;  %v2864_v52 = vadd.f32 %v17381_v58, %v2757_v5 }
 0x2b9   :  { %v2960_v12 = vadd.f32 %v2959_v8, %v17590_v51  ;;  %v2865_v43 = vadd.f32 %v17381_v58, %v2758_v22  ;;  %v17628_v22 = vld [vmem:[%s22140_s5 + $0xa8] sm:$0xff] }
 0x2ba   :  { %v2694_v4 = vpop.f32.mrb[226].mxu0  ;;  %22208 = vst [vmem:[#allocation8_spill] sm:$0xff] %v17628_v22 }
 0x2bb   :  { %v2759_v15 = vadd.f32 %v2694_v4, %v17391_v46  ;;  %v12448_v21 = vpop.f32.mrb[227].mxu0  ;;  %v2961_v46 = vadd.f32 %v2960_v12, %v17600_v26  ;;  %v17621_v4 = vmul.f32 %v2864_v52, %v17607_v62  ;;  %v17632_v32 = vmul.f32 %v2865_v43, %v17617_v35  ;;  %v17638_v52 = vld [vmem:[%s22140_s5 + $0xb0] sm:$0xff]  ;;  %v17648_v43 = vld [vmem:[%s22140_s5 + $0xb8] sm:$0xff] }
 0x2bc   :  { %22209 = vst [vmem:[#allocation9_spill] sm:$0xff] %v17638_v52  ;;  %22211 = vst [vmem:[#allocation11_spill] sm:$0xff] %v17648_v43 }
 0x2bd   :  { %v2866_v21 = vadd.f32 %v17381_v58, %v2759_v15  ;;  %v2962_v44 = vadd.f32 %v2961_v46, %v17611_v0 }
 0x2be   :  { %v2699_v5 = vpop.f32.mrb[228].mxu0 }
 0x2bf   :  { %v2760_v8 = vadd.f32 %v2699_v5, %v17420_v60  ;;  %v12451_v6 = vpop.f32.mrb[229].mxu0  ;;  %v17642_v60 = vmul.f32 %v2866_v21, %v17628_v22 }
 0x2c0   :  { %v2963_v6 = vadd.f32 %v2962_v44, %v17621_v4 }
 0x2c1   :  { %v2867_v12 = vadd.f32 %v17381_v58, %v2760_v8  ;;  %22210 = vst [vmem:[#allocation10_spill] sm:$0xff] %v17642_v60 }
 0x2c2   :  { %v2704_v15 = vpop.f32.mrb[230].mxu0  ;;  %v2964_v46 = vadd.f32 %v2963_v6, %v17632_v32 }
 0x2c3   :  { %v2761_v5 = vadd.f32 %v2704_v15, %v17444_v53  ;;  %v12454_v62 = vpop.f32.mrb[231].mxu0  ;;  %v17652_v8 = vmul.f32 %v2867_v12, %v17638_v52  ;;  %v17663_v15 = vld [vmem:[%s22140_s5 + $0xc0] sm:$0xff] }
 0x2c4   :  { %v2965_v44 = vadd.f32 %v2964_v46, %v17642_v60  ;;  %v22212_v60 = vmov 0.0  }
 0x2c5   :  { %v2868_v35 = vadd.f32 %v17381_v58, %v2761_v5 }
 0x2c6   :  { %v2709_v47 = vpop.f32.mrb[232].mxu0  ;;  %v2966_v6 = vadd.f32 %v2965_v44, %v17652_v8 }
 0x2c7   :  { %v17657_v21 = vmul.f32 %v2868_v35, %v17648_v43  ;;  %v2762_v53 = vadd.f32 %v2709_v47, %v17470_v57  ;;  %v12457_v62 = vpop.f32.mrb[233].mxu0 }
 0x2c9   :  { %v2869_v12 = vadd.f32 %v17381_v58, %v2762_v53  ;;  %v2967_v5 = vadd.f32 %v2966_v6, %v17657_v21  ;;  %v22213_v58 = vmov 0.0|0.0  }
 0x2cb   :  { %v17669_v52 = vmul.f32 %v2869_v12, %v17663_v15 }
 0x2cd   :  { %v2968_v35 = vadd.f32 %v2967_v5, %v17669_v52 }
 0x2cf   :  { %v2969_v46 = vrot.slane %v2968_v35, 4 }
 0x2d1   :  { %v2970_v43 = vadd.f32 %v2969_v46, %v2968_v35 }
 0x2d3   :  { %v2971_v57 = vrot.slane %v2970_v43, 2 }
 0x2d5   :  { %v2972_v47 = vadd.f32 %v2971_v57, %v2970_v43 }
 0x2d7   :  { %v2973_v62 = vrot.slane %v2972_v47, 1 }
 0x2d9   :  { %v2974_v22 = vadd.f32 %v2973_v62, %v2972_v47 }
 0x2db   :  { %12491 = vmatmul.mubr.f32.vlgmr.msra.gmra.mrb[216].mxu1 %v2974_v22 }
 0x2dc   :  { %14836 = vmatpush3.bf16.msra.mxu1 %v17114_v41  ;;  %12525 = vmatprep.mubr.msk.f32.mxu1 %vm15438_vm0, %v22212_v60  ;;  %v3062_v41 = vlaneseq }
 0x2dd   :  { %14837 = vmatprep.subr.bf16.mxu1 %v22213_v58 }
 0x2e0   :  { %14839 = vmatpush3.bf16.msra.mxu1 %v17136_v40  ;;  %v3063_v40 = vshrl.u32 %v3062_v41, 7 }
 0x2e1   :  { %14840 = vmatprep.subr.bf16.mxu1 %v22213_v58 }
 0x2e4   :  { %14842 = vmatpush3.bf16.msra.mxu1 %v17164_v45 }
 0x2e5   :  { %14843 = vmatprep.subr.bf16.mxu1 %v22213_v58 }
 0x2e8   :  { %14845 = vmatpush3.bf16.msra.mxu1 %v17198_v14 }
 0x2e9   :  { %14846 = vmatprep.subr.bf16.mxu1 %v22213_v58 }
 0x2ec   :  { %14848 = vmatpush3.bf16.msra.mxu1 %v17226_v48  ;;  %v17690_v48 = vsub.s32 0, %v3063_v40 }
 0x2ed   :  { %14849 = vmatprep.subr.bf16.mxu1 %v22213_v58 }
 0x2ee   :  { %22214 = vst [vmem:[#allocation12_spill] sm:$0xff] %v17690_v48 }
 0x2f0   :  { %14851 = vmatpush3.bf16.msra.mxu1 %v17254_v59 }
 0x2f1   :  { %14852 = vmatprep.subr.bf16.mxu1 %v22213_v58 }
 0x2f4   :  { %14854 = vmatpush3.bf16.msra.mxu1 %v17282_v20 }
 0x2f5   :  { %14855 = vmatprep.subr.bf16.mxu1 %v22213_v58 }
 0x2f8   :  { %14857 = vmatpush3.bf16.msra.mxu1 %v17304_v61 }
 0x2f9   :  { %14858 = vmatprep.subr.bf16.mxu1 %v22213_v58 }
 0x3ae   :  { %v3057_v45 = vpop.f32.mrb[216].mxu1 }
 0x3af   :  { %v12492_v14 = vpop.f32.mrb[217].mxu1  ;;  %v3061_v22 = vmul.f32 0.0009765625, %v3057_v45 }
 0x3b1   :  { %v17693_v43 = vrot.slane %v3061_v22, %v17690_v48 }
 0x3b3   :  { %v3066_v59 = vsub.f32 %v17424_v38, %v17693_v43  ;;  %v3067_v20 = vsub.f32 %v17410_v54, %v17693_v43  ;;  %v3068_v61 = vsub.f32 %v17427_v9, %v17693_v43  ;;  %v3069_v6 = vsub.f32 %v17434_v10, %v17693_v43 }
 0x3b4   :  { %v3070_v12 = vsub.f32 %v17454_v18, %v17693_v43  ;;  %v3071_v5 = vsub.f32 %v17465_v30, %v17693_v43  ;;  %v3072_v10 = vsub.f32 %v17480_v34, %v17693_v43  ;;  %v3073_v47 = vsub.f32 %v17491_v31, %v17693_v43 }
 0x3b5   :  { %v17702_v44 = vmul.f32 %v3066_v59, %v17402_v37  ;;  %v17705_v53 = vmul.f32 %v3067_v20, %v17388_v13  ;;  %v17712_v38 = vmul.f32 %v3068_v61, %v17407_v16  ;;  %v17721_v35 = vmul.f32 %v3069_v6, %v17417_v28 }
 0x3b6   :  { %v17726_v18 = vmul.f32 %v3070_v12, %v17439_v11  ;;  %v17733_v62 = vmul.f32 %v3071_v5, %v17451_v56  ;;  %v3074_v34 = vsub.f32 %v17503_v17, %v17693_v43  ;;  %v17740_v40 = vmul.f32 %v3072_v10, %v17462_v63 }
 0x3b7   :  { %v3166_v54 = vmul.f32 %v17702_v44, %v17702_v44  ;;  %v3167_v9 = vmul.f32 %v17705_v53, %v17705_v53  ;;  %v3168_v46 = vmul.f32 %v17712_v38, %v17712_v38  ;;  %v3169_v30 = vmul.f32 %v17721_v35, %v17721_v35 }
 0x3b8   :  { %v3170_v45 = vmul.f32 %v17726_v18, %v17726_v18  ;;  %v3075_v31 = vsub.f32 %v17514_v50, %v17693_v43  ;;  %v17747_v22 = vmul.f32 %v3073_v47, %v17476_v19  ;;  %v3171_v59 = vmul.f32 %v17733_v62, %v17733_v62 }
 0x3b9   :  { %v3191_v57 = vadd.f32 %v3167_v9, %v3166_v54  ;;  %v3076_v17 = vsub.f32 %v17526_v42, %v17693_v43  ;;  %v17754_v61 = vmul.f32 %v3074_v34, %v17487_v25  ;;  %v3172_v6 = vmul.f32 %v17740_v40, %v17740_v40 }
 0x3ba   :  { %v3077_v50 = vsub.f32 %v17537_v24, %v17693_v43  ;;  %v17761_v54 = vmul.f32 %v3075_v31, %v17499_v39  ;;  %v3173_v9 = vmul.f32 %v17747_v22, %v17747_v22  ;;  %v3078_v42 = vsub.f32 %v17548_v7, %v17693_v43 }
 0x3bb   :  { %v3192_v41 = vadd.f32 %v3191_v57, %v3168_v46  ;;  %v17768_v10 = vmul.f32 %v3076_v17, %v17510_v3  ;;  %v3174_v46 = vmul.f32 %v17754_v61, %v17754_v61  ;;  %v3079_v24 = vsub.f32 %v17558_v49, %v17693_v43 }
 0x3bc   :  { %v17775_v47 = vmul.f32 %v3077_v50, %v17522_v55  ;;  %v3080_v7 = vsub.f32 %v17569_v1, %v17693_v43  ;;  %v17782_v34 = vmul.f32 %v3078_v42, %v17533_v29  ;;  %v3081_v49 = vsub.f32 %v17579_v33, %v17693_v43 }
 0x3bd   :  { %v3193_v14 = vadd.f32 %v3192_v41, %v3169_v30  ;;  %v3175_v30 = vmul.f32 %v17761_v54, %v17761_v54  ;;  %v17789_v31 = vmul.f32 %v3079_v24, %v17544_v2  ;;  %v3082_v1 = vsub.f32 %v17590_v51, %v17693_v43  ;;  %v22215_v24 = vld [vmem:[#allocation4_spill] sm:$0xff] }
 0x3be   :  { %v17796_v17 = vmul.f32 %v3080_v7, %v17554_v36  ;;  %v3083_v33 = vsub.f32 %v17600_v26, %v17693_v43  ;;  %v17803_v50 = vmul.f32 %v3081_v49, %v17565_v27  ;;  %v3084_v51 = vsub.f32 %v17611_v0, %v17693_v43 }
 0x3bf   :  { %v3194_v20 = vadd.f32 %v3193_v14, %v3170_v45  ;;  %v3176_v45 = vmul.f32 %v17768_v10, %v17768_v10  ;;  %v17810_v42 = vmul.f32 %v3082_v1, %v17575_v23  ;;  %v3085_v26 = vsub.f32 %v17621_v4, %v17693_v43 }
 0x3c0   :  { %v3086_v0 = vsub.f32 %v17632_v32, %v17693_v43  ;;  %v3088_v32 = vsub.f32 %v17652_v8, %v17693_v43  ;;  %v3090_v8 = vsub.f32 %v17669_v52, %v17693_v43 }
 0x3c1   :  { %v3195_v12 = vadd.f32 %v3194_v20, %v3171_v59  ;;  %v3177_v59 = vmul.f32 %v17775_v47, %v17775_v47 }
 0x3c3   :  { %v3196_v5 = vadd.f32 %v3195_v12, %v3172_v6  ;;  %v3178_v6 = vmul.f32 %v17782_v34, %v17782_v34 }
 0x3c5   :  { %v3197_v57 = vadd.f32 %v3196_v5, %v3173_v9  ;;  %v3179_v9 = vmul.f32 %v17789_v31, %v17789_v31 }
 0x3c7   :  { %v3198_v41 = vadd.f32 %v3197_v57, %v3174_v46  ;;  %v3180_v46 = vmul.f32 %v17796_v17, %v17796_v17 }
 0x3c9   :  { %v3199_v14 = vadd.f32 %v3198_v41, %v3175_v30  ;;  %v17817_v30 = vmul.f32 %v3083_v33, %v22215_v24  ;;  %v3181_v41 = vmul.f32 %v17803_v50, %v17803_v50  ;;  %v22219_v33 = vld [vmem:[#allocation7_spill] sm:$0xff] }
 0x3cb   :  { %v3200_v20 = vadd.f32 %v3199_v14, %v3176_v45  ;;  %v22216_v45 = vld [vmem:[#allocation5_spill] sm:$0xff]  ;;  %v3182_v14 = vmul.f32 %v17810_v42, %v17810_v42 }
 0x3cc   :  { %v17824_v23 = vmul.f32 %v3084_v51, %v22216_v45 }
 0x3cd   :  { %v3201_v12 = vadd.f32 %v3200_v20, %v3177_v59  ;;  %v22217_v59 = vld [vmem:[#allocation10_spill] sm:$0xff] }
 0x3ce   :  { %v3087_v4 = vsub.f32 %v22217_v59, %v17693_v43  ;;  %v22218_v20 = vld [vmem:[#allocation6_spill] sm:$0xff] }
 0x3cf   :  { %v3202_v5 = vadd.f32 %v3201_v12, %v3178_v6  ;;  %v17831_v1 = vmul.f32 %v3085_v26, %v22218_v20  ;;  %v3183_v6 = vmul.f32 %v17817_v30, %v17817_v30  ;;  %v17862_v20 = vmul.f32 %v3090_v8, %v17663_v15  ;;  %v3523_v8 = vld [vmem:[%s22136_s1] sm:$0xff] }
 0x3d1   :  { %v3203_v57 = vadd.f32 %v3202_v5, %v3179_v9  ;;  %v17838_v9 = vmul.f32 %v3086_v0, %v22219_v33  ;;  %v3184_v5 = vmul.f32 %v17824_v23, %v17824_v23  ;;  %v3185_v24 = vmul.f32 %v17831_v1, %v17831_v1 }
 0x3d3   :  { %v3204_v7 = vadd.f32 %v3203_v57, %v3180_v46  ;;  %v3089_v46 = vsub.f32 %v17657_v21, %v17693_v43  ;;  %v22220_v57 = vld [vmem:[#allocation8_spill] sm:$0xff]  ;;  %v3186_v45 = vmul.f32 %v17838_v9, %v17838_v9 }
 0x3d4   :  { %v17845_v26 = vmul.f32 %v3087_v4, %v22220_v57 }
 0x3d5   :  { %v3205_v49 = vadd.f32 %v3204_v7, %v3181_v41  ;;  %v22221_v7 = vld [vmem:[#allocation9_spill] sm:$0xff] }
 0x3d6   :  { %v17852_v0 = vmul.f32 %v3088_v32, %v22221_v7  ;;  %v3187_v21 = vmul.f32 %v17845_v26, %v17845_v26  ;;  %v3190_v32 = vmul.f32 %v17862_v20, %v17862_v20 }
 0x3d7   :  { %v3206_v12 = vadd.f32 %v3205_v49, %v3182_v14  ;;  %v22222_v49 = vld [vmem:[#allocation11_spill] sm:$0xff] }
 0x3d8   :  { %v17857_v59 = vmul.f32 %v3089_v46, %v22222_v49  ;;  %v3188_v52 = vmul.f32 %v17852_v0, %v17852_v0  ;;  %v3524_v49 = vld [vmem:[%s22136_s1 + $0x8] sm:$0xff] }
 0x3d9   :  { %v3207_v51 = vadd.f32 %v3206_v12, %v3183_v6 }
 0x3da   :  { %v3189_v6 = vmul.f32 %v17857_v59, %v17857_v59 }
 0x3db   :  { %v3208_v41 = vadd.f32 %v3207_v51, %v3184_v5 }
 0x3dd   :  { %v3209_v14 = vadd.f32 %v3208_v41, %v3185_v24 }
 0x3df   :  { %v3210_v4 = vadd.f32 %v3209_v14, %v3186_v45 }
 0x3e1   :  { %v3211_v43 = vadd.f32 %v3210_v4, %v3187_v21  ;;  %v14859_v21 = vpack.c.bf16 %v3524_v49, %v3523_v8  ;;  %v3779_v4 = vld [vmem:[%s22136_s1 + $0x80] sm:$0xff]  ;;  %v3529_v49 = vld [vmem:[%s22136_s1 + $0x30] sm:$0xff] }
 0x3e3   :  { %v3212_v12 = vadd.f32 %v3211_v43, %v3188_v52  ;;  %v3780_v52 = vld [vmem:[%s22136_s1 + $0x88] sm:$0xff] }
 0x3e4   :  { %v14883_v43 = vpack.c.bf16 %v3780_v52, %v3779_v4  ;;  %v3785_v52 = vld [vmem:[%s22136_s1 + $0xb0] sm:$0xff] }
 0x3e5   :  { %v3213_v5 = vadd.f32 %v3212_v12, %v3189_v6  ;;  %v3525_v6 = vld [vmem:[%s22136_s1 + $0x10] sm:$0xff]  ;;  %v3526_v12 = vld [vmem:[%s22136_s1 + $0x18] sm:$0xff] }
 0x3e6   :  { %14884 = vmatpush3.bf16.msra.mxu0 %v14883_v43  ;;  %v3786_v43 = vld [vmem:[%s22136_s1 + $0xb8] sm:$0xff] }
 0x3e7   :  { %v3214_v51 = vadd.f32 %v3213_v5, %v3190_v32  ;;  %14885 = vmatprep.subr.bf16.mxu0 %v22213_v58  ;;  %v14862_v32 = vpack.c.bf16 %v3526_v12, %v3525_v6  ;;  %v3781_v5 = vld [vmem:[%s22136_s1 + $0x90] sm:$0xff]  ;;  %v14892_v6 = vpack.c.bf16 %v3786_v43, %v3785_v52  ;;  %v3531_v12 = vld [vmem:[%s22136_s1 + $0x40] sm:$0xff]  ;;  %v3792_v43 = vld [vmem:[%s22136_s1 + $0xe8] sm:$0xff] }
 0x3e8   :  { %v3791_v52 = vld [vmem:[%s22136_s1 + $0xe0] sm:$0xff] }
 0x3e9   :  { %v3215_v46 = vrot.slane %v3214_v51, 4 }
 0x3eb   :  { %v3216_v24 = vadd.f32 %v3215_v46, %v3214_v51  ;;  %v3782_v51 = vld [vmem:[%s22136_s1 + $0x98] sm:$0xff] }
 0x3ec   :  { %v14886_v46 = vpack.c.bf16 %v3782_v51, %v3781_v5  ;;  %v3787_v51 = vld [vmem:[%s22136_s1 + $0xc0] sm:$0xff] }
 0x3ed   :  { %v3217_v41 = vrot.slane %v3216_v24, 2 }
 0x3ee   :  { %14887 = vmatpush3.bf16.msra.mxu0 %v14886_v46  ;;  %v3788_v46 = vld [vmem:[%s22136_s1 + $0xc8] sm:$0xff] }
 0x3ef   :  { %v3218_v45 = vadd.f32 %v3217_v41, %v3216_v24  ;;  %v3527_v24 = vld [vmem:[%s22136_s1 + $0x20] sm:$0xff]  ;;  %v3528_v41 = vld [vmem:[%s22136_s1 + $0x28] sm:$0xff]  ;;  %14888 = vmatprep.subr.bf16.mxu0 %v22213_v58 }
 0x3f1   :  { %v3219_v14 = vrot.slane %v3218_v45, 1 }
 0x3f3   :  { %v3220_v15 = vadd.f32 %v3219_v14, %v3218_v45  ;;  %v14865_v45 = vpack.c.bf16 %v3528_v41, %v3527_v24  ;;  %v3783_v14 = vld [vmem:[%s22136_s1 + $0xa0] sm:$0xff]  ;;  %v3533_v24 = vld [vmem:[%s22136_s1 + $0x50] sm:$0xff]  ;;  %v14895_v41 = vpack.c.bf16 %v3788_v46, %v3787_v51  ;;  %v3794_v46 = vld [vmem:[%s22136_s1 + $0xf8] sm:$0xff] }
 0x3f4   :  { %v3793_v51 = vld [vmem:[%s22136_s1 + $0xf0] sm:$0xff] }
 0x3f5   :  { %12526 = vmatmul.mubr.f32.vlgmr.msra.gmra.mrb[218].mxu1 %v3220_v15  ;;  %v3784_v15 = vld [vmem:[%s22136_s1 + $0xa8] sm:$0xff] }
 0x3f6   :  { %12560 = vmatprep.mubr.msk.f32.mxu1 %vm15438_vm0, %v22212_v60  ;;  %14860 = vmatpush3.bf16.msra.mxu1 %v14859_v21  ;;  %v14889_v8 = vpack.c.bf16 %v3784_v15, %v3783_v14  ;;  %v3530_v21 = vld [vmem:[%s22136_s1 + $0x38] sm:$0xff]  ;;  %v3789_v14 = vld [vmem:[%s22136_s1 + $0xd0] sm:$0xff] }
 0x3f7   :  { %14861 = vmatprep.subr.bf16.mxu1 %v22213_v58  ;;  %v14868_v4 = vpack.c.bf16 %v3530_v21, %v3529_v49  ;;  %v3790_v15 = vld [vmem:[%s22136_s1 + $0xd8] sm:$0xff]  ;;  %v3535_v21 = vld [vmem:[%s22136_s1 + $0x60] sm:$0xff] }
 0x3f8   :  { %14890 = vmatpush3.bf16.msra.mxu0 %v14889_v8  ;;  %v14898_v49 = vpack.c.bf16 %v3790_v15, %v3789_v14  ;;  %v4086_v14 = vld [vmem:[%s22136_s1 + $0x108] sm:$0xff] }
 0x3f9   :  { %14891 = vmatprep.subr.bf16.mxu0 %v22213_v58  ;;  %v3498_v15 = vld [vmem:[#allocation2 + $0x5] sm:$0xff] }
 0x3fa   :  { %14863 = vmatpush3.bf16.msra.mxu1 %v14862_v32  ;;  %v3532_v32 = vld [vmem:[%s22136_s1 + $0x48] sm:$0xff] }
 0x3fb   :  { %14864 = vmatprep.subr.bf16.mxu1 %v22213_v58  ;;  %v14871_v5 = vpack.c.bf16 %v3532_v32, %v3531_v12  ;;  %v14901_v12 = vpack.c.bf16 %v3792_v43, %v3791_v52  ;;  %v3537_v32 = vld [vmem:[%s22136_s1 + $0x70] sm:$0xff]  ;;  %v4089_v43 = vld [vmem:[%s22136_s1 + $0x120] sm:$0xff] }
 0x3fc   :  { %14893 = vmatpush3.bf16.msra.mxu0 %v14892_v6 }
 0x3fd   :  { %14894 = vmatprep.subr.bf16.mxu0 %v22213_v58 }
 0x3fe   :  { %14866 = vmatpush3.bf16.msra.mxu1 %v14865_v45  ;;  %v3534_v45 = vld [vmem:[%s22136_s1 + $0x58] sm:$0xff] }
 0x3ff   :  { %14867 = vmatprep.subr.bf16.mxu1 %v22213_v58  ;;  %v14874_v8 = vpack.c.bf16 %v3534_v45, %v3533_v24  ;;  %v4085_v45 = vld [vmem:[%s22136_s1 + $0x100] sm:$0xff] }
 0x400   :  { %14896 = vmatpush3.bf16.msra.mxu0 %v14895_v41  ;;  %v14904_v41 = vpack.c.bf16 %v3794_v46, %v3793_v51  ;;  %v4093_v46 = vld [vmem:[%s22136_s1 + $0x140] sm:$0xff] }
 0x401   :  { %14897 = vmatprep.subr.bf16.mxu0 %v22213_v58 }
 0x402   :  { %14869 = vmatpush3.bf16.msra.mxu1 %v14868_v4  ;;  %v3536_v4 = vld [vmem:[%s22136_s1 + $0x68] sm:$0xff] }
 0x403   :  { %14870 = vmatprep.subr.bf16.mxu1 %v22213_v58  ;;  %v14877_v6 = vpack.c.bf16 %v3536_v4, %v3535_v21  ;;  %v4087_v21 = vld [vmem:[%s22136_s1 + $0x110] sm:$0xff]  ;;  %v4088_v4 = vld [vmem:[%s22136_s1 + $0x118] sm:$0xff] }
 0x404   :  { %14899 = vmatpush3.bf16.msra.mxu0 %v14898_v49  ;;  %v3754_v49 = vld [vmem:[#allocation2 + $0x6] sm:$0xff]  ;;  %v14910_v52 = vpack.c.bf16 %v4088_v4, %v4087_v21  ;;  %v4393_v4 = vld [vmem:[%s22136_s1 + $0x190] sm:$0xff] }
 0x405   :  { %14900 = vmatprep.subr.bf16.mxu0 %v22213_v58 }
 0x406   :  { %14872 = vmatpush3.bf16.msra.mxu1 %v14871_v5  ;;  %v3538_v5 = vld [vmem:[%s22136_s1 + $0x78] sm:$0xff] }
 0x407   :  { %14873 = vmatprep.subr.bf16.mxu1 %v22213_v58  ;;  %v14880_v24 = vpack.c.bf16 %v3538_v5, %v3537_v32  ;;  %v4091_v32 = vld [vmem:[%s22136_s1 + $0x130] sm:$0xff]  ;;  %v4092_v5 = vld [vmem:[%s22136_s1 + $0x138] sm:$0xff] }
 0x408   :  { %14902 = vmatpush3.bf16.msra.mxu0 %v14901_v12  ;;  %v14916_v51 = vpack.c.bf16 %v4092_v5, %v4091_v32  ;;  %v4395_v32 = vld [vmem:[%s22136_s1 + $0x1a0] sm:$0xff] }
 0x409   :  { %14903 = vmatprep.subr.bf16.mxu0 %v22213_v58 }
 0x40a   :  { %14875 = vmatpush3.bf16.msra.mxu1 %v14874_v8  ;;  %v14907_v8 = vpack.c.bf16 %v4086_v14, %v4085_v45  ;;  %v4095_v45 = vld [vmem:[%s22136_s1 + $0x150] sm:$0xff]  ;;  %v4096_v14 = vld [vmem:[%s22136_s1 + $0x158] sm:$0xff] }
 0x40b   :  { %14876 = vmatprep.subr.bf16.mxu1 %v22213_v58 }
 0x40c   :  { %14905 = vmatpush3.bf16.msra.mxu0 %v14904_v41 }
 0x40d   :  { %14930 = vmatprep.subr.bf16.mxu0 %v22213_v58 }
 0x40e   :  { %14878 = vmatpush3.bf16.msra.mxu1 %v14877_v6  ;;  %v4090_v6 = vld [vmem:[%s22136_s1 + $0x128] sm:$0xff] }
 0x40f   :  { %14879 = vmatprep.subr.bf16.mxu1 %v22213_v58  ;;  %12668 = vmatmul.mubr.f32.vlgmr.msra.gmra.mrb[234].mxu0 %v3754_v49  ;;  %v14913_v12 = vpack.c.bf16 %v4090_v6, %v4089_v43  ;;  %v4392_v49 = vld [vmem:[%s22136_s1 + $0x188] sm:$0xff]  ;;  %v4097_v6 = vld [vmem:[%s22136_s1 + $0x160] sm:$0xff] }
 0x410   :  { %12670 = vmatprep.mubr.msk.f32.mxu0 %vm15438_vm0, %v22212_v60 }
 0x412   :  { %14881 = vmatpush3.bf16.msra.mxu1 %v14880_v24  ;;  %v4094_v24 = vld [vmem:[%s22136_s1 + $0x148] sm:$0xff] }
 0x413   :  { %14906 = vmatprep.subr.bf16.mxu1 %v22213_v58  ;;  %v14919_v41 = vpack.c.bf16 %v4094_v24, %v4093_v46  ;;  %v4397_v24 = vld [vmem:[%s22136_s1 + $0x1b0] sm:$0xff] }
 0x415   :  { %12561 = vmatmul.mubr.f32.vlgmr.msra.gmra.mrb[220].mxu1 %v3498_v15  ;;  %v14922_v15 = vpack.c.bf16 %v4096_v14, %v4095_v45  ;;  %v4399_v14 = vld [vmem:[%s22136_s1 + $0x1c0] sm:$0xff] }
 0x416   :  { %14908 = vmatpush3.bf16.msra.mxu1 %v14907_v8  ;;  %12563 = vmatprep.mubr.msk.f32.mxu1 %vm15438_vm0, %v22212_v60  ;;  %v4391_v8 = vld [vmem:[%s22136_s1 + $0x180] sm:$0xff] }
 0x417   :  { %14909 = vmatprep.subr.bf16.mxu1 %v22213_v58  ;;  %v14931_v21 = vpack.c.bf16 %v4392_v49, %v4391_v8  ;;  %v4099_v49 = vld [vmem:[%s22136_s1 + $0x170] sm:$0xff] }
 0x419   :  { %14932 = vmatpush3.bf16.msra.mxu0 %v14931_v21  ;;  %v4100_v21 = vld [vmem:[%s22136_s1 + $0x178] sm:$0xff] }
 0x41a   :  { %14911 = vmatpush3.bf16.msra.mxu1 %v14910_v52  ;;  %14933 = vmatprep.subr.bf16.mxu0 %v22213_v58  ;;  %v4394_v52 = vld [vmem:[%s22136_s1 + $0x198] sm:$0xff] }
 0x41b   :  { %14912 = vmatprep.subr.bf16.mxu1 %v22213_v58  ;;  %v14934_v43 = vpack.c.bf16 %v4394_v52, %v4393_v4  ;;  %v4401_v4 = vld [vmem:[%s22136_s1 + $0x1d0] sm:$0xff]  ;;  %v14928_v52 = vpack.c.bf16 %v4100_v21, %v4099_v49 }
 0x41d   :  { %14935 = vmatpush3.bf16.msra.mxu0 %v14934_v43  ;;  %v4402_v43 = vld [vmem:[%s22136_s1 + $0x1d8] sm:$0xff] }
 0x41e   :  { %14914 = vmatpush3.bf16.msra.mxu1 %v14913_v12  ;;  %v4098_v12 = vld [vmem:[%s22136_s1 + $0x168] sm:$0xff]  ;;  %14936 = vmatprep.subr.bf16.mxu0 %v22213_v58 }
 0x41f   :  { %14915 = vmatprep.subr.bf16.mxu1 %v22213_v58  ;;  %v14925_v5 = vpack.c.bf16 %v4098_v12, %v4097_v6  ;;  %v14946_v6 = vpack.c.bf16 %v4402_v43, %v4401_v4  ;;  %v4403_v12 = vld [vmem:[%s22136_s1 + $0x1e0] sm:$0xff] }
 0x422   :  { %14917 = vmatpush3.bf16.msra.mxu1 %v14916_v51  ;;  %v4396_v51 = vld [vmem:[%s22136_s1 + $0x1a8] sm:$0xff] }
 0x423   :  { %14918 = vmatprep.subr.bf16.mxu1 %v22213_v58  ;;  %v14937_v46 = vpack.c.bf16 %v4396_v51, %v4395_v32  ;;  %v4404_v32 = vld [vmem:[%s22136_s1 + $0x1e8] sm:$0xff] }
 0x425   :  { %14938 = vmatpush3.bf16.msra.mxu0 %v14937_v46 }
 0x426   :  { %14920 = vmatpush3.bf16.msra.mxu1 %v14919_v41  ;;  %v4398_v41 = vld [vmem:[%s22136_s1 + $0x1b8] sm:$0xff]  ;;  %14939 = vmatprep.subr.bf16.mxu0 %v22213_v58 }
 0x427   :  { %14921 = vmatprep.subr.bf16.mxu1 %v22213_v58  ;;  %v14940_v45 = vpack.c.bf16 %v4398_v41, %v4397_v24  ;;  %v4405_v41 = vld [vmem:[%s22136_s1 + $0x1f0] sm:$0xff] }
 0x429   :  { %14941 = vmatpush3.bf16.msra.mxu0 %v14940_v45  ;;  %v4406_v45 = vld [vmem:[%s22136_s1 + $0x1f8] sm:$0xff] }
 0x42a   :  { %14923 = vmatpush3.bf16.msra.mxu1 %v14922_v15  ;;  %v4400_v15 = vld [vmem:[%s22136_s1 + $0x1c8] sm:$0xff]  ;;  %14942 = vmatprep.subr.bf16.mxu0 %v22213_v58 }
 0x42b   :  { %14924 = vmatprep.subr.bf16.mxu1 %v22213_v58  ;;  %v14943_v8 = vpack.c.bf16 %v4400_v15, %v4399_v14  ;;  %v14952_v15 = vpack.c.bf16 %v4406_v45, %v4405_v41 }
 0x42d   :  { %14944 = vmatpush3.bf16.msra.mxu0 %v14943_v8  ;;  %v3310_v8 = vld [vmem:[%s22141_s3] sm:$0x1] }
 0x42e   :  { %14926 = vmatpush3.bf16.msra.mxu1 %v14925_v5  ;;  %14945 = vmatprep.subr.bf16.mxu0 %v22213_v58  ;;  %v14949_v5 = vpack.c.bf16 %v4404_v32, %v4403_v12 }
 0x42f   :  { %14927 = vmatprep.subr.bf16.mxu1 %v22213_v58 }
 0x431   :  { %14947 = vmatpush3.bf16.msra.mxu0 %v14946_v6 }
 0x432   :  { %14929 = vmatpush3.bf16.msra.mxu1 %v14928_v52  ;;  %14948 = vmatprep.subr.bf16.mxu0 %v22213_v58  ;;  %v18109_v52 = vld [vmem:[%s22142_s4] ss:$0 sm:$0xff] }
 0x433   :  { %14954 = vmatprep.subr.bf16.mxu1 %v22213_v58 }
 0x435   :  { %14950 = vmatpush3.bf16.msra.mxu0 %v14949_v5 }
 0x436   :  { %14951 = vmatprep.subr.bf16.mxu0 %v22213_v58 }
 0x439   :  { %14953 = vmatpush3.bf16.msra.mxu0 %v14952_v15  ;;  %v3424_v15 = vld [vmem:[%s22137_s0 + $0x18] sm:$0xff] }
 0x43a   :  { %14978 = vmatprep.subr.bf16.mxu0 %v22213_v58 }
 0x4c8   :  { %v3303_v51 = vpop.f32.mrb[218].mxu1 }
 0x4c9   :  { %v3307_v46 = vmul.f32 0.0009765625, %v3303_v51  ;;  %v12527_v24 = vpop.f32.mrb[219].mxu1 }
 0x4cb   :  { %v3308_v14 = vadd.f32 1e-05, %v3307_v46 }
 0x4cd   :  { %15405 = vrsqrt.f32 %v3308_v14 }
 0x4d7   :  { %v15406_v49 = vpop.eup %15405 }
 0x4d8   :  { %v3311_v21 = vmul.f32 %v15406_v49, %v3310_v8  ;;  %v3425_v49 = vld [vmem:[%s22137_s0 + $0x20] sm:$0xff] }
 0x4da   :  { %v18104_v4 = vrot.slane %v3311_v21, %v17690_v48 }
 0x4dc   :  { %v3316_v43 = vmul.f32 %v18104_v4, %v17702_v44  ;;  %v3317_v6 = vmul.f32 %v18104_v4, %v17705_v53  ;;  %v3318_v12 = vmul.f32 %v18104_v4, %v17712_v38  ;;  %v3319_v32 = vmul.f32 %v18104_v4, %v17721_v35 }
 0x4dd   :  { %v3320_v5 = vmul.f32 %v18104_v4, %v17726_v18  ;;  %v3321_v51 = vmul.f32 %v18104_v4, %v17733_v62  ;;  %v3322_v46 = vmul.f32 %v18104_v4, %v17740_v40  ;;  %v3323_v44 = vmul.f32 %v18104_v4, %v17747_v22  ;;  %v3423_v18 = vld [vmem:[%s22137_s0 + $0x10] sm:$0xff] }
 0x4de   :  { %v3348_v53 = vadd.f32 %v18109_v52, %v3316_v43  ;;  %v3349_v24 = vadd.f32 %v18109_v52, %v3317_v6  ;;  %v3350_v38 = vadd.f32 %v18109_v52, %v3318_v12  ;;  %v3351_v35 = vadd.f32 %v18109_v52, %v3319_v32  ;;  %v3426_v43 = vld [vmem:[%s22137_s0 + $0x28] sm:$0xff]  ;;  %v3427_v12 = vld [vmem:[%s22137_s0 + $0x30] sm:$0xff] }
 0x4df   :  { %v3352_v62 = vadd.f32 %v18109_v52, %v3320_v5  ;;  %v3353_v41 = vadd.f32 %v18109_v52, %v3321_v51  ;;  %v3354_v40 = vadd.f32 %v18109_v52, %v3322_v46  ;;  %v3355_v22 = vadd.f32 %v18109_v52, %v3323_v44 }
 0x4e0   :  { %v3373_v45 = vmax.f32 %v3348_v53, 0.0  ;;  %v3374_v14 = vmax.f32 %v3349_v24, 0.0  ;;  %v3375_v8 = vmax.f32 %v3350_v38, 0.0  ;;  %v3376_v21 = vmax.f32 %v3351_v35, 0.0  ;;  %v3428_v38 = vld [vmem:[%s22137_s0 + $0x38] sm:$0xff]  ;;  %v3429_v35 = vld [vmem:[%s22137_s0 + $0x40] sm:$0xff] }
 0x4e1   :  { %v3377_v6 = vmax.f32 %v3352_v62, 0.0  ;;  %v3378_v32 = vmax.f32 %v3353_v41, 0.0  ;;  %v3379_v5 = vmax.f32 %v3354_v40, 0.0  ;;  %v3380_v51 = vmax.f32 %v3355_v22, 0.0  ;;  %v3430_v62 = vld [vmem:[%s22137_s0 + $0x48] sm:$0xff] }
 0x4e2   :  { %v3398_v46 = vmul.f32 %v3373_v45, %v17402_v37  ;;  %v3399_v44 = vmul.f32 %v3374_v14, %v17388_v13  ;;  %v3400_v53 = vmul.f32 %v3375_v8, %v17407_v16  ;;  %v3401_v24 = vmul.f32 %v3376_v21, %v17417_v28 }
 0x4e3   :  { %v3402_v37 = vmul.f32 %v3377_v6, %v17439_v11  ;;  %v3403_v13 = vmul.f32 %v3378_v32, %v17451_v56  ;;  %v3404_v16 = vmul.f32 %v3379_v5, %v17462_v63  ;;  %v3405_v28 = vmul.f32 %v3380_v51, %v17476_v19  ;;  %v3432_v32 = vld [vmem:[%s22137_s0 + $0x58] sm:$0xff] }
 0x4e4   :  { %v3448_v41 = vadd.f32 %v3423_v18, %v3398_v46  ;;  %v3449_v40 = vadd.f32 %v3424_v15, %v3399_v44  ;;  %v3450_v22 = vadd.f32 %v3425_v49, %v3400_v53  ;;  %v3451_v45 = vadd.f32 %v3426_v43, %v3401_v24  ;;  %v3433_v46 = vld [vmem:[%s22137_s0 + $0x60] sm:$0xff]  ;;  %v3434_v44 = vld [vmem:[%s22137_s0 + $0x68] sm:$0xff] }
 0x4e5   :  { %v3452_v14 = vadd.f32 %v3427_v12, %v3402_v37  ;;  %v3453_v8 = vadd.f32 %v3428_v38, %v3403_v13  ;;  %v3454_v21 = vadd.f32 %v3429_v35, %v3404_v16  ;;  %v3455_v48 = vadd.f32 %v3430_v62, %v3405_v28  ;;  %v3435_v28 = vld [vmem:[%s22137_s0 + $0x70] sm:$0xff] }
 0x4e6   :  { %3473 = vst [vmem:[#allocation2 + $0x10] sm:$0xff] %v3448_v41  ;;  %3474 = vst [vmem:[#allocation2 + $0x18] sm:$0xff] %v3449_v40  ;;  %v3324_v11 = vmul.f32 %v18104_v4, %v17754_v61  ;;  %v3325_v56 = vmul.f32 %v18104_v4, %v17761_v54  ;;  %v3326_v63 = vmul.f32 %v18104_v4, %v17768_v10  ;;  %v3436_v41 = vld [vmem:[%s22137_s0 + $0x78] sm:$0xff]  ;;  %v3437_v40 = vld [vmem:[%s22137_s0 + $0x80] sm:$0xff] }
 0x4e7   :  { %3475 = vst [vmem:[#allocation2 + $0x20] sm:$0xff] %v3450_v22  ;;  %3476 = vst [vmem:[#allocation2 + $0x28] sm:$0xff] %v3451_v45  ;;  %v3327_v19 = vmul.f32 %v18104_v4, %v17775_v47  ;;  %v3328_v18 = vmul.f32 %v18104_v4, %v17782_v34  ;;  %v3329_v15 = vmul.f32 %v18104_v4, %v17789_v31 }
 0x4e8   :  { %3477 = vst [vmem:[#allocation2 + $0x30] sm:$0xff] %v3452_v14  ;;  %3478 = vst [vmem:[#allocation2 + $0x38] sm:$0xff] %v3453_v8  ;;  %v3330_v61 = vmul.f32 %v18104_v4, %v17796_v17  ;;  %v3331_v54 = vmul.f32 %v18104_v4, %v17803_v50  ;;  %v3356_v10 = vadd.f32 %v18109_v52, %v3324_v11  ;;  %v3431_v50 = vld [vmem:[%s22137_s0 + $0x50] sm:$0xff]  ;;  %v3438_v14 = vld [vmem:[%s22137_s0 + $0x88] sm:$0xff] }
 0x4e9   :  { %3479 = vst [vmem:[#allocation2 + $0x40] sm:$0xff] %v3454_v21  ;;  %3480 = vst [vmem:[#allocation2 + $0x48] sm:$0xff] %v3455_v48  ;;  %v3357_v47 = vadd.f32 %v18109_v52, %v3325_v56  ;;  %v3358_v49 = vadd.f32 %v18109_v52, %v3326_v63  ;;  %v3359_v48 = vadd.f32 %v18109_v52, %v3327_v19 }
 0x4ea   :  { %v3360_v43 = vadd.f32 %v18109_v52, %v3328_v18  ;;  %v3361_v34 = vadd.f32 %v18109_v52, %v3329_v15  ;;  %v3362_v31 = vadd.f32 %v18109_v52, %v3330_v61  ;;  %v3363_v6 = vadd.f32 %v18109_v52, %v3331_v54 }
 0x4eb   :  { %v3381_v17 = vmax.f32 %v3356_v10, 0.0  ;;  %v3382_v12 = vmax.f32 %v3357_v47, 0.0  ;;  %v3383_v5 = vmax.f32 %v3358_v49, 0.0  ;;  %v3384_v51 = vmax.f32 %v3359_v48, 0.0  ;;  %v3439_v48 = vld [vmem:[%s22137_s0 + $0x90] sm:$0xff] }
 0x4ec   :  { %v3385_v53 = vmax.f32 %v3360_v43, 0.0  ;;  %v3386_v24 = vmax.f32 %v3361_v34, 0.0  ;;  %v3387_v38 = vmax.f32 %v3362_v31, 0.0  ;;  %v3388_v35 = vmax.f32 %v3363_v6, 0.0 }
 0x4ed   :  { %v3406_v62 = vmul.f32 %v3381_v17, %v17487_v25  ;;  %v3407_v37 = vmul.f32 %v3382_v12, %v17499_v39  ;;  %v3408_v13 = vmul.f32 %v3383_v5, %v17510_v3  ;;  %v3409_v16 = vmul.f32 %v3384_v51, %v17522_v55  ;;  %v3499_v22 = vld [vmem:[#allocation2 + $0xd] sm:$0xff]  ;;  %v3500_v18 = vld [vmem:[#allocation2 + $0x15] sm:$0xff]  ;;  %v15426_v51 = vld [vmem:[%s22140_s5 + $0x80] sm:$0xff] }
 0x4ee   :  { %v3755_v25 = vld [vmem:[#allocation2 + $0xe] sm:$0xff]  ;;  %v3410_v39 = vmul.f32 %v3385_v53, %v17533_v29  ;;  %v3411_v3 = vmul.f32 %v3386_v24, %v17544_v2  ;;  %v3412_v55 = vmul.f32 %v3387_v38, %v17554_v36  ;;  %v3413_v45 = vmul.f32 %v3388_v35, %v17565_v27  ;;  %12564 = vmatmul.mubr.f32.gmra.mrb[222].mxu1 %v3499_v22  ;;  %v3756_v15 = vld [vmem:[#allocation2 + $0x16] sm:$0xff]  ;;  %v3757_v6 = vld [vmem:[#allocation2 + $0x1e] sm:$0xff] }
 0x4ef   :  { %12671 = vmatmul.mubr.f32.gmra.mrb[236].mxu0 %v3755_v25  ;;  %v3456_v8 = vadd.f32 %v3431_v50, %v3406_v62  ;;  %v3457_v21 = vadd.f32 %v3432_v32, %v3407_v37  ;;  %v3458_v11 = vadd.f32 %v3433_v46, %v3408_v13  ;;  %12566 = vmatprep.mubr.msk.f32.mxu1 %vm15438_vm0, %v22212_v60  ;;  %v3501_v31 = vld [vmem:[#allocation2 + $0x1d] sm:$0xff]  ;;  %v3443_v38 = vld [vmem:[%s22137_s0 + $0xb0] sm:$0xff] }
 0x4f0   :  { %12673 = vmatprep.mubr.msk.f32.mxu0 %vm15438_vm0, %v22212_v60  ;;  %v3459_v29 = vadd.f32 %v3434_v44, %v3409_v16  ;;  %v3460_v2 = vadd.f32 %v3435_v28, %v3410_v39  ;;  %v3461_v36 = vadd.f32 %v3436_v41, %v3411_v3  ;;  %v3462_v27 = vadd.f32 %v3437_v40, %v3412_v55  ;;  %v3440_v17 = vld [vmem:[%s22137_s0 + $0x98] sm:$0xff]  ;;  %v15427_v44 = vld [vmem:[%s22140_s5 + $0x88] sm:$0xff]  ;;  %v3441_v24 = vld [vmem:[%s22137_s0 + $0xa0] sm:$0xff] }
 0x4f1   :  { %3481 = vst [vmem:[#allocation2 + $0x50] sm:$0xff] %v3456_v8  ;;  %3482 = vst [vmem:[#allocation2 + $0x58] sm:$0xff] %v3457_v21  ;;  %v3463_v56 = vadd.f32 %v3438_v14, %v3413_v45  ;;  %v3332_v63 = vmul.f32 %v18104_v4, %v17810_v42  ;;  %v3333_v19 = vmul.f32 %v18104_v4, %v17817_v30  ;;  %v15428_v37 = vld [vmem:[%s22140_s5 + $0x90] sm:$0xff]  ;;  %v15429_v16 = vld [vmem:[%s22140_s5 + $0x98] sm:$0xff] }
 0x4f2   :  { %3483 = vst [vmem:[#allocation2 + $0x60] sm:$0xff] %v3458_v11  ;;  %3484 = vst [vmem:[#allocation2 + $0x68] sm:$0xff] %v3459_v29  ;;  %v3334_v61 = vmul.f32 %v18104_v4, %v17824_v23  ;;  %v3335_v54 = vmul.f32 %v18104_v4, %v17831_v1  ;;  %v3336_v10 = vmul.f32 %v18104_v4, %v17838_v9  ;;  %12567 = vmatmul.mubr.f32.gmra.mrb[224].mxu1 %v3500_v18  ;;  %v3444_v40 = vld [vmem:[%s22137_s0 + $0xb8] sm:$0xff]  ;;  %v3445_v22 = vld [vmem:[%s22137_s0 + $0xc0] sm:$0xff] }
 0x4f3   :  { %3485 = vst [vmem:[#allocation2 + $0x70] sm:$0xff] %v3460_v2  ;;  %3486 = vst [vmem:[#allocation2 + $0x78] sm:$0xff] %v3461_v36  ;;  %v3337_v42 = vmul.f32 %v18104_v4, %v17845_v26  ;;  %12674 = vmatmul.mubr.f32.gmra.mrb[238].mxu0 %v3756_v15  ;;  %v3364_v30 = vadd.f32 %v18109_v52, %v3332_v63  ;;  %v3365_v47 = vadd.f32 %v18109_v52, %v3333_v19  ;;  %v3502_v45 = vld [vmem:[#allocation2 + $0x25] sm:$0xff]  ;;  %v15430_v63 = vld [vmem:[%s22140_s5 + $0xb8] sm:$0xff] }
 0x4f4   :  { %3487 = vst [vmem:[#allocation2 + $0x80] sm:$0xff] %v3462_v27  ;;  %3488 = vst [vmem:[#allocation2 + $0x88] sm:$0xff] %v3463_v56  ;;  %v3338_v23 = vmul.f32 %v18104_v4, %v17852_v0  ;;  %12569 = vmatprep.mubr.msk.f32.mxu1 %vm15438_vm0, %v22212_v60  ;;  %12676 = vmatprep.mubr.msk.f32.mxu0 %vm15438_vm0, %v22212_v60  ;;  %v3366_v1 = vadd.f32 %v18109_v52, %v3334_v61  ;;  %v3758_v14 = vld [vmem:[#allocation2 + $0x26] sm:$0xff]  ;;  %v3759_v56 = vld [vmem:[#allocation2 + $0x2e] sm:$0xff] }
 0x4f5   :  { %v3367_v9 = vadd.f32 %v18109_v52, %v3335_v54  ;;  %v3368_v26 = vadd.f32 %v18109_v52, %v3336_v10  ;;  %v3389_v49 = vmax.f32 %v3364_v30, 0.0  ;;  %v3390_v43 = vmax.f32 %v3365_v47, 0.0  ;;  %v3446_v36 = vld [vmem:[%s22137_s0 + $0xc8] sm:$0xff]  ;;  %v3447_v15 = vld [vmem:[%s22137_s0 + $0xd0] sm:$0xff]  ;;  %v3505_v30 = vld [vmem:[#allocation2 + $0x3d] sm:$0xff] }
 0x4f6   :  { %v3369_v0 = vadd.f32 %v18109_v52, %v3337_v42  ;;  %v3370_v34 = vadd.f32 %v18109_v52, %v3338_v23  ;;  %v3391_v50 = vmax.f32 %v3366_v1, 0.0  ;;  %v3339_v5 = vmul.f32 %v18104_v4, %v17857_v59  ;;  %12570 = vmatmul.mubr.f32.gmra.mrb[226].mxu1 %v3501_v31  ;;  %v3442_v59 = vld [vmem:[%s22137_s0 + $0xa8] sm:$0xff]  ;;  %v3504_v61 = vld [vmem:[#allocation2 + $0x35] sm:$0xff]  ;;  %v3761_v47 = vld [vmem:[#allocation2 + $0x3e] sm:$0xff] }
 0x4f7   :  { %v3392_v12 = vmax.f32 %v3367_v9, 0.0  ;;  %v3393_v32 = vmax.f32 %v3368_v26, 0.0  ;;  %12677 = vmatmul.mubr.f32.gmra.mrb[240].mxu0 %v3757_v6  ;;  %v3414_v46 = vmul.f32 %v15426_v51, %v3389_v49  ;;  %v3415_v53 = vmul.f32 %v15427_v44, %v3390_v43  ;;  %12572 = vmatprep.mubr.msk.f32.mxu1 %vm15438_vm0, %v22212_v60  ;;  %v3503_v27 = vld [vmem:[#allocation2 + $0x2d] sm:$0xff]  ;;  %v3760_v54 = vld [vmem:[#allocation2 + $0x36] sm:$0xff]  ;;  %v3506_v23 = vld [vmem:[#allocation2 + $0x45] sm:$0xff] }
 0x4f8   :  { %v3394_v35 = vmax.f32 %v3369_v0, 0.0  ;;  %v3395_v62 = vmax.f32 %v3370_v34, 0.0  ;;  %12679 = vmatprep.mubr.msk.f32.mxu0 %vm15438_vm0, %v22212_v60  ;;  %v3416_v13 = vmul.f32 %v15428_v37, %v3391_v50  ;;  %v3762_v1 = vld [vmem:[#allocation2 + $0x46] sm:$0xff]  ;;  %v3763_v26 = vld [vmem:[#allocation2 + $0x4e] sm:$0xff] }
 0x4f9   :  { %v3417_v28 = vmul.f32 %v15429_v16, %v3392_v12  ;;  %v3418_v41 = vmul.f32 %v3393_v32, %v22219_v33  ;;  %v3464_v25 = vadd.f32 %v3439_v48, %v3414_v46  ;;  %v3465_v39 = vadd.f32 %v3440_v17, %v3415_v53  ;;  %v3507_v9 = vld [vmem:[#allocation2 + $0x4d] sm:$0xff]  ;;  %v3508_v49 = vld [vmem:[#allocation2 + $0x55] sm:$0xff]  ;;  %v3509_v43 = vld [vmem:[#allocation2 + $0x5d] sm:$0xff] }
 0x4fa   :  { %v3419_v3 = vmul.f32 %v3394_v35, %v22220_v57  ;;  %v3420_v55 = vmul.f32 %v3395_v62, %v22221_v7  ;;  %v3466_v8 = vadd.f32 %v3441_v24, %v3416_v13  ;;  %v3371_v33 = vadd.f32 %v18109_v52, %v3339_v5  ;;  %12573 = vmatmul.mubr.f32.gmra.mrb[228].mxu1 %v3502_v45  ;;  %v3764_v48 = vld [vmem:[#allocation2 + $0x56] sm:$0xff]  ;;  %v3765_v0 = vld [vmem:[#allocation2 + $0x5e] sm:$0xff]  ;;  %v3766_v31 = vld [vmem:[#allocation2 + $0x66] sm:$0xff] }
 0x4fb   :  { %v3467_v21 = vadd.f32 %v3442_v59, %v3417_v28  ;;  %v3468_v11 = vadd.f32 %v3443_v38, %v3418_v41  ;;  %12680 = vmatmul.mubr.f32.gmra.mrb[242].mxu0 %v3758_v14  ;;  %3489 = vst [vmem:[#allocation2 + $0x90] sm:$0xff] %v3464_v25  ;;  %3490 = vst [vmem:[#allocation2 + $0x98] sm:$0xff] %v3465_v39  ;;  %12575 = vmatprep.mubr.msk.f32.mxu1 %vm15438_vm0, %v22212_v60  ;;  %v3510_v34 = vld [vmem:[#allocation2 + $0x65] sm:$0xff]  ;;  %v3511_v6 = vld [vmem:[#allocation2 + $0x6d] sm:$0xff]  ;;  %v3605_v28 = vpop.f32.mrb[220].mxu1 }
 0x4fc   :  { %v3469_v29 = vadd.f32 %v3444_v40, %v3419_v3  ;;  %v3470_v2 = vadd.f32 %v3445_v22, %v3420_v55  ;;  %12682 = vmatprep.mubr.msk.f32.mxu0 %vm15438_vm0, %v22212_v60  ;;  %3491 = vst [vmem:[#allocation2 + $0xa0] sm:$0xff] %v3466_v8  ;;  %v3396_v57 = vmax.f32 %v3371_v33, 0.0  ;;  %v3340_v7 = vmul.f32 %v18104_v4, %v17862_v20  ;;  %v3767_v17 = vld [vmem:[#allocation2 + $0x6e] sm:$0xff]  ;;  %v3768_v12 = vld [vmem:[#allocation2 + $0x76] sm:$0xff]  ;;  %v3769_v5 = vld [vmem:[#allocation2 + $0x7e] sm:$0xff]  ;;  %v12562_v41 = vpop.f32.mrb[221].mxu1 }
 0x4fd   :  { %3492 = vst [vmem:[#allocation2 + $0xa8] sm:$0xff] %v3467_v21  ;;  %3493 = vst [vmem:[#allocation2 + $0xb0] sm:$0xff] %v3468_v11  ;;  %v3512_v50 = vld [vmem:[#allocation2 + $0x75] sm:$0xff]  ;;  %v3513_v32 = vld [vmem:[#allocation2 + $0x7d] sm:$0xff]  ;;  %v3861_v40 = vpop.f32.mrb[234].mxu0 }
 0x4fe   :  { %3494 = vst [vmem:[#allocation2 + $0xb8] sm:$0xff] %v3469_v29  ;;  %3495 = vst [vmem:[#allocation2 + $0xc0] sm:$0xff] %v3470_v2  ;;  %v3421_v19 = vmul.f32 %v15430_v63, %v3396_v57  ;;  %v3372_v18 = vadd.f32 %v18109_v52, %v3340_v7  ;;  %12576 = vmatmul.mubr.f32.gmra.mrb[230].mxu1 %v3503_v27  ;;  %v15431_v52 = vld [vmem:[%s22140_s5 + $0xc0] sm:$0xff]  ;;  %v18382_v22 = vadd.f32 %v3861_v40, %v3605_v28  ;;  %v12669_v25 = vpop.f32.mrb[235].mxu0  ;;  %v4698_v8 = vld [vmem:[%s22136_s1 + $0x208] sm:$0xff] }
 0x4ff   :  { %12683 = vmatmul.mubr.f32.gmra.mrb[244].mxu0 %v3759_v56  ;;  %12578 = vmatprep.mubr.msk.f32.mxu1 %vm15438_vm0, %v22212_v60  ;;  %v3514_v51 = vld [vmem:[#allocation2 + $0x85] sm:$0xff]  ;;  %v4366_v7 = vld [vmem:[#allocation2 + $0xf] sm:$0xff]  ;;  %v4700_v27 = vld [vmem:[%s22136_s1 + $0x218] sm:$0xff] }
 0x500   :  { %12685 = vmatprep.mubr.msk.f32.mxu0 %vm15438_vm0, %v22212_v60  ;;  %v3471_v20 = vadd.f32 %v3446_v36, %v3421_v19  ;;  %v3397_v4 = vmax.f32 %v3372_v18, 0.0  ;;  %v3770_v46 = vld [vmem:[#allocation2 + $0x86] sm:$0xff]  ;;  %v4699_v36 = vld [vmem:[%s22136_s1 + $0x210] sm:$0xff]  ;;  %v5006_v19 = vld [vmem:[%s22136_s1 + $0x298] sm:$0xff] }
 0x501   :  { %v4697_v14 = vld [vmem:[%s22136_s1 + $0x200] sm:$0xff]  ;;  %v5004_v29 = vld [vmem:[%s22136_s1 + $0x288] sm:$0xff]  ;;  %v5005_v63 = vld [vmem:[%s22136_s1 + $0x290] sm:$0xff]  ;;  %v14958_v18 = vpack.c.bf16 %v4700_v27, %v4699_v36 }
 0x502   :  { %3496 = vst [vmem:[#allocation2 + $0xc8] sm:$0xff] %v3471_v20  ;;  %v3422_v10 = vmul.f32 %v15431_v52, %v3397_v4  ;;  %12579 = vmatmul.mubr.f32.gmra.mrb[232].mxu1 %v3504_v61  ;;  %v3515_v44 = vld [vmem:[#allocation2 + $0x8d] sm:$0xff]  ;;  %v3516_v24 = vld [vmem:[#allocation2 + $0x95] sm:$0xff]  ;;  %v5003_v33 = vld [vmem:[%s22136_s1 + $0x280] sm:$0xff]  ;;  %v14955_v57 = vpack.c.bf16 %v4698_v8, %v4697_v14  ;;  %v14982_v61 = vpack.c.bf16 %v5006_v19, %v5005_v63 }
 0x503   :  { %12686 = vmatmul.mubr.f32.gmra.mrb[246].mxu0 %v3760_v54  ;;  %12581 = vmatprep.mubr.msk.f32.mxu1 %vm15438_vm0, %v22212_v60  ;;  %v3771_v53 = vld [vmem:[#allocation2 + $0x8e] sm:$0xff]  ;;  %v3772_v59 = vld [vmem:[#allocation2 + $0x96] sm:$0xff]  ;;  %v3773_v35 = vld [vmem:[#allocation2 + $0x9e] sm:$0xff]  ;;  %v14979_v56 = vpack.c.bf16 %v5004_v29, %v5003_v33 }
 0x504   :  { %12688 = vmatprep.mubr.msk.f32.mxu0 %vm15438_vm0, %v22212_v60  ;;  %v3472_v42 = vadd.f32 %v3447_v15, %v3422_v10  ;;  %v3517_v38 = vld [vmem:[#allocation2 + $0x9d] sm:$0xff]  ;;  %v3518_v62 = vld [vmem:[#allocation2 + $0xa5] sm:$0xff]  ;;  %v3519_v13 = vld [vmem:[#allocation2 + $0xad] sm:$0xff] }
 0x505   :  { %v3774_v37 = vld [vmem:[#allocation2 + $0xa6] sm:$0xff]  ;;  %v3775_v16 = vld [vmem:[#allocation2 + $0xae] sm:$0xff]  ;;  %v3776_v3 = vld [vmem:[#allocation2 + $0xb6] sm:$0xff] }
 0x506   :  { %3497 = vst [vmem:[#allocation2 + $0xd0] sm:$0xff] %v3472_v42  ;;  %12582 = vmatmul.mubr.f32.gmra.mrb[234].mxu1 %v3505_v30  ;;  %v3520_v39 = vld [vmem:[#allocation2 + $0xb5] sm:$0xff]  ;;  %v3521_v55 = vld [vmem:[#allocation2 + $0xbd] sm:$0xff]  ;;  %v4060_v2 = vld [vmem:[#allocation2 + $0x7] sm:$0xff] }
 0x507   :  { %12689 = vmatmul.mubr.f32.gmra.mrb[248].mxu0 %v3761_v47  ;;  %12584 = vmatprep.mubr.msk.f32.mxu1 %vm15438_vm0, %v22212_v60  ;;  %v3777_v45 = vld [vmem:[#allocation2 + $0xbe] sm:$0xff]  ;;  %v4702_v15 = vld [vmem:[%s22136_s1 + $0x228] sm:$0xff]  ;;  %v4703_v30 = vld [vmem:[%s22136_s1 + $0x230] sm:$0xff] }
 0x508   :  { %12691 = vmatprep.mubr.msk.f32.mxu0 %vm15438_vm0, %v22212_v60  ;;  %v4367_v20 = vld [vmem:[#allocation2 + $0x17] sm:$0xff]  ;;  %v4701_v4 = vld [vmem:[%s22136_s1 + $0x220] sm:$0xff]  ;;  %v5008_v52 = vld [vmem:[%s22136_s1 + $0x2a8] sm:$0xff] }
 0x509   :  { %v3522_v21 = vld [vmem:[#allocation2 + $0xc5] sm:$0xff]  ;;  %v14961_v10 = vpack.c.bf16 %v4702_v15, %v4701_v4  ;;  %v4704_v47 = vld [vmem:[%s22136_s1 + $0x238] sm:$0xff]  ;;  %v5017_v41 = vld [vmem:[%s22136_s1 + $0x2f0] sm:$0xff] }
 0x50a   :  { %12585 = vmatmul.mubr.f32.gmra.mrb[236].mxu1 %v3506_v23  ;;  %v3778_v11 = vld [vmem:[#allocation2 + $0xc6] sm:$0xff]  ;;  %v5018_v40 = vld [vmem:[%s22136_s1 + $0x2f8] sm:$0xff]  ;;  %v4386_v27 = vld [vmem:[#allocation2 + $0xaf] sm:$0xff] }
 0x50b   :  { %12692 = vmatmul.mubr.f32.gmra.mrb[250].mxu0 %v3762_v1  ;;  %12587 = vmatprep.mubr.msk.f32.mxu1 %vm15438_vm0, %v22212_v60  ;;  %v5007_v54 = vld [vmem:[%s22136_s1 + $0x2a0] sm:$0xff]  ;;  %v5009_v1 = vld [vmem:[%s22136_s1 + $0x2b0] sm:$0xff] }
 0x50c   :  { %12694 = vmatprep.mubr.msk.f32.mxu0 %vm15438_vm0, %v22212_v60  ;;  %v4368_v42 = vld [vmem:[#allocation2 + $0x1f] sm:$0xff]  ;;  %v14985_v23 = vpack.c.bf16 %v5008_v52, %v5007_v54  ;;  %v4377_v8 = vld [vmem:[#allocation2 + $0x67] sm:$0xff]  ;;  %v4672_v52 = vld [vmem:[#allocation2 + $0x10] sm:$0xff] }
 0x50d   :  { %v4376_v14 = vld [vmem:[#allocation2 + $0x5f] sm:$0xff]  ;;  %v4381_v29 = vld [vmem:[#allocation2 + $0x87] sm:$0xff]  ;;  %v4390_v4 = vld [vmem:[#allocation2 + $0xcf] sm:$0xff] }
 0x50e   :  { %12588 = vmatmul.mubr.f32.gmra.mrb[238].mxu1 %v3507_v9  ;;  %v5010_v9 = vld [vmem:[%s22136_s1 + $0x2b8] sm:$0xff]  ;;  %v4385_v36 = vld [vmem:[#allocation2 + $0xa7] sm:$0xff] }
 0x50f   :  { %12695 = vmatmul.mubr.f32.gmra.mrb[252].mxu0 %v3763_v26  ;;  %12590 = vmatprep.mubr.msk.f32.mxu1 %vm15438_vm0, %v22212_v60  ;;  %v14964_v26 = vpack.c.bf16 %v4704_v47, %v4703_v30  ;;  %v4380_v33 = vld [vmem:[#allocation2 + $0x7f] sm:$0xff]  ;;  %v4389_v19 = vld [vmem:[#allocation2 + $0xc7] sm:$0xff] }
 0x510   :  { %12697 = vmatprep.mubr.msk.f32.mxu0 %vm15438_vm0, %v22212_v60  ;;  %v4388_v63 = vld [vmem:[#allocation2 + $0xbf] sm:$0xff] }
 0x511   :  { %v5615_v15 = vld [vmem:[%s22136_s1 + $0x380] sm:$0xff]  ;;  %v5312_v30 = vld [vmem:[%s22136_s1 + $0x318] sm:$0xff] }
 0x512   :  { %12591 = vmatmul.mubr.f32.gmra.mrb[240].mxu1 %v3508_v49  ;;  %v4369_v49 = vld [vmem:[#allocation2 + $0x27] sm:$0xff] }
 0x513   :  { %12698 = vmatmul.mubr.f32.gmra.mrb[254].mxu0 %v3764_v48  ;;  %12593 = vmatprep.mubr.msk.f32.mxu1 %vm15438_vm0, %v22212_v60  ;;  %v4705_v48 = vld [vmem:[%s22136_s1 + $0x240] sm:$0xff] }
 0x514   :  { %12700 = vmatprep.mubr.msk.f32.mxu0 %vm15438_vm0, %v22212_v60 }
 0x516   :  { %12594 = vmatmul.mubr.f32.gmra.mrb[242].mxu1 %v3509_v43  ;;  %v4706_v43 = vld [vmem:[%s22136_s1 + $0x248] sm:$0xff] }
 0x517   :  { %12701 = vmatmul.mubr.f32.gmra.mrb[0].mxu0 %v3765_v0  ;;  %12596 = vmatprep.mubr.msk.f32.mxu1 %vm15438_vm0, %v22212_v60  ;;  %v14988_v0 = vpack.c.bf16 %v5010_v9, %v5009_v1  ;;  %v5618_v1 = vld [vmem:[%s22136_s1 + $0x398] sm:$0xff] }
 0x518   :  { %12703 = vmatprep.mubr.msk.f32.mxu0 %vm15438_vm0, %v22212_v60  ;;  %v4673_v9 = vld [vmem:[#allocation2 + $0x18] sm:$0xff] }
 0x51a   :  { %12597 = vmatmul.mubr.f32.gmra.mrb[244].mxu1 %v3510_v34  ;;  %v5011_v34 = vld [vmem:[%s22136_s1 + $0x2c0] sm:$0xff] }
 0x51b   :  { %12704 = vmatmul.mubr.f32.gmra.mrb[2].mxu0 %v3766_v31  ;;  %12599 = vmatprep.mubr.msk.f32.mxu1 %vm15438_vm0, %v22212_v60  ;;  %v5012_v31 = vld [vmem:[%s22136_s1 + $0x2c8] sm:$0xff] }
 0x51c   :  { %12706 = vmatprep.mubr.msk.f32.mxu0 %vm15438_vm0, %v22212_v60 }
 0x51e   :  { %12600 = vmatmul.mubr.f32.gmra.mrb[246].mxu1 %v3511_v6  ;;  %v14967_v6 = vpack.c.bf16 %v4706_v43, %v4705_v48  ;;  %v5313_v48 = vld [vmem:[%s22136_s1 + $0x320] sm:$0xff]  ;;  %v5314_v43 = vld [vmem:[%s22136_s1 + $0x328] sm:$0xff] }
 0x51f   :  { %12707 = vmatmul.mubr.f32.gmra.mrb[4].mxu0 %v3767_v17  ;;  %12602 = vmatprep.mubr.msk.f32.mxu1 %vm15438_vm0, %v22212_v60  ;;  %v4370_v17 = vld [vmem:[#allocation2 + $0x2f] sm:$0xff] }
 0x520   :  { %12709 = vmatprep.mubr.msk.f32.mxu0 %vm15438_vm0, %v22212_v60 }
 0x522   :  { %12603 = vmatmul.mubr.f32.gmra.mrb[248].mxu1 %v3512_v50  ;;  %v4707_v50 = vld [vmem:[%s22136_s1 + $0x250] sm:$0xff] }
 0x523   :  { %12710 = vmatmul.mubr.f32.gmra.mrb[6].mxu0 %v3768_v12  ;;  %12605 = vmatprep.mubr.msk.f32.mxu1 %vm15438_vm0, %v22212_v60  ;;  %v4708_v12 = vld [vmem:[%s22136_s1 + $0x258] sm:$0xff] }
 0x524   :  { %12712 = vmatprep.mubr.msk.f32.mxu0 %vm15438_vm0, %v22212_v60 }
 0x526   :  { %12606 = vmatmul.mubr.f32.gmra.mrb[250].mxu1 %v3513_v32  ;;  %v14991_v32 = vpack.c.bf16 %v5012_v31, %v5011_v34  ;;  %v5619_v34 = vld [vmem:[%s22136_s1 + $0x3a0] sm:$0xff]  ;;  %v5620_v31 = vld [vmem:[%s22136_s1 + $0x3a8] sm:$0xff] }
 0x527   :  { %12713 = vmatmul.mubr.f32.gmra.mrb[8].mxu0 %v3769_v5  ;;  %12608 = vmatprep.mubr.msk.f32.mxu1 %vm15438_vm0, %v22212_v60  ;;  %v5013_v5 = vld [vmem:[%s22136_s1 + $0x2d0] sm:$0xff] }
 0x528   :  { %12715 = vmatprep.mubr.msk.f32.mxu0 %vm15438_vm0, %v22212_v60 }
 0x52a   :  { %12609 = vmatmul.mubr.f32.gmra.mrb[252].mxu1 %v3514_v51  ;;  %v5014_v51 = vld [vmem:[%s22136_s1 + $0x2d8] sm:$0xff] }
 0x52b   :  { %12716 = vmatmul.mubr.f32.gmra.mrb[10].mxu0 %v3770_v46  ;;  %12611 = vmatprep.mubr.msk.f32.mxu1 %vm15438_vm0, %v22212_v60  ;;  %v14970_v46 = vpack.c.bf16 %v4708_v12, %v4707_v50  ;;  %v18657_v50 = vld [vmem:[#allocation2 + $0x21] sm:$0xff]  ;;  %v5315_v12 = vld [vmem:[%s22136_s1 + $0x330] sm:$0xff] }
 0x52c   :  { %12718 = vmatprep.mubr.msk.f32.mxu0 %vm15438_vm0, %v22212_v60 }
 0x52e   :  { %12612 = vmatmul.mubr.f32.gmra.mrb[254].mxu1 %v3515_v44  ;;  %v4371_v44 = vld [vmem:[#allocation2 + $0x37] sm:$0xff] }
 0x52f   :  { %12719 = vmatmul.mubr.f32.gmra.mrb[12].mxu0 %v3771_v53  ;;  %12614 = vmatprep.mubr.msk.f32.mxu1 %vm15438_vm0, %v22212_v60  ;;  %v4709_v53 = vld [vmem:[%s22136_s1 + $0x260] sm:$0xff] }
 0x530   :  { %12721 = vmatprep.mubr.msk.f32.mxu0 %vm15438_vm0, %v22212_v60 }
 0x532   :  { %12615 = vmatmul.mubr.f32.gmra.mrb[0].mxu1 %v3516_v24  ;;  %v4710_v24 = vld [vmem:[%s22136_s1 + $0x268] sm:$0xff] }
 0x533   :  { %12722 = vmatmul.mubr.f32.gmra.mrb[14].mxu0 %v3772_v59  ;;  %12617 = vmatprep.mubr.msk.f32.mxu1 %vm15438_vm0, %v22212_v60  ;;  %v14994_v59 = vpack.c.bf16 %v5014_v51, %v5013_v5  ;;  %v15033_v5 = vpack.c.bf16 %v5620_v31, %v5619_v34  ;;  %v5621_v51 = vld [vmem:[%s22136_s1 + $0x3b0] sm:$0xff]  ;;  %v4679_v34 = vld [vmem:[#allocation2 + $0x48] sm:$0xff] }
 0x534   :  { %12724 = vmatprep.mubr.msk.f32.mxu0 %vm15438_vm0, %v22212_v60  ;;  %v18768_v31 = vld [vmem:[#allocation2 + $0x49] sm:$0xff] }
 0x536   :  { %12618 = vmatmul.mubr.f32.gmra.mrb[2].mxu1 %v3517_v38  ;;  %v5015_v38 = vld [vmem:[%s22136_s1 + $0x2e0] sm:$0xff] }
 0x537   :  { %12725 = vmatmul.mubr.f32.gmra.mrb[16].mxu0 %v3773_v35  ;;  %12620 = vmatprep.mubr.msk.f32.mxu1 %vm15438_vm0, %v22212_v60  ;;  %v5016_v35 = vld [vmem:[%s22136_s1 + $0x2e8] sm:$0xff] }
 0x538   :  { %12727 = vmatprep.mubr.msk.f32.mxu0 %vm15438_vm0, %v22212_v60  ;;  %v14997_v28 = vpack.c.bf16 %v5016_v35, %v5015_v38  ;;  %v5318_v38 = vld [vmem:[%s22136_s1 + $0x348] sm:$0xff] }
 0x53a   :  { %12621 = vmatmul.mubr.f32.gmra.mrb[4].mxu1 %v3518_v62  ;;  %v14973_v62 = vpack.c.bf16 %v4710_v24, %v4709_v53  ;;  %v18678_v24 = vld [vmem:[#allocation2 + $0x29] sm:$0xff] }
 0x53b   :  { %12728 = vmatmul.mubr.f32.gmra.mrb[18].mxu0 %v3774_v37  ;;  %12623 = vmatprep.mubr.msk.f32.mxu1 %vm15438_vm0, %v22212_v60  ;;  %v4372_v37 = vld [vmem:[#allocation2 + $0x3f] sm:$0xff] }
 0x53c   :  { %12730 = vmatprep.mubr.msk.f32.mxu0 %vm15438_vm0, %v22212_v60 }
 0x53e   :  { %12624 = vmatmul.mubr.f32.gmra.mrb[6].mxu1 %v3519_v13  ;;  %v4711_v13 = vld [vmem:[%s22136_s1 + $0x270] sm:$0xff] }
 0x53f   :  { %12731 = vmatmul.mubr.f32.gmra.mrb[20].mxu0 %v3775_v16  ;;  %12626 = vmatprep.mubr.msk.f32.mxu1 %vm15438_vm0, %v22212_v60  ;;  %v4712_v16 = vld [vmem:[%s22136_s1 + $0x278] sm:$0xff] }
 0x540   :  { %12733 = vmatprep.mubr.msk.f32.mxu0 %vm15438_vm0, %v22212_v60  ;;  %v14976_v25 = vpack.c.bf16 %v4712_v16, %v4711_v13  ;;  %v4676_v13 = vld [vmem:[#allocation2 + $0x30] sm:$0xff] }
 0x542   :  { %12627 = vmatmul.mubr.f32.gmra.mrb[8].mxu1 %v3520_v39  ;;  %v4373_v39 = vld [vmem:[#allocation2 + $0x47] sm:$0xff] }
 0x543   :  { %12734 = vmatmul.mubr.f32.gmra.mrb[22].mxu0 %v3776_v3  ;;  %12629 = vmatprep.mubr.msk.f32.mxu1 %vm15438_vm0, %v22212_v60  ;;  %v15000_v3 = vpack.c.bf16 %v5018_v40, %v5017_v41  ;;  %v18699_v40 = vld [vmem:[#allocation2 + $0x31] sm:$0xff] }
 0x544   :  { %12736 = vmatprep.mubr.msk.f32.mxu0 %vm15438_vm0, %v22212_v60 }
 0x546   :  { %12630 = vmatmul.mubr.f32.gmra.mrb[10].mxu1 %v3521_v55  ;;  %v4374_v55 = vld [vmem:[#allocation2 + $0x4f] sm:$0xff] }
 0x547   :  { %12737 = vmatmul.mubr.f32.gmra.mrb[24].mxu0 %v3777_v45  ;;  %12632 = vmatprep.mubr.msk.f32.mxu1 %vm15438_vm0, %v22212_v60  ;;  %v4375_v45 = vld [vmem:[#allocation2 + $0x57] sm:$0xff] }
 0x548   :  { %12739 = vmatprep.mubr.msk.f32.mxu0 %vm15438_vm0, %v22212_v60 }
 0x54a   :  { %12633 = vmatmul.mubr.f32.gmra.mrb[12].mxu1 %v3522_v21  ;;  %v4378_v21 = vld [vmem:[#allocation2 + $0x6f] sm:$0xff] }
 0x54b   :  { %12740 = vmatmul.mubr.f32.gmra.mrb[26].mxu0 %v3778_v11  ;;  %12774 = vmatprep.mubr.msk.f32.mxu1 %vm15438_vm0, %v22212_v60  ;;  %v4379_v11 = vld [vmem:[#allocation2 + $0x77] sm:$0xff] }
 0x54c   :  { %12881 = vmatprep.mubr.msk.f32.mxu0 %vm15438_vm0, %v22212_v60 }
 0x54e   :  { %12775 = vmatmul.mubr.f32.vlgmr.msra.gmra.mrb[14].mxu1 %v4060_v2  ;;  %v4382_v2 = vld [vmem:[#allocation2 + $0x8f] sm:$0xff] }
 0x54f   :  { %12882 = vmatmul.mubr.f32.vlgmr.msra.gmra.mrb[28].mxu0 %v4366_v7  ;;  %14956 = vmatpush3.bf16.msra.mxu1 %v14955_v57  ;;  %v4383_v57 = vld [vmem:[#allocation2 + $0x97] sm:$0xff] }
 0x550   :  { %12777 = vmatprep.mubr.msk.f32.mxu1 %vm15438_vm0, %v22212_v60  ;;  %12884 = vmatprep.mubr.msk.f32.mxu0 %vm15438_vm0, %v22212_v60 }
 0x551   :  { %14957 = vmatprep.subr.bf16.mxu1 %v22213_v58  ;;  %14980 = vmatpush3.bf16.msra.mxu0 %v14979_v56  ;;  %v4387_v56 = vld [vmem:[#allocation2 + $0xb7] sm:$0xff] }
 0x552   :  { %12778 = vmatmul.mubr.f32.gmra.mrb[16].mxu1 %v4366_v7  ;;  %14981 = vmatprep.subr.bf16.mxu0 %v22213_v58  ;;  %v4384_v7 = vld [vmem:[#allocation2 + $0x9f] sm:$0xff] }
 0x553   :  { %12885 = vmatmul.mubr.f32.gmra.mrb[30].mxu0 %v4367_v20  ;;  %12780 = vmatprep.mubr.msk.f32.mxu1 %vm15438_vm0, %v22212_v60 }
 0x554   :  { %12887 = vmatprep.mubr.msk.f32.mxu0 %vm15438_vm0, %v22212_v60  ;;  %14959 = vmatpush3.bf16.msra.mxu1 %v14958_v18  ;;  %v5309_v18 = vld [vmem:[%s22136_s1 + $0x300] sm:$0xff] }
 0x555   :  { %14960 = vmatprep.subr.bf16.mxu1 %v22213_v58  ;;  %14983 = vmatpush3.bf16.msra.mxu0 %v14982_v61  ;;  %v5616_v61 = vld [vmem:[%s22136_s1 + $0x388] sm:$0xff] }
 0x556   :  { %12781 = vmatmul.mubr.f32.gmra.mrb[18].mxu1 %v4367_v20  ;;  %14984 = vmatprep.subr.bf16.mxu0 %v22213_v58  ;;  %v5310_v20 = vld [vmem:[%s22136_s1 + $0x308] sm:$0xff]  ;;  %v15027_v47 = vpack.c.bf16 %v5616_v61, %v5615_v15 }
 0x557   :  { %12888 = vmatmul.mubr.f32.gmra.mrb[32].mxu0 %v4368_v42  ;;  %12783 = vmatprep.mubr.msk.f32.mxu1 %vm15438_vm0, %v22212_v60  ;;  %v15003_v54 = vpack.c.bf16 %v5310_v20, %v5309_v18  ;;  %v5627_v18 = vld [vmem:[%s22136_s1 + $0x3e0] sm:$0xff]  ;;  %v5628_v20 = vld [vmem:[%s22136_s1 + $0x3e8] sm:$0xff] }
 0x558   :  { %12890 = vmatprep.mubr.msk.f32.mxu0 %vm15438_vm0, %v22212_v60  ;;  %14962 = vmatpush3.bf16.msra.mxu1 %v14961_v10  ;;  %v4978_v10 = vld [vmem:[#allocation2 + $0x11] sm:$0xff] }
 0x559   :  { %14963 = vmatprep.subr.bf16.mxu1 %v22213_v58  ;;  %14986 = vmatpush3.bf16.msra.mxu0 %v14985_v23  ;;  %v5617_v23 = vld [vmem:[%s22136_s1 + $0x390] sm:$0xff] }
 0x55a   :  { %12784 = vmatmul.mubr.f32.gmra.mrb[20].mxu1 %v4368_v42  ;;  %14987 = vmatprep.subr.bf16.mxu0 %v22213_v58  ;;  %v5311_v42 = vld [vmem:[%s22136_s1 + $0x310] sm:$0xff] }
 0x55b   :  { %12891 = vmatmul.mubr.f32.gmra.mrb[34].mxu0 %v4369_v49  ;;  %12786 = vmatprep.mubr.msk.f32.mxu1 %vm15438_vm0, %v22212_v60 }
 0x55c   :  { %12893 = vmatprep.mubr.msk.f32.mxu0 %vm15438_vm0, %v22212_v60  ;;  %14965 = vmatpush3.bf16.msra.mxu1 %v14964_v26  ;;  %v15006_v26 = vpack.c.bf16 %v5312_v30, %v5311_v42  ;;  %v5324_v42 = vld [vmem:[%s22136_s1 + $0x378] sm:$0xff]  ;;  %v15045_v30 = vpack.c.bf16 %v5628_v20, %v5627_v18  ;;  %v4684_v18 = vld [vmem:[#allocation2 + $0x70] sm:$0xff] }
 0x55d   :  { %14966 = vmatprep.subr.bf16.mxu1 %v22213_v58  ;;  %14989 = vmatpush3.bf16.msra.mxu0 %v14988_v0  ;;  %v15030_v0 = vpack.c.bf16 %v5618_v1, %v5617_v23  ;;  %v18817_v20 = vld [vmem:[#allocation2 + $0x71] sm:$0xff] }
 0x55e   :  { %12787 = vmatmul.mubr.f32.gmra.mrb[22].mxu1 %v4369_v49  ;;  %14990 = vmatprep.subr.bf16.mxu0 %v22213_v58  ;;  %v18637_v49 = vld [vmem:[#allocation2 + $0x19] sm:$0xff] }
 0x55f   :  { %12894 = vmatmul.mubr.f32.gmra.mrb[36].mxu0 %v4370_v17  ;;  %12789 = vmatprep.mubr.msk.f32.mxu1 %vm15438_vm0, %v22212_v60 }
 0x560   :  { %12896 = vmatprep.mubr.msk.f32.mxu0 %vm15438_vm0, %v22212_v60  ;;  %14968 = vmatpush3.bf16.msra.mxu1 %v14967_v6  ;;  %v4674_v6 = vld [vmem:[#allocation2 + $0x20] sm:$0xff] }
 0x561   :  { %14969 = vmatprep.subr.bf16.mxu1 %v22213_v58  ;;  %14992 = vmatpush3.bf16.msra.mxu0 %v14991_v32  ;;  %v5316_v32 = vld [vmem:[%s22136_s1 + $0x338] sm:$0xff] }
 0x562   :  { %12790 = vmatmul.mubr.f32.gmra.mrb[24].mxu1 %v4370_v17  ;;  %14993 = vmatprep.subr.bf16.mxu0 %v22213_v58  ;;  %v15009_v17 = vpack.c.bf16 %v5314_v43, %v5313_v48  ;;  %v15012_v53 = vpack.c.bf16 %v5316_v32, %v5315_v12 }
 0x563   :  { %12897 = vmatmul.mubr.f32.gmra.mrb[38].mxu0 %v4371_v44  ;;  %12792 = vmatprep.mubr.msk.f32.mxu1 %vm15438_vm0, %v22212_v60 }
 0x564   :  { %12899 = vmatprep.mubr.msk.f32.mxu0 %vm15438_vm0, %v22212_v60  ;;  %14971 = vmatpush3.bf16.msra.mxu1 %v14970_v46  ;;  %v5622_v46 = vld [vmem:[%s22136_s1 + $0x3b8] sm:$0xff] }
 0x565   :  { %14972 = vmatprep.subr.bf16.mxu1 %v22213_v58  ;;  %14995 = vmatpush3.bf16.msra.mxu0 %v14994_v59  ;;  %v5317_v59 = vld [vmem:[%s22136_s1 + $0x340] sm:$0xff]  ;;  %v15036_v35 = vpack.c.bf16 %v5622_v46, %v5621_v51  ;;  %v4680_v46 = vld [vmem:[#allocation2 + $0x50] sm:$0xff] }
 0x566   :  { %12793 = vmatmul.mubr.f32.gmra.mrb[26].mxu1 %v4371_v44  ;;  %14996 = vmatprep.subr.bf16.mxu0 %v22213_v58  ;;  %v4675_v44 = vld [vmem:[#allocation2 + $0x28] sm:$0xff]  ;;  %v15015_v16 = vpack.c.bf16 %v5318_v38, %v5317_v59 }
 0x567   :  { %12900 = vmatmul.mubr.f32.gmra.mrb[40].mxu0 %v4372_v37  ;;  %12795 = vmatprep.mubr.msk.f32.mxu1 %vm15438_vm0, %v22212_v60 }
 0x568   :  { %12902 = vmatprep.mubr.msk.f32.mxu0 %vm15438_vm0, %v22212_v60  ;;  %14974 = vmatpush3.bf16.msra.mxu1 %v14973_v62  ;;  %v5623_v62 = vld [vmem:[%s22136_s1 + $0x3c0] sm:$0xff] }
 0x569   :  { %14975 = vmatprep.subr.bf16.mxu1 %v22213_v58  ;;  %14998 = vmatpush3.bf16.msra.mxu0 %v14997_v28 }
 0x56a   :  { %12796 = vmatmul.mubr.f32.gmra.mrb[28].mxu1 %v4372_v37  ;;  %14999 = vmatprep.subr.bf16.mxu0 %v22213_v58  ;;  %v5624_v37 = vld [vmem:[%s22136_s1 + $0x3c8] sm:$0xff] }
 0x56b   :  { %12903 = vmatmul.mubr.f32.gmra.mrb[42].mxu0 %v4373_v39  ;;  %12798 = vmatprep.mubr.msk.f32.mxu1 %vm15438_vm0, %v22212_v60 }
 0x56c   :  { %12905 = vmatprep.mubr.msk.f32.mxu0 %vm15438_vm0, %v22212_v60  ;;  %14977 = vmatpush3.bf16.msra.mxu1 %v14976_v25  ;;  %v5319_v25 = vld [vmem:[%s22136_s1 + $0x350] sm:$0xff] }
 0x56d   :  { %15001 = vmatpush3.bf16.msra.mxu0 %v15000_v3  ;;  %15002 = vmatprep.subr.bf16.mxu1 %v22213_v58  ;;  %v15039_v3 = vpack.c.bf16 %v5624_v37, %v5623_v62  ;;  %v4681_v37 = vld [vmem:[#allocation2 + $0x58] sm:$0xff] }
 0x56e   :  { %12799 = vmatmul.mubr.f32.gmra.mrb[30].mxu1 %v4373_v39  ;;  %15026 = vmatprep.subr.bf16.mxu0 %v22213_v58  ;;  %v5320_v39 = vld [vmem:[%s22136_s1 + $0x358] sm:$0xff] }
 0x56f   :  { %12906 = vmatmul.mubr.f32.gmra.mrb[44].mxu0 %v4374_v55  ;;  %12801 = vmatprep.mubr.msk.f32.mxu1 %vm15438_vm0, %v22212_v60 }
 0x570   :  { %12908 = vmatprep.mubr.msk.f32.mxu0 %vm15438_vm0, %v22212_v60 }
 0x572   :  { %12802 = vmatmul.mubr.f32.gmra.mrb[32].mxu1 %v4374_v55 }
 0x573   :  { %12909 = vmatmul.mubr.f32.gmra.mrb[46].mxu0 %v4375_v45  ;;  %12804 = vmatprep.mubr.msk.f32.mxu1 %vm15438_vm0, %v22212_v60 }
 0x574   :  { %12911 = vmatprep.mubr.msk.f32.mxu0 %vm15438_vm0, %v22212_v60 }
 0x576   :  { %12805 = vmatmul.mubr.f32.gmra.mrb[34].mxu1 %v4375_v45 }
 0x577   :  { %12912 = vmatmul.mubr.f32.gmra.mrb[48].mxu0 %v4376_v14  ;;  %12807 = vmatprep.mubr.msk.f32.mxu1 %vm15438_vm0, %v22212_v60 }
 0x578   :  { %12914 = vmatprep.mubr.msk.f32.mxu0 %vm15438_vm0, %v22212_v60 }
 0x57a   :  { %12808 = vmatmul.mubr.f32.gmra.mrb[36].mxu1 %v4376_v14 }
 0x57b   :  { %12915 = vmatmul.mubr.f32.gmra.mrb[50].mxu0 %v4377_v8  ;;  %12810 = vmatprep.mubr.msk.f32.mxu1 %vm15438_vm0, %v22212_v60 }
 0x57c   :  { %12917 = vmatprep.mubr.msk.f32.mxu0 %vm15438_vm0, %v22212_v60 }
 0x57e   :  { %12811 = vmatmul.mubr.f32.gmra.mrb[38].mxu1 %v4377_v8  ;;  %v5625_v8 = vld [vmem:[%s22136_s1 + $0x3d0] sm:$0xff] }
 0x57f   :  { %12918 = vmatmul.mubr.f32.gmra.mrb[52].mxu0 %v4378_v21  ;;  %12813 = vmatprep.mubr.msk.f32.mxu1 %vm15438_vm0, %v22212_v60 }
 0x580   :  { %12920 = vmatprep.mubr.msk.f32.mxu0 %vm15438_vm0, %v22212_v60 }
 0x582   :  { %12814 = vmatmul.mubr.f32.gmra.mrb[40].mxu1 %v4378_v21  ;;  %v5626_v21 = vld [vmem:[%s22136_s1 + $0x3d8] sm:$0xff] }
 0x583   :  { %12921 = vmatmul.mubr.f32.gmra.mrb[54].mxu0 %v4379_v11  ;;  %12816 = vmatprep.mubr.msk.f32.mxu1 %vm15438_vm0, %v22212_v60 }
 0x584   :  { %12923 = vmatprep.mubr.msk.f32.mxu0 %vm15438_vm0, %v22212_v60 }
 0x586   :  { %12817 = vmatmul.mubr.f32.gmra.mrb[42].mxu1 %v4379_v11  ;;  %v4677_v11 = vld [vmem:[#allocation2 + $0x38] sm:$0xff] }
 0x587   :  { %12924 = vmatmul.mubr.f32.gmra.mrb[56].mxu0 %v4380_v33  ;;  %12819 = vmatprep.mubr.msk.f32.mxu1 %vm15438_vm0, %v22212_v60 }
 0x588   :  { %12926 = vmatprep.mubr.msk.f32.mxu0 %vm15438_vm0, %v22212_v60 }
 0x58a   :  { %12820 = vmatmul.mubr.f32.gmra.mrb[44].mxu1 %v4380_v33  ;;  %v15018_v33 = vpack.c.bf16 %v5320_v39, %v5319_v25 }
 0x58b   :  { %12927 = vmatmul.mubr.f32.gmra.mrb[58].mxu0 %v4381_v29  ;;  %12822 = vmatprep.mubr.msk.f32.mxu1 %vm15438_vm0, %v22212_v60 }
 0x58c   :  { %12929 = vmatprep.mubr.msk.f32.mxu0 %vm15438_vm0, %v22212_v60 }
 0x58e   :  { %12823 = vmatmul.mubr.f32.gmra.mrb[46].mxu1 %v4381_v29 }
 0x58f   :  { %12930 = vmatmul.mubr.f32.gmra.mrb[60].mxu0 %v4382_v2  ;;  %12825 = vmatprep.mubr.msk.f32.mxu1 %vm15438_vm0, %v22212_v60 }
 0x590   :  { %12932 = vmatprep.mubr.msk.f32.mxu0 %vm15438_vm0, %v22212_v60 }
 0x592   :  { %12826 = vmatmul.mubr.f32.gmra.mrb[48].mxu1 %v4382_v2 }
 0x593   :  { %12933 = vmatmul.mubr.f32.gmra.mrb[62].mxu0 %v4383_v57  ;;  %12828 = vmatprep.mubr.msk.f32.mxu1 %vm15438_vm0, %v22212_v60 }
 0x594   :  { %12935 = vmatprep.mubr.msk.f32.mxu0 %vm15438_vm0, %v22212_v60 }
 0x596   :  { %12829 = vmatmul.mubr.f32.gmra.mrb[50].mxu1 %v4383_v57  ;;  %v18722_v57 = vld [vmem:[#allocation2 + $0x39] sm:$0xff] }
 0x597   :  { %12936 = vmatmul.mubr.f32.gmra.mrb[64].mxu0 %v4384_v7  ;;  %12831 = vmatprep.mubr.msk.f32.mxu1 %vm15438_vm0, %v22212_v60 }
 0x598   :  { %12938 = vmatprep.mubr.msk.f32.mxu0 %vm15438_vm0, %v22212_v60 }
 0x59a   :  { %12832 = vmatmul.mubr.f32.gmra.mrb[52].mxu1 %v4384_v7  ;;  %v5321_v7 = vld [vmem:[%s22136_s1 + $0x360] sm:$0xff] }
 0x59b   :  { %12939 = vmatmul.mubr.f32.gmra.mrb[66].mxu0 %v4385_v36  ;;  %12834 = vmatprep.mubr.msk.f32.mxu1 %vm15438_vm0, %v22212_v60 }
 0x59c   :  { %12941 = vmatprep.mubr.msk.f32.mxu0 %vm15438_vm0, %v22212_v60 }
 0x59e   :  { %12835 = vmatmul.mubr.f32.gmra.mrb[54].mxu1 %v4385_v36  ;;  %v5322_v36 = vld [vmem:[%s22136_s1 + $0x368] sm:$0xff] }
 0x59f   :  { %12942 = vmatmul.mubr.f32.gmra.mrb[68].mxu0 %v4386_v27  ;;  %12837 = vmatprep.mubr.msk.f32.mxu1 %vm15438_vm0, %v22212_v60  ;;  %v15021_v15 = vpack.c.bf16 %v5322_v36, %v5321_v7 }
 0x5a0   :  { %12944 = vmatprep.mubr.msk.f32.mxu0 %vm15438_vm0, %v22212_v60 }
 0x5a2   :  { %12838 = vmatmul.mubr.f32.gmra.mrb[56].mxu1 %v4386_v27  ;;  %v15042_v27 = vpack.c.bf16 %v5626_v21, %v5625_v8 }
 0x5a3   :  { %12945 = vmatmul.mubr.f32.gmra.mrb[70].mxu0 %v4387_v56  ;;  %12840 = vmatprep.mubr.msk.f32.mxu1 %vm15438_vm0, %v22212_v60 }
 0x5a4   :  { %12947 = vmatprep.mubr.msk.f32.mxu0 %vm15438_vm0, %v22212_v60 }
 0x5a6   :  { %12841 = vmatmul.mubr.f32.gmra.mrb[58].mxu1 %v4387_v56 }
 0x5a7   :  { %12948 = vmatmul.mubr.f32.gmra.mrb[72].mxu0 %v4388_v63  ;;  %12843 = vmatprep.mubr.msk.f32.mxu1 %vm15438_vm0, %v22212_v60 }
 0x5a8   :  { %12950 = vmatprep.mubr.msk.f32.mxu0 %vm15438_vm0, %v22212_v60 }
 0x5aa   :  { %12844 = vmatmul.mubr.f32.gmra.mrb[60].mxu1 %v4388_v63 }
 0x5ab   :  { %12951 = vmatmul.mubr.f32.gmra.mrb[74].mxu0 %v4389_v19  ;;  %12846 = vmatprep.mubr.msk.f32.mxu1 %vm15438_vm0, %v22212_v60 }
 0x5ac   :  { %12953 = vmatprep.mubr.msk.f32.mxu0 %vm15438_vm0, %v22212_v60 }
 0x5ae   :  { %12847 = vmatmul.mubr.f32.gmra.mrb[62].mxu1 %v4389_v19 }
 0x5af   :  { %12954 = vmatmul.mubr.f32.gmra.mrb[76].mxu0 %v4390_v4  ;;  %12988 = vmatprep.mubr.msk.f32.mxu1 %vm15438_vm0, %v22212_v60  ;;  %v4678_v4 = vld [vmem:[#allocation2 + $0x40] sm:$0xff] }
 0x5b0   :  { %13095 = vmatprep.mubr.msk.f32.mxu0 %vm15438_vm0, %v22212_v60 }
 0x5b2   :  { %12989 = vmatmul.mubr.f32.vlgmr.msra.gmra.mrb[64].mxu1 %v4672_v52  ;;  %v18745_v52 = vld [vmem:[#allocation2 + $0x41] sm:$0xff] }
 0x5b3   :  { %13096 = vmatmul.mubr.f32.vlgmr.msra.gmra.mrb[78].mxu0 %v4978_v10  ;;  %15004 = vmatpush3.bf16.msra.mxu1 %v15003_v54  ;;  %v5323_v10 = vld [vmem:[%s22136_s1 + $0x370] sm:$0xff] }
 0x5b4   :  { %12991 = vmatprep.mubr.msk.f32.mxu1 %vm15438_vm0, %v22212_v60  ;;  %13098 = vmatprep.mubr.msk.f32.mxu0 %vm15438_vm0, %v22212_v60  ;;  %v15024_v48 = vpack.c.bf16 %v5324_v42, %v5323_v10  ;;  %v4685_v42 = vld [vmem:[#allocation2 + $0x78] sm:$0xff] }
 0x5b5   :  { %15005 = vmatprep.subr.bf16.mxu1 %v22213_v58  ;;  %15028 = vmatpush3.bf16.msra.mxu0 %v15027_v47 }
 0x5b6   :  { %12992 = vmatmul.mubr.f32.gmra.mrb[66].mxu1 %v4673_v9  ;;  %15029 = vmatprep.subr.bf16.mxu0 %v22213_v58  ;;  %v5629_v9 = vld [vmem:[%s22136_s1 + $0x3f0] sm:$0xff] }
 0x5b7   :  { %13099 = vmatmul.mubr.f32.gmra.mrb[80].mxu0 %v18637_v49  ;;  %12994 = vmatprep.mubr.msk.f32.mxu1 %vm15438_vm0, %v22212_v60 }
 0x5b8   :  { %13101 = vmatprep.mubr.msk.f32.mxu0 %vm15438_vm0, %v22212_v60  ;;  %15007 = vmatpush3.bf16.msra.mxu1 %v15006_v26  ;;  %v5630_v26 = vld [vmem:[%s22136_s1 + $0x3f8] sm:$0xff] }
 0x5b9   :  { %15008 = vmatprep.subr.bf16.mxu1 %v22213_v58  ;;  %15031 = vmatpush3.bf16.msra.mxu0 %v15030_v0 }
 0x5ba   :  { %12995 = vmatmul.mubr.f32.gmra.mrb[68].mxu1 %v4674_v6  ;;  %15032 = vmatprep.subr.bf16.mxu0 %v22213_v58  ;;  %v15048_v6 = vpack.c.bf16 %v5630_v26, %v5629_v9 }
 0x5bb   :  { %13102 = vmatmul.mubr.f32.gmra.mrb[82].mxu0 %v18657_v50  ;;  %12997 = vmatprep.mubr.msk.f32.mxu1 %vm15438_vm0, %v22212_v60 }
 0x5bc   :  { %13104 = vmatprep.mubr.msk.f32.mxu0 %vm15438_vm0, %v22212_v60  ;;  %15010 = vmatpush3.bf16.msra.mxu1 %v15009_v17 }
 0x5bd   :  { %15011 = vmatprep.subr.bf16.mxu1 %v22213_v58  ;;  %15034 = vmatpush3.bf16.msra.mxu0 %v15033_v5 }
 0x5be   :  { %12998 = vmatmul.mubr.f32.gmra.mrb[70].mxu1 %v4675_v44  ;;  %15035 = vmatprep.subr.bf16.mxu0 %v22213_v58  ;;  %v18779_v44 = vld [vmem:[#allocation2 + $0x51] sm:$0xff] }
 0x5bf   :  { %13105 = vmatmul.mubr.f32.gmra.mrb[84].mxu0 %v18678_v24  ;;  %13000 = vmatprep.mubr.msk.f32.mxu1 %vm15438_vm0, %v22212_v60 }
 0x5c0   :  { %13107 = vmatprep.mubr.msk.f32.mxu0 %vm15438_vm0, %v22212_v60  ;;  %15013 = vmatpush3.bf16.msra.mxu1 %v15012_v53 }
 0x5c1   :  { %v3610_v28 = vpop.f32.mrb[222].mxu1  ;;  %15014 = vmatprep.subr.bf16.mxu1 %v22213_v58  ;;  %15037 = vmatpush3.bf16.msra.mxu0 %v15036_v35 }
 0x5c2   :  { %v3866_v41 = vpop.f32.mrb[236].mxu0  ;;  %v12565_v45 = vpop.f32.mrb[223].mxu1  ;;  %13001 = vmatmul.mubr.f32.gmra.mrb[72].mxu1 %v4676_v13  ;;  %15038 = vmatprep.subr.bf16.mxu0 %v22213_v58  ;;  %v18790_v13 = vld [vmem:[#allocation2 + $0x59] sm:$0xff] }
 0x5c3   :  { %v18708_v55 = vadd.f32 %v3866_v41, %v3610_v28  ;;  %v12672_v14 = vpop.f32.mrb[237].mxu0  ;;  %13108 = vmatmul.mubr.f32.gmra.mrb[86].mxu0 %v18699_v40  ;;  %13003 = vmatprep.mubr.msk.f32.mxu1 %vm15438_vm0, %v22212_v60  ;;  %v18799_v45 = vld [vmem:[#allocation2 + $0x61] sm:$0xff] }
 0x5c4   :  { %13110 = vmatprep.mubr.msk.f32.mxu0 %vm15438_vm0, %v22212_v60  ;;  %15016 = vmatpush3.bf16.msra.mxu1 %v15015_v16 }
 0x5c5   :  { %v3615_v29 = vpop.f32.mrb[224].mxu1  ;;  %15017 = vmatprep.subr.bf16.mxu1 %v22213_v58  ;;  %15040 = vmatpush3.bf16.msra.mxu0 %v15039_v3  ;;  %v4682_v3 = vld [vmem:[#allocation2 + $0x60] sm:$0xff] }
 0x5c6   :  { %v3871_v2 = vpop.f32.mrb[238].mxu0  ;;  %v12568_v63 = vpop.f32.mrb[225].mxu1  ;;  %13004 = vmatmul.mubr.f32.gmra.mrb[74].mxu1 %v4677_v11  ;;  %15041 = vmatprep.subr.bf16.mxu0 %v22213_v58 }
 0x5c7   :  { %v18731_v56 = vadd.f32 %v3871_v2, %v3615_v29  ;;  %v12675_v19 = vpop.f32.mrb[239].mxu0  ;;  %13111 = vmatmul.mubr.f32.gmra.mrb[88].mxu0 %v18722_v57  ;;  %13006 = vmatprep.mubr.msk.f32.mxu1 %vm15438_vm0, %v22212_v60  ;;  %v4683_v29 = vld [vmem:[#allocation2 + $0x68] sm:$0xff] }
 0x5c8   :  { %13113 = vmatprep.mubr.msk.f32.mxu0 %vm15438_vm0, %v22212_v60  ;;  %15019 = vmatpush3.bf16.msra.mxu1 %v15018_v33  ;;  %v18808_v2 = vld [vmem:[#allocation2 + $0x69] sm:$0xff] }
 0x5c9   :  { %v3620_v61 = vpop.f32.mrb[226].mxu1  ;;  %15020 = vmatprep.subr.bf16.mxu1 %v22213_v58  ;;  %15043 = vmatpush3.bf16.msra.mxu0 %v15042_v27 }
 0x5ca   :  { %v3876_v54 = vpop.f32.mrb[240].mxu0  ;;  %v12571_v23 = vpop.f32.mrb[227].mxu1  ;;  %13007 = vmatmul.mubr.f32.gmra.mrb[76].mxu1 %v4678_v4  ;;  %15044 = vmatprep.subr.bf16.mxu0 %v22213_v58 }
 0x5cb   :  { %v18754_v47 = vadd.f32 %v3876_v54, %v3620_v61  ;;  %v12678_v1 = vpop.f32.mrb[241].mxu0  ;;  %13114 = vmatmul.mubr.f32.gmra.mrb[90].mxu0 %v18745_v52  ;;  %13009 = vmatprep.mubr.msk.f32.mxu1 %vm15438_vm0, %v22212_v60 }
 0x5cc   :  { %13116 = vmatprep.mubr.msk.f32.mxu0 %vm15438_vm0, %v22212_v60  ;;  %15022 = vmatpush3.bf16.msra.mxu1 %v15021_v15 }
 0x5cd   :  { %v3625_v43 = vpop.f32.mrb[228].mxu1  ;;  %15023 = vmatprep.subr.bf16.mxu1 %v22213_v58  ;;  %15046 = vmatpush3.bf16.msra.mxu0 %v15045_v30  ;;  %v18826_v30 = vld [vmem:[#allocation2 + $0x79] sm:$0xff] }
 0x5ce   :  { %v3881_v0 = vpop.f32.mrb[242].mxu0  ;;  %v12574_v12 = vpop.f32.mrb[229].mxu1  ;;  %13010 = vmatmul.mubr.f32.gmra.mrb[78].mxu1 %v4679_v34  ;;  %15047 = vmatprep.subr.bf16.mxu0 %v22213_v58 }
 0x5cf   :  { %v18771_v17 = vadd.f32 %v3881_v0, %v3625_v43  ;;  %v12681_v32 = vpop.f32.mrb[243].mxu0  ;;  %13117 = vmatmul.mubr.f32.gmra.mrb[92].mxu0 %v18768_v31  ;;  %13012 = vmatprep.mubr.msk.f32.mxu1 %vm15438_vm0, %v22212_v60  ;;  %v4686_v43 = vld [vmem:[#allocation2 + $0x80] sm:$0xff] }
 0x5d0   :  { %13119 = vmatprep.mubr.msk.f32.mxu0 %vm15438_vm0, %v22212_v60  ;;  %15025 = vmatpush3.bf16.msra.mxu1 %v15024_v48  ;;  %v18835_v0 = vld [vmem:[#allocation2 + $0x81] sm:$0xff] }
 0x5d1   :  { %v3630_v5 = vpop.f32.mrb[230].mxu1  ;;  %15049 = vmatpush3.bf16.msra.mxu0 %v15048_v6  ;;  %15050 = vmatprep.subr.bf16.mxu1 %v22213_v58 }
 0x5d2   :  { %v3886_v51 = vpop.f32.mrb[244].mxu0  ;;  %v12577_v59 = vpop.f32.mrb[231].mxu1  ;;  %13013 = vmatmul.mubr.f32.gmra.mrb[80].mxu1 %v4680_v46  ;;  %15074 = vmatprep.subr.bf16.mxu0 %v22213_v58  ;;  %v18844_v46 = vld [vmem:[#allocation2 + $0x89] sm:$0xff] }
 0x5d3   :  { %v18782_v53 = vadd.f32 %v3886_v51, %v3630_v5  ;;  %v12684_v38 = vpop.f32.mrb[245].mxu0  ;;  %13120 = vmatmul.mubr.f32.gmra.mrb[94].mxu0 %v18779_v44  ;;  %13015 = vmatprep.mubr.msk.f32.mxu1 %vm15438_vm0, %v22212_v60  ;;  %v4687_v51 = vld [vmem:[#allocation2 + $0x88] sm:$0xff] }
 0x5d4   :  { %13122 = vmatprep.mubr.msk.f32.mxu0 %vm15438_vm0, %v22212_v60 }
 0x5d5   :  { %v3635_v35 = vpop.f32.mrb[232].mxu1 }
 0x5d6   :  { %v3891_v62 = vpop.f32.mrb[246].mxu0  ;;  %v12580_v28 = vpop.f32.mrb[233].mxu1  ;;  %13016 = vmatmul.mubr.f32.gmra.mrb[82].mxu1 %v4681_v37 }
 0x5d7   :  { %v18792_v16 = vadd.f32 %v3891_v62, %v3635_v35  ;;  %v12687_v41 = vpop.f32.mrb[247].mxu0  ;;  %13123 = vmatmul.mubr.f32.gmra.mrb[96].mxu0 %v18790_v13  ;;  %13018 = vmatprep.mubr.msk.f32.mxu1 %vm15438_vm0, %v22212_v60  ;;  %v4688_v28 = vld [vmem:[#allocation2 + $0x90] sm:$0xff] }
 0x5d8   :  { %13125 = vmatprep.mubr.msk.f32.mxu0 %vm15438_vm0, %v22212_v60  ;;  %v18853_v41 = vld [vmem:[#allocation2 + $0x91] sm:$0xff] }
 0x5d9   :  { %v3640_v25 = vpop.f32.mrb[234].mxu1 }
 0x5da   :  { %v3896_v39 = vpop.f32.mrb[248].mxu0  ;;  %v12583_v8 = vpop.f32.mrb[235].mxu1  ;;  %13019 = vmatmul.mubr.f32.gmra.mrb[84].mxu1 %v4682_v3 }
 0x5db   :  { %v18801_v14 = vadd.f32 %v3896_v39, %v3640_v25  ;;  %v12690_v21 = vpop.f32.mrb[249].mxu0  ;;  %13126 = vmatmul.mubr.f32.gmra.mrb[98].mxu0 %v18799_v45  ;;  %13021 = vmatprep.mubr.msk.f32.mxu1 %vm15438_vm0, %v22212_v60 }
 0x5dc   :  { %13128 = vmatprep.mubr.msk.f32.mxu0 %vm15438_vm0, %v22212_v60 }
 0x5dd   :  { %v3645_v11 = vpop.f32.mrb[236].mxu1 }
 0x5de   :  { %v3901_v33 = vpop.f32.mrb[250].mxu0  ;;  %v12586_v36 = vpop.f32.mrb[237].mxu1  ;;  %13022 = vmatmul.mubr.f32.gmra.mrb[86].mxu1 %v4683_v29 }
 0x5df   :  { %v18810_v7 = vadd.f32 %v3901_v33, %v3645_v11  ;;  %v12693_v27 = vpop.f32.mrb[251].mxu0  ;;  %13129 = vmatmul.mubr.f32.gmra.mrb[100].mxu0 %v18808_v2  ;;  %13024 = vmatprep.mubr.msk.f32.mxu1 %vm15438_vm0, %v22212_v60  ;;  %v4689_v11 = vld [vmem:[#allocation2 + $0x98] sm:$0xff] }
 0x5e0   :  { %13131 = vmatprep.mubr.msk.f32.mxu0 %vm15438_vm0, %v22212_v60  ;;  %v18862_v33 = vld [vmem:[#allocation2 + $0x99] sm:$0xff] }
 0x5e1   :  { %v3650_v63 = vpop.f32.mrb[238].mxu1 }
 0x5e2   :  { %v3906_v19 = vpop.f32.mrb[252].mxu0  ;;  %v12589_v15 = vpop.f32.mrb[239].mxu1  ;;  %13025 = vmatmul.mubr.f32.gmra.mrb[88].mxu1 %v4684_v18  ;;  %v4690_v18 = vld [vmem:[#allocation2 + $0xa0] sm:$0xff] }
 0x5e3   :  { %v18819_v4 = vadd.f32 %v3906_v19, %v3650_v63  ;;  %v12696_v61 = vpop.f32.mrb[253].mxu0  ;;  %13132 = vmatmul.mubr.f32.gmra.mrb[102].mxu0 %v18817_v20  ;;  %13027 = vmatprep.mubr.msk.f32.mxu1 %vm15438_vm0, %v22212_v60  ;;  %v18871_v15 = vld [vmem:[#allocation2 + $0xa1] sm:$0xff] }
 0x5e4   :  { %13134 = vmatprep.mubr.msk.f32.mxu0 %vm15438_vm0, %v22212_v60 }
 0x5e5   :  { %v3655_v54 = vpop.f32.mrb[240].mxu1 }
 0x5e6   :  { %v3911_v10 = vpop.f32.mrb[254].mxu0  ;;  %v12592_v1 = vpop.f32.mrb[241].mxu1  ;;  %13028 = vmatmul.mubr.f32.gmra.mrb[90].mxu1 %v4685_v42 }
 0x5e7   :  { %v18828_v23 = vadd.f32 %v3911_v10, %v3655_v54  ;;  %v12699_v9 = vpop.f32.mrb[255].mxu0  ;;  %13135 = vmatmul.mubr.f32.gmra.mrb[104].mxu0 %v18826_v30  ;;  %13030 = vmatprep.mubr.msk.f32.mxu1 %vm15438_vm0, %v22212_v60 }
 0x5e8   :  { %13137 = vmatprep.mubr.msk.f32.mxu0 %vm15438_vm0, %v22212_v60  ;;  %v4691_v9 = vld [vmem:[#allocation2 + $0xa8] sm:$0xff] }
 0x5e9   :  { %v3660_v26 = vpop.f32.mrb[242].mxu1 }
 0x5ea   :  { %v3916_v48 = vpop.f32.mrb[0].mxu0  ;;  %v12595_v6 = vpop.f32.mrb[243].mxu1  ;;  %13031 = vmatmul.mubr.f32.gmra.mrb[92].mxu1 %v4686_v43 }
 0x5eb   :  { %v18837_v34 = vadd.f32 %v3916_v48, %v3660_v26  ;;  %v12702_v12 = vpop.f32.mrb[1].mxu0  ;;  %13138 = vmatmul.mubr.f32.gmra.mrb[106].mxu0 %v18835_v0  ;;  %13033 = vmatprep.mubr.msk.f32.mxu1 %vm15438_vm0, %v22212_v60  ;;  %v18880_v26 = vld [vmem:[#allocation2 + $0xa9] sm:$0xff] }
 0x5ec   :  { %13140 = vmatprep.mubr.msk.f32.mxu0 %vm15438_vm0, %v22212_v60 }
 0x5ed   :  { %v3665_v32 = vpop.f32.mrb[244].mxu1 }
 0x5ee   :  { %v3921_v5 = vpop.f32.mrb[2].mxu0  ;;  %v12598_v38 = vpop.f32.mrb[245].mxu1  ;;  %13034 = vmatmul.mubr.f32.gmra.mrb[94].mxu1 %v4687_v51  ;;  %v18889_v51 = vld [vmem:[#allocation2 + $0xb1] sm:$0xff] }
 0x5ef   :  { %v18846_v59 = vadd.f32 %v3921_v5, %v3665_v32  ;;  %v12705_v35 = vpop.f32.mrb[3].mxu0  ;;  %13141 = vmatmul.mubr.f32.gmra.mrb[108].mxu0 %v18844_v46  ;;  %13036 = vmatprep.mubr.msk.f32.mxu1 %vm15438_vm0, %v22212_v60  ;;  %v4692_v5 = vld [vmem:[#allocation2 + $0xb0] sm:$0xff] }
 0x5f0   :  { %13143 = vmatprep.mubr.msk.f32.mxu0 %vm15438_vm0, %v22212_v60 }
 0x5f1   :  { %v3670_v62 = vpop.f32.mrb[246].mxu1 }
 0x5f2   :  { %v3926_v37 = vpop.f32.mrb[4].mxu0  ;;  %v12601_v39 = vpop.f32.mrb[247].mxu1  ;;  %13037 = vmatmul.mubr.f32.gmra.mrb[96].mxu1 %v4688_v28 }
 0x5f3   :  { %v18855_v25 = vadd.f32 %v3926_v37, %v3670_v62  ;;  %v12708_v3 = vpop.f32.mrb[5].mxu0  ;;  %13144 = vmatmul.mubr.f32.gmra.mrb[110].mxu0 %v18853_v41  ;;  %13039 = vmatprep.mubr.msk.f32.mxu1 %vm15438_vm0, %v22212_v60  ;;  %v4693_v39 = vld [vmem:[#allocation2 + $0xb8] sm:$0xff] }
 0x5f4   :  { %13146 = vmatprep.mubr.msk.f32.mxu0 %vm15438_vm0, %v22212_v60  ;;  %v18898_v3 = vld [vmem:[#allocation2 + $0xb9] sm:$0xff] }
 0x5f5   :  { %v3675_v8 = vpop.f32.mrb[248].mxu1 }
 0x5f6   :  { %v3931_v21 = vpop.f32.mrb[6].mxu0  ;;  %v12604_v36 = vpop.f32.mrb[249].mxu1  ;;  %13040 = vmatmul.mubr.f32.gmra.mrb[98].mxu1 %v4689_v11 }
 0x5f7   :  { %v18864_v29 = vadd.f32 %v3931_v21, %v3675_v8  ;;  %v12711_v27 = vpop.f32.mrb[7].mxu0  ;;  %13147 = vmatmul.mubr.f32.gmra.mrb[112].mxu0 %v18862_v33  ;;  %13042 = vmatprep.mubr.msk.f32.mxu1 %vm15438_vm0, %v22212_v60 }
 0x5f8   :  { %13149 = vmatprep.mubr.msk.f32.mxu0 %vm15438_vm0, %v22212_v60 }
 0x5f9   :  { %v3680_v63 = vpop.f32.mrb[250].mxu1 }
 0x5fa   :  { %v3936_v19 = vpop.f32.mrb[8].mxu0  ;;  %v12607_v54 = vpop.f32.mrb[251].mxu1  ;;  %13043 = vmatmul.mubr.f32.gmra.mrb[100].mxu1 %v4690_v18 }
 0x5fb   :  { %v18873_v61 = vadd.f32 %v3936_v19, %v3680_v63  ;;  %v12714_v10 = vpop.f32.mrb[9].mxu0  ;;  %13150 = vmatmul.mubr.f32.gmra.mrb[114].mxu0 %v18871_v15  ;;  %13045 = vmatprep.mubr.msk.f32.mxu1 %vm15438_vm0, %v22212_v60  ;;  %v4694_v63 = vld [vmem:[#allocation2 + $0xc0] sm:$0xff] }
 0x5fc   :  { %13152 = vmatprep.mubr.msk.f32.mxu0 %vm15438_vm0, %v22212_v60  ;;  %v18907_v19 = vld [vmem:[#allocation2 + $0xc1] sm:$0xff] }
 0x5fd   :  { %v3685_v42 = vpop.f32.mrb[252].mxu1 }
 0x5fe   :  { %v3941_v1 = vpop.f32.mrb[10].mxu0  ;;  %v12610_v43 = vpop.f32.mrb[253].mxu1  ;;  %13046 = vmatmul.mubr.f32.gmra.mrb[102].mxu1 %v4691_v9  ;;  %v4695_v9 = vld [vmem:[#allocation2 + $0xc8] sm:$0xff] }
 0x5ff   :  { %v18882_v48 = vadd.f32 %v3941_v1, %v3685_v42  ;;  %v12717_v6 = vpop.f32.mrb[11].mxu0  ;;  %13153 = vmatmul.mubr.f32.gmra.mrb[116].mxu0 %v18880_v26  ;;  %13048 = vmatprep.mubr.msk.f32.mxu1 %vm15438_vm0, %v22212_v60  ;;  %v18916_v43 = vld [vmem:[#allocation2 + $0xc9] sm:$0xff] }
 0x600   :  { %13155 = vmatprep.mubr.msk.f32.mxu0 %vm15438_vm0, %v22212_v60 }
 0x601   :  { %v3690_v12 = vpop.f32.mrb[254].mxu1 }
 0x602   :  { %v3946_v32 = vpop.f32.mrb[12].mxu0  ;;  %v12613_v35 = vpop.f32.mrb[255].mxu1  ;;  %13049 = vmatmul.mubr.f32.gmra.mrb[104].mxu1 %v4692_v5  ;;  %v5921_v5 = vld [vmem:[%s22136_s1 + $0x400] sm:$0xff] }
 0x603   :  { %v18891_v38 = vadd.f32 %v3946_v32, %v3690_v12  ;;  %v12720_v62 = vpop.f32.mrb[13].mxu0  ;;  %13156 = vmatmul.mubr.f32.gmra.mrb[118].mxu0 %v18889_v51  ;;  %13051 = vmatprep.mubr.msk.f32.mxu1 %vm15438_vm0, %v22212_v60  ;;  %v5922_v35 = vld [vmem:[%s22136_s1 + $0x408] sm:$0xff] }
 0x604   :  { %13158 = vmatprep.mubr.msk.f32.mxu0 %vm15438_vm0, %v22212_v60 }
 0x605   :  { %v3695_v37 = vpop.f32.mrb[0].mxu1 }
 0x606   :  { %v3951_v28 = vpop.f32.mrb[14].mxu0  ;;  %v12616_v21 = vpop.f32.mrb[1].mxu1  ;;  %13052 = vmatmul.mubr.f32.gmra.mrb[106].mxu1 %v4693_v39 }
 0x607   :  { %v18900_v8 = vadd.f32 %v3951_v28, %v3695_v37  ;;  %v12723_v11 = vpop.f32.mrb[15].mxu0  ;;  %13159 = vmatmul.mubr.f32.gmra.mrb[120].mxu0 %v18898_v3  ;;  %13054 = vmatprep.mubr.msk.f32.mxu1 %vm15438_vm0, %v22212_v60  ;;  %v18931_v28 = vld [vmem:[#allocation2 + $0xd1] sm:$0xff] }
 0x608   :  { %13161 = vmatprep.mubr.msk.f32.mxu0 %vm15438_vm0, %v22212_v60 }
 0x609   :  { %v3700_v36 = vpop.f32.mrb[2].mxu1 }
 0x60a   :  { %v3956_v27 = vpop.f32.mrb[16].mxu0  ;;  %v12619_v54 = vpop.f32.mrb[3].mxu1  ;;  %13055 = vmatmul.mubr.f32.gmra.mrb[108].mxu1 %v4694_v63 }
 0x60b   :  { %v18909_v18 = vadd.f32 %v3956_v27, %v3700_v36  ;;  %v12726_v10 = vpop.f32.mrb[17].mxu0  ;;  %13162 = vmatmul.mubr.f32.gmra.mrb[122].mxu0 %v18907_v19  ;;  %13057 = vmatprep.mubr.msk.f32.mxu1 %vm15438_vm0, %v22212_v60  ;;  %v15432_v36 = vld [vmem:[#allocation2 + $0xd0] sm:$0xff]  ;;  %v15051_v27 = vpack.c.bf16 %v5922_v35, %v5921_v5 }
 0x60c   :  { %13164 = vmatprep.mubr.msk.f32.mxu0 %vm15438_vm0, %v22212_v60  ;;  %v5590_v10 = vld [vmem:[#allocation2 + $0x1a] sm:$0xff] }
 0x60d   :  { %v3705_v42 = vpop.f32.mrb[4].mxu1 }
 0x60e   :  { %v3961_v1 = vpop.f32.mrb[18].mxu0  ;;  %v12622_v12 = vpop.f32.mrb[5].mxu1  ;;  %13058 = vmatmul.mubr.f32.gmra.mrb[110].mxu1 %v4695_v9 }
 0x60f   :  { %v18918_v6 = vadd.f32 %v3961_v1, %v3705_v42  ;;  %v12729_v32 = vpop.f32.mrb[19].mxu0  ;;  %13165 = vmatmul.mubr.f32.gmra.mrb[124].mxu0 %v18916_v43  ;;  %13060 = vmatprep.mubr.msk.f32.mxu1 %vm15438_vm0, %v22212_v60  ;;  %v5923_v42 = vld [vmem:[%s22136_s1 + $0x410] sm:$0xff]  ;;  %v5924_v1 = vld [vmem:[%s22136_s1 + $0x418] sm:$0xff] }
 0x610   :  { %13167 = vmatprep.mubr.msk.f32.mxu0 %vm15438_vm0, %v22212_v60  ;;  %v15054_v5 = vpack.c.bf16 %v5924_v1, %v5923_v42  ;;  %v5592_v42 = vld [vmem:[#allocation2 + $0x2a] sm:$0xff] }
 0x611   :  { %v3710_v62 = vpop.f32.mrb[6].mxu1  ;;  %v5927_v1 = vld [vmem:[%s22136_s1 + $0x430] sm:$0xff] }
 0x612   :  { %v3966_v37 = vpop.f32.mrb[20].mxu0  ;;  %v12625_v21 = vpop.f32.mrb[7].mxu1  ;;  %13061 = vmatmul.mubr.f32.gmra.mrb[112].mxu1 %v15432_v36 }
 0x613   :  { %v18933_v39 = vadd.f32 %v3966_v37, %v3710_v62  ;;  %v12732_v11 = vpop.f32.mrb[21].mxu0  ;;  %13168 = vmatmul.mubr.f32.gmra.mrb[126].mxu0 %v18931_v28  ;;  %13202 = vmatprep.mubr.msk.f32.mxu1 %vm15438_vm0, %v22212_v60  ;;  %v5591_v37 = vld [vmem:[#allocation2 + $0x22] sm:$0xff] }
 0x614   :  { %13309 = vmatprep.mubr.msk.f32.mxu0 %vm15438_vm0, %v22212_v60  ;;  %v5925_v21 = vld [vmem:[%s22136_s1 + $0x420] sm:$0xff] }
 0x615   :  { %v3715_v63 = vpop.f32.mrb[8].mxu1 }
 0x616   :  { %v3971_v54 = vpop.f32.mrb[22].mxu0  ;;  %v12628_v12 = vpop.f32.mrb[9].mxu1  ;;  %13203 = vmatmul.mubr.f32.vlgmr.msra.gmra.mrb[114].mxu1 %v18637_v49  ;;  %v5926_v49 = vld [vmem:[%s22136_s1 + $0x428] sm:$0xff] }
 0x617   :  { %v18946_v9 = vadd.f32 %v3971_v54, %v3715_v63  ;;  %v12735_v32 = vpop.f32.mrb[23].mxu0  ;;  %13310 = vmatmul.mubr.f32.vlgmr.msra.gmra.mrb[128].mxu0 %v5590_v10  ;;  %15052 = vmatpush3.bf16.msra.mxu1 %v15051_v27  ;;  %v15057_v63 = vpack.c.bf16 %v5926_v49, %v5925_v21  ;;  %v5593_v21 = vld [vmem:[#allocation2 + $0x32] sm:$0xff]  ;;  %v5929_v49 = vld [vmem:[%s22136_s1 + $0x440] sm:$0xff] }
 0x618   :  { %13205 = vmatprep.mubr.msk.f32.mxu1 %vm15438_vm0, %v22212_v60  ;;  %13312 = vmatprep.mubr.msk.f32.mxu0 %vm15438_vm0, %v22212_v60 }
 0x619   :  { %15053 = vmatprep.subr.bf16.mxu1 %v22213_v58  ;;  %v3720_v35 = vpop.f32.mrb[10].mxu1 }
 0x61a   :  { %v3976_v62 = vpop.f32.mrb[24].mxu0  ;;  %v12631_v36 = vpop.f32.mrb[11].mxu1  ;;  %13206 = vmatmul.mubr.f32.gmra.mrb[116].mxu1 %v18657_v50  ;;  %v5928_v50 = vld [vmem:[%s22136_s1 + $0x438] sm:$0xff] }
 0x61b   :  { %v18960_v11 = vadd.f32 %v3976_v62, %v3720_v35  ;;  %v12738_v27 = vpop.f32.mrb[25].mxu0  ;;  %13313 = vmatmul.mubr.f32.gmra.mrb[130].mxu0 %v5591_v37  ;;  %13208 = vmatprep.mubr.msk.f32.mxu1 %vm15438_vm0, %v22212_v60 }
 0x61c   :  { %13315 = vmatprep.mubr.msk.f32.mxu0 %vm15438_vm0, %v22212_v60  ;;  %15055 = vmatpush3.bf16.msra.mxu1 %v15054_v5  ;;  %v15060_v5 = vpack.c.bf16 %v5928_v50, %v5927_v1  ;;  %v5594_v50 = vld [vmem:[#allocation2 + $0x3a] sm:$0xff] }
 0x61d   :  { %v3725_v54 = vpop.f32.mrb[12].mxu1  ;;  %15056 = vmatprep.subr.bf16.mxu1 %v22213_v58 }
 0x61e   :  { %v3981_v10 = vpop.f32.mrb[26].mxu0  ;;  %v12634_v32 = vpop.f32.mrb[13].mxu1  ;;  %13209 = vmatmul.mubr.f32.gmra.mrb[118].mxu1 %v18678_v24  ;;  %v5930_v24 = vld [vmem:[%s22136_s1 + $0x448] sm:$0xff] }
 0x61f   :  { %v18974_v12 = vadd.f32 %v3981_v10, %v3725_v54  ;;  %v12741_v35 = vpop.f32.mrb[27].mxu0  ;;  %13316 = vmatmul.mubr.f32.gmra.mrb[132].mxu0 %v5592_v42  ;;  %13211 = vmatprep.mubr.msk.f32.mxu1 %vm15438_vm0, %v22212_v60  ;;  %v15063_v10 = vpack.c.bf16 %v5930_v24, %v5929_v49  ;;  %v5595_v24 = vld [vmem:[#allocation2 + $0x42] sm:$0xff] }
 0x620   :  { %13318 = vmatprep.mubr.msk.f32.mxu0 %vm15438_vm0, %v22212_v60  ;;  %15058 = vmatpush3.bf16.msra.mxu1 %v15057_v63 }
 0x621   :  { %v4167_v62 = vpop.f32.mrb[14].mxu1  ;;  %15059 = vmatprep.subr.bf16.mxu1 %v22213_v58 }
 0x622   :  { %v4473_v37 = vpop.f32.mrb[28].mxu0  ;;  %v4316_v36 = vadd.f32 %v4167_v62, %v18382_v22  ;;  %v12776_v27 = vpop.f32.mrb[15].mxu1  ;;  %13212 = vmatmul.mubr.f32.gmra.mrb[120].mxu1 %v18699_v40  ;;  %v5931_v22 = vld [vmem:[%s22136_s1 + $0x450] sm:$0xff]  ;;  %v5932_v40 = vld [vmem:[%s22136_s1 + $0x458] sm:$0xff] }
 0x623   :  { %v12883_v54 = vpop.f32.mrb[29].mxu0  ;;  %13319 = vmatmul.mubr.f32.gmra.mrb[134].mxu0 %v5593_v21  ;;  %13214 = vmatprep.mubr.msk.f32.mxu1 %vm15438_vm0, %v22212_v60 }
 0x624   :  { %13321 = vmatprep.mubr.msk.f32.mxu0 %vm15438_vm0, %v22212_v60  ;;  %v18994_v63 = vadd.f32 %v4473_v37, %v4316_v36  ;;  %15061 = vmatpush3.bf16.msra.mxu1 %v15060_v5  ;;  %v15066_v37 = vpack.c.bf16 %v5932_v40, %v5931_v22  ;;  %v5596_v22 = vld [vmem:[#allocation2 + $0x4a] sm:$0xff] }
 0x625   :  { %v4172_v42 = vpop.f32.mrb[16].mxu1  ;;  %15062 = vmatprep.subr.bf16.mxu1 %v22213_v58 }
 0x626   :  { %v4478_v1 = vpop.f32.mrb[30].mxu0  ;;  %v4317_v32 = vadd.f32 %v4172_v42, %v18708_v55  ;;  %v12779_v35 = vpop.f32.mrb[17].mxu1  ;;  %13215 = vmatmul.mubr.f32.gmra.mrb[122].mxu1 %v18722_v57  ;;  %v5933_v55 = vld [vmem:[%s22136_s1 + $0x460] sm:$0xff]  ;;  %v5934_v57 = vld [vmem:[%s22136_s1 + $0x468] sm:$0xff] }
 0x627   :  { %v12886_v62 = vpop.f32.mrb[31].mxu0  ;;  %13322 = vmatmul.mubr.f32.gmra.mrb[136].mxu0 %v5594_v50  ;;  %13217 = vmatprep.mubr.msk.f32.mxu1 %vm15438_vm0, %v22212_v60  ;;  %v15069_v42 = vpack.c.bf16 %v5934_v57, %v5933_v55 }
 0x628   :  { %13324 = vmatprep.mubr.msk.f32.mxu0 %vm15438_vm0, %v22212_v60  ;;  %v19009_v5 = vadd.f32 %v4478_v1, %v4317_v32  ;;  %15064 = vmatpush3.bf16.msra.mxu1 %v15063_v10 }
 0x629   :  { %v4177_v21 = vpop.f32.mrb[18].mxu1  ;;  %15065 = vmatprep.subr.bf16.mxu1 %v22213_v58 }
 0x62a   :  { %v4483_v49 = vpop.f32.mrb[32].mxu0  ;;  %v4318_v36 = vadd.f32 %v4177_v21, %v18731_v56  ;;  %v12782_v27 = vpop.f32.mrb[19].mxu1  ;;  %13218 = vmatmul.mubr.f32.gmra.mrb[124].mxu1 %v18745_v52  ;;  %v5935_v56 = vld [vmem:[%s22136_s1 + $0x470] sm:$0xff]  ;;  %v5936_v52 = vld [vmem:[%s22136_s1 + $0x478] sm:$0xff] }
 0x62b   :  { %v12889_v54 = vpop.f32.mrb[33].mxu0  ;;  %13325 = vmatmul.mubr.f32.gmra.mrb[138].mxu0 %v5595_v24  ;;  %13220 = vmatprep.mubr.msk.f32.mxu1 %vm15438_vm0, %v22212_v60  ;;  %v5597_v24 = vld [vmem:[#allocation2 + $0x52] sm:$0xff] }
 0x62c   :  { %13327 = vmatprep.mubr.msk.f32.mxu0 %vm15438_vm0, %v22212_v60  ;;  %v19024_v10 = vadd.f32 %v4483_v49, %v4318_v36  ;;  %15067 = vmatpush3.bf16.msra.mxu1 %v15066_v37  ;;  %v15072_v37 = vpack.c.bf16 %v5936_v52, %v5935_v56  ;;  %v5598_v54 = vld [vmem:[#allocation2 + $0x5a] sm:$0xff]  ;;  %v5599_v56 = vld [vmem:[#allocation2 + $0x62] sm:$0xff] }
 0x62d   :  { %v4182_v1 = vpop.f32.mrb[20].mxu1  ;;  %15068 = vmatprep.subr.bf16.mxu1 %v22213_v58 }
 0x62e   :  { %v4488_v50 = vpop.f32.mrb[34].mxu0  ;;  %v4319_v40 = vadd.f32 %v4182_v1, %v18754_v47  ;;  %v12785_v32 = vpop.f32.mrb[21].mxu1  ;;  %13221 = vmatmul.mubr.f32.gmra.mrb[126].mxu1 %v18768_v31 }
 0x62f   :  { %v12892_v35 = vpop.f32.mrb[35].mxu0  ;;  %13328 = vmatmul.mubr.f32.gmra.mrb[140].mxu0 %v5596_v22  ;;  %13223 = vmatprep.mubr.msk.f32.mxu1 %vm15438_vm0, %v22212_v60 }
 0x630   :  { %13330 = vmatprep.mubr.msk.f32.mxu0 %vm15438_vm0, %v22212_v60  ;;  %v19039_v62 = vadd.f32 %v4488_v50, %v4319_v40  ;;  %15070 = vmatpush3.bf16.msra.mxu1 %v15069_v42 }
 0x631   :  { %v4187_v21 = vpop.f32.mrb[22].mxu1  ;;  %15071 = vmatprep.subr.bf16.mxu1 %v22213_v58 }
 0x632   :  { %v4493_v49 = vpop.f32.mrb[36].mxu0  ;;  %v4320_v47 = vadd.f32 %v4187_v21, %v18771_v17  ;;  %v12788_v55 = vpop.f32.mrb[23].mxu1  ;;  %13224 = vmatmul.mubr.f32.gmra.mrb[128].mxu1 %v18779_v44 }
 0x633   :  { %v12895_v31 = vpop.f32.mrb[37].mxu0  ;;  %13331 = vmatmul.mubr.f32.gmra.mrb[142].mxu0 %v5597_v24  ;;  %13226 = vmatprep.mubr.msk.f32.mxu1 %vm15438_vm0, %v22212_v60  ;;  %v5601_v55 = vld [vmem:[#allocation2 + $0x72] sm:$0xff] }
 0x634   :  { %13333 = vmatprep.mubr.msk.f32.mxu0 %vm15438_vm0, %v22212_v60  ;;  %v19048_v57 = vadd.f32 %v4493_v49, %v4320_v47  ;;  %15073 = vmatpush3.bf16.msra.mxu1 %v15072_v37  ;;  %v5600_v37 = vld [vmem:[#allocation2 + $0x6a] sm:$0xff] }
 0x635   :  { %v4192_v36 = vpop.f32.mrb[24].mxu1  ;;  %15146 = vmatprep.subr.bf16.mxu1 %v22213_v58 }
 0x636   :  { %v4498_v27 = vpop.f32.mrb[38].mxu0  ;;  %v4321_v17 = vadd.f32 %v4192_v36, %v18782_v53  ;;  %v12791_v42 = vpop.f32.mrb[25].mxu1  ;;  %13227 = vmatmul.mubr.f32.gmra.mrb[130].mxu1 %v18790_v13 }
 0x637   :  { %v12898_v1 = vpop.f32.mrb[39].mxu0  ;;  %13334 = vmatmul.mubr.f32.gmra.mrb[144].mxu0 %v5598_v54  ;;  %13229 = vmatprep.mubr.msk.f32.mxu1 %vm15438_vm0, %v22212_v60 }
 0x638   :  { %13336 = vmatprep.mubr.msk.f32.mxu0 %vm15438_vm0, %v22212_v60  ;;  %v19057_v44 = vadd.f32 %v4498_v27, %v4321_v17  ;;  %v5602_v17 = vld [vmem:[#allocation2 + $0x7a] sm:$0xff] }
 0x639   :  { %v4197_v50 = vpop.f32.mrb[26].mxu1 }
 0x63a   :  { %v4503_v22 = vpop.f32.mrb[40].mxu0  ;;  %v4322_v52 = vadd.f32 %v4197_v50, %v18792_v16  ;;  %v12794_v40 = vpop.f32.mrb[27].mxu1  ;;  %13230 = vmatmul.mubr.f32.gmra.mrb[132].mxu1 %v18799_v45 }
 0x63b   :  { %v12901_v53 = vpop.f32.mrb[41].mxu0  ;;  %13337 = vmatmul.mubr.f32.gmra.mrb[146].mxu0 %v5599_v56  ;;  %13232 = vmatprep.mubr.msk.f32.mxu1 %vm15438_vm0, %v22212_v60  ;;  %v5603_v56 = vld [vmem:[#allocation2 + $0x82] sm:$0xff] }
 0x63c   :  { %13339 = vmatprep.mubr.msk.f32.mxu0 %vm15438_vm0, %v22212_v60  ;;  %v19065_v13 = vadd.f32 %v4503_v22, %v4322_v52 }
 0x63d   :  { %v4202_v32 = vpop.f32.mrb[28].mxu1 }
 0x63e   :  { %v4508_v35 = vpop.f32.mrb[42].mxu0  ;;  %v4323_v21 = vadd.f32 %v4202_v32, %v18801_v14  ;;  %v12797_v49 = vpop.f32.mrb[29].mxu1  ;;  %13233 = vmatmul.mubr.f32.gmra.mrb[134].mxu1 %v18808_v2 }
 0x63f   :  { %v12904_v16 = vpop.f32.mrb[43].mxu0  ;;  %13340 = vmatmul.mubr.f32.gmra.mrb[148].mxu0 %v5600_v37  ;;  %13235 = vmatprep.mubr.msk.f32.mxu1 %vm15438_vm0, %v22212_v60 }
 0x640   :  { %13342 = vmatprep.mubr.msk.f32.mxu0 %vm15438_vm0, %v22212_v60  ;;  %v19073_v45 = vadd.f32 %v4508_v35, %v4323_v21  ;;  %v5604_v35 = vld [vmem:[#allocation2 + $0x8a] sm:$0xff] }
 0x641   :  { %v4207_v24 = vpop.f32.mrb[30].mxu1 }
 0x642   :  { %v4513_v47 = vpop.f32.mrb[44].mxu0  ;;  %v4324_v31 = vadd.f32 %v4207_v24, %v18810_v7  ;;  %v12800_v36 = vpop.f32.mrb[31].mxu1  ;;  %13236 = vmatmul.mubr.f32.gmra.mrb[136].mxu1 %v18817_v20  ;;  %v5605_v24 = vld [vmem:[#allocation2 + $0x92] sm:$0xff] }
 0x643   :  { %v12907_v14 = vpop.f32.mrb[45].mxu0  ;;  %13343 = vmatmul.mubr.f32.gmra.mrb[150].mxu0 %v5601_v55  ;;  %13238 = vmatprep.mubr.msk.f32.mxu1 %vm15438_vm0, %v22212_v60 }
 0x644   :  { %13345 = vmatprep.mubr.msk.f32.mxu0 %vm15438_vm0, %v22212_v60  ;;  %v19081_v2 = vadd.f32 %v4513_v47, %v4324_v31  ;;  %v5606_v14 = vld [vmem:[#allocation2 + $0x9a] sm:$0xff] }
 0x645   :  { %v4212_v27 = vpop.f32.mrb[32].mxu1 }
 0x646   :  { %v4518_v54 = vpop.f32.mrb[46].mxu0  ;;  %v4325_v42 = vadd.f32 %v4212_v27, %v18819_v4  ;;  %v12803_v1 = vpop.f32.mrb[33].mxu1  ;;  %13239 = vmatmul.mubr.f32.gmra.mrb[138].mxu1 %v18826_v30 }
 0x647   :  { %v12910_v7 = vpop.f32.mrb[47].mxu0  ;;  %13346 = vmatmul.mubr.f32.gmra.mrb[152].mxu0 %v5602_v17  ;;  %13241 = vmatprep.mubr.msk.f32.mxu1 %vm15438_vm0, %v22212_v60  ;;  %v5607_v1 = vld [vmem:[#allocation2 + $0xa2] sm:$0xff] }
 0x648   :  { %13348 = vmatprep.mubr.msk.f32.mxu0 %vm15438_vm0, %v22212_v60  ;;  %v19089_v20 = vadd.f32 %v4518_v54, %v4325_v42 }
 0x649   :  { %v4217_v50 = vpop.f32.mrb[34].mxu1 }
 0x64a   :  { %v4523_v22 = vpop.f32.mrb[48].mxu0  ;;  %v4326_v52 = vadd.f32 %v4217_v50, %v18828_v23  ;;  %v12806_v40 = vpop.f32.mrb[35].mxu1  ;;  %13242 = vmatmul.mubr.f32.gmra.mrb[140].mxu1 %v18835_v0 }
 0x64b   :  { %v12913_v4 = vpop.f32.mrb[49].mxu0  ;;  %13349 = vmatmul.mubr.f32.gmra.mrb[154].mxu0 %v5603_v56  ;;  %13244 = vmatprep.mubr.msk.f32.mxu1 %vm15438_vm0, %v22212_v60 }
 0x64c   :  { %13351 = vmatprep.mubr.msk.f32.mxu0 %vm15438_vm0, %v22212_v60  ;;  %v19097_v30 = vadd.f32 %v4523_v22, %v4326_v52  ;;  %v5608_v52 = vld [vmem:[#allocation2 + $0xaa] sm:$0xff] }
 0x64d   :  { %v4222_v53 = vpop.f32.mrb[36].mxu1 }
 0x64e   :  { %v4528_v32 = vpop.f32.mrb[50].mxu0  ;;  %v4327_v37 = vadd.f32 %v4222_v53, %v18837_v34  ;;  %v12809_v21 = vpop.f32.mrb[37].mxu1  ;;  %13245 = vmatmul.mubr.f32.gmra.mrb[142].mxu1 %v18844_v46 }
 0x64f   :  { %v12916_v23 = vpop.f32.mrb[51].mxu0  ;;  %13352 = vmatmul.mubr.f32.gmra.mrb[156].mxu0 %v5604_v35  ;;  %13247 = vmatprep.mubr.msk.f32.mxu1 %vm15438_vm0, %v22212_v60  ;;  %v5609_v35 = vld [vmem:[#allocation2 + $0xb2] sm:$0xff] }
 0x650   :  { %13354 = vmatprep.mubr.msk.f32.mxu0 %vm15438_vm0, %v22212_v60  ;;  %v19105_v0 = vadd.f32 %v4528_v32, %v4327_v37 }
 0x651   :  { %v4227_v49 = vpop.f32.mrb[38].mxu1 }
 0x652   :  { %v4533_v16 = vpop.f32.mrb[52].mxu0  ;;  %v4328_v47 = vadd.f32 %v4227_v49, %v18846_v59  ;;  %v12812_v55 = vpop.f32.mrb[39].mxu1  ;;  %13248 = vmatmul.mubr.f32.gmra.mrb[144].mxu1 %v18853_v41 }
 0x653   :  { %v12919_v34 = vpop.f32.mrb[53].mxu0  ;;  %13355 = vmatmul.mubr.f32.gmra.mrb[158].mxu0 %v5605_v24  ;;  %13250 = vmatprep.mubr.msk.f32.mxu1 %vm15438_vm0, %v22212_v60 }
 0x654   :  { %13357 = vmatprep.mubr.msk.f32.mxu0 %vm15438_vm0, %v22212_v60  ;;  %v19113_v46 = vadd.f32 %v4533_v16, %v4328_v47  ;;  %v5610_v16 = vld [vmem:[#allocation2 + $0xba] sm:$0xff] }
 0x655   :  { %v4232_v31 = vpop.f32.mrb[40].mxu1 }
 0x656   :  { %v4538_v36 = vpop.f32.mrb[54].mxu0  ;;  %v4329_v27 = vadd.f32 %v4232_v31, %v18855_v25  ;;  %v12815_v54 = vpop.f32.mrb[41].mxu1  ;;  %13251 = vmatmul.mubr.f32.gmra.mrb[146].mxu1 %v18862_v33  ;;  %v5611_v31 = vld [vmem:[#allocation2 + $0xc2] sm:$0xff] }
 0x657   :  { %v12922_v59 = vpop.f32.mrb[55].mxu0  ;;  %13358 = vmatmul.mubr.f32.gmra.mrb[160].mxu0 %v5606_v14  ;;  %13253 = vmatprep.mubr.msk.f32.mxu1 %vm15438_vm0, %v22212_v60 }
 0x658   :  { %13360 = vmatprep.mubr.msk.f32.mxu0 %vm15438_vm0, %v22212_v60  ;;  %v19121_v41 = vadd.f32 %v4538_v36, %v4329_v27  ;;  %v5612_v59 = vld [vmem:[#allocation2 + $0xca] sm:$0xff] }
 0x659   :  { %v4237_v17 = vpop.f32.mrb[42].mxu1 }
 0x65a   :  { %v4543_v42 = vpop.f32.mrb[56].mxu0  ;;  %v4330_v7 = vadd.f32 %v4237_v17, %v18864_v29  ;;  %v12818_v50 = vpop.f32.mrb[43].mxu1  ;;  %13254 = vmatmul.mubr.f32.gmra.mrb[148].mxu1 %v18871_v15 }
 0x65b   :  { %v12925_v25 = vpop.f32.mrb[57].mxu0  ;;  %13361 = vmatmul.mubr.f32.gmra.mrb[162].mxu0 %v5607_v1  ;;  %13256 = vmatprep.mubr.msk.f32.mxu1 %vm15438_vm0, %v22212_v60  ;;  %v5613_v50 = vld [vmem:[#allocation2 + $0xd2] sm:$0xff] }
 0x65c   :  { %13363 = vmatprep.mubr.msk.f32.mxu0 %vm15438_vm0, %v22212_v60  ;;  %v19129_v33 = vadd.f32 %v4543_v42, %v4330_v7 }
 0x65d   :  { %v4242_v22 = vpop.f32.mrb[44].mxu1 }
 0x65e   :  { %v4548_v56 = vpop.f32.mrb[58].mxu0  ;;  %v4331_v40 = vadd.f32 %v4242_v22, %v18873_v61  ;;  %v12821_v4 = vpop.f32.mrb[45].mxu1  ;;  %13257 = vmatmul.mubr.f32.gmra.mrb[150].mxu1 %v18880_v26 }
 0x65f   :  { %v12928_v29 = vpop.f32.mrb[59].mxu0  ;;  %13364 = vmatmul.mubr.f32.gmra.mrb[164].mxu0 %v5608_v52  ;;  %13259 = vmatprep.mubr.msk.f32.mxu1 %vm15438_vm0, %v22212_v60 }
 0x660   :  { %13366 = vmatprep.mubr.msk.f32.mxu0 %vm15438_vm0, %v22212_v60  ;;  %v19137_v15 = vadd.f32 %v4548_v56, %v4331_v40  ;;  %v5614_v56 = vld [vmem:[#allocation2 + $0xda] sm:$0xff] }
 0x661   :  { %v4247_v53 = vpop.f32.mrb[46].mxu1 }
 0x662   :  { %v4553_v32 = vpop.f32.mrb[60].mxu0  ;;  %v4332_v37 = vadd.f32 %v4247_v53, %v18882_v48  ;;  %v12824_v21 = vpop.f32.mrb[47].mxu1  ;;  %13260 = vmatmul.mubr.f32.gmra.mrb[152].mxu1 %v18889_v51 }
 0x663   :  { %v12931_v61 = vpop.f32.mrb[61].mxu0  ;;  %13367 = vmatmul.mubr.f32.gmra.mrb[166].mxu0 %v5609_v35  ;;  %13262 = vmatprep.mubr.msk.f32.mxu1 %vm15438_vm0, %v22212_v60 }
 0x664   :  { %13369 = vmatprep.mubr.msk.f32.mxu0 %vm15438_vm0, %v22212_v60  ;;  %v19145_v26 = vadd.f32 %v4553_v32, %v4332_v37  ;;  %v5896_v37 = vld [vmem:[#allocation2 + $0x1b] sm:$0xff] }
 0x665   :  { %v4252_v23 = vpop.f32.mrb[48].mxu1 }
 0x666   :  { %v4558_v49 = vpop.f32.mrb[62].mxu0  ;;  %v4333_v24 = vadd.f32 %v4252_v23, %v18891_v38  ;;  %v12827_v47 = vpop.f32.mrb[49].mxu1  ;;  %13263 = vmatmul.mubr.f32.gmra.mrb[154].mxu1 %v18898_v3 }
 0x667   :  { %v12934_v48 = vpop.f32.mrb[63].mxu0  ;;  %13370 = vmatmul.mubr.f32.gmra.mrb[168].mxu0 %v5610_v16  ;;  %13265 = vmatprep.mubr.msk.f32.mxu1 %vm15438_vm0, %v22212_v60 }
 0x668   :  { %13372 = vmatprep.mubr.msk.f32.mxu0 %vm15438_vm0, %v22212_v60  ;;  %v19153_v51 = vadd.f32 %v4558_v49, %v4333_v24  ;;  %v5897_v24 = vld [vmem:[#allocation2 + $0x23] sm:$0xff] }
 0x669   :  { %v4257_v55 = vpop.f32.mrb[50].mxu1 }
 0x66a   :  { %v4563_v34 = vpop.f32.mrb[64].mxu0  ;;  %v4334_v36 = vadd.f32 %v4257_v55, %v18900_v8  ;;  %v12830_v14 = vpop.f32.mrb[51].mxu1  ;;  %13266 = vmatmul.mubr.f32.gmra.mrb[156].mxu1 %v18907_v19 }
 0x66b   :  { %v12937_v38 = vpop.f32.mrb[65].mxu0  ;;  %13373 = vmatmul.mubr.f32.gmra.mrb[170].mxu0 %v5611_v31  ;;  %13268 = vmatprep.mubr.msk.f32.mxu1 %vm15438_vm0, %v22212_v60 }
 0x66c   :  { %13375 = vmatprep.mubr.msk.f32.mxu0 %vm15438_vm0, %v22212_v60  ;;  %v19161_v3 = vadd.f32 %v4563_v34, %v4334_v36  ;;  %v5898_v36 = vld [vmem:[#allocation2 + $0x2b] sm:$0xff] }
 0x66d   :  { %v4262_v27 = vpop.f32.mrb[52].mxu1 }
 0x66e   :  { %v4568_v54 = vpop.f32.mrb[66].mxu0  ;;  %v4335_v17 = vadd.f32 %v4262_v27, %v18909_v18  ;;  %v12833_v42 = vpop.f32.mrb[53].mxu1  ;;  %13269 = vmatmul.mubr.f32.gmra.mrb[158].mxu1 %v18916_v43  ;;  %v5308_v43 = vld [vmem:[#allocation2 + $0xd9] sm:$0xff] }
 0x66f   :  { %v12940_v8 = vpop.f32.mrb[67].mxu0  ;;  %13376 = vmatmul.mubr.f32.gmra.mrb[172].mxu0 %v5612_v59  ;;  %13271 = vmatprep.mubr.msk.f32.mxu1 %vm15438_vm0, %v22212_v60 }
 0x670   :  { %13378 = vmatprep.mubr.msk.f32.mxu0 %vm15438_vm0, %v22212_v60  ;;  %v19169_v19 = vadd.f32 %v4568_v54, %v4335_v17  ;;  %v5899_v17 = vld [vmem:[#allocation2 + $0x33] sm:$0xff] }
 0x671   :  { %v4267_v1 = vpop.f32.mrb[54].mxu1 }
 0x672   :  { %v4573_v7 = vpop.f32.mrb[68].mxu0  ;;  %v4336_v25 = vadd.f32 %v4267_v1, %v18918_v6  ;;  %v12836_v22 = vpop.f32.mrb[55].mxu1  ;;  %13272 = vmatmul.mubr.f32.gmra.mrb[160].mxu1 %v18931_v28 }
 0x673   :  { %v12943_v18 = vpop.f32.mrb[69].mxu0  ;;  %13379 = vmatmul.mubr.f32.gmra.mrb[174].mxu0 %v5613_v50  ;;  %13274 = vmatprep.mubr.msk.f32.mxu1 %vm15438_vm0, %v22212_v60 }
 0x674   :  { %13381 = vmatprep.mubr.msk.f32.mxu0 %vm15438_vm0, %v22212_v60  ;;  %v19177_v52 = vadd.f32 %v4573_v7, %v4336_v25  ;;  %v5900_v25 = vld [vmem:[#allocation2 + $0x3b] sm:$0xff] }
 0x675   :  { %v4272_v40 = vpop.f32.mrb[56].mxu1 }
 0x676   :  { %v4578_v4 = vpop.f32.mrb[70].mxu0  ;;  %v4337_v29 = vadd.f32 %v4272_v40, %v18933_v39  ;;  %v12839_v6 = vpop.f32.mrb[57].mxu1  ;;  %13275 = vmatmul.mubr.f32.gmra.mrb[162].mxu1 %v5308_v43 }
 0x677   :  { %v12946_v53 = vpop.f32.mrb[71].mxu0  ;;  %13382 = vmatmul.mubr.f32.gmra.mrb[176].mxu0 %v5614_v56  ;;  %13416 = vmatprep.mubr.msk.f32.mxu1 %vm15438_vm0, %v22212_v60 }
 0x678   :  { %13523 = vmatprep.mubr.msk.f32.mxu0 %vm15438_vm0, %v22212_v60  ;;  %v19184_v28 = vadd.f32 %v4578_v4, %v4337_v29  ;;  %v5901_v4 = vld [vmem:[#allocation2 + $0x43] sm:$0xff] }
 0x679   :  { %v4277_v32 = vpop.f32.mrb[58].mxu1 }
 0x67a   :  { %v4583_v35 = vpop.f32.mrb[72].mxu0  ;;  %v4338_v21 = vadd.f32 %v4277_v32, %v18946_v9  ;;  %v12842_v61 = vpop.f32.mrb[59].mxu1  ;;  %13417 = vmatmul.mubr.f32.vlgmr.msra.gmra.mrb[164].mxu1 %v5896_v37  ;;  %v5902_v37 = vld [vmem:[#allocation2 + $0x4b] sm:$0xff] }
 0x67b   :  { %v12949_v23 = vpop.f32.mrb[73].mxu0  ;;  %13419 = vmatprep.mubr.msk.f32.mxu1 %vm15438_vm0, %v22212_v60 }
 0x67c   :  { %v19189_v39 = vadd.f32 %v4583_v35, %v4338_v21 }
 0x67d   :  { %v4282_v49 = vpop.f32.mrb[60].mxu1 }
 0x67e   :  { %v4588_v16 = vpop.f32.mrb[74].mxu0  ;;  %v4339_v47 = vadd.f32 %v4282_v49, %v18960_v11  ;;  %v12845_v48 = vpop.f32.mrb[61].mxu1  ;;  %13420 = vmatmul.mubr.f32.gmra.mrb[166].mxu1 %v5897_v24  ;;  %v5903_v24 = vld [vmem:[#allocation2 + $0x53] sm:$0xff] }
 0x67f   :  { %v12952_v55 = vpop.f32.mrb[75].mxu0  ;;  %13422 = vmatprep.mubr.msk.f32.mxu1 %vm15438_vm0, %v22212_v60 }
 0x680   :  { %v19194_v9 = vadd.f32 %v4588_v16, %v4339_v47 }
 0x681   :  { %v4287_v34 = vpop.f32.mrb[62].mxu1 }
 0x682   :  { %v4593_v31 = vpop.f32.mrb[76].mxu0  ;;  %v4340_v14 = vadd.f32 %v4287_v34, %v18974_v12  ;;  %v12848_v38 = vpop.f32.mrb[63].mxu1  ;;  %13423 = vmatmul.mubr.f32.gmra.mrb[168].mxu1 %v5898_v36  ;;  %v5904_v36 = vld [vmem:[#allocation2 + $0x5b] sm:$0xff] }
 0x683   :  { %v12955_v27 = vpop.f32.mrb[77].mxu0  ;;  %13425 = vmatprep.mubr.msk.f32.mxu1 %vm15438_vm0, %v22212_v60 }
 0x684   :  { %v19199_v11 = vadd.f32 %v4593_v31, %v4340_v14 }
 0x685   :  { %v4779_v54 = vpop.f32.mrb[64].mxu1 }
 0x686   :  { %v5085_v59 = vpop.f32.mrb[78].mxu0  ;;  %v4928_v42 = vadd.f32 %v4779_v54, %v18994_v63  ;;  %v12990_v8 = vpop.f32.mrb[65].mxu1  ;;  %13426 = vmatmul.mubr.f32.gmra.mrb[170].mxu1 %v5899_v17  ;;  %v5905_v17 = vld [vmem:[#allocation2 + $0x63] sm:$0xff] }
 0x687   :  { %v13097_v1 = vpop.f32.mrb[79].mxu0  ;;  %13428 = vmatprep.mubr.msk.f32.mxu1 %vm15438_vm0, %v22212_v60 }
 0x688   :  { %v19204_v12 = vadd.f32 %v5085_v59, %v4928_v42 }
 0x689   :  { %v4784_v7 = vpop.f32.mrb[66].mxu1 }
 0x68a   :  { %v5090_v50 = vpop.f32.mrb[80].mxu0  ;;  %v4929_v22 = vadd.f32 %v4784_v7, %v19009_v5  ;;  %v12993_v18 = vpop.f32.mrb[67].mxu1  ;;  %13429 = vmatmul.mubr.f32.gmra.mrb[172].mxu1 %v5900_v25  ;;  %v5906_v25 = vld [vmem:[#allocation2 + $0x6b] sm:$0xff] }
 0x68b   :  { %v13100_v43 = vpop.f32.mrb[81].mxu0  ;;  %13431 = vmatprep.mubr.msk.f32.mxu1 %vm15438_vm0, %v22212_v60 }
 0x68c   :  { %v19209_v63 = vadd.f32 %v5090_v50, %v4929_v22 }
 0x68d   :  { %v4789_v56 = vpop.f32.mrb[68].mxu1 }
 0x68e   :  { %v5095_v40 = vpop.f32.mrb[82].mxu0  ;;  %v4930_v29 = vadd.f32 %v4789_v56, %v19024_v10  ;;  %v12996_v6 = vpop.f32.mrb[69].mxu1  ;;  %13432 = vmatmul.mubr.f32.gmra.mrb[174].mxu1 %v5901_v4  ;;  %v5907_v4 = vld [vmem:[#allocation2 + $0x73] sm:$0xff] }
 0x68f   :  { %v13103_v53 = vpop.f32.mrb[83].mxu0  ;;  %13434 = vmatprep.mubr.msk.f32.mxu1 %vm15438_vm0, %v22212_v60 }
 0x690   :  { %v19214_v5 = vadd.f32 %v5095_v40, %v4930_v29 }
 0x691   :  { %v4794_v32 = vpop.f32.mrb[70].mxu1 }
 0x692   :  { %v5100_v35 = vpop.f32.mrb[84].mxu0  ;;  %v4931_v21 = vadd.f32 %v4794_v32, %v19039_v62  ;;  %v12999_v61 = vpop.f32.mrb[71].mxu1  ;;  %13435 = vmatmul.mubr.f32.gmra.mrb[176].mxu1 %v5902_v37  ;;  %v5908_v37 = vld [vmem:[#allocation2 + $0x7b] sm:$0xff] }
 0x693   :  { %v13106_v23 = vpop.f32.mrb[85].mxu0  ;;  %13437 = vmatprep.mubr.msk.f32.mxu1 %vm15438_vm0, %v22212_v60 }
 0x694   :  { %v19219_v10 = vadd.f32 %v5100_v35, %v4931_v21 }
 0x695   :  { %v4799_v49 = vpop.f32.mrb[72].mxu1 }
 0x696   :  { %v5105_v16 = vpop.f32.mrb[86].mxu0  ;;  %v4932_v47 = vadd.f32 %v4799_v49, %v19048_v57  ;;  %v13002_v48 = vpop.f32.mrb[73].mxu1  ;;  %13438 = vmatmul.mubr.f32.gmra.mrb[178].mxu1 %v5903_v24  ;;  %v5909_v24 = vld [vmem:[#allocation2 + $0x83] sm:$0xff] }
 0x697   :  { %v13109_v55 = vpop.f32.mrb[87].mxu0  ;;  %13440 = vmatprep.mubr.msk.f32.mxu1 %vm15438_vm0, %v22212_v60 }
 0x698   :  { %v19224_v62 = vadd.f32 %v5105_v16, %v4932_v47 }
 0x699   :  { %v4804_v34 = vpop.f32.mrb[74].mxu1 }
 0x69a   :  { %v5110_v31 = vpop.f32.mrb[88].mxu0  ;;  %v4933_v14 = vadd.f32 %v4804_v34, %v19057_v44  ;;  %v13005_v38 = vpop.f32.mrb[75].mxu1  ;;  %13441 = vmatmul.mubr.f32.gmra.mrb[180].mxu1 %v5904_v36  ;;  %v5910_v36 = vld [vmem:[#allocation2 + $0x8b] sm:$0xff] }
 0x69b   :  { %v13112_v27 = vpop.f32.mrb[89].mxu0  ;;  %13443 = vmatprep.mubr.msk.f32.mxu1 %vm15438_vm0, %v22212_v60 }
 0x69c   :  { %v19229_v57 = vadd.f32 %v5110_v31, %v4933_v14 }
 0x69d   :  { %v4809_v54 = vpop.f32.mrb[76].mxu1 }
 0x69e   :  { %v5115_v59 = vpop.f32.mrb[90].mxu0  ;;  %v4934_v42 = vadd.f32 %v4809_v54, %v19065_v13  ;;  %v13008_v8 = vpop.f32.mrb[77].mxu1  ;;  %13444 = vmatmul.mubr.f32.gmra.mrb[182].mxu1 %v5905_v17  ;;  %v5911_v17 = vld [vmem:[#allocation2 + $0x93] sm:$0xff] }
 0x69f   :  { %v13115_v1 = vpop.f32.mrb[91].mxu0  ;;  %13446 = vmatprep.mubr.msk.f32.mxu1 %vm15438_vm0, %v22212_v60 }
 0x6a0   :  { %v19234_v44 = vadd.f32 %v5115_v59, %v4934_v42 }
 0x6a1   :  { %v4814_v7 = vpop.f32.mrb[78].mxu1 }
 0x6a2   :  { %v5120_v50 = vpop.f32.mrb[92].mxu0  ;;  %v4935_v22 = vadd.f32 %v4814_v7, %v19073_v45  ;;  %v13011_v18 = vpop.f32.mrb[79].mxu1  ;;  %13447 = vmatmul.mubr.f32.gmra.mrb[184].mxu1 %v5906_v25  ;;  %v5912_v25 = vld [vmem:[#allocation2 + $0x9b] sm:$0xff] }
 0x6a3   :  { %v13118_v43 = vpop.f32.mrb[93].mxu0  ;;  %13449 = vmatprep.mubr.msk.f32.mxu1 %vm15438_vm0, %v22212_v60 }
 0x6a4   :  { %v19239_v13 = vadd.f32 %v5120_v50, %v4935_v22 }
 0x6a5   :  { %v4819_v56 = vpop.f32.mrb[80].mxu1 }
 0x6a6   :  { %v5125_v40 = vpop.f32.mrb[94].mxu0  ;;  %v4936_v29 = vadd.f32 %v4819_v56, %v19081_v2  ;;  %v13014_v6 = vpop.f32.mrb[81].mxu1  ;;  %13450 = vmatmul.mubr.f32.gmra.mrb[186].mxu1 %v5907_v4  ;;  %v5913_v4 = vld [vmem:[#allocation2 + $0xa3] sm:$0xff] }
 0x6a7   :  { %v13121_v53 = vpop.f32.mrb[95].mxu0  ;;  %13452 = vmatprep.mubr.msk.f32.mxu1 %vm15438_vm0, %v22212_v60 }
 0x6a8   :  { %v19244_v45 = vadd.f32 %v5125_v40, %v4936_v29 }
 0x6a9   :  { %v4824_v32 = vpop.f32.mrb[82].mxu1 }
 0x6aa   :  { %v5130_v35 = vpop.f32.mrb[96].mxu0  ;;  %v4937_v21 = vadd.f32 %v4824_v32, %v19089_v20  ;;  %v13017_v61 = vpop.f32.mrb[83].mxu1  ;;  %13453 = vmatmul.mubr.f32.gmra.mrb[188].mxu1 %v5908_v37  ;;  %v5914_v37 = vld [vmem:[#allocation2 + $0xab] sm:$0xff] }
 0x6ab   :  { %v13124_v23 = vpop.f32.mrb[97].mxu0  ;;  %13455 = vmatprep.mubr.msk.f32.mxu1 %vm15438_vm0, %v22212_v60 }
 0x6ac   :  { %v19249_v2 = vadd.f32 %v5130_v35, %v4937_v21 }
 0x6ad   :  { %v4829_v49 = vpop.f32.mrb[84].mxu1 }
 0x6ae   :  { %v5135_v16 = vpop.f32.mrb[98].mxu0  ;;  %v4938_v47 = vadd.f32 %v4829_v49, %v19097_v30  ;;  %v13020_v48 = vpop.f32.mrb[85].mxu1  ;;  %13456 = vmatmul.mubr.f32.gmra.mrb[190].mxu1 %v5909_v24  ;;  %v5915_v24 = vld [vmem:[#allocation2 + $0xb3] sm:$0xff] }
 0x6af   :  { %v13127_v55 = vpop.f32.mrb[99].mxu0  ;;  %13458 = vmatprep.mubr.msk.f32.mxu1 %vm15438_vm0, %v22212_v60 }
 0x6b0   :  { %v19254_v20 = vadd.f32 %v5135_v16, %v4938_v47 }
 0x6b1   :  { %v4834_v34 = vpop.f32.mrb[86].mxu1 }
 0x6b2   :  { %v5140_v31 = vpop.f32.mrb[100].mxu0  ;;  %v4939_v14 = vadd.f32 %v4834_v34, %v19105_v0  ;;  %v13023_v38 = vpop.f32.mrb[87].mxu1  ;;  %13459 = vmatmul.mubr.f32.gmra.mrb[192].mxu1 %v5910_v36  ;;  %v5916_v36 = vld [vmem:[#allocation2 + $0xbb] sm:$0xff] }
 0x6b3   :  { %v13130_v27 = vpop.f32.mrb[101].mxu0  ;;  %13461 = vmatprep.mubr.msk.f32.mxu1 %vm15438_vm0, %v22212_v60 }
 0x6b4   :  { %v19259_v30 = vadd.f32 %v5140_v31, %v4939_v14 }
 0x6b5   :  { %v4839_v54 = vpop.f32.mrb[88].mxu1 }
 0x6b6   :  { %v5145_v59 = vpop.f32.mrb[102].mxu0  ;;  %v4940_v42 = vadd.f32 %v4839_v54, %v19113_v46  ;;  %v13026_v8 = vpop.f32.mrb[89].mxu1  ;;  %13462 = vmatmul.mubr.f32.gmra.mrb[194].mxu1 %v5911_v17  ;;  %v5917_v17 = vld [vmem:[#allocation2 + $0xc3] sm:$0xff] }
 0x6b7   :  { %v13133_v1 = vpop.f32.mrb[103].mxu0  ;;  %13464 = vmatprep.mubr.msk.f32.mxu1 %vm15438_vm0, %v22212_v60 }
 0x6b8   :  { %v19264_v0 = vadd.f32 %v5145_v59, %v4940_v42 }
 0x6b9   :  { %v4844_v7 = vpop.f32.mrb[90].mxu1 }
 0x6ba   :  { %v5150_v50 = vpop.f32.mrb[104].mxu0  ;;  %v4941_v22 = vadd.f32 %v4844_v7, %v19121_v41  ;;  %v13029_v18 = vpop.f32.mrb[91].mxu1  ;;  %13465 = vmatmul.mubr.f32.gmra.mrb[196].mxu1 %v5912_v25  ;;  %v5918_v25 = vld [vmem:[#allocation2 + $0xcb] sm:$0xff] }
 0x6bb   :  { %v13136_v43 = vpop.f32.mrb[105].mxu0  ;;  %13467 = vmatprep.mubr.msk.f32.mxu1 %vm15438_vm0, %v22212_v60 }
 0x6bc   :  { %v19269_v46 = vadd.f32 %v5150_v50, %v4941_v22 }
 0x6bd   :  { %v4849_v56 = vpop.f32.mrb[92].mxu1 }
 0x6be   :  { %v5155_v40 = vpop.f32.mrb[106].mxu0  ;;  %v4942_v29 = vadd.f32 %v4849_v56, %v19129_v33  ;;  %v13032_v6 = vpop.f32.mrb[93].mxu1  ;;  %13468 = vmatmul.mubr.f32.gmra.mrb[198].mxu1 %v5913_v4  ;;  %v5919_v4 = vld [vmem:[#allocation2 + $0xd3] sm:$0xff] }
 0x6bf   :  { %v13139_v53 = vpop.f32.mrb[107].mxu0  ;;  %13470 = vmatprep.mubr.msk.f32.mxu1 %vm15438_vm0, %v22212_v60 }
 0x6c0   :  { %v19274_v41 = vadd.f32 %v5155_v40, %v4942_v29 }
 0x6c1   :  { %v4854_v32 = vpop.f32.mrb[94].mxu1 }
 0x6c2   :  { %v5160_v35 = vpop.f32.mrb[108].mxu0  ;;  %v4943_v21 = vadd.f32 %v4854_v32, %v19137_v15  ;;  %v13035_v61 = vpop.f32.mrb[95].mxu1  ;;  %13471 = vmatmul.mubr.f32.gmra.mrb[200].mxu1 %v5914_v37 }
 0x6c3   :  { %v13142_v23 = vpop.f32.mrb[109].mxu0  ;;  %13473 = vmatprep.mubr.msk.f32.mxu1 %vm15438_vm0, %v22212_v60 }
 0x6c4   :  { %v19279_v33 = vadd.f32 %v5160_v35, %v4943_v21 }
 0x6c5   :  { %v4859_v49 = vpop.f32.mrb[96].mxu1 }
 0x6c6   :  { %v5165_v16 = vpop.f32.mrb[110].mxu0  ;;  %v4944_v47 = vadd.f32 %v4859_v49, %v19145_v26  ;;  %v13038_v48 = vpop.f32.mrb[97].mxu1  ;;  %13474 = vmatmul.mubr.f32.gmra.mrb[202].mxu1 %v5915_v24 }
 0x6c7   :  { %v13145_v55 = vpop.f32.mrb[111].mxu0  ;;  %13476 = vmatprep.mubr.msk.f32.mxu1 %vm15438_vm0, %v22212_v60 }
 0x6c8   :  { %v19284_v15 = vadd.f32 %v5165_v16, %v4944_v47 }
 0x6c9   :  { %v4864_v34 = vpop.f32.mrb[98].mxu1 }
 0x6ca   :  { %v5170_v31 = vpop.f32.mrb[112].mxu0  ;;  %v4945_v14 = vadd.f32 %v4864_v34, %v19153_v51  ;;  %v13041_v38 = vpop.f32.mrb[99].mxu1  ;;  %13477 = vmatmul.mubr.f32.gmra.mrb[204].mxu1 %v5916_v36 }
 0x6cb   :  { %v13148_v27 = vpop.f32.mrb[113].mxu0  ;;  %13479 = vmatprep.mubr.msk.f32.mxu1 %vm15438_vm0, %v22212_v60 }
 0x6cc   :  { %v19289_v26 = vadd.f32 %v5170_v31, %v4945_v14  ;;  %v6389_v27 = vld [vmem:[%s22138_s6] sm:$0xff] }
 0x6cd   :  { %v4869_v54 = vpop.f32.mrb[100].mxu1 }
 0x6ce   :  { %v5175_v59 = vpop.f32.mrb[114].mxu0  ;;  %v4946_v42 = vadd.f32 %v4869_v54, %v19161_v3  ;;  %v13044_v8 = vpop.f32.mrb[101].mxu1  ;;  %13480 = vmatmul.mubr.f32.gmra.mrb[206].mxu1 %v5917_v17 }
 0x6cf   :  { %v13151_v1 = vpop.f32.mrb[115].mxu0  ;;  %13482 = vmatprep.mubr.msk.f32.mxu1 %vm15438_vm0, %v22212_v60 }
 0x6d0   :  { %v19294_v51 = vadd.f32 %v5175_v59, %v4946_v42 }
 0x6d1   :  { %v4874_v7 = vpop.f32.mrb[102].mxu1 }
 0x6d2   :  { %v5180_v50 = vpop.f32.mrb[116].mxu0  ;;  %v4947_v22 = vadd.f32 %v4874_v7, %v19169_v19  ;;  %v13047_v18 = vpop.f32.mrb[103].mxu1  ;;  %13483 = vmatmul.mubr.f32.gmra.mrb[208].mxu1 %v5918_v25  ;;  %v5920_v19 = vld [vmem:[#allocation2 + $0xdb] sm:$0xff] }
 0x6d3   :  { %v13154_v43 = vpop.f32.mrb[117].mxu0  ;;  %13485 = vmatprep.mubr.msk.f32.mxu1 %vm15438_vm0, %v22212_v60 }
 0x6d4   :  { %v19299_v3 = vadd.f32 %v5180_v50, %v4947_v22 }
 0x6d5   :  { %v4879_v56 = vpop.f32.mrb[104].mxu1 }
 0x6d6   :  { %v5185_v40 = vpop.f32.mrb[118].mxu0  ;;  %v4948_v29 = vadd.f32 %v4879_v56, %v19177_v52  ;;  %v13050_v6 = vpop.f32.mrb[105].mxu1  ;;  %13486 = vmatmul.mubr.f32.gmra.mrb[210].mxu1 %v5919_v4 }
 0x6d7   :  { %v13157_v53 = vpop.f32.mrb[119].mxu0  ;;  %13488 = vmatprep.mubr.msk.f32.mxu1 %vm15438_vm0, %v22212_v60 }
 0x6d8   :  { %v19304_v32 = vadd.f32 %v5185_v40, %v4948_v29  ;;  %v6391_v53 = vld [vmem:[%s22138_s6 + $0x10] sm:$0xff] }
 0x6d9   :  { %v4884_v35 = vpop.f32.mrb[106].mxu1 }
 0x6da   :  { %v5190_v37 = vpop.f32.mrb[120].mxu0  ;;  %v4949_v21 = vadd.f32 %v4884_v35, %v19184_v28  ;;  %v13053_v61 = vpop.f32.mrb[107].mxu1  ;;  %13489 = vmatmul.mubr.f32.gmra.mrb[212].mxu1 %v5920_v19 }
 0x6db   :  { %v13160_v23 = vpop.f32.mrb[121].mxu0  ;;  %13700 = vmatprep.mubr.msk.f32.mxu1 %vm15438_vm0, %v22212_v60 }
 0x6dc   :  { %v19309_v52 = vadd.f32 %v5190_v37, %v4949_v21 }
 0x6dd   :  { %v4889_v49 = vpop.f32.mrb[108].mxu1 }
 0x6de   :  { %v5195_v16 = vpop.f32.mrb[122].mxu0  ;;  %v4950_v24 = vadd.f32 %v4889_v49, %v19189_v39  ;;  %v13056_v47 = vpop.f32.mrb[109].mxu1  ;;  %v6390_v39 = vld [vmem:[%s22138_s6 + $0x8] sm:$0xff] }
 0x6df   :  { %v13163_v48 = vpop.f32.mrb[123].mxu0  ;;  %v19323_v17 = vpack.c.bf16 %v6390_v39, %v6389_v27  ;;  %v6393_v39 = vld [vmem:[%s22138_s6 + $0x20] sm:$0xff] }
 0x6e0   :  { %v19312_v55 = vadd.f32 %v5195_v16, %v4950_v24 }
 0x6e1   :  { %v4894_v34 = vpop.f32.mrb[110].mxu1  ;;  %15076 = vmatpush3.bf16.msra.mxu0 %v19323_v17 }
 0x6e2   :  { %v5200_v31 = vpop.f32.mrb[124].mxu0  ;;  %v4951_v28 = vadd.f32 %v4894_v34, %v19194_v9  ;;  %v13059_v36 = vpop.f32.mrb[111].mxu1  ;;  %15077 = vmatprep.subr.bf16.mxu0 %v22213_v58 }
 0x6e3   :  { %v13166_v14 = vpop.f32.mrb[125].mxu0 }
 0x6e4   :  { %v19315_v38 = vadd.f32 %v5200_v31, %v4951_v28 }
 0x6e5   :  { %v4899_v54 = vpop.f32.mrb[112].mxu1 }
 0x6e6   :  { %v5205_v59 = vpop.f32.mrb[126].mxu0  ;;  %v4952_v42 = vadd.f32 %v4899_v54, %v19199_v11  ;;  %v13062_v8 = vpop.f32.mrb[113].mxu1 }
 0x6e7   :  { %v13169_v9 = vpop.f32.mrb[127].mxu0 }
 0x6e8   :  { %v19327_v1 = vadd.f32 %v5205_v59, %v4952_v42 }
 0x6e9   :  { %v5391_v7 = vpop.f32.mrb[114].mxu1 }
 0x6ea   :  { %v5697_v50 = vpop.f32.mrb[128].mxu0  ;;  %v5540_v25 = vadd.f32 %v5391_v7, %v19204_v12  ;;  %v13204_v22 = vpop.f32.mrb[115].mxu1  ;;  %v6392_v12 = vld [vmem:[%s22138_s6 + $0x18] sm:$0xff] }
 0x6eb   :  { %v13311_v18 = vpop.f32.mrb[129].mxu0  ;;  %v19342_v37 = vpack.c.bf16 %v6392_v12, %v6391_v53 }
 0x6ec   :  { %v19331_v43 = vadd.f32 %v5697_v50, %v5540_v25 }
 0x6ed   :  { %v5396_v56 = vpop.f32.mrb[116].mxu1  ;;  %15079 = vmatpush3.bf16.msra.mxu0 %v19342_v37 }
 0x6ee   :  { %v5702_v40 = vpop.f32.mrb[130].mxu0  ;;  %v5541_v11 = vadd.f32 %v5396_v56, %v19209_v63  ;;  %v13207_v4 = vpop.f32.mrb[117].mxu1  ;;  %15080 = vmatprep.subr.bf16.mxu0 %v22213_v58 }
 0x6ef   :  { %v13314_v29 = vpop.f32.mrb[131].mxu0 }
 0x6f0   :  { %v19334_v6 = vadd.f32 %v5702_v40, %v5541_v11 }
 0x6f1   :  { %v5401_v19 = vpop.f32.mrb[118].mxu1 }
 0x6f2   :  { %v5707_v35 = vpop.f32.mrb[132].mxu0  ;;  %v5542_v21 = vadd.f32 %v5401_v19, %v19214_v5  ;;  %v13210_v61 = vpop.f32.mrb[119].mxu1 }
 0x6f3   :  { %v13317_v63 = vpop.f32.mrb[133].mxu0 }
 0x6f4   :  { %v19346_v23 = vadd.f32 %v5707_v35, %v5542_v21 }
 0x6f5   :  { %v5406_v49 = vpop.f32.mrb[120].mxu1 }
 0x6f6   :  { %v5712_v16 = vpop.f32.mrb[134].mxu0  ;;  %v5543_v24 = vadd.f32 %v5406_v49, %v19219_v10  ;;  %v13213_v47 = vpop.f32.mrb[121].mxu1  ;;  %v6394_v10 = vld [vmem:[%s22138_s6 + $0x28] sm:$0xff] }
 0x6f7   :  { %v13320_v48 = vpop.f32.mrb[135].mxu0  ;;  %v19361_v42 = vpack.c.bf16 %v6394_v10, %v6393_v39 }
 0x6f8   :  { %v19350_v34 = vadd.f32 %v5712_v16, %v5543_v24 }
 0x6f9   :  { %v5411_v31 = vpop.f32.mrb[122].mxu1  ;;  %15082 = vmatpush3.bf16.msra.mxu0 %v19361_v42 }
 0x6fa   :  { %v5717_v28 = vpop.f32.mrb[136].mxu0  ;;  %v5544_v5 = vadd.f32 %v5411_v31, %v19224_v62  ;;  %v13216_v36 = vpop.f32.mrb[123].mxu1  ;;  %15083 = vmatprep.subr.bf16.mxu0 %v22213_v58 }
 0x6fb   :  { %v13323_v14 = vpop.f32.mrb[137].mxu0 }
 0x6fc   :  { %v19353_v27 = vadd.f32 %v5717_v28, %v5544_v5 }
 0x6fd   :  { %v5416_v54 = vpop.f32.mrb[124].mxu1 }
 0x6fe   :  { %v5722_v59 = vpop.f32.mrb[138].mxu0  ;;  %v5545_v8 = vadd.f32 %v5416_v54, %v19229_v57  ;;  %v13219_v9 = vpop.f32.mrb[125].mxu1 }
 0x6ff   :  { %v13326_v62 = vpop.f32.mrb[139].mxu0 }
 0x700   :  { %v19365_v7 = vadd.f32 %v5722_v59, %v5545_v8 }
 0x701   :  { %v5421_v50 = vpop.f32.mrb[126].mxu1 }
 0x702   :  { %v5727_v25 = vpop.f32.mrb[140].mxu0  ;;  %v5546_v22 = vadd.f32 %v5421_v50, %v19234_v44  ;;  %v13222_v18 = vpop.f32.mrb[127].mxu1  ;;  %v6395_v44 = vld [vmem:[%s22138_s6 + $0x30] sm:$0xff] }
 0x703   :  { %v13329_v56 = vpop.f32.mrb[141].mxu0 }
 0x704   :  { %v19369_v40 = vadd.f32 %v5727_v25, %v5546_v22  ;;  %v6397_v25 = vld [vmem:[%s22138_s6 + $0x40] sm:$0xff] }
 0x705   :  { %v5426_v11 = vpop.f32.mrb[128].mxu1 }
 0x706   :  { %v5732_v4 = vpop.f32.mrb[142].mxu0  ;;  %v5547_v57 = vadd.f32 %v5426_v11, %v19239_v13  ;;  %v13225_v29 = vpop.f32.mrb[129].mxu1  ;;  %v6396_v13 = vld [vmem:[%s22138_s6 + $0x38] sm:$0xff] }
 0x707   :  { %v13332_v53 = vpop.f32.mrb[143].mxu0  ;;  %v19383_v47 = vpack.c.bf16 %v6396_v13, %v6395_v44 }
 0x708   :  { %v19372_v12 = vadd.f32 %v5732_v4, %v5547_v57 }
 0x709   :  { %v5431_v19 = vpop.f32.mrb[130].mxu1  ;;  %15085 = vmatpush3.bf16.msra.mxu0 %v19383_v47 }
 0x70a   :  { %v5737_v35 = vpop.f32.mrb[144].mxu0  ;;  %v5548_v21 = vadd.f32 %v5431_v19, %v19244_v45  ;;  %v13228_v61 = vpop.f32.mrb[131].mxu1  ;;  %15086 = vmatprep.subr.bf16.mxu0 %v22213_v58 }
 0x70b   :  { %v13335_v63 = vpop.f32.mrb[145].mxu0 }
 0x70c   :  { %v19375_v49 = vadd.f32 %v5737_v35, %v5548_v21 }
 0x70d   :  { %v5436_v16 = vpop.f32.mrb[132].mxu1 }
 0x70e   :  { %v5742_v24 = vpop.f32.mrb[146].mxu0  ;;  %v5549_v48 = vadd.f32 %v5436_v16, %v19249_v2  ;;  %v13231_v31 = vpop.f32.mrb[133].mxu1 }
 0x70f   :  { %v13338_v45 = vpop.f32.mrb[147].mxu0 }
 0x710   :  { %v19387_v28 = vadd.f32 %v5742_v24, %v5549_v48  ;;  %v6399_v48 = vld [vmem:[%s22138_s6 + $0x50] sm:$0xff] }
 0x711   :  { %v5441_v5 = vpop.f32.mrb[134].mxu1 }
 0x712   :  { %v5747_v36 = vpop.f32.mrb[148].mxu0  ;;  %v5550_v14 = vadd.f32 %v5441_v5, %v19254_v20  ;;  %v13234_v39 = vpop.f32.mrb[135].mxu1  ;;  %v6398_v20 = vld [vmem:[%s22138_s6 + $0x48] sm:$0xff] }
 0x713   :  { %v13341_v10 = vpop.f32.mrb[149].mxu0  ;;  %v19402_v56 = vpack.c.bf16 %v6398_v20, %v6397_v25 }
 0x714   :  { %v19391_v54 = vadd.f32 %v5747_v36, %v5550_v14 }
 0x715   :  { %v5446_v59 = vpop.f32.mrb[136].mxu1  ;;  %15088 = vmatpush3.bf16.msra.mxu0 %v19402_v56 }
 0x716   :  { %v5752_v8 = vpop.f32.mrb[150].mxu0  ;;  %v5551_v2 = vadd.f32 %v5446_v59, %v19259_v30  ;;  %v13237_v9 = vpop.f32.mrb[137].mxu1  ;;  %15089 = vmatprep.subr.bf16.mxu0 %v22213_v58 }
 0x717   :  { %v13344_v62 = vpop.f32.mrb[151].mxu0 }
 0x718   :  { %v19394_v50 = vadd.f32 %v5752_v8, %v5551_v2 }
 0x719   :  { %v5451_v22 = vpop.f32.mrb[138].mxu1 }
 0x71a   :  { %v5757_v18 = vpop.f32.mrb[152].mxu0  ;;  %v5552_v11 = vadd.f32 %v5451_v22, %v19264_v0  ;;  %v13240_v4 = vpop.f32.mrb[139].mxu1 }
 0x71b   :  { %v13347_v30 = vpop.f32.mrb[153].mxu0  ;;  %v6401_v4 = vld [vmem:[%s22138_s6 + $0x60] sm:$0xff] }
 0x71c   :  { %v19406_v57 = vadd.f32 %v5757_v18, %v5552_v11 }
 0x71d   :  { %v5456_v29 = vpop.f32.mrb[140].mxu1 }
 0x71e   :  { %v5762_v53 = vpop.f32.mrb[154].mxu0  ;;  %v5553_v19 = vadd.f32 %v5456_v29, %v19269_v46  ;;  %v13243_v35 = vpop.f32.mrb[141].mxu1  ;;  %v6400_v46 = vld [vmem:[%s22138_s6 + $0x58] sm:$0xff] }
 0x71f   :  { %v13350_v21 = vpop.f32.mrb[155].mxu0  ;;  %v19421_v5 = vpack.c.bf16 %v6400_v46, %v6399_v48 }
 0x720   :  { %v19410_v61 = vadd.f32 %v5762_v53, %v5553_v19 }
 0x721   :  { %v5461_v63 = vpop.f32.mrb[142].mxu1  ;;  %15091 = vmatpush3.bf16.msra.mxu0 %v19421_v5 }
 0x722   :  { %v5767_v44 = vpop.f32.mrb[156].mxu0  ;;  %v5554_v0 = vadd.f32 %v5461_v63, %v19274_v41  ;;  %v13246_v13 = vpop.f32.mrb[143].mxu1  ;;  %15092 = vmatprep.subr.bf16.mxu0 %v22213_v58 }
 0x723   :  { %v13353_v16 = vpop.f32.mrb[157].mxu0 }
 0x724   :  { %v19413_v24 = vadd.f32 %v5767_v44, %v5554_v0 }
 0x725   :  { %v5466_v31 = vpop.f32.mrb[144].mxu1 }
 0x726   :  { %v5772_v45 = vpop.f32.mrb[158].mxu0  ;;  %v5555_v36 = vadd.f32 %v5466_v31, %v19279_v33  ;;  %v13249_v14 = vpop.f32.mrb[145].mxu1 }
 0x727   :  { %v13356_v41 = vpop.f32.mrb[159].mxu0 }
 0x728   :  { %v19425_v39 = vadd.f32 %v5772_v45, %v5555_v36 }
 0x729   :  { %v5471_v10 = vpop.f32.mrb[146].mxu1 }
 0x72a   :  { %v5777_v59 = vpop.f32.mrb[160].mxu0  ;;  %v5556_v8 = vadd.f32 %v5471_v10, %v19284_v15  ;;  %v13252_v2 = vpop.f32.mrb[147].mxu1  ;;  %v6402_v15 = vld [vmem:[%s22138_s6 + $0x68] sm:$0xff] }
 0x72b   :  { %v13359_v9 = vpop.f32.mrb[161].mxu0  ;;  %v19440_v53 = vpack.c.bf16 %v6402_v15, %v6401_v4 }
 0x72c   :  { %v19429_v62 = vadd.f32 %v5777_v59, %v5556_v8 }
 0x72d   :  { %v5476_v25 = vpop.f32.mrb[148].mxu1  ;;  %15094 = vmatpush3.bf16.msra.mxu0 %v19440_v53 }
 0x72e   :  { %v5782_v20 = vpop.f32.mrb[162].mxu0  ;;  %v5557_v33 = vadd.f32 %v5476_v25, %v19289_v26  ;;  %v13255_v22 = vpop.f32.mrb[149].mxu1  ;;  %15095 = vmatprep.subr.bf16.mxu0 %v22213_v58 }
 0x72f   :  { %v13362_v18 = vpop.f32.mrb[163].mxu0 }
 0x730   :  { %v19432_v11 = vadd.f32 %v5782_v20, %v5557_v33 }
 0x731   :  { %v5481_v30 = vpop.f32.mrb[150].mxu1 }
 0x732   :  { %v5787_v29 = vpop.f32.mrb[164].mxu0  ;;  %v5558_v19 = vadd.f32 %v5481_v30, %v19294_v51  ;;  %v13258_v35 = vpop.f32.mrb[151].mxu1 }
 0x733   :  { %v13365_v26 = vpop.f32.mrb[165].mxu0 }
 0x734   :  { %v19444_v21 = vadd.f32 %v5787_v29, %v5558_v19 }
 0x735   :  { %v5486_v63 = vpop.f32.mrb[152].mxu1 }
 0x736   :  { %v5792_v44 = vpop.f32.mrb[166].mxu0  ;;  %v5559_v0 = vadd.f32 %v5486_v63, %v19299_v3  ;;  %v13261_v13 = vpop.f32.mrb[153].mxu1  ;;  %v6403_v3 = vld [vmem:[%s22138_s6 + $0x70] sm:$0xff] }
 0x737   :  { %v13368_v16 = vpop.f32.mrb[167].mxu0 }
 0x738   :  { %v19448_v48 = vadd.f32 %v5792_v44, %v5559_v0 }
 0x739   :  { %v5491_v46 = vpop.f32.mrb[154].mxu1 }
 0x73a   :  { %v5797_v31 = vpop.f32.mrb[168].mxu0  ;;  %v5560_v51 = vadd.f32 %v5491_v46, %v19304_v32  ;;  %v13264_v45 = vpop.f32.mrb[155].mxu1  ;;  %v6404_v32 = vld [vmem:[%s22138_s6 + $0x78] sm:$0xff] }
 0x73b   :  { %v13371_v36 = vpop.f32.mrb[169].mxu0  ;;  %v19462_v33 = vpack.c.bf16 %v6404_v32, %v6403_v3 }
 0x73c   :  { %v19451_v14 = vadd.f32 %v5797_v31, %v5560_v51 }
 0x73d   :  { %v5496_v41 = vpop.f32.mrb[156].mxu1  ;;  %15097 = vmatpush3.bf16.msra.mxu0 %v19462_v33 }
 0x73e   :  { %v5802_v10 = vpop.f32.mrb[170].mxu0  ;;  %v5561_v59 = vadd.f32 %v5496_v41, %v19309_v52  ;;  %v13267_v8 = vpop.f32.mrb[157].mxu1  ;;  %15098 = vmatprep.subr.bf16.mxu0 %v22213_v58 }
 0x73f   :  { %v13374_v2 = vpop.f32.mrb[171].mxu0 }
 0x740   :  { %v19454_v9 = vadd.f32 %v5802_v10, %v5561_v59 }
 0x741   :  { %v5501_v25 = vpop.f32.mrb[158].mxu1 }
 0x742   :  { %v5807_v20 = vpop.f32.mrb[172].mxu0  ;;  %v5562_v22 = vadd.f32 %v5501_v25, %v19312_v55  ;;  %v13270_v18 = vpop.f32.mrb[159].mxu1 }
 0x743   :  { %v13377_v52 = vpop.f32.mrb[173].mxu0 }
 0x744   :  { %v19466_v4 = vadd.f32 %v5807_v20, %v5562_v22 }
 0x745   :  { %v5506_v15 = vpop.f32.mrb[160].mxu1 }
 0x746   :  { %v5812_v30 = vpop.f32.mrb[174].mxu0  ;;  %v5563_v29 = vadd.f32 %v5506_v15, %v19315_v38  ;;  %v13273_v19 = vpop.f32.mrb[161].mxu1 }
 0x747   :  { %v13380_v35 = vpop.f32.mrb[175].mxu0 }
 0x748   :  { %v19470_v26 = vadd.f32 %v5812_v30, %v5563_v29 }
 0x749   :  { %v5511_v63 = vpop.f32.mrb[162].mxu1 }
 0x74a   :  { %v5817_v44 = vpop.f32.mrb[176].mxu0  ;;  %v5564_v55 = vadd.f32 %v5511_v63, %v19327_v1  ;;  %v13276_v0 = vpop.f32.mrb[163].mxu1 }
 0x74b   :  { %v13383_v13 = vpop.f32.mrb[177].mxu0 }
 0x74c   :  { %v19473_v16 = vadd.f32 %v5817_v44, %v5564_v55 }
 0x74d   :  { %v6003_v46 = vpop.f32.mrb[164].mxu1 }
 0x74e   :  { %v6152_v31 = vadd.f32 %v6003_v46, %v19331_v43  ;;  %v13418_v51 = vpop.f32.mrb[165].mxu1 }
 0x751   :  { %v6008_v45 = vpop.f32.mrb[166].mxu1 }
 0x752   :  { %v6153_v36 = vadd.f32 %v6008_v45, %v19334_v6  ;;  %v13421_v38 = vpop.f32.mrb[167].mxu1 }
 0x753   :  { %v19504_v38 = vld [vmem:[%s22140_s5] sm:$0xff] }
 0x755   :  { %v6013_v41 = vpop.f32.mrb[168].mxu1 }
 0x756   :  { %v6154_v10 = vadd.f32 %v6013_v41, %v19346_v23  ;;  %v13424_v59 = vpop.f32.mrb[169].mxu1 }
 0x759   :  { %v6018_v8 = vpop.f32.mrb[170].mxu1 }
 0x75a   :  { %v6155_v2 = vadd.f32 %v6018_v8, %v19350_v34  ;;  %v13427_v1 = vpop.f32.mrb[171].mxu1 }
 0x75d   :  { %v6023_v3 = vpop.f32.mrb[172].mxu1 }
 0x75e   :  { %v6156_v32 = vadd.f32 %v6023_v3, %v19353_v27  ;;  %v13430_v25 = vpop.f32.mrb[173].mxu1 }
 0x761   :  { %v6028_v20 = vpop.f32.mrb[174].mxu1 }
 0x762   :  { %v6157_v43 = vadd.f32 %v6028_v20, %v19365_v7  ;;  %v13433_v22 = vpop.f32.mrb[175].mxu1 }
 0x765   :  { %v6033_v18 = vpop.f32.mrb[176].mxu1 }
 0x766   :  { %v6158_v6 = vadd.f32 %v6033_v18, %v19369_v40  ;;  %v13436_v52 = vpop.f32.mrb[177].mxu1 }
 0x769   :  { %v6038_v15 = vpop.f32.mrb[178].mxu1 }
 0x76a   :  { %v6159_v23 = vadd.f32 %v6038_v15, %v19372_v12  ;;  %v13439_v30 = vpop.f32.mrb[179].mxu1  ;;  %v19490_v12 = vld [vmem:[%s22139_s2] ss:$0 sm:$0xff] }
 0x76b   :  { %v6259_v45 = vadd.f32 %v19490_v12, %v6152_v31  ;;  %v6262_v59 = vadd.f32 %v19490_v12, %v6155_v2  ;;  %v6263_v25 = vadd.f32 %v19490_v12, %v6156_v32  ;;  %v19531_v2 = vld [vmem:[%s22140_s5 + $0x20] sm:$0xff]  ;;  %v6264_v18 = vadd.f32 %v19490_v12, %v6157_v43  ;;  %v19543_v32 = vld [vmem:[%s22140_s5 + $0x28] sm:$0xff] }
 0x76d   :  { %v6043_v29 = vpop.f32.mrb[180].mxu1  ;;  %v19522_v1 = vmul.f32 %v6259_v45, %v19504_v38 }
 0x76e   :  { %v6160_v34 = vadd.f32 %v6043_v29, %v19375_v49  ;;  %v13442_v19 = vpop.f32.mrb[181].mxu1  ;;  %v6260_v49 = vadd.f32 %v19490_v12, %v6153_v36  ;;  %v19509_v36 = vld [vmem:[%s22140_s5 + $0x10] sm:$0xff]  ;;  %v19547_v29 = vmul.f32 %v6263_v25, %v19531_v2 }
 0x76f   :  { %v6265_v19 = vadd.f32 %v19490_v12, %v6158_v6  ;;  %v19564_v6 = vld [vmem:[%s22140_s5 + $0x38] sm:$0xff] }
 0x771   :  { %v6048_v35 = vpop.f32.mrb[182].mxu1 }
 0x772   :  { %v6161_v27 = vadd.f32 %v6048_v35, %v19387_v28  ;;  %v13445_v63 = vpop.f32.mrb[183].mxu1  ;;  %v19553_v35 = vld [vmem:[%s22140_s5 + $0x30] sm:$0xff] }
 0x773   :  { %v19557_v63 = vmul.f32 %v6264_v18, %v19543_v32 }
 0x775   :  { %v6053_v44 = vpop.f32.mrb[184].mxu1 }
 0x776   :  { %v6162_v7 = vadd.f32 %v6053_v44, %v19391_v54  ;;  %v13448_v55 = vpop.f32.mrb[185].mxu1  ;;  %v19497_v54 = vld [vmem:[%s22140_s5 + $0x8] sm:$0xff]  ;;  %v6266_v44 = vadd.f32 %v19490_v12, %v6159_v23 }
 0x777   :  { %v19512_v41 = vmul.f32 %v6260_v49, %v19497_v54  ;;  %v6267_v49 = vadd.f32 %v19490_v12, %v6160_v34  ;;  %v19585_v34 = vld [vmem:[%s22140_s5 + $0x48] sm:$0xff] }
 0x778   :  { %v19578_v45 = vmul.f32 %v6266_v44, %v19564_v6 }
 0x779   :  { %v6058_v0 = vpop.f32.mrb[186].mxu1  ;;  %v6359_v20 = vadd.f32 %v19512_v41, %v19522_v1 }
 0x77a   :  { %v6163_v40 = vadd.f32 %v6058_v0, %v19394_v50  ;;  %v13451_v13 = vpop.f32.mrb[187].mxu1  ;;  %v6261_v50 = vadd.f32 %v19490_v12, %v6154_v10  ;;  %v19519_v10 = vld [vmem:[%s22140_s5 + $0x18] sm:$0xff] }
 0x77b   :  { %v19536_v22 = vmul.f32 %v6262_v59, %v19519_v10 }
 0x77c   :  { %v19525_v3 = vmul.f32 %v6261_v50, %v19509_v36  ;;  %v6268_v50 = vadd.f32 %v19490_v12, %v6161_v27 }
 0x77d   :  { %v6063_v46 = vpop.f32.mrb[188].mxu1 }
 0x77e   :  { %v6164_v51 = vadd.f32 %v6063_v46, %v19406_v57  ;;  %v13454_v28 = vpop.f32.mrb[189].mxu1  ;;  %v6360_v30 = vadd.f32 %v6359_v20, %v19525_v3  ;;  %v19568_v46 = vmul.f32 %v6265_v19, %v19553_v35  ;;  %v19595_v20 = vld [vmem:[%s22140_s5 + $0x50] sm:$0xff]  ;;  %v19599_v18 = vmul.f32 %v6268_v50, %v19585_v34 }
 0x77f   :  { %v19574_v28 = vld [vmem:[%s22140_s5 + $0x40] sm:$0xff] }
 0x780   :  { %v19589_v25 = vmul.f32 %v6267_v49, %v19574_v28  ;;  %v6271_v44 = vadd.f32 %v19490_v12, %v6164_v51  ;;  %v19627_v51 = vld [vmem:[%s22140_s5 + $0x68] sm:$0xff] }
 0x781   :  { %v6068_v57 = vpop.f32.mrb[190].mxu1 }
 0x782   :  { %v6165_v31 = vadd.f32 %v6068_v57, %v19410_v61  ;;  %v13457_v8 = vpop.f32.mrb[191].mxu1 }
 0x784   :  { %v6272_v49 = vadd.f32 %v19490_v12, %v6165_v31 }
 0x785   :  { %v6073_v61 = vpop.f32.mrb[192].mxu1 }
 0x786   :  { %v6166_v52 = vadd.f32 %v6073_v61, %v19413_v24  ;;  %v13460_v15 = vpop.f32.mrb[193].mxu1  ;;  %v6361_v24 = vadd.f32 %v6360_v30, %v19536_v22  ;;  %v6269_v61 = vadd.f32 %v19490_v12, %v6162_v7  ;;  %v19606_v7 = vld [vmem:[%s22140_s5 + $0x58] sm:$0xff] }
 0x787   :  { %v6270_v15 = vadd.f32 %v19490_v12, %v6163_v40 }
 0x788   :  { %v6362_v13 = vadd.f32 %v6361_v24, %v19547_v29  ;;  %v19610_v24 = vmul.f32 %v6269_v61, %v19595_v20  ;;  %v19637_v61 = vld [vmem:[%s22140_s5 + $0x70] sm:$0xff] }
 0x789   :  { %v6078_v43 = vpop.f32.mrb[194].mxu1 }
 0x78a   :  { %v6167_v55 = vadd.f32 %v6078_v43, %v19425_v39  ;;  %v13463_v0 = vpop.f32.mrb[195].mxu1  ;;  %v6363_v39 = vadd.f32 %v6362_v13, %v19557_v63  ;;  %v19620_v13 = vmul.f32 %v6270_v15, %v19606_v7 }
 0x78b   :  { %v19616_v0 = vld [vmem:[%s22140_s5 + $0x60] sm:$0xff] }
 0x78c   :  { %v6364_v8 = vadd.f32 %v6363_v39, %v19568_v46 }
 0x78d   :  { %v6083_v23 = vpop.f32.mrb[196].mxu1 }
 0x78e   :  { %v6168_v57 = vadd.f32 %v6083_v23, %v19429_v62  ;;  %v13466_v59 = vpop.f32.mrb[197].mxu1  ;;  %v6365_v62 = vadd.f32 %v6364_v8, %v19578_v45  ;;  %v6273_v8 = vadd.f32 %v19490_v12, %v6166_v52  ;;  %v19648_v52 = vld [vmem:[%s22140_s5 + $0x78] sm:$0xff] }
 0x78f   :  { %v19631_v59 = vmul.f32 %v6271_v44, %v19616_v0 }
 0x790   :  { %v6366_v43 = vadd.f32 %v6365_v62, %v19589_v25  ;;  %v6274_v62 = vadd.f32 %v19490_v12, %v6167_v55  ;;  %v19652_v44 = vmul.f32 %v6273_v8, %v19637_v61 }
 0x791   :  { %v6088_v27 = vpop.f32.mrb[198].mxu1 }
 0x792   :  { %v6169_v30 = vadd.f32 %v6088_v27, %v19432_v11  ;;  %v13469_v19 = vpop.f32.mrb[199].mxu1  ;;  %v6367_v11 = vadd.f32 %v6366_v43, %v19599_v18  ;;  %v19641_v27 = vmul.f32 %v6272_v49, %v19627_v51  ;;  %v19662_v49 = vmul.f32 %v6274_v62, %v19648_v52  ;;  %v19679_v62 = vld [vmem:[%s22140_s5 + $0x90] sm:$0xff] }
 0x793   :  { %22225 = vst [vmem:[#allocation10_spill] sm:$0xff] %v19679_v62 }
 0x794   :  { %v6368_v50 = vadd.f32 %v6367_v11, %v19610_v24  ;;  %v19658_v11 = vld [vmem:[%s22140_s5 + $0x80] sm:$0xff] }
 0x795   :  { %v6093_v40 = vpop.f32.mrb[200].mxu1  ;;  %22223 = vst [vmem:[#allocation4_spill] sm:$0xff] %v19658_v11 }
 0x796   :  { %v6170_v23 = vadd.f32 %v6093_v40, %v19444_v21  ;;  %v13472_v39 = vpop.f32.mrb[201].mxu1  ;;  %v6369_v21 = vadd.f32 %v6368_v50, %v19620_v13  ;;  %v6275_v40 = vadd.f32 %v19490_v12, %v6168_v57  ;;  %v19669_v57 = vld [vmem:[%s22140_s5 + $0x88] sm:$0xff] }
 0x797   :  { %v6276_v39 = vadd.f32 %v19490_v12, %v6169_v30  ;;  %22224 = vst [vmem:[#allocation5_spill] sm:$0xff] %v19669_v57 }
 0x798   :  { %v6370_v43 = vadd.f32 %v6369_v21, %v19631_v59  ;;  %v19673_v21 = vmul.f32 %v6275_v40, %v19658_v11 }
 0x799   :  { %v6098_v31 = vpop.f32.mrb[202].mxu1 }
 0x79a   :  { %v6171_v15 = vadd.f32 %v6098_v31, %v19448_v48  ;;  %v13475_v19 = vpop.f32.mrb[203].mxu1  ;;  %v6371_v48 = vadd.f32 %v6370_v43, %v19641_v27  ;;  %v19683_v43 = vmul.f32 %v6276_v39, %v19669_v57  ;;  %v19700_v39 = vld [vmem:[%s22140_s5 + $0xa0] sm:$0xff] }
 0x79b   :  { %v6277_v19 = vadd.f32 %v19490_v12, %v6170_v23  ;;  %v19690_v23 = vld [vmem:[%s22140_s5 + $0x98] sm:$0xff]  ;;  %22228 = vst [vmem:[#allocation8_spill] sm:$0xff] %v19700_v39 }
 0x79c   :  { %v6372_v8 = vadd.f32 %v6371_v48, %v19652_v44  ;;  %22226 = vst [vmem:[#allocation6_spill] sm:$0xff] %v19690_v23 }
 0x79d   :  { %v6103_v55 = vpop.f32.mrb[204].mxu1  ;;  %v19694_v11 = vmul.f32 %v6277_v19, %v19679_v62 }
 0x79e   :  { %v6172_v50 = vadd.f32 %v6103_v55, %v19451_v14  ;;  %v13478_v31 = vpop.f32.mrb[205].mxu1  ;;  %v6373_v14 = vadd.f32 %v6372_v8, %v19662_v49  ;;  %v6278_v55 = vadd.f32 %v19490_v12, %v6171_v15 }
 0x79f   :  { %22227 = vst [vmem:[#allocation7_spill] sm:$0xff] %v19694_v11 }
 0x7a0   :  { %v6374_v40 = vadd.f32 %v6373_v14, %v19673_v21  ;;  %v6279_v8 = vadd.f32 %v19490_v12, %v6172_v50  ;;  %v19711_v50 = vld [vmem:[%s22140_s5 + $0xa8] sm:$0xff] }
 0x7a1   :  { %v6108_v30 = vpop.f32.mrb[206].mxu1  ;;  %22229 = vst [vmem:[#allocation9_spill] sm:$0xff] %v19711_v50 }
 0x7a2   :  { %v6173_v48 = vadd.f32 %v6108_v30, %v19454_v9  ;;  %v13481_v31 = vpop.f32.mrb[207].mxu1  ;;  %v6375_v9 = vadd.f32 %v6374_v40, %v19683_v43  ;;  %v19704_v30 = vmul.f32 %v6278_v55, %v19690_v23  ;;  %v19715_v62 = vmul.f32 %v6279_v8, %v19700_v39  ;;  %v19721_v55 = vld [vmem:[%s22140_s5 + $0xb0] sm:$0xff]  ;;  %v19731_v8 = vld [vmem:[%s22140_s5 + $0xb8] sm:$0xff] }
 0x7a3   :  { %22230 = vst [vmem:[#allocation11_spill] sm:$0xff] %v19721_v55  ;;  %22231 = vst [vmem:[#allocation13_spill] sm:$0xff] %v19731_v8 }
 0x7a4   :  { %v6280_v31 = vadd.f32 %v19490_v12, %v6173_v48  ;;  %v6376_v19 = vadd.f32 %v6375_v9, %v19694_v11 }
 0x7a5   :  { %v6113_v15 = vpop.f32.mrb[208].mxu1 }
 0x7a6   :  { %v6174_v14 = vadd.f32 %v6113_v15, %v19466_v4  ;;  %v13484_v57 = vpop.f32.mrb[209].mxu1  ;;  %v6377_v4 = vadd.f32 %v6376_v19, %v19704_v30 }
 0x7a7   :  { %v19725_v57 = vmul.f32 %v6280_v31, %v19711_v50 }
 0x7a8   :  { %v6281_v40 = vadd.f32 %v19490_v12, %v6174_v14  ;;  %v6378_v9 = vadd.f32 %v6377_v4, %v19715_v62 }
 0x7a9   :  { %v6118_v48 = vpop.f32.mrb[210].mxu1 }
 0x7aa   :  { %v6175_v15 = vadd.f32 %v6118_v48, %v19470_v26  ;;  %v13487_v23 = vpop.f32.mrb[211].mxu1  ;;  %v19735_v14 = vmul.f32 %v6281_v40, %v19721_v55  ;;  %v6379_v19 = vadd.f32 %v6378_v9, %v19725_v57  ;;  %v19746_v48 = vld [vmem:[%s22140_s5 + $0xc0] sm:$0xff] }
 0x7ab   :  { %22232 = vst [vmem:[#allocation14_spill] sm:$0xff] %v19746_v48 }
 0x7ac   :  { %v6282_v39 = vadd.f32 %v19490_v12, %v6175_v15  ;;  %v6380_v4 = vadd.f32 %v6379_v19, %v19735_v14 }
 0x7ad   :  { %v6123_v11 = vpop.f32.mrb[212].mxu1 }
 0x7ae   :  { %v19740_v31 = vmul.f32 %v6282_v39, %v19731_v8  ;;  %v6176_v26 = vadd.f32 %v6123_v11, %v19473_v16  ;;  %v13490_v23 = vpop.f32.mrb[213].mxu1 }
 0x7b0   :  { %v6283_v40 = vadd.f32 %v19490_v12, %v6176_v26  ;;  %v6381_v15 = vadd.f32 %v6380_v4, %v19740_v31 }
 0x7b2   :  { %v19752_v55 = vmul.f32 %v6283_v40, %v19746_v48 }
 0x7b4   :  { %v6382_v39 = vadd.f32 %v6381_v15, %v19752_v55 }
 0x7b6   :  { %v6383_v9 = vrot.slane %v6382_v39, 4 }
 0x7b8   :  { %v6384_v8 = vadd.f32 %v6383_v9, %v6382_v39 }
 0x7ba   :  { %v6385_v16 = vrot.slane %v6384_v8, 2 }
 0x7bc   :  { %v6386_v11 = vadd.f32 %v6385_v16, %v6384_v8 }
 0x7be   :  { %v6387_v23 = vrot.slane %v6386_v11, 1 }
 0x7c0   :  { %v6388_v50 = vadd.f32 %v6387_v23, %v6386_v11 }
 0x7c2   :  { %13524 = vmatmul.mubr.f32.vlgmr.msra.gmra.mrb[178].mxu0 %v6388_v50 }
 0x7c3   :  { %15100 = vmatpush3.bf16.msra.mxu0 %v19323_v17  ;;  %13558 = vmatprep.mubr.msk.f32.mxu0 %vm15438_vm0, %v22212_v60 }
 0x7c4   :  { %15101 = vmatprep.subr.bf16.mxu0 %v22213_v58 }
 0x7c7   :  { %15103 = vmatpush3.bf16.msra.mxu0 %v19342_v37 }
 0x7c8   :  { %15104 = vmatprep.subr.bf16.mxu0 %v22213_v58 }
 0x7cb   :  { %15106 = vmatpush3.bf16.msra.mxu0 %v19361_v42 }
 0x7cc   :  { %15107 = vmatprep.subr.bf16.mxu0 %v22213_v58 }
 0x7cf   :  { %15109 = vmatpush3.bf16.msra.mxu0 %v19383_v47  ;;  %v22233_v47 = vld [vmem:[#allocation12_spill] sm:$0xff] }
 0x7d0   :  { %15110 = vmatprep.subr.bf16.mxu0 %v22213_v58 }
 0x7d3   :  { %15112 = vmatpush3.bf16.msra.mxu0 %v19402_v56 }
 0x7d4   :  { %15113 = vmatprep.subr.bf16.mxu0 %v22213_v58 }
 0x7d7   :  { %15115 = vmatpush3.bf16.msra.mxu0 %v19421_v5 }
 0x7d8   :  { %15116 = vmatprep.subr.bf16.mxu0 %v22213_v58 }
 0x7db   :  { %15118 = vmatpush3.bf16.msra.mxu0 %v19440_v53 }
 0x7dc   :  { %15119 = vmatprep.subr.bf16.mxu0 %v22213_v58 }
 0x7df   :  { %15121 = vmatpush3.bf16.msra.mxu0 %v19462_v33 }
 0x7e0   :  { %15122 = vmatprep.subr.bf16.mxu0 %v22213_v58 }
 0x895   :  { %v6471_v17 = vpop.f32.mrb[178].mxu0 }
 0x896   :  { %v13525_v37 = vpop.f32.mrb[179].mxu0  ;;  %v6475_v42 = vmul.f32 0.0009765625, %v6471_v17 }
 0x898   :  { %v19774_v12 = vrot.slane %v6475_v42, %v22233_v47 }
 0x89a   :  { %v6480_v56 = vsub.f32 %v19522_v1, %v19774_v12  ;;  %v6481_v5 = vsub.f32 %v19512_v41, %v19774_v12  ;;  %v6482_v53 = vsub.f32 %v19525_v3, %v19774_v12  ;;  %v6483_v8 = vsub.f32 %v19536_v22, %v19774_v12 }
 0x89b   :  { %v6484_v19 = vsub.f32 %v19547_v29, %v19774_v12  ;;  %v6486_v22 = vsub.f32 %v19568_v46, %v19774_v12  ;;  %v6487_v15 = vsub.f32 %v19578_v45, %v19774_v12  ;;  %v6488_v46 = vsub.f32 %v19589_v25, %v19774_v12 }
 0x89c   :  { %v19783_v50 = vmul.f32 %v6480_v56, %v19504_v38  ;;  %v19786_v33 = vmul.f32 %v6481_v5, %v19497_v54  ;;  %v19793_v1 = vmul.f32 %v6482_v53, %v19509_v36  ;;  %v6485_v38 = vsub.f32 %v19557_v63, %v19774_v12 }
 0x89d   :  { %v19802_v26 = vmul.f32 %v6483_v8, %v19519_v10  ;;  %v19807_v29 = vmul.f32 %v6484_v19, %v19531_v2  ;;  %v19821_v16 = vmul.f32 %v6486_v22, %v19553_v35  ;;  %v6489_v45 = vsub.f32 %v19599_v18, %v19774_v12 }
 0x89e   :  { %22234 = vst [vmem:[#allocation15_spill] sm:$0xff] %v19783_v50  ;;  %v6580_v41 = vmul.f32 %v19783_v50, %v19783_v50  ;;  %v6581_v3 = vmul.f32 %v19786_v33, %v19786_v33  ;;  %v6582_v4 = vmul.f32 %v19793_v1, %v19793_v1  ;;  %v19814_v39 = vmul.f32 %v6485_v38, %v19543_v32 }
 0x89f   :  { %v6583_v63 = vmul.f32 %v19802_v26, %v19802_v26  ;;  %v6584_v11 = vmul.f32 %v19807_v29, %v19807_v29  ;;  %v19828_v17 = vmul.f32 %v6487_v15, %v19564_v6  ;;  %v6490_v25 = vsub.f32 %v19610_v24, %v19774_v12 }
 0x8a0   :  { %v6605_v40 = vadd.f32 %v6581_v3, %v6580_v41  ;;  %v6585_v37 = vmul.f32 %v19814_v39, %v19814_v39  ;;  %v19835_v56 = vmul.f32 %v6488_v46, %v19574_v28  ;;  %v6586_v5 = vmul.f32 %v19821_v16, %v19821_v16 }
 0x8a1   :  { %v6491_v18 = vsub.f32 %v19620_v13, %v19774_v12  ;;  %v19842_v8 = vmul.f32 %v6489_v45, %v19585_v34  ;;  %v6587_v19 = vmul.f32 %v19828_v17, %v19828_v17  ;;  %v6492_v24 = vsub.f32 %v19631_v59, %v19774_v12 }
 0x8a2   :  { %v6606_v9 = vadd.f32 %v6605_v40, %v6582_v4  ;;  %v19849_v3 = vmul.f32 %v6490_v25, %v19595_v20  ;;  %v6588_v38 = vmul.f32 %v19835_v56, %v19835_v56  ;;  %v6493_v13 = vsub.f32 %v19641_v27, %v19774_v12 }
 0x8a3   :  { %v19856_v4 = vmul.f32 %v6491_v18, %v19606_v7  ;;  %v6589_v40 = vmul.f32 %v19842_v8, %v19842_v8  ;;  %v6494_v59 = vsub.f32 %v19652_v44, %v19774_v12  ;;  %v6495_v27 = vsub.f32 %v19662_v49, %v19774_v12 }
 0x8a4   :  { %v6607_v23 = vadd.f32 %v6606_v9, %v6583_v63  ;;  %v19863_v63 = vmul.f32 %v6492_v24, %v19616_v0  ;;  %v6590_v9 = vmul.f32 %v19849_v3, %v19849_v3  ;;  %v6496_v44 = vsub.f32 %v19673_v21, %v19774_v12 }
 0x8a5   :  { %v6497_v49 = vsub.f32 %v19683_v43, %v19774_v12  ;;  %v6499_v43 = vsub.f32 %v19704_v30, %v19774_v12  ;;  %v6501_v30 = vsub.f32 %v19725_v57, %v19774_v12  ;;  %v6503_v57 = vsub.f32 %v19740_v31, %v19774_v12 }
 0x8a6   :  { %v6608_v42 = vadd.f32 %v6607_v23, %v6584_v11  ;;  %v19870_v11 = vmul.f32 %v6493_v13, %v19627_v51  ;;  %v6591_v23 = vmul.f32 %v19856_v4, %v19856_v4  ;;  %v22237_v13 = vld [vmem:[#allocation5_spill] sm:$0xff] }
 0x8a8   :  { %v6609_v53 = vadd.f32 %v6608_v42, %v6585_v37  ;;  %v19877_v37 = vmul.f32 %v6494_v59, %v19637_v61  ;;  %v6592_v42 = vmul.f32 %v19863_v63, %v19863_v63 }
 0x8aa   :  { %v6610_v41 = vadd.f32 %v6609_v53, %v6586_v5  ;;  %v19884_v5 = vmul.f32 %v6495_v27, %v19648_v52  ;;  %v6593_v53 = vmul.f32 %v19870_v11, %v19870_v11 }
 0x8ac   :  { %v6611_v22 = vadd.f32 %v6610_v41, %v6587_v19  ;;  %v22235_v19 = vld [vmem:[#allocation7_spill] sm:$0xff]  ;;  %v22236_v41 = vld [vmem:[#allocation4_spill] sm:$0xff] }
 0x8ad   :  { %v6498_v21 = vsub.f32 %v22235_v19, %v19774_v12  ;;  %v19891_v24 = vmul.f32 %v6496_v44, %v22236_v41  ;;  %v22239_v44 = vld [vmem:[#allocation6_spill] sm:$0xff] }
 0x8ae   :  { %v6612_v15 = vadd.f32 %v6611_v22, %v6588_v38  ;;  %v6594_v38 = vmul.f32 %v19877_v37, %v19877_v37 }
 0x8b0   :  { %v6613_v46 = vadd.f32 %v6612_v15, %v6589_v40  ;;  %v19898_v40 = vmul.f32 %v6497_v49, %v22237_v13  ;;  %v6595_v15 = vmul.f32 %v19884_v5, %v19884_v5 }
 0x8b2   :  { %v6614_v45 = vadd.f32 %v6613_v46, %v6590_v9  ;;  %v6500_v9 = vsub.f32 %v19715_v62, %v19774_v12  ;;  %v22238_v46 = vld [vmem:[#allocation10_spill] sm:$0xff]  ;;  %v6502_v62 = vsub.f32 %v19735_v14, %v19774_v12  ;;  %v6504_v14 = vsub.f32 %v19752_v55, %v19774_v12 }
 0x8b3   :  { %v19905_v27 = vmul.f32 %v6498_v21, %v22238_v46 }
 0x8b4   :  { %v6615_v25 = vadd.f32 %v6614_v45, %v6591_v23  ;;  %v6596_v23 = vmul.f32 %v19891_v24, %v19891_v24  ;;  %v19943_v50 = vmul.f32 %v6504_v14, %v19746_v48 }
 0x8b5   :  { %v6598_v19 = vmul.f32 %v19905_v27, %v19905_v27 }
 0x8b6   :  { %v6616_v18 = vadd.f32 %v6615_v25, %v6592_v42  ;;  %v19912_v42 = vmul.f32 %v6499_v43, %v22239_v44  ;;  %v6597_v25 = vmul.f32 %v19898_v40, %v19898_v40  ;;  %22244 = vst [vmem:[#allocation7_spill] sm:$0xff] %v19943_v50 }
 0x8b8   :  { %v6617_v22 = vadd.f32 %v6616_v18, %v6593_v53  ;;  %v22240_v53 = vld [vmem:[#allocation8_spill] sm:$0xff]  ;;  %v6599_v43 = vmul.f32 %v19912_v42, %v19912_v42 }
 0x8b9   :  { %v19919_v18 = vmul.f32 %v6500_v9, %v22240_v53 }
 0x8ba   :  { %v6618_v59 = vadd.f32 %v6617_v22, %v6594_v38  ;;  %v22241_v38 = vld [vmem:[#allocation9_spill] sm:$0xff] }
 0x8bb   :  { %v19926_v22 = vmul.f32 %v6501_v30, %v22241_v38 }
 0x8bc   :  { %v6619_v45 = vadd.f32 %v6618_v59, %v6595_v15  ;;  %v22242_v59 = vld [vmem:[#allocation11_spill] sm:$0xff] }
 0x8bd   :  { %v19933_v9 = vmul.f32 %v6502_v62, %v22242_v59  ;;  %v6601_v31 = vmul.f32 %v19926_v22, %v19926_v22 }
 0x8be   :  { %v6620_v49 = vadd.f32 %v6619_v45, %v6596_v23  ;;  %v6600_v23 = vmul.f32 %v19919_v18, %v19919_v18 }
 0x8bf   :  { %v6602_v55 = vmul.f32 %v19933_v9, %v19933_v9 }
 0x8c0   :  { %v6621_v21 = vadd.f32 %v6620_v49, %v6597_v25  ;;  %v22243_v25 = vld [vmem:[#allocation13_spill] sm:$0xff] }
 0x8c1   :  { %v19938_v49 = vmul.f32 %v6503_v57, %v22243_v25 }
 0x8c2   :  { %v6622_v15 = vadd.f32 %v6621_v21, %v6598_v19  ;;  %v6604_v21 = vmul.f32 %v19943_v50, %v19943_v50 }
 0x8c3   :  { %v6603_v62 = vmul.f32 %v19938_v49, %v19938_v49 }
 0x8c4   :  { %v6623_v45 = vadd.f32 %v6622_v15, %v6599_v43 }
 0x8c6   :  { %v6624_v30 = vadd.f32 %v6623_v45, %v6600_v23 }
 0x8c8   :  { %v6625_v12 = vadd.f32 %v6624_v30, %v6601_v31  ;;  %v6937_v31 = vld [vmem:[%s22136_s1] sm:$0xff]  ;;  %v6938_v30 = vld [vmem:[%s22136_s1 + $0x8] sm:$0xff] }
 0x8ca   :  { %v6626_v19 = vadd.f32 %v6625_v12, %v6602_v55  ;;  %v7193_v55 = vld [vmem:[%s22136_s1 + $0x80] sm:$0xff]  ;;  %v15123_v12 = vpack.c.bf16 %v6938_v30, %v6937_v31  ;;  %v7198_v31 = vld [vmem:[%s22136_s1 + $0xa8] sm:$0xff] }
 0x8cc   :  { %v6627_v57 = vadd.f32 %v6626_v19, %v6603_v62  ;;  %v6940_v62 = vld [vmem:[%s22136_s1 + $0x18] sm:$0xff] }
 0x8ce   :  { %v6628_v43 = vadd.f32 %v6627_v57, %v6604_v21  ;;  %v7195_v21 = vld [vmem:[%s22136_s1 + $0x90] sm:$0xff]  ;;  %v7196_v57 = vld [vmem:[%s22136_s1 + $0x98] sm:$0xff] }
 0x8d0   :  { %v6629_v15 = vrot.slane %v6628_v43, 4 }
 0x8d2   :  { %v6630_v25 = vadd.f32 %v6629_v15, %v6628_v43  ;;  %v15150_v15 = vpack.c.bf16 %v7196_v57, %v7195_v21  ;;  %v6945_v57 = vld [vmem:[%s22136_s1 + $0x40] sm:$0xff] }
 0x8d4   :  { %v6631_v59 = vrot.slane %v6630_v25, 2 }
 0x8d6   :  { %v6632_v23 = vadd.f32 %v6631_v59, %v6630_v25  ;;  %v7194_v59 = vld [vmem:[%s22136_s1 + $0x88] sm:$0xff]  ;;  %v6939_v25 = vld [vmem:[%s22136_s1 + $0x10] sm:$0xff] }
 0x8d7   :  { %v15147_v19 = vpack.c.bf16 %v7194_v59, %v7193_v55  ;;  %v15126_v43 = vpack.c.bf16 %v6940_v62, %v6939_v25  ;;  %v6944_v59 = vld [vmem:[%s22136_s1 + $0x38] sm:$0xff]  ;;  %v7199_v25 = vld [vmem:[%s22136_s1 + $0xb0] sm:$0xff] }
 0x8d8   :  { %v6633_v45 = vrot.slane %v6632_v23, 1  ;;  %v7200_v62 = vld [vmem:[%s22136_s1 + $0xb8] sm:$0xff] }
 0x8d9   :  { %15148 = vmatpush3.bf16.msra.mxu1 %v15147_v19  ;;  %v15156_v21 = vpack.c.bf16 %v7200_v62, %v7199_v25  ;;  %v6949_v62 = vld [vmem:[%s22136_s1 + $0x60] sm:$0xff] }
 0x8da   :  { %v6634_v14 = vadd.f32 %v6633_v45, %v6632_v23  ;;  %v6941_v23 = vld [vmem:[%s22136_s1 + $0x20] sm:$0xff]  ;;  %v6942_v45 = vld [vmem:[%s22136_s1 + $0x28] sm:$0xff]  ;;  %15149 = vmatprep.subr.bf16.mxu1 %v22213_v58 }
 0x8db   :  { %v15129_v30 = vpack.c.bf16 %v6942_v45, %v6941_v23  ;;  %v7202_v23 = vld [vmem:[%s22136_s1 + $0xc8] sm:$0xff] }
 0x8dc   :  { %13559 = vmatmul.mubr.f32.vlgmr.msra.gmra.mrb[180].mxu0 %v6634_v14  ;;  %v7197_v14 = vld [vmem:[%s22136_s1 + $0xa0] sm:$0xff] }
 0x8dd   :  { %13593 = vmatprep.mubr.msk.f32.mxu0 %vm15438_vm0, %v22212_v60  ;;  %15124 = vmatpush3.bf16.msra.mxu0 %v15123_v12  ;;  %v15153_v55 = vpack.c.bf16 %v7198_v31, %v7197_v14  ;;  %v6943_v12 = vld [vmem:[%s22136_s1 + $0x30] sm:$0xff] }
 0x8de   :  { %15125 = vmatprep.subr.bf16.mxu0 %v22213_v58  ;;  %15151 = vmatpush3.bf16.msra.mxu1 %v15150_v15  ;;  %v15132_v19 = vpack.c.bf16 %v6944_v59, %v6943_v12  ;;  %v7201_v15 = vld [vmem:[%s22136_s1 + $0xc0] sm:$0xff]  ;;  %v6947_v31 = vld [vmem:[%s22136_s1 + $0x50] sm:$0xff]  ;;  %v7204_v12 = vld [vmem:[%s22136_s1 + $0xd8] sm:$0xff] }
 0x8df   :  { %15152 = vmatprep.subr.bf16.mxu1 %v22213_v58  ;;  %v15159_v14 = vpack.c.bf16 %v7202_v23, %v7201_v15  ;;  %v6951_v23 = vld [vmem:[%s22136_s1 + $0x70] sm:$0xff] }
 0x8e1   :  { %15127 = vmatpush3.bf16.msra.mxu0 %v15126_v43  ;;  %v6946_v43 = vld [vmem:[%s22136_s1 + $0x48] sm:$0xff] }
 0x8e2   :  { %15128 = vmatprep.subr.bf16.mxu0 %v22213_v58  ;;  %15154 = vmatpush3.bf16.msra.mxu1 %v15153_v55  ;;  %v15135_v45 = vpack.c.bf16 %v6946_v43, %v6945_v57  ;;  %v7203_v55 = vld [vmem:[%s22136_s1 + $0xd0] sm:$0xff]  ;;  %v7206_v57 = vld [vmem:[%s22136_s1 + $0xe8] sm:$0xff] }
 0x8e3   :  { %15155 = vmatprep.subr.bf16.mxu1 %v22213_v58  ;;  %v15162_v25 = vpack.c.bf16 %v7204_v12, %v7203_v55  ;;  %v7499_v12 = vld [vmem:[%s22136_s1 + $0x100] sm:$0xff] }
 0x8e5   :  { %15130 = vmatpush3.bf16.msra.mxu0 %v15129_v30  ;;  %v6948_v30 = vld [vmem:[%s22136_s1 + $0x58] sm:$0xff] }
 0x8e6   :  { %15131 = vmatprep.subr.bf16.mxu0 %v22213_v58  ;;  %15157 = vmatpush3.bf16.msra.mxu1 %v15156_v21  ;;  %v15138_v59 = vpack.c.bf16 %v6948_v30, %v6947_v31  ;;  %v7205_v21 = vld [vmem:[%s22136_s1 + $0xe0] sm:$0xff]  ;;  %v7208_v31 = vld [vmem:[%s22136_s1 + $0xf8] sm:$0xff] }
 0x8e7   :  { %15158 = vmatprep.subr.bf16.mxu1 %v22213_v58  ;;  %v15165_v15 = vpack.c.bf16 %v7206_v57, %v7205_v21  ;;  %v7501_v21 = vld [vmem:[%s22136_s1 + $0x110] sm:$0xff]  ;;  %v7502_v57 = vld [vmem:[%s22136_s1 + $0x118] sm:$0xff] }
 0x8e9   :  { %15133 = vmatpush3.bf16.msra.mxu0 %v15132_v19  ;;  %v6950_v19 = vld [vmem:[%s22136_s1 + $0x68] sm:$0xff] }
 0x8ea   :  { %15134 = vmatprep.subr.bf16.mxu0 %v22213_v58  ;;  %15160 = vmatpush3.bf16.msra.mxu1 %v15159_v14  ;;  %v15141_v43 = vpack.c.bf16 %v6950_v19, %v6949_v62  ;;  %v7207_v14 = vld [vmem:[%s22136_s1 + $0xf0] sm:$0xff]  ;;  %v7168_v19 = vld [vmem:[#allocation2 + $0x6] sm:$0xff] }
 0x8eb   :  { %15161 = vmatprep.subr.bf16.mxu1 %v22213_v58  ;;  %v15168_v55 = vpack.c.bf16 %v7208_v31, %v7207_v14  ;;  %v7505_v14 = vld [vmem:[%s22136_s1 + $0x130] sm:$0xff]  ;;  %v7506_v31 = vld [vmem:[%s22136_s1 + $0x138] sm:$0xff] }
 0x8ed   :  { %15136 = vmatpush3.bf16.msra.mxu0 %v15135_v45  ;;  %v6952_v45 = vld [vmem:[%s22136_s1 + $0x78] sm:$0xff] }
 0x8ee   :  { %15137 = vmatprep.subr.bf16.mxu0 %v22213_v58  ;;  %15163 = vmatpush3.bf16.msra.mxu1 %v15162_v25  ;;  %v15144_v30 = vpack.c.bf16 %v6952_v45, %v6951_v23  ;;  %v6912_v25 = vld [vmem:[#allocation2 + $0x5] sm:$0xff] }
 0x8ef   :  { %15164 = vmatprep.subr.bf16.mxu1 %v22213_v58  ;;  %v7504_v23 = vld [vmem:[%s22136_s1 + $0x128] sm:$0xff] }
 0x8f1   :  { %15139 = vmatpush3.bf16.msra.mxu0 %v15138_v59  ;;  %v7500_v59 = vld [vmem:[%s22136_s1 + $0x108] sm:$0xff] }
 0x8f2   :  { %15140 = vmatprep.subr.bf16.mxu0 %v22213_v58  ;;  %15166 = vmatpush3.bf16.msra.mxu1 %v15165_v15  ;;  %v15171_v62 = vpack.c.bf16 %v7500_v59, %v7499_v12  ;;  %v7503_v15 = vld [vmem:[%s22136_s1 + $0x120] sm:$0xff]  ;;  %v7508_v12 = vld [vmem:[%s22136_s1 + $0x148] sm:$0xff] }
 0x8f3   :  { %15167 = vmatprep.subr.bf16.mxu1 %v22213_v58  ;;  %v15177_v45 = vpack.c.bf16 %v7504_v23, %v7503_v15  ;;  %v7805_v15 = vld [vmem:[%s22136_s1 + $0x180] sm:$0xff]  ;;  %v7806_v23 = vld [vmem:[%s22136_s1 + $0x188] sm:$0xff] }
 0x8f5   :  { %15142 = vmatpush3.bf16.msra.mxu0 %v15141_v43  ;;  %v15174_v43 = vpack.c.bf16 %v7502_v57, %v7501_v21 }
 0x8f6   :  { %15143 = vmatprep.subr.bf16.mxu0 %v22213_v58  ;;  %15169 = vmatpush3.bf16.msra.mxu1 %v15168_v55  ;;  %v7507_v55 = vld [vmem:[%s22136_s1 + $0x140] sm:$0xff] }
 0x8f7   :  { %15194 = vmatprep.subr.bf16.mxu1 %v22213_v58  ;;  %v15183_v59 = vpack.c.bf16 %v7508_v12, %v7507_v55  ;;  %v7511_v12 = vld [vmem:[%s22136_s1 + $0x160] sm:$0xff] }
 0x8f9   :  { %15145 = vmatpush3.bf16.msra.mxu0 %v15144_v30  ;;  %13701 = vmatmul.mubr.f32.vlgmr.msra.gmra.mrb[214].mxu1 %v7168_v19  ;;  %v15180_v30 = vpack.c.bf16 %v7506_v31, %v7505_v14  ;;  %v15195_v14 = vpack.c.bf16 %v7806_v23, %v7805_v15  ;;  %v7807_v31 = vld [vmem:[%s22136_s1 + $0x190] sm:$0xff]  ;;  %v7812_v15 = vld [vmem:[%s22136_s1 + $0x1b8] sm:$0xff] }
 0x8fa   :  { %15170 = vmatprep.subr.bf16.mxu0 %v22213_v58  ;;  %13703 = vmatprep.mubr.msk.f32.mxu1 %vm15438_vm0, %v22212_v60 }
 0x8fb   :  { %15196 = vmatpush3.bf16.msra.mxu1 %v15195_v14 }
 0x8fc   :  { %13594 = vmatmul.mubr.f32.vlgmr.msra.gmra.mrb[182].mxu0 %v6912_v25  ;;  %v7509_v25 = vld [vmem:[%s22136_s1 + $0x150] sm:$0xff]  ;;  %15197 = vmatprep.subr.bf16.mxu1 %v22213_v58 }
 0x8fd   :  { %15172 = vmatpush3.bf16.msra.mxu0 %v15171_v62  ;;  %13596 = vmatprep.mubr.msk.f32.mxu0 %vm15438_vm0, %v22212_v60  ;;  %v7510_v62 = vld [vmem:[%s22136_s1 + $0x158] sm:$0xff] }
 0x8fe   :  { %15173 = vmatprep.subr.bf16.mxu0 %v22213_v58  ;;  %v15186_v19 = vpack.c.bf16 %v7510_v62, %v7509_v25  ;;  %v7809_v25 = vld [vmem:[%s22136_s1 + $0x1a0] sm:$0xff] }
 0x901   :  { %15175 = vmatpush3.bf16.msra.mxu0 %v15174_v43 }
 0x902   :  { %15176 = vmatprep.subr.bf16.mxu0 %v22213_v58 }
 0x905   :  { %15178 = vmatpush3.bf16.msra.mxu0 %v15177_v45 }
 0x906   :  { %15179 = vmatprep.subr.bf16.mxu0 %v22213_v58 }
 0x909   :  { %15181 = vmatpush3.bf16.msra.mxu0 %v15180_v30  ;;  %v7808_v30 = vld [vmem:[%s22136_s1 + $0x198] sm:$0xff] }
 0x90a   :  { %15182 = vmatprep.subr.bf16.mxu0 %v22213_v58  ;;  %v15198_v55 = vpack.c.bf16 %v7808_v30, %v7807_v31  ;;  %v7813_v30 = vld [vmem:[%s22136_s1 + $0x1c0] sm:$0xff] }
 0x90c   :  { %15199 = vmatpush3.bf16.msra.mxu1 %v15198_v55  ;;  %v7814_v55 = vld [vmem:[%s22136_s1 + $0x1c8] sm:$0xff] }
 0x90d   :  { %15184 = vmatpush3.bf16.msra.mxu0 %v15183_v59  ;;  %v7512_v59 = vld [vmem:[%s22136_s1 + $0x168] sm:$0xff]  ;;  %15200 = vmatprep.subr.bf16.mxu1 %v22213_v58 }
 0x90e   :  { %15185 = vmatprep.subr.bf16.mxu0 %v22213_v58  ;;  %v15189_v62 = vpack.c.bf16 %v7512_v59, %v7511_v12  ;;  %v15207_v12 = vpack.c.bf16 %v7814_v55, %v7813_v30 }
 0x911   :  { %15187 = vmatpush3.bf16.msra.mxu0 %v15186_v19  ;;  %v7810_v19 = vld [vmem:[%s22136_s1 + $0x1a8] sm:$0xff] }
 0x912   :  { %15188 = vmatprep.subr.bf16.mxu0 %v22213_v58 }
 0x915   :  { %15190 = vmatpush3.bf16.msra.mxu0 %v15189_v62 }
 0x916   :  { %15191 = vmatprep.subr.bf16.mxu0 %v22213_v58 }
 0x9af   :  { %v6717_v21 = vpop.f32.mrb[180].mxu0 }
 0x9b0   :  { %v6721_v57 = vmul.f32 0.0009765625, %v6717_v21  ;;  %v13560_v43 = vpop.f32.mrb[181].mxu0  ;;  %v15201_v21 = vpack.c.bf16 %v7810_v19, %v7809_v25 }
 0x9b1   :  { %v7811_v43 = vld [vmem:[%s22136_s1 + $0x1b0] sm:$0xff] }
 0x9b2   :  { %v6722_v45 = vadd.f32 1e-05, %v6721_v57  ;;  %v6724_v57 = vld [vmem:[%s22141_s3] sm:$0x1]  ;;  %15202 = vmatpush3.bf16.msra.mxu1 %v15201_v21 }
 0x9b3   :  { %15203 = vmatprep.subr.bf16.mxu1 %v22213_v58 }
 0x9b4   :  { %15407 = vrsqrt.f32 %v6722_v45  ;;  %v15204_v45 = vpack.c.bf16 %v7812_v15, %v7811_v43 }
 0x9b6   :  { %15205 = vmatpush3.bf16.msra.mxu1 %v15204_v45 }
 0x9b7   :  { %15206 = vmatprep.subr.bf16.mxu1 %v22213_v58 }
 0x9ba   :  { %15208 = vmatpush3.bf16.msra.mxu1 %v15207_v12 }
 0x9bb   :  { %15209 = vmatprep.subr.bf16.mxu1 %v22213_v58 }
 0x9be   :  { %v15408_v23 = vpop.eup %15407 }
 0x9bf   :  { %v6725_v14 = vmul.f32 %v15408_v23, %v6724_v57 }
 0x9c1   :  { %v20149_v31 = vrot.slane %v6725_v14, %v22233_v47 }
 0x9c3   :  { %22245 = vst [vmem:[#allocation4_spill] sm:$0xff] %v20149_v31  ;;  %v6731_v59 = vmul.f32 %v20149_v31, %v19786_v33  ;;  %v6732_v25 = vmul.f32 %v20149_v31, %v19793_v1  ;;  %v6733_v62 = vmul.f32 %v20149_v31, %v19802_v26  ;;  %v6734_v19 = vmul.f32 %v20149_v31, %v19807_v29 }
 0x9c4   :  { %v6735_v21 = vmul.f32 %v20149_v31, %v19814_v39  ;;  %v6736_v57 = vmul.f32 %v20149_v31, %v19821_v16  ;;  %v6737_v43 = vmul.f32 %v20149_v31, %v19828_v17  ;;  %v6738_v33 = vmul.f32 %v20149_v31, %v19835_v56 }
 0x9c5   :  { %v6739_v1 = vmul.f32 %v20149_v31, %v19842_v8  ;;  %v6740_v26 = vmul.f32 %v20149_v31, %v19849_v3  ;;  %v6741_v29 = vmul.f32 %v20149_v31, %v19856_v4  ;;  %v6742_v39 = vmul.f32 %v20149_v31, %v19863_v63 }
 0x9c6   :  { %v6743_v16 = vmul.f32 %v20149_v31, %v19870_v11  ;;  %v6744_v17 = vmul.f32 %v20149_v31, %v19877_v37  ;;  %v6745_v56 = vmul.f32 %v20149_v31, %v19884_v5  ;;  %v6746_v8 = vmul.f32 %v20149_v31, %v19891_v24 }
 0x9c7   :  { %v6747_v3 = vmul.f32 %v20149_v31, %v19898_v40  ;;  %v6748_v4 = vmul.f32 %v20149_v31, %v19905_v27  ;;  %v6749_v63 = vmul.f32 %v20149_v31, %v19912_v42  ;;  %v6750_v11 = vmul.f32 %v20149_v31, %v19919_v18  ;;  %v20208_v40 = vld [vmem:[%s22142_s4] ss:$0 sm:$0xff] }
 0x9c8   :  { %v6751_v37 = vmul.f32 %v20149_v31, %v19926_v22  ;;  %v6752_v5 = vmul.f32 %v20149_v31, %v19933_v9  ;;  %v6753_v24 = vmul.f32 %v20149_v31, %v19938_v49  ;;  %v6763_v27 = vadd.f32 %v20208_v40, %v6731_v59 }
 0x9c9   :  { %v6764_v42 = vadd.f32 %v20208_v40, %v6732_v25  ;;  %v6765_v18 = vadd.f32 %v20208_v40, %v6733_v62  ;;  %v6766_v15 = vadd.f32 %v20208_v40, %v6734_v19  ;;  %v6767_v22 = vadd.f32 %v20208_v40, %v6735_v21 }
 0x9ca   :  { %v6768_v9 = vadd.f32 %v20208_v40, %v6736_v57  ;;  %v6769_v23 = vadd.f32 %v20208_v40, %v6737_v43  ;;  %v6770_v49 = vadd.f32 %v20208_v40, %v6738_v33  ;;  %v6771_v45 = vadd.f32 %v20208_v40, %v6739_v1 }
 0x9cb   :  { %v6772_v14 = vadd.f32 %v20208_v40, %v6740_v26  ;;  %v6773_v30 = vadd.f32 %v20208_v40, %v6741_v29  ;;  %v6774_v55 = vadd.f32 %v20208_v40, %v6742_v39  ;;  %v6775_v12 = vadd.f32 %v20208_v40, %v6743_v16 }
 0x9cc   :  { %v6776_v59 = vadd.f32 %v20208_v40, %v6744_v17  ;;  %v6777_v25 = vadd.f32 %v20208_v40, %v6745_v56  ;;  %v6778_v62 = vadd.f32 %v20208_v40, %v6746_v8  ;;  %v6779_v19 = vadd.f32 %v20208_v40, %v6747_v3 }
 0x9cd   :  { %v6780_v21 = vadd.f32 %v20208_v40, %v6748_v4  ;;  %v6781_v57 = vadd.f32 %v20208_v40, %v6749_v63  ;;  %v6782_v43 = vadd.f32 %v20208_v40, %v6750_v11  ;;  %v6783_v33 = vadd.f32 %v20208_v40, %v6751_v37 }
 0x9ce   :  { %v6784_v1 = vadd.f32 %v20208_v40, %v6752_v5  ;;  %v6785_v26 = vadd.f32 %v20208_v40, %v6753_v24  ;;  %v6788_v29 = vmax.f32 %v6763_v27, 0.0  ;;  %v6789_v39 = vmax.f32 %v6764_v42, 0.0 }
 0x9cf   :  { %v6790_v16 = vmax.f32 %v6765_v18, 0.0  ;;  %v6791_v17 = vmax.f32 %v6766_v15, 0.0  ;;  %v6792_v56 = vmax.f32 %v6767_v22, 0.0  ;;  %v6793_v8 = vmax.f32 %v6768_v9, 0.0 }
 0x9d0   :  { %v6794_v47 = vmax.f32 %v6769_v23, 0.0  ;;  %v6795_v3 = vmax.f32 %v6770_v49, 0.0  ;;  %v6796_v60 = vmax.f32 %v6771_v45, 0.0  ;;  %v6797_v4 = vmax.f32 %v6772_v14, 0.0 }
 0x9d1   :  { %v6798_v48 = vmax.f32 %v6773_v30, 0.0  ;;  %v6799_v63 = vmax.f32 %v6774_v55, 0.0  ;;  %v6800_v58 = vmax.f32 %v6775_v12, 0.0  ;;  %v6801_v11 = vmax.f32 %v6776_v59, 0.0  ;;  %v6838_v30 = vld [vmem:[%s22137_s0 + $0x18] sm:$0xff]  ;;  %v6843_v55 = vld [vmem:[%s22137_s0 + $0x40] sm:$0xff] }
 0x9d2   :  { %v6802_v50 = vmax.f32 %v6777_v25, 0.0  ;;  %v6803_v37 = vmax.f32 %v6778_v62, 0.0  ;;  %v6804_v31 = vmax.f32 %v6779_v19, 0.0  ;;  %v6805_v5 = vmax.f32 %v6780_v21, 0.0  ;;  %v6846_v12 = vld [vmem:[%s22137_s0 + $0x58] sm:$0xff]  ;;  %v6849_v59 = vld [vmem:[%s22137_s0 + $0x70] sm:$0xff] }
 0x9d3   :  { %v6806_v38 = vmax.f32 %v6781_v57, 0.0  ;;  %v6807_v24 = vmax.f32 %v6782_v43, 0.0  ;;  %v6808_v27 = vmax.f32 %v6783_v33, 0.0  ;;  %v6809_v42 = vmax.f32 %v6784_v1, 0.0  ;;  %v22246_v25 = vld [vmem:[#allocation9_spill] sm:$0xff]  ;;  %v6851_v19 = vld [vmem:[%s22137_s0 + $0x80] sm:$0xff] }
 0x9d4   :  { %v6810_v18 = vmax.f32 %v6785_v26, 0.0  ;;  %v6813_v15 = vmul.f32 %v6788_v29, %v19497_v54  ;;  %v6814_v22 = vmul.f32 %v6789_v39, %v19509_v36  ;;  %v6815_v9 = vmul.f32 %v6790_v16, %v19519_v10  ;;  %v6839_v54 = vld [vmem:[%s22137_s0 + $0x20] sm:$0xff]  ;;  %v6840_v36 = vld [vmem:[%s22137_s0 + $0x28] sm:$0xff]  ;;  %v22248_v62 = vld [vmem:[#allocation13_spill] sm:$0xff] }
 0x9d5   :  { %v6816_v23 = vmul.f32 %v6791_v17, %v19531_v2  ;;  %v6817_v49 = vmul.f32 %v6792_v56, %v19543_v32  ;;  %v6818_v45 = vmul.f32 %v6793_v8, %v19553_v35  ;;  %v6819_v14 = vmul.f32 %v6794_v47, %v19564_v6  ;;  %v6841_v6 = vld [vmem:[%s22137_s0 + $0x30] sm:$0xff]  ;;  %v6842_v47 = vld [vmem:[%s22137_s0 + $0x38] sm:$0xff]  ;;  %v6852_v21 = vld [vmem:[%s22137_s0 + $0x88] sm:$0xff] }
 0x9d6   :  { %v6820_v10 = vmul.f32 %v6795_v3, %v19574_v28  ;;  %v6821_v2 = vmul.f32 %v6796_v60, %v19585_v34  ;;  %v6822_v32 = vmul.f32 %v6797_v4, %v19595_v20  ;;  %v6823_v35 = vmul.f32 %v6798_v48, %v19606_v7  ;;  %v6844_v7 = vld [vmem:[%s22137_s0 + $0x48] sm:$0xff]  ;;  %v6845_v48 = vld [vmem:[%s22137_s0 + $0x50] sm:$0xff]  ;;  %v6854_v57 = vld [vmem:[%s22137_s0 + $0x98] sm:$0xff] }
 0x9d7   :  { %v6824_v28 = vmul.f32 %v6799_v63, %v19616_v0  ;;  %v6825_v60 = vmul.f32 %v6800_v58, %v19627_v51  ;;  %v6826_v34 = vmul.f32 %v6801_v11, %v19637_v61  ;;  %v6827_v20 = vmul.f32 %v6802_v50, %v19648_v52  ;;  %v6847_v52 = vld [vmem:[%s22137_s0 + $0x60] sm:$0xff]  ;;  %v6848_v50 = vld [vmem:[%s22137_s0 + $0x68] sm:$0xff]  ;;  %v6857_v16 = vld [vmem:[%s22137_s0 + $0xb0] sm:$0xff] }
 0x9d8   :  { %v6828_v0 = vmul.f32 %v6803_v37, %v22236_v41  ;;  %v6829_v58 = vmul.f32 %v6804_v31, %v22237_v13  ;;  %v6830_v51 = vmul.f32 %v6805_v5, %v22238_v46  ;;  %v6831_v61 = vmul.f32 %v6806_v38, %v22239_v44  ;;  %v22247_v31 = vld [vmem:[#allocation11_spill] sm:$0xff]  ;;  %v6850_v38 = vld [vmem:[%s22137_s0 + $0x78] sm:$0xff]  ;;  %v6856_v39 = vld [vmem:[%s22137_s0 + $0xa8] sm:$0xff] }
 0x9d9   :  { %v6832_v41 = vmul.f32 %v6807_v24, %v22240_v53  ;;  %v6833_v13 = vmul.f32 %v6808_v27, %v22246_v25  ;;  %v6834_v46 = vmul.f32 %v6809_v42, %v22247_v31  ;;  %v6835_v44 = vmul.f32 %v6810_v18, %v22248_v62  ;;  %v6853_v53 = vld [vmem:[%s22137_s0 + $0x90] sm:$0xff]  ;;  %v6855_v43 = vld [vmem:[%s22137_s0 + $0xa0] sm:$0xff]  ;;  %v6858_v17 = vld [vmem:[%s22137_s0 + $0xb8] sm:$0xff] }
 0x9da   :  { %v6863_v33 = vadd.f32 %v6838_v30, %v6813_v15  ;;  %v6864_v1 = vadd.f32 %v6839_v54, %v6814_v22  ;;  %v6865_v26 = vadd.f32 %v6840_v36, %v6815_v9  ;;  %v6866_v29 = vadd.f32 %v6841_v6, %v6816_v23  ;;  %v6859_v63 = vld [vmem:[%s22137_s0 + $0xc0] sm:$0xff]  ;;  %v6860_v11 = vld [vmem:[%s22137_s0 + $0xc8] sm:$0xff]  ;;  %v7513_v42 = vld [vmem:[%s22136_s1 + $0x170] sm:$0xff] }
 0x9db   :  { %v6867_v56 = vadd.f32 %v6842_v47, %v6817_v49  ;;  %v6868_v8 = vadd.f32 %v6843_v55, %v6818_v45  ;;  %v6869_v3 = vadd.f32 %v6844_v7, %v6819_v14  ;;  %v6870_v4 = vadd.f32 %v6845_v48, %v6820_v10  ;;  %v7514_v23 = vld [vmem:[%s22136_s1 + $0x178] sm:$0xff]  ;;  %v7815_v49 = vld [vmem:[%s22136_s1 + $0x1d0] sm:$0xff]  ;;  %v22250_v6 = vld [vmem:[#allocation4_spill] sm:$0xff] }
 0x9dc   :  { %v6871_v37 = vadd.f32 %v6846_v12, %v6821_v2  ;;  %v6872_v5 = vadd.f32 %v6847_v52, %v6822_v32  ;;  %v6873_v24 = vadd.f32 %v6848_v50, %v6823_v35  ;;  %v6874_v27 = vadd.f32 %v6849_v59, %v6824_v28  ;;  %6888 = vst [vmem:[#allocation2 + $0x18] sm:$0xff] %v6863_v33  ;;  %v7816_v45 = vld [vmem:[%s22136_s1 + $0x1d8] sm:$0xff]  ;;  %v22249_v35 = vld [vmem:[#allocation15_spill] sm:$0xff]  ;;  %v7818_v28 = vld [vmem:[%s22136_s1 + $0x1e8] sm:$0xff] }
 0x9dd   :  { %6889 = vst [vmem:[#allocation2 + $0x20] sm:$0xff] %v6864_v1  ;;  %6890 = vst [vmem:[#allocation2 + $0x28] sm:$0xff] %v6865_v26  ;;  %v6875_v18 = vadd.f32 %v6850_v38, %v6825_v60  ;;  %v6876_v15 = vadd.f32 %v6851_v19, %v6826_v34  ;;  %v6877_v22 = vadd.f32 %v6852_v21, %v6827_v20  ;;  %v7817_v55 = vld [vmem:[%s22136_s1 + $0x1e0] sm:$0xff]  ;;  %v6837_v50 = vld [vmem:[%s22137_s0 + $0x10] sm:$0xff]  ;;  %v22254_v21 = vmov 0.0  }
 0x9de   :  { %6891 = vst [vmem:[#allocation2 + $0x30] sm:$0xff] %v6866_v29  ;;  %v6878_v9 = vadd.f32 %v6853_v53, %v6828_v0  ;;  %6892 = vst [vmem:[#allocation2 + $0x38] sm:$0xff] %v6867_v56  ;;  %v6879_v14 = vadd.f32 %v6854_v57, %v6829_v58  ;;  %v6880_v30 = vadd.f32 %v6855_v43, %v6830_v51  ;;  %v22251_v7 = vld [vmem:[#allocation7_spill] sm:$0xff]  ;;  %v22252_v58 = vmov 0.0|0.0   ;;  %v7819_v51 = vld [vmem:[%s22136_s1 + $0x1f0] sm:$0xff] }
 0x9df   :  { %6893 = vst [vmem:[#allocation2 + $0x40] sm:$0xff] %v6868_v8  ;;  %6894 = vst [vmem:[#allocation2 + $0x48] sm:$0xff] %v6869_v3  ;;  %v6881_v54 = vadd.f32 %v6856_v39, %v6831_v61  ;;  %v6882_v36 = vadd.f32 %v6857_v16, %v6832_v41  ;;  %v6883_v10 = vadd.f32 %v6858_v17, %v6833_v13  ;;  %v7820_v61 = vld [vmem:[%s22136_s1 + $0x1f8] sm:$0xff]  ;;  %v15434_v59 = vld [vmem:[%s22140_s5] sm:$0xff] }
 0x9e0   :  { %6895 = vst [vmem:[#allocation2 + $0x50] sm:$0xff] %v6870_v4  ;;  %6896 = vst [vmem:[#allocation2 + $0x58] sm:$0xff] %v6871_v37  ;;  %v6884_v2 = vadd.f32 %v6859_v63, %v6834_v46  ;;  %v6885_v32 = vadd.f32 %v6860_v11, %v6835_v44  ;;  %v6730_v47 = vmul.f32 %v22250_v6, %v22249_v35  ;;  %v6861_v31 = vld [vmem:[%s22137_s0 + $0xd0] sm:$0xff] }
 0x9e1   :  { %6897 = vst [vmem:[#allocation2 + $0x60] sm:$0xff] %v6872_v5  ;;  %6898 = vst [vmem:[#allocation2 + $0x68] sm:$0xff] %v6873_v24  ;;  %v15192_v60 = vpack.c.bf16 %v7514_v23, %v7513_v42  ;;  %v15210_v34 = vpack.c.bf16 %v7816_v45, %v7815_v49  ;;  %v6754_v48 = vmul.f32 %v22250_v6, %v22251_v7 }
 0x9e2   :  { %6899 = vst [vmem:[#allocation2 + $0x70] sm:$0xff] %v6874_v27  ;;  %6900 = vst [vmem:[#allocation2 + $0x78] sm:$0xff] %v6875_v18  ;;  %v6762_v20 = vadd.f32 %v20208_v40, %v6730_v47  ;;  %v15213_v12 = vpack.c.bf16 %v7818_v28, %v7817_v55  ;;  %v15216_v13 = vpack.c.bf16 %v7820_v61, %v7819_v51  ;;  %v8417_v61 = vld [vmem:[%s22136_s1 + $0x280] sm:$0xff] }
 0x9e3   :  { %6901 = vst [vmem:[#allocation2 + $0x80] sm:$0xff] %v6876_v15  ;;  %6902 = vst [vmem:[#allocation2 + $0x88] sm:$0xff] %v6877_v22  ;;  %15193 = vmatpush3.bf16.msra.mxu0 %v15192_v60  ;;  %15211 = vmatpush3.bf16.msra.mxu1 %v15210_v34  ;;  %v6786_v52 = vadd.f32 %v20208_v40, %v6754_v48  ;;  %v22253_v40 = vld [vmem:[#allocation14_spill] sm:$0xff]  ;;  %v8111_v48 = vld [vmem:[%s22136_s1 + $0x200] sm:$0xff] }
 0x9e4   :  { %6903 = vst [vmem:[#allocation2 + $0x90] sm:$0xff] %v6878_v9  ;;  %6904 = vst [vmem:[#allocation2 + $0x98] sm:$0xff] %v6879_v14  ;;  %v6787_v0 = vmax.f32 %v6762_v20, 0.0  ;;  %15212 = vmatprep.subr.bf16.mxu1 %v22252_v58  ;;  %15218 = vmatprep.subr.bf16.mxu0 %v22252_v58  ;;  %v6915_v43 = vld [vmem:[#allocation2 + $0x1d] sm:$0xff]  ;;  %v6916_v1 = vld [vmem:[#allocation2 + $0x25] sm:$0xff] }
 0x9e5   :  { %6905 = vst [vmem:[#allocation2 + $0xa0] sm:$0xff] %v6880_v30  ;;  %6906 = vst [vmem:[#allocation2 + $0xa8] sm:$0xff] %v6881_v54  ;;  %v6811_v25 = vmax.f32 %v6786_v52, 0.0  ;;  %v7171_v33 = vld [vmem:[#allocation2 + $0x1e] sm:$0xff]  ;;  %v7172_v26 = vld [vmem:[#allocation2 + $0x26] sm:$0xff] }
 0x9e6   :  { %6907 = vst [vmem:[#allocation2 + $0xb0] sm:$0xff] %v6882_v36  ;;  %6908 = vst [vmem:[#allocation2 + $0xb8] sm:$0xff] %v6883_v10  ;;  %v6812_v41 = vmul.f32 %v15434_v59, %v6787_v0  ;;  %v6917_v29 = vld [vmem:[#allocation2 + $0x2d] sm:$0xff]  ;;  %v6918_v16 = vld [vmem:[#allocation2 + $0x35] sm:$0xff] }
 0x9e7   :  { %6909 = vst [vmem:[#allocation2 + $0xc0] sm:$0xff] %v6884_v2  ;;  %6910 = vst [vmem:[#allocation2 + $0xc8] sm:$0xff] %v6885_v32  ;;  %15214 = vmatpush3.bf16.msra.mxu1 %v15213_v12  ;;  %v6836_v62 = vmul.f32 %v6811_v25, %v22253_v40  ;;  %v7173_v39 = vld [vmem:[#allocation2 + $0x2e] sm:$0xff]  ;;  %v7174_v17 = vld [vmem:[#allocation2 + $0x36] sm:$0xff] }
 0x9e8   :  { %v20366_v46 = vadd.f32 %v6837_v50, %v6812_v41  ;;  %15215 = vmatprep.subr.bf16.mxu1 %v22252_v58  ;;  %v6919_v56 = vld [vmem:[#allocation2 + $0x3d] sm:$0xff]  ;;  %v6920_v3 = vld [vmem:[#allocation2 + $0x45] sm:$0xff]  ;;  %v6921_v63 = vld [vmem:[#allocation2 + $0x4d] sm:$0xff] }
 0x9e9   :  { %v6886_v44 = vadd.f32 %v6861_v31, %v6836_v62  ;;  %v7175_v8 = vld [vmem:[#allocation2 + $0x3e] sm:$0xff]  ;;  %v7176_v4 = vld [vmem:[#allocation2 + $0x46] sm:$0xff]  ;;  %v7177_v11 = vld [vmem:[#allocation2 + $0x4e] sm:$0xff] }
 0x9ea   :  { %6887 = vst [vmem:[#allocation2 + $0x10] sm:$0xff] %v20366_v46  ;;  %v6922_v37 = vld [vmem:[#allocation2 + $0x55] sm:$0xff]  ;;  %v6923_v24 = vld [vmem:[#allocation2 + $0x5d] sm:$0xff]  ;;  %v6924_v42 = vld [vmem:[#allocation2 + $0x65] sm:$0xff] }
 0x9eb   :  { %15217 = vmatpush3.bf16.msra.mxu1 %v15216_v13  ;;  %6911 = vst [vmem:[#allocation2 + $0xd0] sm:$0xff] %v6886_v44  ;;  %v7178_v5 = vld [vmem:[#allocation2 + $0x56] sm:$0xff]  ;;  %v7179_v27 = vld [vmem:[#allocation2 + $0x5e] sm:$0xff]  ;;  %v7180_v18 = vld [vmem:[#allocation2 + $0x66] sm:$0xff] }
 0x9ec   :  { %15242 = vmatprep.subr.bf16.mxu1 %v22252_v58  ;;  %v6925_v15 = vld [vmem:[#allocation2 + $0x6d] sm:$0xff]  ;;  %v6926_v9 = vld [vmem:[#allocation2 + $0x75] sm:$0xff]  ;;  %v6927_v49 = vld [vmem:[#allocation2 + $0x7d] sm:$0xff] }
 0x9ed   :  { %v7181_v22 = vld [vmem:[#allocation2 + $0x6e] sm:$0xff]  ;;  %v7182_v23 = vld [vmem:[#allocation2 + $0x76] sm:$0xff]  ;;  %v7183_v45 = vld [vmem:[#allocation2 + $0x7e] sm:$0xff] }
 0x9ee   :  { %v6928_v14 = vld [vmem:[#allocation2 + $0x85] sm:$0xff]  ;;  %v6929_v54 = vld [vmem:[#allocation2 + $0x8d] sm:$0xff]  ;;  %v6930_v10 = vld [vmem:[#allocation2 + $0x95] sm:$0xff] }
 0x9ef   :  { %v7184_v30 = vld [vmem:[#allocation2 + $0x86] sm:$0xff]  ;;  %v7185_v36 = vld [vmem:[#allocation2 + $0x8e] sm:$0xff]  ;;  %v7186_v2 = vld [vmem:[#allocation2 + $0x96] sm:$0xff] }
 0x9f0   :  { %v6931_v32 = vld [vmem:[#allocation2 + $0x9d] sm:$0xff]  ;;  %v6932_v6 = vld [vmem:[#allocation2 + $0xa5] sm:$0xff]  ;;  %v6933_v55 = vld [vmem:[#allocation2 + $0xad] sm:$0xff] }
 0x9f1   :  { %v6913_v38 = vld [vmem:[#allocation2 + $0xd] sm:$0xff]  ;;  %v6914_v53 = vld [vmem:[#allocation2 + $0x15] sm:$0xff]  ;;  %v7187_v35 = vld [vmem:[#allocation2 + $0x9e] sm:$0xff] }
 0x9f2   :  { %v7169_v19 = vld [vmem:[#allocation2 + $0xe] sm:$0xff]  ;;  %13597 = vmatmul.mubr.f32.gmra.mrb[184].mxu0 %v6913_v38  ;;  %v7170_v57 = vld [vmem:[#allocation2 + $0x16] sm:$0xff]  ;;  %v7188_v47 = vld [vmem:[#allocation2 + $0xa6] sm:$0xff] }
 0x9f3   :  { %13704 = vmatmul.mubr.f32.gmra.mrb[216].mxu1 %v7169_v19  ;;  %13599 = vmatprep.mubr.msk.f32.mxu0 %vm15438_vm0, %v22254_v21  ;;  %v7189_v28 = vld [vmem:[#allocation2 + $0xae] sm:$0xff]  ;;  %v7190_v34 = vld [vmem:[#allocation2 + $0xb6] sm:$0xff]  ;;  %v7191_v7 = vld [vmem:[#allocation2 + $0xbe] sm:$0xff] }
 0x9f4   :  { %13706 = vmatprep.mubr.msk.f32.mxu1 %vm15438_vm0, %v22254_v21  ;;  %v6934_v60 = vld [vmem:[#allocation2 + $0xb5] sm:$0xff]  ;;  %v6935_v20 = vld [vmem:[#allocation2 + $0xbd] sm:$0xff]  ;;  %v8112_v12 = vld [vmem:[%s22136_s1 + $0x208] sm:$0xff] }
 0x9f5   :  { %v6936_v0 = vld [vmem:[#allocation2 + $0xc5] sm:$0xff]  ;;  %v15219_v59 = vpack.c.bf16 %v8112_v12, %v8111_v48  ;;  %v7780_v41 = vld [vmem:[#allocation2 + $0xf] sm:$0xff]  ;;  %v8114_v13 = vld [vmem:[%s22136_s1 + $0x218] sm:$0xff] }
 0x9f6   :  { %13600 = vmatmul.mubr.f32.gmra.mrb[186].mxu0 %v6914_v53  ;;  %v7192_v51 = vld [vmem:[#allocation2 + $0xc6] sm:$0xff]  ;;  %v8113_v25 = vld [vmem:[%s22136_s1 + $0x210] sm:$0xff]  ;;  %v8420_v62 = vld [vmem:[%s22136_s1 + $0x298] sm:$0xff] }
 0x9f7   :  { %13707 = vmatmul.mubr.f32.gmra.mrb[218].mxu1 %v7170_v57  ;;  %13602 = vmatprep.mubr.msk.f32.mxu0 %vm15438_vm0, %v22254_v21  ;;  %v8418_v52 = vld [vmem:[%s22136_s1 + $0x288] sm:$0xff]  ;;  %v8419_v40 = vld [vmem:[%s22136_s1 + $0x290] sm:$0xff]  ;;  %v15222_v44 = vpack.c.bf16 %v8114_v13, %v8113_v25  ;;  %v8115_v19 = vld [vmem:[%s22136_s1 + $0x220] sm:$0xff] }
 0x9f8   :  { %13709 = vmatprep.mubr.msk.f32.mxu1 %vm15438_vm0, %v22254_v21  ;;  %v7474_v50 = vld [vmem:[#allocation2 + $0x7] sm:$0xff]  ;;  %v15243_v31 = vpack.c.bf16 %v8418_v52, %v8417_v61  ;;  %v7781_v38 = vld [vmem:[#allocation2 + $0x17] sm:$0xff]  ;;  %v15246_v57 = vpack.c.bf16 %v8420_v62, %v8419_v40  ;;  %v7790_v52 = vld [vmem:[#allocation2 + $0x5f] sm:$0xff] }
 0x9f9   :  { %v8116_v53 = vld [vmem:[%s22136_s1 + $0x228] sm:$0xff]  ;;  %v7789_v61 = vld [vmem:[#allocation2 + $0x57] sm:$0xff]  ;;  %v7794_v25 = vld [vmem:[#allocation2 + $0x7f] sm:$0xff] }
 0x9fa   :  { %13603 = vmatmul.mubr.f32.gmra.mrb[188].mxu0 %v6915_v43  ;;  %v8421_v43 = vld [vmem:[%s22136_s1 + $0x2a0] sm:$0xff]  ;;  %v7797_v40 = vld [vmem:[#allocation2 + $0x97] sm:$0xff] }
 0x9fb   :  { %13710 = vmatmul.mubr.f32.gmra.mrb[220].mxu1 %v7171_v33  ;;  %13605 = vmatprep.mubr.msk.f32.mxu0 %vm15438_vm0, %v22254_v21  ;;  %v8422_v33 = vld [vmem:[%s22136_s1 + $0x2a8] sm:$0xff]  ;;  %v7798_v62 = vld [vmem:[#allocation2 + $0x9f] sm:$0xff] }
 0x9fc   :  { %13712 = vmatprep.mubr.msk.f32.mxu1 %vm15438_vm0, %v22254_v21  ;;  %v7787_v12 = vld [vmem:[#allocation2 + $0x47] sm:$0xff] }
 0x9fd   :  { %v7795_v13 = vld [vmem:[#allocation2 + $0x87] sm:$0xff] }
 0x9fe   :  { %13606 = vmatmul.mubr.f32.gmra.mrb[190].mxu0 %v6916_v1  ;;  %v7019_v1 = vpop.f32.mrb[182].mxu0 }
 0x9ff   :  { %13713 = vmatmul.mubr.f32.gmra.mrb[222].mxu1 %v7172_v26  ;;  %13608 = vmatprep.mubr.msk.f32.mxu0 %vm15438_vm0, %v22254_v21  ;;  %v15225_v26 = vpack.c.bf16 %v8116_v53, %v8115_v19  ;;  %v7801_v19 = vld [vmem:[#allocation2 + $0xb7] sm:$0xff]  ;;  %v7802_v53 = vld [vmem:[#allocation2 + $0xbf] sm:$0xff] }
 0xa00   :  { %13715 = vmatprep.mubr.msk.f32.mxu1 %vm15438_vm0, %v22254_v21 }
 0xa02   :  { %13609 = vmatmul.mubr.f32.gmra.mrb[192].mxu0 %v6917_v29  ;;  %v13595_v29 = vpop.f32.mrb[183].mxu0 }
 0xa03   :  { %13716 = vmatmul.mubr.f32.gmra.mrb[224].mxu1 %v7173_v39  ;;  %13611 = vmatprep.mubr.msk.f32.mxu0 %vm15438_vm0, %v22254_v21  ;;  %v7275_v39 = vpop.f32.mrb[214].mxu1  ;;  %v9030_v29 = vld [vmem:[%s22136_s1 + $0x388] sm:$0xff] }
 0xa04   :  { %13718 = vmatprep.mubr.msk.f32.mxu1 %vm15438_vm0, %v22254_v21 }
 0xa06   :  { %13612 = vmatmul.mubr.f32.gmra.mrb[194].mxu0 %v6918_v16  ;;  %v7782_v16 = vld [vmem:[#allocation2 + $0x1f] sm:$0xff] }
 0xa07   :  { %13719 = vmatmul.mubr.f32.gmra.mrb[226].mxu1 %v7174_v17  ;;  %13614 = vmatprep.mubr.msk.f32.mxu0 %vm15438_vm0, %v22254_v21  ;;  %v8117_v17 = vld [vmem:[%s22136_s1 + $0x230] sm:$0xff] }
 0xa08   :  { %13721 = vmatprep.mubr.msk.f32.mxu1 %vm15438_vm0, %v22254_v21 }
 0xa0a   :  { %13615 = vmatmul.mubr.f32.gmra.mrb[196].mxu0 %v6919_v56  ;;  %v8118_v56 = vld [vmem:[%s22136_s1 + $0x238] sm:$0xff] }
 0xa0b   :  { %13722 = vmatmul.mubr.f32.gmra.mrb[228].mxu1 %v7175_v8  ;;  %13617 = vmatprep.mubr.msk.f32.mxu0 %vm15438_vm0, %v22254_v21  ;;  %v15249_v8 = vpack.c.bf16 %v8422_v33, %v8421_v43  ;;  %v8723_v43 = vld [vmem:[%s22136_s1 + $0x300] sm:$0xff]  ;;  %v8724_v33 = vld [vmem:[%s22136_s1 + $0x308] sm:$0xff] }
 0xa0c   :  { %13724 = vmatprep.mubr.msk.f32.mxu1 %vm15438_vm0, %v22254_v21 }
 0xa0e   :  { %13618 = vmatmul.mubr.f32.gmra.mrb[198].mxu0 %v6920_v3  ;;  %v20521_v3 = vadd.f32 %v7275_v39, %v7019_v1  ;;  %v7804_v1 = vld [vmem:[#allocation2 + $0xcf] sm:$0xff]  ;;  %v15267_v39 = vpack.c.bf16 %v8724_v33, %v8723_v43  ;;  %v8092_v33 = vld [vmem:[#allocation2 + $0x40] sm:$0xff] }
 0xa0f   :  { %13725 = vmatmul.mubr.f32.gmra.mrb[230].mxu1 %v7176_v4  ;;  %13620 = vmatprep.mubr.msk.f32.mxu0 %vm15438_vm0, %v22254_v21  ;;  %v13702_v4 = vpop.f32.mrb[215].mxu1  ;;  %v9042_v43 = vld [vmem:[%s22136_s1 + $0x3e8] sm:$0xff] }
 0xa10   :  { %13727 = vmatprep.mubr.msk.f32.mxu1 %vm15438_vm0, %v22254_v21  ;;  %v9031_v4 = vld [vmem:[%s22136_s1 + $0x390] sm:$0xff] }
 0xa12   :  { %13621 = vmatmul.mubr.f32.gmra.mrb[200].mxu0 %v6921_v63  ;;  %v8423_v63 = vld [vmem:[%s22136_s1 + $0x2b0] sm:$0xff] }
 0xa13   :  { %13728 = vmatmul.mubr.f32.gmra.mrb[232].mxu1 %v7177_v11  ;;  %13623 = vmatprep.mubr.msk.f32.mxu0 %vm15438_vm0, %v22254_v21  ;;  %v8424_v11 = vld [vmem:[%s22136_s1 + $0x2b8] sm:$0xff] }
 0xa14   :  { %13730 = vmatprep.mubr.msk.f32.mxu1 %vm15438_vm0, %v22254_v21 }
 0xa16   :  { %13624 = vmatmul.mubr.f32.gmra.mrb[202].mxu0 %v6922_v37  ;;  %v15228_v37 = vpack.c.bf16 %v8118_v56, %v8117_v17  ;;  %v8725_v17 = vld [vmem:[%s22136_s1 + $0x310] sm:$0xff]  ;;  %v8726_v56 = vld [vmem:[%s22136_s1 + $0x318] sm:$0xff] }
 0xa17   :  { %13731 = vmatmul.mubr.f32.gmra.mrb[234].mxu1 %v7178_v5  ;;  %13626 = vmatprep.mubr.msk.f32.mxu0 %vm15438_vm0, %v22254_v21  ;;  %v7783_v5 = vld [vmem:[#allocation2 + $0x27] sm:$0xff] }
 0xa18   :  { %13733 = vmatprep.mubr.msk.f32.mxu1 %vm15438_vm0, %v22254_v21 }
 0xa1a   :  { %13627 = vmatmul.mubr.f32.gmra.mrb[204].mxu0 %v6923_v24  ;;  %v8119_v24 = vld [vmem:[%s22136_s1 + $0x240] sm:$0xff] }
 0xa1b   :  { %13734 = vmatmul.mubr.f32.gmra.mrb[236].mxu1 %v7179_v27  ;;  %13629 = vmatprep.mubr.msk.f32.mxu0 %vm15438_vm0, %v22254_v21  ;;  %v8120_v27 = vld [vmem:[%s22136_s1 + $0x248] sm:$0xff] }
 0xa1c   :  { %13736 = vmatprep.mubr.msk.f32.mxu1 %vm15438_vm0, %v22254_v21 }
 0xa1e   :  { %13630 = vmatmul.mubr.f32.gmra.mrb[206].mxu0 %v6924_v42  ;;  %v15252_v42 = vpack.c.bf16 %v8424_v11, %v8423_v63  ;;  %v9032_v63 = vld [vmem:[%s22136_s1 + $0x398] sm:$0xff] }
 0xa1f   :  { %13737 = vmatmul.mubr.f32.gmra.mrb[238].mxu1 %v7180_v18  ;;  %13632 = vmatprep.mubr.msk.f32.mxu0 %vm15438_vm0, %v22254_v21  ;;  %v8425_v18 = vld [vmem:[%s22136_s1 + $0x2c0] sm:$0xff]  ;;  %v8087_v11 = vld [vmem:[#allocation2 + $0x18] sm:$0xff] }
 0xa20   :  { %13739 = vmatprep.mubr.msk.f32.mxu1 %vm15438_vm0, %v22254_v21 }
 0xa22   :  { %13633 = vmatmul.mubr.f32.gmra.mrb[208].mxu0 %v6925_v15  ;;  %v8426_v15 = vld [vmem:[%s22136_s1 + $0x2c8] sm:$0xff] }
 0xa23   :  { %13740 = vmatmul.mubr.f32.gmra.mrb[240].mxu1 %v7181_v22  ;;  %13635 = vmatprep.mubr.msk.f32.mxu0 %vm15438_vm0, %v22254_v21  ;;  %v15231_v22 = vpack.c.bf16 %v8120_v27, %v8119_v24  ;;  %v8728_v24 = vld [vmem:[%s22136_s1 + $0x328] sm:$0xff]  ;;  %v15294_v27 = vpack.c.bf16 %v9032_v63, %v9031_v4 }
 0xa24   :  { %13742 = vmatprep.mubr.msk.f32.mxu1 %vm15438_vm0, %v22254_v21 }
 0xa26   :  { %13636 = vmatmul.mubr.f32.gmra.mrb[210].mxu0 %v6926_v9  ;;  %v7784_v9 = vld [vmem:[#allocation2 + $0x2f] sm:$0xff] }
 0xa27   :  { %13743 = vmatmul.mubr.f32.gmra.mrb[242].mxu1 %v7182_v23  ;;  %13638 = vmatprep.mubr.msk.f32.mxu0 %vm15438_vm0, %v22254_v21  ;;  %v8121_v23 = vld [vmem:[%s22136_s1 + $0x250] sm:$0xff] }
 0xa28   :  { %13745 = vmatprep.mubr.msk.f32.mxu1 %vm15438_vm0, %v22254_v21 }
 0xa2a   :  { %13639 = vmatmul.mubr.f32.gmra.mrb[212].mxu0 %v6927_v49  ;;  %v8122_v49 = vld [vmem:[%s22136_s1 + $0x258] sm:$0xff] }
 0xa2b   :  { %13746 = vmatmul.mubr.f32.gmra.mrb[244].mxu1 %v7183_v45  ;;  %13641 = vmatprep.mubr.msk.f32.mxu0 %vm15438_vm0, %v22254_v21  ;;  %v15255_v45 = vpack.c.bf16 %v8426_v15, %v8425_v18  ;;  %v9034_v18 = vld [vmem:[%s22136_s1 + $0x3a8] sm:$0xff]  ;;  %v8088_v15 = vld [vmem:[#allocation2 + $0x20] sm:$0xff] }
 0xa2c   :  { %13748 = vmatprep.mubr.msk.f32.mxu1 %vm15438_vm0, %v22254_v21 }
 0xa2e   :  { %13642 = vmatmul.mubr.f32.gmra.mrb[214].mxu0 %v6928_v14  ;;  %v8427_v14 = vld [vmem:[%s22136_s1 + $0x2d0] sm:$0xff] }
 0xa2f   :  { %13749 = vmatmul.mubr.f32.gmra.mrb[246].mxu1 %v7184_v30  ;;  %13644 = vmatprep.mubr.msk.f32.mxu0 %vm15438_vm0, %v22254_v21  ;;  %v8428_v30 = vld [vmem:[%s22136_s1 + $0x2d8] sm:$0xff] }
 0xa30   :  { %13751 = vmatprep.mubr.msk.f32.mxu1 %vm15438_vm0, %v22254_v21 }
 0xa32   :  { %13645 = vmatmul.mubr.f32.gmra.mrb[216].mxu0 %v6929_v54  ;;  %v15234_v54 = vpack.c.bf16 %v8122_v49, %v8121_v23  ;;  %v8729_v23 = vld [vmem:[%s22136_s1 + $0x330] sm:$0xff]  ;;  %v8730_v49 = vld [vmem:[%s22136_s1 + $0x338] sm:$0xff] }
 0xa33   :  { %13752 = vmatmul.mubr.f32.gmra.mrb[248].mxu1 %v7185_v36  ;;  %13647 = vmatprep.mubr.msk.f32.mxu0 %vm15438_vm0, %v22254_v21  ;;  %v7785_v36 = vld [vmem:[#allocation2 + $0x37] sm:$0xff] }
 0xa34   :  { %13754 = vmatprep.mubr.msk.f32.mxu1 %vm15438_vm0, %v22254_v21 }
 0xa36   :  { %13648 = vmatmul.mubr.f32.gmra.mrb[218].mxu0 %v6930_v10  ;;  %v8123_v10 = vld [vmem:[%s22136_s1 + $0x260] sm:$0xff] }
 0xa37   :  { %13755 = vmatmul.mubr.f32.gmra.mrb[250].mxu1 %v7186_v2  ;;  %13650 = vmatprep.mubr.msk.f32.mxu0 %vm15438_vm0, %v22254_v21  ;;  %v8124_v2 = vld [vmem:[%s22136_s1 + $0x268] sm:$0xff] }
 0xa38   :  { %13757 = vmatprep.mubr.msk.f32.mxu1 %vm15438_vm0, %v22254_v21 }
 0xa3a   :  { %13651 = vmatmul.mubr.f32.gmra.mrb[220].mxu0 %v6931_v32  ;;  %v15258_v32 = vpack.c.bf16 %v8428_v30, %v8427_v14  ;;  %v9035_v14 = vld [vmem:[%s22136_s1 + $0x3b0] sm:$0xff]  ;;  %v9036_v30 = vld [vmem:[%s22136_s1 + $0x3b8] sm:$0xff] }
 0xa3b   :  { %13758 = vmatmul.mubr.f32.gmra.mrb[252].mxu1 %v7187_v35  ;;  %13653 = vmatprep.mubr.msk.f32.mxu0 %vm15438_vm0, %v22254_v21  ;;  %v8429_v35 = vld [vmem:[%s22136_s1 + $0x2e0] sm:$0xff] }
 0xa3c   :  { %13760 = vmatprep.mubr.msk.f32.mxu1 %vm15438_vm0, %v22254_v21 }
 0xa3e   :  { %13654 = vmatmul.mubr.f32.gmra.mrb[222].mxu0 %v6932_v6  ;;  %v8430_v6 = vld [vmem:[%s22136_s1 + $0x2e8] sm:$0xff] }
 0xa3f   :  { %13761 = vmatmul.mubr.f32.gmra.mrb[254].mxu1 %v7188_v47  ;;  %13656 = vmatprep.mubr.msk.f32.mxu0 %vm15438_vm0, %v22254_v21  ;;  %v15237_v47 = vpack.c.bf16 %v8124_v2, %v8123_v10  ;;  %v20753_v10 = vld [vmem:[#allocation2 + $0x29] sm:$0xff]  ;;  %v8731_v2 = vld [vmem:[%s22136_s1 + $0x340] sm:$0xff] }
 0xa40   :  { %13763 = vmatprep.mubr.msk.f32.mxu1 %vm15438_vm0, %v22254_v21 }
 0xa42   :  { %13657 = vmatmul.mubr.f32.gmra.mrb[224].mxu0 %v6933_v55  ;;  %v7786_v55 = vld [vmem:[#allocation2 + $0x3f] sm:$0xff] }
 0xa43   :  { %13764 = vmatmul.mubr.f32.gmra.mrb[0].mxu1 %v7189_v28  ;;  %13659 = vmatprep.mubr.msk.f32.mxu0 %vm15438_vm0, %v22254_v21  ;;  %v8125_v28 = vld [vmem:[%s22136_s1 + $0x270] sm:$0xff] }
 0xa44   :  { %13766 = vmatprep.mubr.msk.f32.mxu1 %vm15438_vm0, %v22254_v21 }
 0xa46   :  { %13660 = vmatmul.mubr.f32.gmra.mrb[226].mxu0 %v6934_v60  ;;  %v8126_v60 = vld [vmem:[%s22136_s1 + $0x278] sm:$0xff] }
 0xa47   :  { %13767 = vmatmul.mubr.f32.gmra.mrb[2].mxu1 %v7190_v34  ;;  %13662 = vmatprep.mubr.msk.f32.mxu0 %vm15438_vm0, %v22254_v21  ;;  %v15261_v34 = vpack.c.bf16 %v8430_v6, %v8429_v35  ;;  %v15240_v48 = vpack.c.bf16 %v8126_v60, %v8125_v28  ;;  %v15300_v35 = vpack.c.bf16 %v9036_v30, %v9035_v14  ;;  %v9037_v6 = vld [vmem:[%s22136_s1 + $0x3c0] sm:$0xff]  ;;  %v8094_v30 = vld [vmem:[#allocation2 + $0x50] sm:$0xff] }
 0xa48   :  { %13769 = vmatprep.mubr.msk.f32.mxu1 %vm15438_vm0, %v22254_v21 }
 0xa4a   :  { %13663 = vmatmul.mubr.f32.gmra.mrb[228].mxu0 %v6935_v20  ;;  %v8431_v20 = vld [vmem:[%s22136_s1 + $0x2f0] sm:$0xff] }
 0xa4b   :  { %13770 = vmatmul.mubr.f32.gmra.mrb[4].mxu1 %v7191_v7  ;;  %13665 = vmatprep.mubr.msk.f32.mxu0 %vm15438_vm0, %v22254_v21  ;;  %v8432_v7 = vld [vmem:[%s22136_s1 + $0x2f8] sm:$0xff] }
 0xa4c   :  { %13772 = vmatprep.mubr.msk.f32.mxu1 %vm15438_vm0, %v22254_v21 }
 0xa4e   :  { %13666 = vmatmul.mubr.f32.gmra.mrb[230].mxu0 %v6936_v0  ;;  %v15264_v0 = vpack.c.bf16 %v8432_v7, %v8431_v20  ;;  %v20774_v20 = vld [vmem:[#allocation2 + $0x31] sm:$0xff] }
 0xa4f   :  { %13773 = vmatmul.mubr.f32.gmra.mrb[6].mxu1 %v7192_v51  ;;  %13807 = vmatprep.mubr.msk.f32.mxu0 %vm15438_vm0, %v22254_v21  ;;  %v7788_v51 = vld [vmem:[#allocation2 + $0x4f] sm:$0xff] }
 0xa50   :  { %13914 = vmatprep.mubr.msk.f32.mxu1 %vm15438_vm0, %v22254_v21  ;;  %v8733_v7 = vld [vmem:[%s22136_s1 + $0x350] sm:$0xff] }
 0xa52   :  { %13808 = vmatmul.mubr.f32.vlgmr.msra.gmra.mrb[232].mxu0 %v7474_v50  ;;  %v7791_v50 = vld [vmem:[#allocation2 + $0x67] sm:$0xff] }
 0xa53   :  { %13915 = vmatmul.mubr.f32.vlgmr.msra.gmra.mrb[8].mxu1 %v7780_v41  ;;  %15220 = vmatpush3.bf16.msra.mxu0 %v15219_v59  ;;  %v7792_v59 = vld [vmem:[#allocation2 + $0x6f] sm:$0xff] }
 0xa54   :  { %13810 = vmatprep.mubr.msk.f32.mxu0 %vm15438_vm0, %v22254_v21  ;;  %13917 = vmatprep.mubr.msk.f32.mxu1 %vm15438_vm0, %v22254_v21 }
 0xa55   :  { %15221 = vmatprep.subr.bf16.mxu0 %v22252_v58  ;;  %15244 = vmatpush3.bf16.msra.mxu1 %v15243_v31  ;;  %v7796_v31 = vld [vmem:[#allocation2 + $0x8f] sm:$0xff] }
 0xa56   :  { %13811 = vmatmul.mubr.f32.gmra.mrb[234].mxu0 %v7780_v41  ;;  %15245 = vmatprep.subr.bf16.mxu1 %v22252_v58  ;;  %v7793_v41 = vld [vmem:[#allocation2 + $0x77] sm:$0xff] }
 0xa57   :  { %13918 = vmatmul.mubr.f32.gmra.mrb[10].mxu1 %v7781_v38  ;;  %13813 = vmatprep.mubr.msk.f32.mxu0 %vm15438_vm0, %v22254_v21 }
 0xa58   :  { %13920 = vmatprep.mubr.msk.f32.mxu1 %vm15438_vm0, %v22254_v21  ;;  %15223 = vmatpush3.bf16.msra.mxu0 %v15222_v44  ;;  %v7799_v44 = vld [vmem:[#allocation2 + $0xa7] sm:$0xff] }
 0xa59   :  { %15224 = vmatprep.subr.bf16.mxu0 %v22252_v58  ;;  %15247 = vmatpush3.bf16.msra.mxu1 %v15246_v57  ;;  %v7803_v57 = vld [vmem:[#allocation2 + $0xc7] sm:$0xff] }
 0xa5a   :  { %13814 = vmatmul.mubr.f32.gmra.mrb[236].mxu0 %v7781_v38  ;;  %15248 = vmatprep.subr.bf16.mxu1 %v22252_v58  ;;  %v7800_v38 = vld [vmem:[#allocation2 + $0xaf] sm:$0xff] }
 0xa5b   :  { %13921 = vmatmul.mubr.f32.gmra.mrb[12].mxu1 %v7782_v16  ;;  %13816 = vmatprep.mubr.msk.f32.mxu0 %vm15438_vm0, %v22254_v21 }
 0xa5c   :  { %13923 = vmatprep.mubr.msk.f32.mxu1 %vm15438_vm0, %v22254_v21  ;;  %15226 = vmatpush3.bf16.msra.mxu0 %v15225_v26  ;;  %v9029_v26 = vld [vmem:[%s22136_s1 + $0x380] sm:$0xff] }
 0xa5d   :  { %15227 = vmatprep.subr.bf16.mxu0 %v22252_v58  ;;  %15250 = vmatpush3.bf16.msra.mxu1 %v15249_v8  ;;  %v15291_v8 = vpack.c.bf16 %v9030_v29, %v9029_v26 }
 0xa5e   :  { %13817 = vmatmul.mubr.f32.gmra.mrb[238].mxu0 %v7782_v16  ;;  %15251 = vmatprep.subr.bf16.mxu1 %v22252_v58  ;;  %v8392_v16 = vld [vmem:[#allocation2 + $0x11] sm:$0xff] }
 0xa5f   :  { %13924 = vmatmul.mubr.f32.gmra.mrb[14].mxu1 %v7783_v5  ;;  %13819 = vmatprep.mubr.msk.f32.mxu0 %vm15438_vm0, %v22254_v21 }
 0xa60   :  { %13926 = vmatprep.mubr.msk.f32.mxu1 %vm15438_vm0, %v22254_v21  ;;  %15229 = vmatpush3.bf16.msra.mxu0 %v15228_v37  ;;  %v20712_v37 = vld [vmem:[#allocation2 + $0x19] sm:$0xff] }
 0xa61   :  { %15230 = vmatprep.subr.bf16.mxu0 %v22252_v58  ;;  %15253 = vmatpush3.bf16.msra.mxu1 %v15252_v42  ;;  %v9033_v42 = vld [vmem:[%s22136_s1 + $0x3a0] sm:$0xff] }
 0xa62   :  { %13820 = vmatmul.mubr.f32.gmra.mrb[240].mxu0 %v7783_v5  ;;  %15254 = vmatprep.subr.bf16.mxu1 %v22252_v58  ;;  %v8727_v5 = vld [vmem:[%s22136_s1 + $0x320] sm:$0xff] }
 0xa63   :  { %13927 = vmatmul.mubr.f32.gmra.mrb[16].mxu1 %v7784_v9  ;;  %13822 = vmatprep.mubr.msk.f32.mxu0 %vm15438_vm0, %v22254_v21 }
 0xa64   :  { %13929 = vmatprep.mubr.msk.f32.mxu1 %vm15438_vm0, %v22254_v21  ;;  %15232 = vmatpush3.bf16.msra.mxu0 %v15231_v22  ;;  %v15273_v22 = vpack.c.bf16 %v8728_v24, %v8727_v5 }
 0xa65   :  { %15233 = vmatprep.subr.bf16.mxu0 %v22252_v58  ;;  %15256 = vmatpush3.bf16.msra.mxu1 %v15255_v45  ;;  %v15297_v45 = vpack.c.bf16 %v9034_v18, %v9033_v42  ;;  %v8093_v42 = vld [vmem:[#allocation2 + $0x48] sm:$0xff] }
 0xa66   :  { %13823 = vmatmul.mubr.f32.gmra.mrb[242].mxu0 %v7784_v9  ;;  %15257 = vmatprep.subr.bf16.mxu1 %v22252_v58  ;;  %v20732_v9 = vld [vmem:[#allocation2 + $0x21] sm:$0xff]  ;;  %v20843_v18 = vld [vmem:[#allocation2 + $0x49] sm:$0xff] }
 0xa67   :  { %13930 = vmatmul.mubr.f32.gmra.mrb[18].mxu1 %v7785_v36  ;;  %13825 = vmatprep.mubr.msk.f32.mxu0 %vm15438_vm0, %v22254_v21 }
 0xa68   :  { %13932 = vmatprep.mubr.msk.f32.mxu1 %vm15438_vm0, %v22254_v21  ;;  %15235 = vmatpush3.bf16.msra.mxu0 %v15234_v54  ;;  %v8089_v54 = vld [vmem:[#allocation2 + $0x28] sm:$0xff] }
 0xa69   :  { %15236 = vmatprep.subr.bf16.mxu0 %v22252_v58  ;;  %15259 = vmatpush3.bf16.msra.mxu1 %v15258_v32  ;;  %v8732_v32 = vld [vmem:[%s22136_s1 + $0x348] sm:$0xff] }
 0xa6a   :  { %13826 = vmatmul.mubr.f32.gmra.mrb[244].mxu0 %v7785_v36  ;;  %15260 = vmatprep.subr.bf16.mxu1 %v22252_v58  ;;  %v15276_v36 = vpack.c.bf16 %v8730_v49, %v8729_v23  ;;  %v15279_v28 = vpack.c.bf16 %v8732_v32, %v8731_v2 }
 0xa6b   :  { %13933 = vmatmul.mubr.f32.gmra.mrb[20].mxu1 %v7786_v55  ;;  %13828 = vmatprep.mubr.msk.f32.mxu0 %vm15438_vm0, %v22254_v21 }
 0xa6c   :  { %13935 = vmatprep.mubr.msk.f32.mxu1 %vm15438_vm0, %v22254_v21  ;;  %15238 = vmatpush3.bf16.msra.mxu0 %v15237_v47  ;;  %v9038_v47 = vld [vmem:[%s22136_s1 + $0x3c8] sm:$0xff] }
 0xa6d   :  { %15239 = vmatprep.subr.bf16.mxu0 %v22252_v58  ;;  %15262 = vmatpush3.bf16.msra.mxu1 %v15261_v34 }
 0xa6e   :  { %13829 = vmatmul.mubr.f32.gmra.mrb[246].mxu0 %v7786_v55  ;;  %15263 = vmatprep.subr.bf16.mxu1 %v22252_v58  ;;  %v8090_v55 = vld [vmem:[#allocation2 + $0x30] sm:$0xff] }
 0xa6f   :  { %13936 = vmatmul.mubr.f32.gmra.mrb[22].mxu1 %v7787_v12  ;;  %13831 = vmatprep.mubr.msk.f32.mxu0 %vm15438_vm0, %v22254_v21 }
 0xa70   :  { %13938 = vmatprep.mubr.msk.f32.mxu1 %vm15438_vm0, %v22254_v21  ;;  %15241 = vmatpush3.bf16.msra.mxu0 %v15240_v48  ;;  %v8734_v48 = vld [vmem:[%s22136_s1 + $0x358] sm:$0xff] }
 0xa71   :  { %15265 = vmatpush3.bf16.msra.mxu1 %v15264_v0  ;;  %15266 = vmatprep.subr.bf16.mxu0 %v22252_v58 }
 0xa72   :  { %13832 = vmatmul.mubr.f32.gmra.mrb[248].mxu0 %v7787_v12  ;;  %15290 = vmatprep.subr.bf16.mxu1 %v22252_v58  ;;  %v15303_v12 = vpack.c.bf16 %v9038_v47, %v9037_v6  ;;  %v8095_v47 = vld [vmem:[#allocation2 + $0x58] sm:$0xff] }
 0xa73   :  { %13939 = vmatmul.mubr.f32.gmra.mrb[24].mxu1 %v7788_v51  ;;  %13834 = vmatprep.mubr.msk.f32.mxu0 %vm15438_vm0, %v22254_v21 }
 0xa74   :  { %13941 = vmatprep.mubr.msk.f32.mxu1 %vm15438_vm0, %v22254_v21 }
 0xa76   :  { %13835 = vmatmul.mubr.f32.gmra.mrb[250].mxu0 %v7788_v51 }
 0xa77   :  { %13942 = vmatmul.mubr.f32.gmra.mrb[26].mxu1 %v7789_v61  ;;  %13837 = vmatprep.mubr.msk.f32.mxu0 %vm15438_vm0, %v22254_v21 }
 0xa78   :  { %13944 = vmatprep.mubr.msk.f32.mxu1 %vm15438_vm0, %v22254_v21 }
 0xa7a   :  { %13838 = vmatmul.mubr.f32.gmra.mrb[252].mxu0 %v7789_v61 }
 0xa7b   :  { %13945 = vmatmul.mubr.f32.gmra.mrb[28].mxu1 %v7790_v52  ;;  %13840 = vmatprep.mubr.msk.f32.mxu0 %vm15438_vm0, %v22254_v21 }
 0xa7c   :  { %13947 = vmatprep.mubr.msk.f32.mxu1 %vm15438_vm0, %v22254_v21 }
 0xa7e   :  { %13841 = vmatmul.mubr.f32.gmra.mrb[254].mxu0 %v7790_v52  ;;  %v9039_v52 = vld [vmem:[%s22136_s1 + $0x3d0] sm:$0xff] }
 0xa7f   :  { %13948 = vmatmul.mubr.f32.gmra.mrb[30].mxu1 %v7791_v50  ;;  %13843 = vmatprep.mubr.msk.f32.mxu0 %vm15438_vm0, %v22254_v21 }
 0xa80   :  { %13950 = vmatprep.mubr.msk.f32.mxu1 %vm15438_vm0, %v22254_v21 }
 0xa82   :  { %13844 = vmatmul.mubr.f32.gmra.mrb[0].mxu0 %v7791_v50  ;;  %v9040_v50 = vld [vmem:[%s22136_s1 + $0x3d8] sm:$0xff] }
 0xa83   :  { %13951 = vmatmul.mubr.f32.gmra.mrb[32].mxu1 %v7792_v59  ;;  %13846 = vmatprep.mubr.msk.f32.mxu0 %vm15438_vm0, %v22254_v21 }
 0xa84   :  { %13953 = vmatprep.mubr.msk.f32.mxu1 %vm15438_vm0, %v22254_v21 }
 0xa86   :  { %13847 = vmatmul.mubr.f32.gmra.mrb[2].mxu0 %v7792_v59  ;;  %v8091_v59 = vld [vmem:[#allocation2 + $0x38] sm:$0xff] }
 0xa87   :  { %13954 = vmatmul.mubr.f32.gmra.mrb[34].mxu1 %v7793_v41  ;;  %13849 = vmatprep.mubr.msk.f32.mxu0 %vm15438_vm0, %v22254_v21 }
 0xa88   :  { %13956 = vmatprep.mubr.msk.f32.mxu1 %vm15438_vm0, %v22254_v21 }
 0xa8a   :  { %13850 = vmatmul.mubr.f32.gmra.mrb[4].mxu0 %v7793_v41  ;;  %v15282_v41 = vpack.c.bf16 %v8734_v48, %v8733_v7 }
 0xa8b   :  { %13957 = vmatmul.mubr.f32.gmra.mrb[36].mxu1 %v7794_v25  ;;  %13852 = vmatprep.mubr.msk.f32.mxu0 %vm15438_vm0, %v22254_v21 }
 0xa8c   :  { %13959 = vmatprep.mubr.msk.f32.mxu1 %vm15438_vm0, %v22254_v21 }
 0xa8e   :  { %13853 = vmatmul.mubr.f32.gmra.mrb[6].mxu0 %v7794_v25 }
 0xa8f   :  { %13960 = vmatmul.mubr.f32.gmra.mrb[38].mxu1 %v7795_v13  ;;  %13855 = vmatprep.mubr.msk.f32.mxu0 %vm15438_vm0, %v22254_v21 }
 0xa90   :  { %13962 = vmatprep.mubr.msk.f32.mxu1 %vm15438_vm0, %v22254_v21 }
 0xa92   :  { %13856 = vmatmul.mubr.f32.gmra.mrb[8].mxu0 %v7795_v13 }
 0xa93   :  { %13963 = vmatmul.mubr.f32.gmra.mrb[40].mxu1 %v7796_v31  ;;  %13858 = vmatprep.mubr.msk.f32.mxu0 %vm15438_vm0, %v22254_v21 }
 0xa94   :  { %13965 = vmatprep.mubr.msk.f32.mxu1 %vm15438_vm0, %v22254_v21 }
 0xa96   :  { %13859 = vmatmul.mubr.f32.gmra.mrb[10].mxu0 %v7796_v31  ;;  %v20797_v31 = vld [vmem:[#allocation2 + $0x39] sm:$0xff] }
 0xa97   :  { %13966 = vmatmul.mubr.f32.gmra.mrb[42].mxu1 %v7797_v40  ;;  %13861 = vmatprep.mubr.msk.f32.mxu0 %vm15438_vm0, %v22254_v21 }
 0xa98   :  { %13968 = vmatprep.mubr.msk.f32.mxu1 %vm15438_vm0, %v22254_v21 }
 0xa9a   :  { %13862 = vmatmul.mubr.f32.gmra.mrb[12].mxu0 %v7797_v40  ;;  %v8735_v40 = vld [vmem:[%s22136_s1 + $0x360] sm:$0xff] }
 0xa9b   :  { %13969 = vmatmul.mubr.f32.gmra.mrb[44].mxu1 %v7798_v62  ;;  %13864 = vmatprep.mubr.msk.f32.mxu0 %vm15438_vm0, %v22254_v21 }
 0xa9c   :  { %13971 = vmatprep.mubr.msk.f32.mxu1 %vm15438_vm0, %v22254_v21 }
 0xa9e   :  { %13865 = vmatmul.mubr.f32.gmra.mrb[14].mxu0 %v7798_v62  ;;  %v8736_v62 = vld [vmem:[%s22136_s1 + $0x368] sm:$0xff] }
 0xa9f   :  { %13972 = vmatmul.mubr.f32.gmra.mrb[46].mxu1 %v7799_v44  ;;  %13867 = vmatprep.mubr.msk.f32.mxu0 %vm15438_vm0, %v22254_v21 }
 0xaa0   :  { %13974 = vmatprep.mubr.msk.f32.mxu1 %vm15438_vm0, %v22254_v21 }
 0xaa2   :  { %13868 = vmatmul.mubr.f32.gmra.mrb[16].mxu0 %v7799_v44  ;;  %v15306_v44 = vpack.c.bf16 %v9040_v50, %v9039_v52 }
 0xaa3   :  { %13975 = vmatmul.mubr.f32.gmra.mrb[48].mxu1 %v7800_v38  ;;  %13870 = vmatprep.mubr.msk.f32.mxu0 %vm15438_vm0, %v22254_v21 }
 0xaa4   :  { %13977 = vmatprep.mubr.msk.f32.mxu1 %vm15438_vm0, %v22254_v21 }
 0xaa6   :  { %13871 = vmatmul.mubr.f32.gmra.mrb[18].mxu0 %v7800_v38 }
 0xaa7   :  { %13978 = vmatmul.mubr.f32.gmra.mrb[50].mxu1 %v7801_v19  ;;  %13873 = vmatprep.mubr.msk.f32.mxu0 %vm15438_vm0, %v22254_v21 }
 0xaa8   :  { %13980 = vmatprep.mubr.msk.f32.mxu1 %vm15438_vm0, %v22254_v21 }
 0xaaa   :  { %13874 = vmatmul.mubr.f32.gmra.mrb[20].mxu0 %v7801_v19 }
 0xaab   :  { %13981 = vmatmul.mubr.f32.gmra.mrb[52].mxu1 %v7802_v53  ;;  %13876 = vmatprep.mubr.msk.f32.mxu0 %vm15438_vm0, %v22254_v21 }
 0xaac   :  { %13983 = vmatprep.mubr.msk.f32.mxu1 %vm15438_vm0, %v22254_v21 }
 0xaae   :  { %13877 = vmatmul.mubr.f32.gmra.mrb[22].mxu0 %v7802_v53 }
 0xaaf   :  { %13984 = vmatmul.mubr.f32.gmra.mrb[54].mxu1 %v7803_v57  ;;  %13879 = vmatprep.mubr.msk.f32.mxu0 %vm15438_vm0, %v22254_v21 }
 0xab0   :  { %13986 = vmatprep.mubr.msk.f32.mxu1 %vm15438_vm0, %v22254_v21 }
 0xab2   :  { %13880 = vmatmul.mubr.f32.gmra.mrb[24].mxu0 %v7803_v57  ;;  %v9041_v57 = vld [vmem:[%s22136_s1 + $0x3e0] sm:$0xff] }
 0xab3   :  { %13987 = vmatmul.mubr.f32.gmra.mrb[56].mxu1 %v7804_v1  ;;  %14021 = vmatprep.mubr.msk.f32.mxu0 %vm15438_vm0, %v22254_v21  ;;  %v15285_v1 = vpack.c.bf16 %v8736_v62, %v8735_v40 }
 0xab4   :  { %14128 = vmatprep.mubr.msk.f32.mxu1 %vm15438_vm0, %v22254_v21 }
 0xab6   :  { %14022 = vmatmul.mubr.f32.vlgmr.msra.gmra.mrb[26].mxu0 %v20366_v46  ;;  %v15270_v46 = vpack.c.bf16 %v8726_v56, %v8725_v17  ;;  %v8738_v17 = vld [vmem:[%s22136_s1 + $0x378] sm:$0xff]  ;;  %v15309_v56 = vpack.c.bf16 %v9042_v43, %v9041_v57  ;;  %v8098_v57 = vld [vmem:[#allocation2 + $0x70] sm:$0xff] }
 0xab7   :  { %14129 = vmatmul.mubr.f32.vlgmr.msra.gmra.mrb[58].mxu1 %v8392_v16  ;;  %15268 = vmatpush3.bf16.msra.mxu0 %v15267_v39  ;;  %v20820_v39 = vld [vmem:[#allocation2 + $0x41] sm:$0xff]  ;;  %v8737_v16 = vld [vmem:[%s22136_s1 + $0x370] sm:$0xff] }
 0xab8   :  { %14024 = vmatprep.mubr.msk.f32.mxu0 %vm15438_vm0, %v22254_v21  ;;  %14131 = vmatprep.mubr.msk.f32.mxu1 %vm15438_vm0, %v22254_v21  ;;  %v15288_v5 = vpack.c.bf16 %v8738_v17, %v8737_v16  ;;  %v20892_v43 = vld [vmem:[#allocation2 + $0x71] sm:$0xff] }
 0xab9   :  { %15269 = vmatprep.subr.bf16.mxu0 %v22252_v58  ;;  %15292 = vmatpush3.bf16.msra.mxu1 %v15291_v8  ;;  %v8099_v17 = vld [vmem:[#allocation2 + $0x78] sm:$0xff] }
 0xaba   :  { %14025 = vmatmul.mubr.f32.gmra.mrb[28].mxu0 %v8087_v11  ;;  %15293 = vmatprep.subr.bf16.mxu1 %v22252_v58  ;;  %v9043_v11 = vld [vmem:[%s22136_s1 + $0x3f0] sm:$0xff] }
 0xabb   :  { %14132 = vmatmul.mubr.f32.gmra.mrb[60].mxu1 %v20712_v37  ;;  %14027 = vmatprep.mubr.msk.f32.mxu0 %vm15438_vm0, %v22254_v21 }
 0xabc   :  { %14134 = vmatprep.mubr.msk.f32.mxu1 %vm15438_vm0, %v22254_v21  ;;  %15271 = vmatpush3.bf16.msra.mxu0 %v15270_v46  ;;  %v9044_v46 = vld [vmem:[%s22136_s1 + $0x3f8] sm:$0xff] }
 0xabd   :  { %15272 = vmatprep.subr.bf16.mxu0 %v22252_v58  ;;  %15295 = vmatpush3.bf16.msra.mxu1 %v15294_v27 }
 0xabe   :  { %14028 = vmatmul.mubr.f32.gmra.mrb[30].mxu0 %v8088_v15  ;;  %15296 = vmatprep.subr.bf16.mxu1 %v22252_v58  ;;  %v15312_v15 = vpack.c.bf16 %v9044_v46, %v9043_v11 }
 0xabf   :  { %14135 = vmatmul.mubr.f32.gmra.mrb[62].mxu1 %v20732_v9  ;;  %14030 = vmatprep.mubr.msk.f32.mxu0 %vm15438_vm0, %v22254_v21 }
 0xac0   :  { %14137 = vmatprep.mubr.msk.f32.mxu1 %vm15438_vm0, %v22254_v21  ;;  %15274 = vmatpush3.bf16.msra.mxu0 %v15273_v22 }
 0xac1   :  { %15275 = vmatprep.subr.bf16.mxu0 %v22252_v58  ;;  %15298 = vmatpush3.bf16.msra.mxu1 %v15297_v45 }
 0xac2   :  { %14031 = vmatmul.mubr.f32.gmra.mrb[32].mxu0 %v8089_v54  ;;  %15299 = vmatprep.subr.bf16.mxu1 %v22252_v58  ;;  %v20854_v54 = vld [vmem:[#allocation2 + $0x51] sm:$0xff] }
 0xac3   :  { %14138 = vmatmul.mubr.f32.gmra.mrb[64].mxu1 %v20753_v10  ;;  %14033 = vmatprep.mubr.msk.f32.mxu0 %vm15438_vm0, %v22254_v21 }
 0xac4   :  { %14140 = vmatprep.mubr.msk.f32.mxu1 %vm15438_vm0, %v22254_v21  ;;  %15277 = vmatpush3.bf16.msra.mxu0 %v15276_v36 }
 0xac5   :  { %v7024_v60 = vpop.f32.mrb[184].mxu0  ;;  %15278 = vmatprep.subr.bf16.mxu0 %v22252_v58  ;;  %15301 = vmatpush3.bf16.msra.mxu1 %v15300_v35 }
 0xac6   :  { %v7280_v34 = vpop.f32.mrb[216].mxu1  ;;  %v13598_v51 = vpop.f32.mrb[185].mxu0  ;;  %14034 = vmatmul.mubr.f32.gmra.mrb[34].mxu0 %v8090_v55  ;;  %15302 = vmatprep.subr.bf16.mxu1 %v22252_v58  ;;  %v20865_v55 = vld [vmem:[#allocation2 + $0x59] sm:$0xff] }
 0xac7   :  { %v20783_v0 = vadd.f32 %v7280_v34, %v7024_v60  ;;  %v13705_v61 = vpop.f32.mrb[217].mxu1  ;;  %14141 = vmatmul.mubr.f32.gmra.mrb[66].mxu1 %v20774_v20  ;;  %14036 = vmatprep.mubr.msk.f32.mxu0 %vm15438_vm0, %v22254_v21  ;;  %v20874_v51 = vld [vmem:[#allocation2 + $0x61] sm:$0xff] }
 0xac8   :  { %14143 = vmatprep.mubr.msk.f32.mxu1 %vm15438_vm0, %v22254_v21  ;;  %15280 = vmatpush3.bf16.msra.mxu0 %v15279_v28 }
 0xac9   :  { %v7029_v25 = vpop.f32.mrb[186].mxu0  ;;  %15281 = vmatprep.subr.bf16.mxu0 %v22252_v58  ;;  %15304 = vmatpush3.bf16.msra.mxu1 %v15303_v12  ;;  %v8096_v12 = vld [vmem:[#allocation2 + $0x60] sm:$0xff] }
 0xaca   :  { %v7285_v13 = vpop.f32.mrb[218].mxu1  ;;  %v13601_v19 = vpop.f32.mrb[187].mxu0  ;;  %14037 = vmatmul.mubr.f32.gmra.mrb[36].mxu0 %v8091_v59  ;;  %15305 = vmatprep.subr.bf16.mxu1 %v22252_v58 }
 0xacb   :  { %v20806_v38 = vadd.f32 %v7285_v13, %v7029_v25  ;;  %v13708_v53 = vpop.f32.mrb[219].mxu1  ;;  %14144 = vmatmul.mubr.f32.gmra.mrb[68].mxu1 %v20797_v31  ;;  %14039 = vmatprep.mubr.msk.f32.mxu0 %vm15438_vm0, %v22254_v21  ;;  %v8097_v25 = vld [vmem:[#allocation2 + $0x68] sm:$0xff] }
 0xacc   :  { %14146 = vmatprep.mubr.msk.f32.mxu1 %vm15438_vm0, %v22254_v21  ;;  %15283 = vmatpush3.bf16.msra.mxu0 %v15282_v41  ;;  %v20883_v13 = vld [vmem:[#allocation2 + $0x69] sm:$0xff] }
 0xacd   :  { %v7034_v26 = vpop.f32.mrb[188].mxu0  ;;  %15284 = vmatprep.subr.bf16.mxu0 %v22252_v58  ;;  %15307 = vmatpush3.bf16.msra.mxu1 %v15306_v44 }
 0xace   :  { %v7290_v29 = vpop.f32.mrb[220].mxu1  ;;  %v13604_v4 = vpop.f32.mrb[189].mxu0  ;;  %14040 = vmatmul.mubr.f32.gmra.mrb[38].mxu0 %v8092_v33  ;;  %15308 = vmatprep.subr.bf16.mxu1 %v22252_v58 }
 0xacf   :  { %v20829_v8 = vadd.f32 %v7290_v29, %v7034_v26  ;;  %v13711_v63 = vpop.f32.mrb[221].mxu1  ;;  %14147 = vmatmul.mubr.f32.gmra.mrb[70].mxu1 %v20820_v39  ;;  %14042 = vmatprep.mubr.msk.f32.mxu0 %vm15438_vm0, %v22254_v21 }
 0xad0   :  { %14149 = vmatprep.mubr.msk.f32.mxu1 %vm15438_vm0, %v22254_v21  ;;  %15286 = vmatpush3.bf16.msra.mxu0 %v15285_v1 }
 0xad1   :  { %v7039_v24 = vpop.f32.mrb[190].mxu0  ;;  %15287 = vmatprep.subr.bf16.mxu0 %v22252_v58  ;;  %15310 = vmatpush3.bf16.msra.mxu1 %v15309_v56  ;;  %v20901_v56 = vld [vmem:[#allocation2 + $0x79] sm:$0xff] }
 0xad2   :  { %v7295_v27 = vpop.f32.mrb[222].mxu1  ;;  %v13607_v23 = vpop.f32.mrb[191].mxu0  ;;  %14043 = vmatmul.mubr.f32.gmra.mrb[40].mxu0 %v8093_v42  ;;  %15311 = vmatprep.subr.bf16.mxu1 %v22252_v58 }
 0xad3   :  { %v20846_v22 = vadd.f32 %v7295_v27, %v7039_v24  ;;  %v13714_v49 = vpop.f32.mrb[223].mxu1  ;;  %14150 = vmatmul.mubr.f32.gmra.mrb[72].mxu1 %v20843_v18  ;;  %14045 = vmatprep.mubr.msk.f32.mxu0 %vm15438_vm0, %v22254_v21  ;;  %v8100_v24 = vld [vmem:[#allocation2 + $0x80] sm:$0xff] }
 0xad4   :  { %14152 = vmatprep.mubr.msk.f32.mxu1 %vm15438_vm0, %v22254_v21  ;;  %15289 = vmatpush3.bf16.msra.mxu0 %v15288_v5  ;;  %v20910_v27 = vld [vmem:[#allocation2 + $0x81] sm:$0xff] }
 0xad5   :  { %v7044_v45 = vpop.f32.mrb[192].mxu0  ;;  %15313 = vmatpush3.bf16.msra.mxu1 %v15312_v15  ;;  %15314 = vmatprep.subr.bf16.mxu0 %v22252_v58 }
 0xad6   :  { %v7300_v14 = vpop.f32.mrb[224].mxu1  ;;  %v13610_v2 = vpop.f32.mrb[193].mxu0  ;;  %14046 = vmatmul.mubr.f32.gmra.mrb[42].mxu0 %v8094_v30  ;;  %15338 = vmatprep.subr.bf16.mxu1 %v22252_v58  ;;  %v20919_v30 = vld [vmem:[#allocation2 + $0x89] sm:$0xff] }
 0xad7   :  { %v20857_v36 = vadd.f32 %v7300_v14, %v7044_v45  ;;  %v13717_v32 = vpop.f32.mrb[225].mxu1  ;;  %14153 = vmatmul.mubr.f32.gmra.mrb[74].mxu1 %v20854_v54  ;;  %14048 = vmatprep.mubr.msk.f32.mxu0 %vm15438_vm0, %v22254_v21  ;;  %v8101_v14 = vld [vmem:[#allocation2 + $0x88] sm:$0xff] }
 0xad8   :  { %14155 = vmatprep.mubr.msk.f32.mxu1 %vm15438_vm0, %v22254_v21 }
 0xad9   :  { %v7049_v35 = vpop.f32.mrb[194].mxu0 }
 0xada   :  { %v7305_v6 = vpop.f32.mrb[226].mxu1  ;;  %v13613_v60 = vpop.f32.mrb[195].mxu0  ;;  %14049 = vmatmul.mubr.f32.gmra.mrb[44].mxu0 %v8095_v47 }
 0xadb   :  { %v20867_v28 = vadd.f32 %v7305_v6, %v7049_v35  ;;  %v13720_v34 = vpop.f32.mrb[227].mxu1  ;;  %14156 = vmatmul.mubr.f32.gmra.mrb[76].mxu1 %v20865_v55  ;;  %14051 = vmatprep.mubr.msk.f32.mxu0 %vm15438_vm0, %v22254_v21  ;;  %v8102_v60 = vld [vmem:[#allocation2 + $0x90] sm:$0xff] }
 0xadc   :  { %14158 = vmatprep.mubr.msk.f32.mxu1 %vm15438_vm0, %v22254_v21  ;;  %v20928_v34 = vld [vmem:[#allocation2 + $0x91] sm:$0xff] }
 0xadd   :  { %v7054_v7 = vpop.f32.mrb[196].mxu0 }
 0xade   :  { %v7310_v48 = vpop.f32.mrb[228].mxu1  ;;  %v13616_v52 = vpop.f32.mrb[197].mxu0  ;;  %14052 = vmatmul.mubr.f32.gmra.mrb[46].mxu0 %v8096_v12 }
 0xadf   :  { %v20876_v61 = vadd.f32 %v7310_v48, %v7054_v7  ;;  %v13723_v50 = vpop.f32.mrb[229].mxu1  ;;  %14159 = vmatmul.mubr.f32.gmra.mrb[78].mxu1 %v20874_v51  ;;  %14054 = vmatprep.mubr.msk.f32.mxu0 %vm15438_vm0, %v22254_v21 }
 0xae0   :  { %14161 = vmatprep.mubr.msk.f32.mxu1 %vm15438_vm0, %v22254_v21 }
 0xae1   :  { %v7059_v59 = vpop.f32.mrb[198].mxu0 }
 0xae2   :  { %v7315_v41 = vpop.f32.mrb[230].mxu1  ;;  %v13619_v62 = vpop.f32.mrb[199].mxu0  ;;  %14055 = vmatmul.mubr.f32.gmra.mrb[48].mxu0 %v8097_v25 }
 0xae3   :  { %v20885_v40 = vadd.f32 %v7315_v41, %v7059_v59  ;;  %v13726_v44 = vpop.f32.mrb[231].mxu1  ;;  %14162 = vmatmul.mubr.f32.gmra.mrb[80].mxu1 %v20883_v13  ;;  %14057 = vmatprep.mubr.msk.f32.mxu0 %vm15438_vm0, %v22254_v21  ;;  %v8103_v59 = vld [vmem:[#allocation2 + $0x98] sm:$0xff] }
 0xae4   :  { %14164 = vmatprep.mubr.msk.f32.mxu1 %vm15438_vm0, %v22254_v21  ;;  %v20937_v41 = vld [vmem:[#allocation2 + $0x99] sm:$0xff] }
 0xae5   :  { %v7064_v19 = vpop.f32.mrb[200].mxu0 }
 0xae6   :  { %v7320_v53 = vpop.f32.mrb[232].mxu1  ;;  %v13622_v1 = vpop.f32.mrb[201].mxu0  ;;  %14058 = vmatmul.mubr.f32.gmra.mrb[50].mxu0 %v8098_v57  ;;  %v8104_v57 = vld [vmem:[#allocation2 + $0xa0] sm:$0xff] }
 0xae7   :  { %v20894_v33 = vadd.f32 %v7320_v53, %v7064_v19  ;;  %v13729_v26 = vpop.f32.mrb[233].mxu1  ;;  %14165 = vmatmul.mubr.f32.gmra.mrb[82].mxu1 %v20892_v43  ;;  %14060 = vmatprep.mubr.msk.f32.mxu0 %vm15438_vm0, %v22254_v21  ;;  %v20946_v1 = vld [vmem:[#allocation2 + $0xa1] sm:$0xff] }
 0xae8   :  { %14167 = vmatprep.mubr.msk.f32.mxu1 %vm15438_vm0, %v22254_v21 }
 0xae9   :  { %v7069_v29 = vpop.f32.mrb[202].mxu0 }
 0xaea   :  { %v7325_v16 = vpop.f32.mrb[234].mxu1  ;;  %v13625_v63 = vpop.f32.mrb[203].mxu0  ;;  %14061 = vmatmul.mubr.f32.gmra.mrb[52].mxu0 %v8099_v17 }
 0xaeb   :  { %v20903_v4 = vadd.f32 %v7325_v16, %v7069_v29  ;;  %v13732_v11 = vpop.f32.mrb[235].mxu1  ;;  %14168 = vmatmul.mubr.f32.gmra.mrb[84].mxu1 %v20901_v56  ;;  %14063 = vmatprep.mubr.msk.f32.mxu0 %vm15438_vm0, %v22254_v21 }
 0xaec   :  { %14170 = vmatprep.mubr.msk.f32.mxu1 %vm15438_vm0, %v22254_v21  ;;  %v8105_v11 = vld [vmem:[#allocation2 + $0xa8] sm:$0xff] }
 0xaed   :  { %v7074_v46 = vpop.f32.mrb[204].mxu0 }
 0xaee   :  { %v7330_v5 = vpop.f32.mrb[236].mxu1  ;;  %v13628_v15 = vpop.f32.mrb[205].mxu0  ;;  %14064 = vmatmul.mubr.f32.gmra.mrb[54].mxu0 %v8100_v24 }
 0xaef   :  { %v20912_v42 = vadd.f32 %v7330_v5, %v7074_v46  ;;  %v13735_v23 = vpop.f32.mrb[237].mxu1  ;;  %14171 = vmatmul.mubr.f32.gmra.mrb[86].mxu1 %v20910_v27  ;;  %14066 = vmatprep.mubr.msk.f32.mxu0 %vm15438_vm0, %v22254_v21  ;;  %v20955_v46 = vld [vmem:[#allocation2 + $0xa9] sm:$0xff] }
 0xaf0   :  { %14173 = vmatprep.mubr.msk.f32.mxu1 %vm15438_vm0, %v22254_v21 }
 0xaf1   :  { %v7079_v49 = vpop.f32.mrb[206].mxu0 }
 0xaf2   :  { %v7335_v45 = vpop.f32.mrb[238].mxu1  ;;  %v13631_v32 = vpop.f32.mrb[207].mxu0  ;;  %14067 = vmatmul.mubr.f32.gmra.mrb[56].mxu0 %v8101_v14  ;;  %v20964_v14 = vld [vmem:[#allocation2 + $0xb1] sm:$0xff] }
 0xaf3   :  { %v20921_v2 = vadd.f32 %v7335_v45, %v7079_v49  ;;  %v13738_v35 = vpop.f32.mrb[239].mxu1  ;;  %14174 = vmatmul.mubr.f32.gmra.mrb[88].mxu1 %v20919_v30  ;;  %14069 = vmatprep.mubr.msk.f32.mxu0 %vm15438_vm0, %v22254_v21  ;;  %v8106_v45 = vld [vmem:[#allocation2 + $0xb0] sm:$0xff] }
 0xaf4   :  { %14176 = vmatprep.mubr.msk.f32.mxu1 %vm15438_vm0, %v22254_v21 }
 0xaf5   :  { %v7084_v6 = vpop.f32.mrb[208].mxu0 }
 0xaf6   :  { %v7340_v47 = vpop.f32.mrb[240].mxu1  ;;  %v13634_v48 = vpop.f32.mrb[209].mxu0  ;;  %14070 = vmatmul.mubr.f32.gmra.mrb[58].mxu0 %v8102_v60 }
 0xaf7   :  { %v20930_v7 = vadd.f32 %v7340_v47, %v7084_v6  ;;  %v13741_v12 = vpop.f32.mrb[241].mxu1  ;;  %14177 = vmatmul.mubr.f32.gmra.mrb[90].mxu1 %v20928_v34  ;;  %14072 = vmatprep.mubr.msk.f32.mxu0 %vm15438_vm0, %v22254_v21  ;;  %v8107_v48 = vld [vmem:[#allocation2 + $0xb8] sm:$0xff] }
 0xaf8   :  { %14179 = vmatprep.mubr.msk.f32.mxu1 %vm15438_vm0, %v22254_v21  ;;  %v20973_v12 = vld [vmem:[#allocation2 + $0xb9] sm:$0xff] }
 0xaf9   :  { %v7089_v52 = vpop.f32.mrb[210].mxu0 }
 0xafa   :  { %v7345_v50 = vpop.f32.mrb[242].mxu1  ;;  %v13637_v62 = vpop.f32.mrb[211].mxu0  ;;  %14073 = vmatmul.mubr.f32.gmra.mrb[60].mxu0 %v8103_v59 }
 0xafb   :  { %v20939_v25 = vadd.f32 %v7345_v50, %v7089_v52  ;;  %v13744_v44 = vpop.f32.mrb[243].mxu1  ;;  %14180 = vmatmul.mubr.f32.gmra.mrb[92].mxu1 %v20937_v41  ;;  %14075 = vmatprep.mubr.msk.f32.mxu0 %vm15438_vm0, %v22254_v21 }
 0xafc   :  { %14182 = vmatprep.mubr.msk.f32.mxu1 %vm15438_vm0, %v22254_v21 }
 0xafd   :  { %v7094_v19 = vpop.f32.mrb[212].mxu0 }
 0xafe   :  { %v7350_v53 = vpop.f32.mrb[244].mxu1  ;;  %v13640_v29 = vpop.f32.mrb[213].mxu0  ;;  %14076 = vmatmul.mubr.f32.gmra.mrb[62].mxu0 %v8104_v57 }
 0xaff   :  { %v20948_v26 = vadd.f32 %v7350_v53, %v7094_v19  ;;  %v13747_v16 = vpop.f32.mrb[245].mxu1  ;;  %14183 = vmatmul.mubr.f32.gmra.mrb[94].mxu1 %v20946_v1  ;;  %14078 = vmatprep.mubr.msk.f32.mxu0 %vm15438_vm0, %v22254_v21  ;;  %v8108_v19 = vld [vmem:[#allocation2 + $0xc0] sm:$0xff] }
 0xb00   :  { %14185 = vmatprep.mubr.msk.f32.mxu1 %vm15438_vm0, %v22254_v21  ;;  %v20982_v53 = vld [vmem:[#allocation2 + $0xc1] sm:$0xff] }
 0xb01   :  { %v7099_v17 = vpop.f32.mrb[214].mxu0 }
 0xb02   :  { %v7355_v63 = vpop.f32.mrb[246].mxu1  ;;  %v13643_v24 = vpop.f32.mrb[215].mxu0  ;;  %14079 = vmatmul.mubr.f32.gmra.mrb[64].mxu0 %v8105_v11  ;;  %v8109_v11 = vld [vmem:[#allocation2 + $0xc8] sm:$0xff] }
 0xb03   :  { %v20957_v5 = vadd.f32 %v7355_v63, %v7099_v17  ;;  %v13750_v15 = vpop.f32.mrb[247].mxu1  ;;  %14186 = vmatmul.mubr.f32.gmra.mrb[96].mxu1 %v20955_v46  ;;  %14081 = vmatprep.mubr.msk.f32.mxu0 %vm15438_vm0, %v22254_v21  ;;  %v20991_v24 = vld [vmem:[#allocation2 + $0xc9] sm:$0xff] }
 0xb04   :  { %14188 = vmatprep.mubr.msk.f32.mxu1 %vm15438_vm0, %v22254_v21 }
 0xb05   :  { %v7104_v23 = vpop.f32.mrb[216].mxu0 }
 0xb06   :  { %v7360_v49 = vpop.f32.mrb[248].mxu1  ;;  %v13646_v35 = vpop.f32.mrb[217].mxu0  ;;  %14082 = vmatmul.mubr.f32.gmra.mrb[66].mxu0 %v8106_v45  ;;  %v9335_v45 = vld [vmem:[%s22136_s1 + $0x400] sm:$0xff] }
 0xb07   :  { %v20966_v32 = vadd.f32 %v7360_v49, %v7104_v23  ;;  %v13753_v6 = vpop.f32.mrb[249].mxu1  ;;  %14189 = vmatmul.mubr.f32.gmra.mrb[98].mxu1 %v20964_v14  ;;  %14084 = vmatprep.mubr.msk.f32.mxu0 %vm15438_vm0, %v22254_v21  ;;  %v9336_v35 = vld [vmem:[%s22136_s1 + $0x408] sm:$0xff] }
 0xb08   :  { %14191 = vmatprep.mubr.msk.f32.mxu1 %vm15438_vm0, %v22254_v21 }
 0xb09   :  { %v7109_v47 = vpop.f32.mrb[218].mxu0 }
 0xb0a   :  { %v7365_v60 = vpop.f32.mrb[250].mxu1  ;;  %v13649_v50 = vpop.f32.mrb[219].mxu0  ;;  %14085 = vmatmul.mubr.f32.gmra.mrb[68].mxu0 %v8107_v48 }
 0xb0b   :  { %v20975_v52 = vadd.f32 %v7365_v60, %v7109_v47  ;;  %v13756_v59 = vpop.f32.mrb[251].mxu1  ;;  %14192 = vmatmul.mubr.f32.gmra.mrb[100].mxu1 %v20973_v12  ;;  %14087 = vmatprep.mubr.msk.f32.mxu0 %vm15438_vm0, %v22254_v21  ;;  %v21006_v60 = vld [vmem:[#allocation2 + $0xd1] sm:$0xff] }
 0xb0c   :  { %14194 = vmatprep.mubr.msk.f32.mxu1 %vm15438_vm0, %v22254_v21 }
 0xb0d   :  { %v7114_v62 = vpop.f32.mrb[220].mxu0 }
 0xb0e   :  { %v7370_v44 = vpop.f32.mrb[252].mxu1  ;;  %v13652_v29 = vpop.f32.mrb[221].mxu0  ;;  %14088 = vmatmul.mubr.f32.gmra.mrb[70].mxu0 %v8108_v19 }
 0xb0f   :  { %v20984_v57 = vadd.f32 %v7370_v44, %v7114_v62  ;;  %v13759_v16 = vpop.f32.mrb[253].mxu1  ;;  %14195 = vmatmul.mubr.f32.gmra.mrb[102].mxu1 %v20982_v53  ;;  %14090 = vmatprep.mubr.msk.f32.mxu0 %vm15438_vm0, %v22254_v21  ;;  %v15435_v62 = vld [vmem:[#allocation2 + $0xd0] sm:$0xff]  ;;  %v15315_v44 = vpack.c.bf16 %v9336_v35, %v9335_v45 }
 0xb10   :  { %14197 = vmatprep.mubr.msk.f32.mxu1 %vm15438_vm0, %v22254_v21  ;;  %v9004_v16 = vld [vmem:[#allocation2 + $0x1a] sm:$0xff] }
 0xb11   :  { %v7119_v17 = vpop.f32.mrb[222].mxu0 }
 0xb12   :  { %v7375_v63 = vpop.f32.mrb[254].mxu1  ;;  %v13655_v23 = vpop.f32.mrb[223].mxu0  ;;  %14091 = vmatmul.mubr.f32.gmra.mrb[72].mxu0 %v8109_v11 }
 0xb13   :  { %v20993_v15 = vadd.f32 %v7375_v63, %v7119_v17  ;;  %v13762_v49 = vpop.f32.mrb[255].mxu1  ;;  %14198 = vmatmul.mubr.f32.gmra.mrb[104].mxu1 %v20991_v24  ;;  %14093 = vmatprep.mubr.msk.f32.mxu0 %vm15438_vm0, %v22254_v21  ;;  %v9337_v17 = vld [vmem:[%s22136_s1 + $0x410] sm:$0xff]  ;;  %v9338_v63 = vld [vmem:[%s22136_s1 + $0x418] sm:$0xff] }
 0xb14   :  { %14200 = vmatprep.mubr.msk.f32.mxu1 %vm15438_vm0, %v22254_v21  ;;  %v15318_v45 = vpack.c.bf16 %v9338_v63, %v9337_v17  ;;  %v9006_v17 = vld [vmem:[#allocation2 + $0x2a] sm:$0xff] }
 0xb15   :  { %v7124_v6 = vpop.f32.mrb[224].mxu0  ;;  %v9341_v63 = vld [vmem:[%s22136_s1 + $0x430] sm:$0xff] }
 0xb16   :  { %v7380_v47 = vpop.f32.mrb[0].mxu1  ;;  %v13658_v50 = vpop.f32.mrb[225].mxu0  ;;  %14094 = vmatmul.mubr.f32.gmra.mrb[74].mxu0 %v15435_v62 }
 0xb17   :  { %v21008_v48 = vadd.f32 %v7380_v47, %v7124_v6  ;;  %v13765_v59 = vpop.f32.mrb[1].mxu1  ;;  %14201 = vmatmul.mubr.f32.gmra.mrb[106].mxu1 %v21006_v60  ;;  %14235 = vmatprep.mubr.msk.f32.mxu0 %vm15438_vm0, %v22254_v21  ;;  %v9005_v47 = vld [vmem:[#allocation2 + $0x22] sm:$0xff] }
 0xb18   :  { %14342 = vmatprep.mubr.msk.f32.mxu1 %vm15438_vm0, %v22254_v21  ;;  %v9339_v50 = vld [vmem:[%s22136_s1 + $0x420] sm:$0xff] }
 0xb19   :  { %v7129_v19 = vpop.f32.mrb[226].mxu0 }
 0xb1a   :  { %v7385_v29 = vpop.f32.mrb[2].mxu1  ;;  %v13661_v23 = vpop.f32.mrb[227].mxu0  ;;  %14236 = vmatmul.mubr.f32.vlgmr.msra.gmra.mrb[76].mxu0 %v20712_v37  ;;  %v9340_v37 = vld [vmem:[%s22136_s1 + $0x428] sm:$0xff] }
 0xb1b   :  { %v21021_v11 = vadd.f32 %v7385_v29, %v7129_v19  ;;  %v13768_v49 = vpop.f32.mrb[3].mxu1  ;;  %14343 = vmatmul.mubr.f32.vlgmr.msra.gmra.mrb[108].mxu1 %v9004_v16  ;;  %15316 = vmatpush3.bf16.msra.mxu0 %v15315_v44  ;;  %v15321_v19 = vpack.c.bf16 %v9340_v37, %v9339_v50  ;;  %v9007_v50 = vld [vmem:[#allocation2 + $0x32] sm:$0xff]  ;;  %v9343_v37 = vld [vmem:[%s22136_s1 + $0x440] sm:$0xff] }
 0xb1c   :  { %14238 = vmatprep.mubr.msk.f32.mxu0 %vm15438_vm0, %v22254_v21  ;;  %14345 = vmatprep.mubr.msk.f32.mxu1 %vm15438_vm0, %v22254_v21 }
 0xb1d   :  { %15317 = vmatprep.subr.bf16.mxu0 %v22252_v58  ;;  %v7134_v35 = vpop.f32.mrb[228].mxu0 }
 0xb1e   :  { %v7390_v6 = vpop.f32.mrb[4].mxu1  ;;  %v13664_v62 = vpop.f32.mrb[229].mxu0  ;;  %14239 = vmatmul.mubr.f32.gmra.mrb[78].mxu0 %v20732_v9  ;;  %v9342_v9 = vld [vmem:[%s22136_s1 + $0x438] sm:$0xff] }
 0xb1f   :  { %v21035_v59 = vadd.f32 %v7390_v6, %v7134_v35  ;;  %v13771_v44 = vpop.f32.mrb[5].mxu1  ;;  %14346 = vmatmul.mubr.f32.gmra.mrb[110].mxu1 %v9005_v47  ;;  %14241 = vmatprep.mubr.msk.f32.mxu0 %vm15438_vm0, %v22254_v21 }
 0xb20   :  { %14348 = vmatprep.mubr.msk.f32.mxu1 %vm15438_vm0, %v22254_v21  ;;  %15319 = vmatpush3.bf16.msra.mxu0 %v15318_v45  ;;  %v15324_v45 = vpack.c.bf16 %v9342_v9, %v9341_v63  ;;  %v9008_v9 = vld [vmem:[#allocation2 + $0x3a] sm:$0xff] }
 0xb21   :  { %v7139_v29 = vpop.f32.mrb[230].mxu0  ;;  %15320 = vmatprep.subr.bf16.mxu0 %v22252_v58 }
 0xb22   :  { %v7395_v16 = vpop.f32.mrb[6].mxu1  ;;  %v13667_v49 = vpop.f32.mrb[231].mxu0  ;;  %14242 = vmatmul.mubr.f32.gmra.mrb[80].mxu0 %v20753_v10  ;;  %v9344_v10 = vld [vmem:[%s22136_s1 + $0x448] sm:$0xff] }
 0xb23   :  { %v21049_v23 = vadd.f32 %v7395_v16, %v7139_v29  ;;  %v13774_v35 = vpop.f32.mrb[7].mxu1  ;;  %14349 = vmatmul.mubr.f32.gmra.mrb[112].mxu1 %v9006_v17  ;;  %14244 = vmatprep.mubr.msk.f32.mxu0 %vm15438_vm0, %v22254_v21  ;;  %v15327_v16 = vpack.c.bf16 %v9344_v10, %v9343_v37  ;;  %v9009_v10 = vld [vmem:[#allocation2 + $0x42] sm:$0xff] }
 0xb24   :  { %14351 = vmatprep.mubr.msk.f32.mxu1 %vm15438_vm0, %v22254_v21  ;;  %15322 = vmatpush3.bf16.msra.mxu0 %v15321_v19 }
 0xb25   :  { %v7581_v6 = vpop.f32.mrb[232].mxu0  ;;  %15323 = vmatprep.subr.bf16.mxu0 %v22252_v58 }
 0xb26   :  { %v7887_v47 = vpop.f32.mrb[8].mxu1  ;;  %v7730_v62 = vadd.f32 %v7581_v6, %v20521_v3  ;;  %v13809_v44 = vpop.f32.mrb[233].mxu0  ;;  %14245 = vmatmul.mubr.f32.gmra.mrb[82].mxu0 %v20774_v20  ;;  %v9345_v3 = vld [vmem:[%s22136_s1 + $0x450] sm:$0xff]  ;;  %v9346_v20 = vld [vmem:[%s22136_s1 + $0x458] sm:$0xff] }
 0xb27   :  { %v13916_v29 = vpop.f32.mrb[9].mxu1  ;;  %14352 = vmatmul.mubr.f32.gmra.mrb[114].mxu1 %v9007_v50  ;;  %14247 = vmatprep.mubr.msk.f32.mxu0 %vm15438_vm0, %v22254_v21 }
 0xb28   :  { %14354 = vmatprep.mubr.msk.f32.mxu1 %vm15438_vm0, %v22254_v21  ;;  %v21069_v19 = vadd.f32 %v7887_v47, %v7730_v62  ;;  %15325 = vmatpush3.bf16.msra.mxu0 %v15324_v45  ;;  %v15330_v47 = vpack.c.bf16 %v9346_v20, %v9345_v3  ;;  %v9010_v3 = vld [vmem:[#allocation2 + $0x4a] sm:$0xff] }
 0xb29   :  { %v7586_v17 = vpop.f32.mrb[234].mxu0  ;;  %15326 = vmatprep.subr.bf16.mxu0 %v22252_v58 }
 0xb2a   :  { %v7892_v63 = vpop.f32.mrb[10].mxu1  ;;  %v7731_v49 = vadd.f32 %v7586_v17, %v20783_v0  ;;  %v13812_v35 = vpop.f32.mrb[235].mxu0  ;;  %14248 = vmatmul.mubr.f32.gmra.mrb[84].mxu0 %v20797_v31  ;;  %v9347_v0 = vld [vmem:[%s22136_s1 + $0x460] sm:$0xff]  ;;  %v9348_v31 = vld [vmem:[%s22136_s1 + $0x468] sm:$0xff] }
 0xb2b   :  { %v13919_v6 = vpop.f32.mrb[11].mxu1  ;;  %14355 = vmatmul.mubr.f32.gmra.mrb[116].mxu1 %v9008_v9  ;;  %14250 = vmatprep.mubr.msk.f32.mxu0 %vm15438_vm0, %v22254_v21  ;;  %v15333_v17 = vpack.c.bf16 %v9348_v31, %v9347_v0 }
 0xb2c   :  { %14357 = vmatprep.mubr.msk.f32.mxu1 %vm15438_vm0, %v22254_v21  ;;  %v21084_v45 = vadd.f32 %v7892_v63, %v7731_v49  ;;  %15328 = vmatpush3.bf16.msra.mxu0 %v15327_v16 }
 0xb2d   :  { %v7591_v50 = vpop.f32.mrb[236].mxu0  ;;  %15329 = vmatprep.subr.bf16.mxu0 %v22252_v58 }
 0xb2e   :  { %v7897_v37 = vpop.f32.mrb[12].mxu1  ;;  %v7732_v62 = vadd.f32 %v7591_v50, %v20806_v38  ;;  %v13815_v44 = vpop.f32.mrb[237].mxu0  ;;  %14251 = vmatmul.mubr.f32.gmra.mrb[86].mxu0 %v20820_v39  ;;  %v9349_v38 = vld [vmem:[%s22136_s1 + $0x470] sm:$0xff]  ;;  %v9350_v39 = vld [vmem:[%s22136_s1 + $0x478] sm:$0xff] }
 0xb2f   :  { %v13922_v29 = vpop.f32.mrb[13].mxu1  ;;  %14358 = vmatmul.mubr.f32.gmra.mrb[118].mxu1 %v9009_v10  ;;  %14253 = vmatprep.mubr.msk.f32.mxu0 %vm15438_vm0, %v22254_v21  ;;  %v9011_v10 = vld [vmem:[#allocation2 + $0x52] sm:$0xff] }
 0xb30   :  { %14360 = vmatprep.mubr.msk.f32.mxu1 %vm15438_vm0, %v22254_v21  ;;  %v21099_v16 = vadd.f32 %v7897_v37, %v7732_v62  ;;  %15331 = vmatpush3.bf16.msra.mxu0 %v15330_v47  ;;  %v15336_v47 = vpack.c.bf16 %v9350_v39, %v9349_v38  ;;  %v9012_v29 = vld [vmem:[#allocation2 + $0x5a] sm:$0xff]  ;;  %v9013_v38 = vld [vmem:[#allocation2 + $0x62] sm:$0xff] }
 0xb31   :  { %v7596_v63 = vpop.f32.mrb[238].mxu0  ;;  %15332 = vmatprep.subr.bf16.mxu0 %v22252_v58 }
 0xb32   :  { %v7902_v9 = vpop.f32.mrb[14].mxu1  ;;  %v7733_v20 = vadd.f32 %v7596_v63, %v20829_v8  ;;  %v13818_v49 = vpop.f32.mrb[239].mxu0  ;;  %14254 = vmatmul.mubr.f32.gmra.mrb[88].mxu0 %v20843_v18 }
 0xb33   :  { %v13925_v35 = vpop.f32.mrb[15].mxu1  ;;  %14361 = vmatmul.mubr.f32.gmra.mrb[120].mxu1 %v9010_v3  ;;  %14256 = vmatprep.mubr.msk.f32.mxu0 %vm15438_vm0, %v22254_v21 }
 0xb34   :  { %14363 = vmatprep.mubr.msk.f32.mxu1 %vm15438_vm0, %v22254_v21  ;;  %v21114_v6 = vadd.f32 %v7902_v9, %v7733_v20  ;;  %15334 = vmatpush3.bf16.msra.mxu0 %v15333_v17 }
 0xb35   :  { %v7601_v50 = vpop.f32.mrb[240].mxu0  ;;  %15335 = vmatprep.subr.bf16.mxu0 %v22252_v58 }
 0xb36   :  { %v7907_v37 = vpop.f32.mrb[16].mxu1  ;;  %v7734_v8 = vadd.f32 %v7601_v50, %v20846_v22  ;;  %v13821_v0 = vpop.f32.mrb[241].mxu0  ;;  %14257 = vmatmul.mubr.f32.gmra.mrb[90].mxu0 %v20854_v54 }
 0xb37   :  { %v13928_v18 = vpop.f32.mrb[17].mxu1  ;;  %14364 = vmatmul.mubr.f32.gmra.mrb[122].mxu1 %v9011_v10  ;;  %14259 = vmatprep.mubr.msk.f32.mxu0 %vm15438_vm0, %v22254_v21  ;;  %v9015_v0 = vld [vmem:[#allocation2 + $0x72] sm:$0xff] }
 0xb38   :  { %14366 = vmatprep.mubr.msk.f32.mxu1 %vm15438_vm0, %v22254_v21  ;;  %v21123_v31 = vadd.f32 %v7907_v37, %v7734_v8  ;;  %15337 = vmatpush3.bf16.msra.mxu0 %v15336_v47  ;;  %v9014_v47 = vld [vmem:[#allocation2 + $0x6a] sm:$0xff] }
 0xb39   :  { %v7606_v62 = vpop.f32.mrb[242].mxu0 }
 0xb3a   :  { %v7912_v44 = vpop.f32.mrb[18].mxu1  ;;  %v7735_v17 = vadd.f32 %v7606_v62, %v20857_v36  ;;  %v13824_v22 = vpop.f32.mrb[243].mxu0  ;;  %14260 = vmatmul.mubr.f32.gmra.mrb[92].mxu0 %v20865_v55 }
 0xb3b   :  { %v13931_v63 = vpop.f32.mrb[19].mxu1  ;;  %14367 = vmatmul.mubr.f32.gmra.mrb[124].mxu1 %v9012_v29  ;;  %14262 = vmatprep.mubr.msk.f32.mxu0 %vm15438_vm0, %v22254_v21 }
 0xb3c   :  { %14369 = vmatprep.mubr.msk.f32.mxu1 %vm15438_vm0, %v22254_v21  ;;  %v21131_v54 = vadd.f32 %v7912_v44, %v7735_v17  ;;  %v9016_v17 = vld [vmem:[#allocation2 + $0x7a] sm:$0xff] }
 0xb3d   :  { %v7611_v9 = vpop.f32.mrb[244].mxu0 }
 0xb3e   :  { %v7917_v3 = vpop.f32.mrb[20].mxu1  ;;  %v7736_v39 = vadd.f32 %v7611_v9, %v20867_v28  ;;  %v13827_v20 = vpop.f32.mrb[245].mxu0  ;;  %14263 = vmatmul.mubr.f32.gmra.mrb[94].mxu0 %v20874_v51 }
 0xb3f   :  { %v13934_v36 = vpop.f32.mrb[21].mxu1  ;;  %14370 = vmatmul.mubr.f32.gmra.mrb[126].mxu1 %v9013_v38  ;;  %14265 = vmatprep.mubr.msk.f32.mxu0 %vm15438_vm0, %v22254_v21  ;;  %v9017_v38 = vld [vmem:[#allocation2 + $0x82] sm:$0xff] }
 0xb40   :  { %14372 = vmatprep.mubr.msk.f32.mxu1 %vm15438_vm0, %v22254_v21  ;;  %v21139_v55 = vadd.f32 %v7917_v3, %v7736_v39 }
 0xb41   :  { %v7616_v49 = vpop.f32.mrb[246].mxu0 }
 0xb42   :  { %v7922_v35 = vpop.f32.mrb[22].mxu1  ;;  %v7737_v50 = vadd.f32 %v7616_v49, %v20876_v61  ;;  %v13830_v37 = vpop.f32.mrb[247].mxu0  ;;  %14266 = vmatmul.mubr.f32.gmra.mrb[96].mxu0 %v20883_v13 }
 0xb43   :  { %v13937_v28 = vpop.f32.mrb[23].mxu1  ;;  %14373 = vmatmul.mubr.f32.gmra.mrb[128].mxu1 %v9014_v47  ;;  %14268 = vmatprep.mubr.msk.f32.mxu0 %vm15438_vm0, %v22254_v21 }
 0xb44   :  { %14375 = vmatprep.mubr.msk.f32.mxu1 %vm15438_vm0, %v22254_v21  ;;  %v21147_v51 = vadd.f32 %v7922_v35, %v7737_v50  ;;  %v9018_v35 = vld [vmem:[#allocation2 + $0x8a] sm:$0xff] }
 0xb45   :  { %v7621_v10 = vpop.f32.mrb[248].mxu0 }
 0xb46   :  { %v7927_v8 = vpop.f32.mrb[24].mxu1  ;;  %v7738_v18 = vadd.f32 %v7621_v10, %v20885_v40  ;;  %v13833_v62 = vpop.f32.mrb[249].mxu0  ;;  %14269 = vmatmul.mubr.f32.gmra.mrb[98].mxu0 %v20892_v43  ;;  %v9019_v10 = vld [vmem:[#allocation2 + $0x92] sm:$0xff] }
 0xb47   :  { %v13940_v61 = vpop.f32.mrb[25].mxu1  ;;  %14376 = vmatmul.mubr.f32.gmra.mrb[130].mxu1 %v9015_v0  ;;  %14271 = vmatprep.mubr.msk.f32.mxu0 %vm15438_vm0, %v22254_v21 }
 0xb48   :  { %14378 = vmatprep.mubr.msk.f32.mxu1 %vm15438_vm0, %v22254_v21  ;;  %v21155_v13 = vadd.f32 %v7927_v8, %v7738_v18  ;;  %v9020_v61 = vld [vmem:[#allocation2 + $0x9a] sm:$0xff] }
 0xb49   :  { %v7626_v44 = vpop.f32.mrb[250].mxu0 }
 0xb4a   :  { %v7932_v29 = vpop.f32.mrb[26].mxu1  ;;  %v7739_v22 = vadd.f32 %v7626_v44, %v20894_v33  ;;  %v13836_v63 = vpop.f32.mrb[251].mxu0  ;;  %14272 = vmatmul.mubr.f32.gmra.mrb[100].mxu0 %v20901_v56 }
 0xb4b   :  { %v13943_v40 = vpop.f32.mrb[27].mxu1  ;;  %14379 = vmatmul.mubr.f32.gmra.mrb[132].mxu1 %v9016_v17  ;;  %14274 = vmatprep.mubr.msk.f32.mxu0 %vm15438_vm0, %v22254_v21  ;;  %v9021_v63 = vld [vmem:[#allocation2 + $0xa2] sm:$0xff] }
 0xb4c   :  { %14381 = vmatprep.mubr.msk.f32.mxu1 %vm15438_vm0, %v22254_v21  ;;  %v21163_v43 = vadd.f32 %v7932_v29, %v7739_v22 }
 0xb4d   :  { %v7631_v9 = vpop.f32.mrb[252].mxu0 }
 0xb4e   :  { %v7937_v3 = vpop.f32.mrb[28].mxu1  ;;  %v7740_v39 = vadd.f32 %v7631_v9, %v20903_v4  ;;  %v13839_v20 = vpop.f32.mrb[253].mxu0  ;;  %14275 = vmatmul.mubr.f32.gmra.mrb[102].mxu0 %v20910_v27 }
 0xb4f   :  { %v13946_v33 = vpop.f32.mrb[29].mxu1  ;;  %14382 = vmatmul.mubr.f32.gmra.mrb[134].mxu1 %v9017_v38  ;;  %14277 = vmatprep.mubr.msk.f32.mxu0 %vm15438_vm0, %v22254_v21 }
 0xb50   :  { %14384 = vmatprep.mubr.msk.f32.mxu1 %vm15438_vm0, %v22254_v21  ;;  %v21171_v56 = vadd.f32 %v7937_v3, %v7740_v39  ;;  %v9022_v39 = vld [vmem:[#allocation2 + $0xaa] sm:$0xff] }
 0xb51   :  { %v7636_v36 = vpop.f32.mrb[254].mxu0 }
 0xb52   :  { %v7942_v49 = vpop.f32.mrb[30].mxu1  ;;  %v7741_v47 = vadd.f32 %v7636_v36, %v20912_v42  ;;  %v13842_v50 = vpop.f32.mrb[255].mxu0  ;;  %14278 = vmatmul.mubr.f32.gmra.mrb[104].mxu0 %v20919_v30 }
 0xb53   :  { %v13949_v4 = vpop.f32.mrb[31].mxu1  ;;  %14385 = vmatmul.mubr.f32.gmra.mrb[136].mxu1 %v9018_v35  ;;  %14280 = vmatprep.mubr.msk.f32.mxu0 %vm15438_vm0, %v22254_v21  ;;  %v9023_v35 = vld [vmem:[#allocation2 + $0xb2] sm:$0xff] }
 0xb54   :  { %14387 = vmatprep.mubr.msk.f32.mxu1 %vm15438_vm0, %v22254_v21  ;;  %v21179_v27 = vadd.f32 %v7942_v49, %v7741_v47 }
 0xb55   :  { %v7641_v37 = vpop.f32.mrb[0].mxu0 }
 0xb56   :  { %v7947_v28 = vpop.f32.mrb[32].mxu1  ;;  %v7742_v8 = vadd.f32 %v7641_v37, %v20921_v2  ;;  %v13845_v0 = vpop.f32.mrb[1].mxu0  ;;  %14281 = vmatmul.mubr.f32.gmra.mrb[106].mxu0 %v20928_v34 }
 0xb57   :  { %v13952_v42 = vpop.f32.mrb[33].mxu1  ;;  %14388 = vmatmul.mubr.f32.gmra.mrb[138].mxu1 %v9019_v10  ;;  %14283 = vmatprep.mubr.msk.f32.mxu0 %vm15438_vm0, %v22254_v21 }
 0xb58   :  { %14390 = vmatprep.mubr.msk.f32.mxu1 %vm15438_vm0, %v22254_v21  ;;  %v21187_v30 = vadd.f32 %v7947_v28, %v7742_v8  ;;  %v9024_v28 = vld [vmem:[#allocation2 + $0xba] sm:$0xff] }
 0xb59   :  { %v7646_v18 = vpop.f32.mrb[2].mxu0 }
 0xb5a   :  { %v7952_v62 = vpop.f32.mrb[34].mxu1  ;;  %v7743_v44 = vadd.f32 %v7646_v18, %v20930_v7  ;;  %v13848_v29 = vpop.f32.mrb[3].mxu0  ;;  %14284 = vmatmul.mubr.f32.gmra.mrb[108].mxu0 %v20937_v41  ;;  %v9025_v18 = vld [vmem:[#allocation2 + $0xc2] sm:$0xff] }
 0xb5b   :  { %v13955_v2 = vpop.f32.mrb[35].mxu1  ;;  %14391 = vmatmul.mubr.f32.gmra.mrb[140].mxu1 %v9020_v61  ;;  %14286 = vmatprep.mubr.msk.f32.mxu0 %vm15438_vm0, %v22254_v21 }
 0xb5c   :  { %14393 = vmatprep.mubr.msk.f32.mxu1 %vm15438_vm0, %v22254_v21  ;;  %v21195_v34 = vadd.f32 %v7952_v62, %v7743_v44  ;;  %v9026_v2 = vld [vmem:[#allocation2 + $0xca] sm:$0xff] }
 0xb5d   :  { %v7651_v17 = vpop.f32.mrb[4].mxu0 }
 0xb5e   :  { %v7957_v22 = vpop.f32.mrb[36].mxu1  ;;  %v7744_v40 = vadd.f32 %v7651_v17, %v20939_v25  ;;  %v13851_v9 = vpop.f32.mrb[5].mxu0  ;;  %14287 = vmatmul.mubr.f32.gmra.mrb[110].mxu0 %v20946_v1 }
 0xb5f   :  { %v13958_v7 = vpop.f32.mrb[37].mxu1  ;;  %14394 = vmatmul.mubr.f32.gmra.mrb[142].mxu1 %v9021_v63  ;;  %14289 = vmatprep.mubr.msk.f32.mxu0 %vm15438_vm0, %v22254_v21  ;;  %v9027_v9 = vld [vmem:[#allocation2 + $0xd2] sm:$0xff] }
 0xb60   :  { %14396 = vmatprep.mubr.msk.f32.mxu1 %vm15438_vm0, %v22254_v21  ;;  %v21203_v41 = vadd.f32 %v7957_v22, %v7744_v40 }
 0xb61   :  { %v7656_v3 = vpop.f32.mrb[6].mxu0 }
 0xb62   :  { %v7962_v38 = vpop.f32.mrb[38].mxu1  ;;  %v7745_v20 = vadd.f32 %v7656_v3, %v20948_v26  ;;  %v13854_v33 = vpop.f32.mrb[7].mxu0  ;;  %14290 = vmatmul.mubr.f32.gmra.mrb[112].mxu0 %v20955_v46 }
 0xb63   :  { %v13961_v25 = vpop.f32.mrb[39].mxu1  ;;  %14397 = vmatmul.mubr.f32.gmra.mrb[144].mxu1 %v9022_v39  ;;  %14292 = vmatprep.mubr.msk.f32.mxu0 %vm15438_vm0, %v22254_v21 }
 0xb64   :  { %14399 = vmatprep.mubr.msk.f32.mxu1 %vm15438_vm0, %v22254_v21  ;;  %v21211_v1 = vadd.f32 %v7962_v38, %v7745_v20  ;;  %v9028_v38 = vld [vmem:[#allocation2 + $0xda] sm:$0xff] }
 0xb65   :  { %v7661_v36 = vpop.f32.mrb[8].mxu0 }
 0xb66   :  { %v7967_v49 = vpop.f32.mrb[40].mxu1  ;;  %v7746_v47 = vadd.f32 %v7661_v36, %v20957_v5  ;;  %v13857_v50 = vpop.f32.mrb[9].mxu0  ;;  %14293 = vmatmul.mubr.f32.gmra.mrb[114].mxu0 %v20964_v14 }
 0xb67   :  { %v13964_v26 = vpop.f32.mrb[41].mxu1  ;;  %14400 = vmatmul.mubr.f32.gmra.mrb[146].mxu1 %v9023_v35  ;;  %14295 = vmatprep.mubr.msk.f32.mxu0 %vm15438_vm0, %v22254_v21 }
 0xb68   :  { %14402 = vmatprep.mubr.msk.f32.mxu1 %vm15438_vm0, %v22254_v21  ;;  %v21219_v46 = vadd.f32 %v7967_v49, %v7746_v47  ;;  %v9310_v47 = vld [vmem:[#allocation2 + $0x1b] sm:$0xff] }
 0xb69   :  { %v7666_v4 = vpop.f32.mrb[10].mxu0 }
 0xb6a   :  { %v7972_v37 = vpop.f32.mrb[42].mxu1  ;;  %v7747_v10 = vadd.f32 %v7666_v4, %v20966_v32  ;;  %v13860_v8 = vpop.f32.mrb[11].mxu0  ;;  %14296 = vmatmul.mubr.f32.gmra.mrb[116].mxu0 %v20973_v12 }
 0xb6b   :  { %v13967_v5 = vpop.f32.mrb[43].mxu1  ;;  %14403 = vmatmul.mubr.f32.gmra.mrb[148].mxu1 %v9024_v28  ;;  %14298 = vmatprep.mubr.msk.f32.mxu0 %vm15438_vm0, %v22254_v21 }
 0xb6c   :  { %14405 = vmatprep.mubr.msk.f32.mxu1 %vm15438_vm0, %v22254_v21  ;;  %v21227_v14 = vadd.f32 %v7972_v37, %v7747_v10  ;;  %v9311_v10 = vld [vmem:[#allocation2 + $0x23] sm:$0xff] }
 0xb6d   :  { %v7671_v0 = vpop.f32.mrb[12].mxu0 }
 0xb6e   :  { %v7977_v42 = vpop.f32.mrb[44].mxu1  ;;  %v7748_v62 = vadd.f32 %v7671_v0, %v20975_v52  ;;  %v13863_v61 = vpop.f32.mrb[13].mxu0  ;;  %14299 = vmatmul.mubr.f32.gmra.mrb[118].mxu0 %v20982_v53 }
 0xb6f   :  { %v13970_v32 = vpop.f32.mrb[45].mxu1  ;;  %14406 = vmatmul.mubr.f32.gmra.mrb[150].mxu1 %v9025_v18  ;;  %14301 = vmatprep.mubr.msk.f32.mxu0 %vm15438_vm0, %v22254_v21 }
 0xb70   :  { %14408 = vmatprep.mubr.msk.f32.mxu1 %vm15438_vm0, %v22254_v21  ;;  %v21235_v12 = vadd.f32 %v7977_v42, %v7748_v62  ;;  %v9312_v62 = vld [vmem:[#allocation2 + $0x2b] sm:$0xff] }
 0xb71   :  { %v7676_v44 = vpop.f32.mrb[14].mxu0 }
 0xb72   :  { %v7982_v29 = vpop.f32.mrb[46].mxu1  ;;  %v7749_v17 = vadd.f32 %v7676_v44, %v20984_v57  ;;  %v13866_v22 = vpop.f32.mrb[15].mxu0  ;;  %14302 = vmatmul.mubr.f32.gmra.mrb[120].mxu0 %v20991_v24  ;;  %v8722_v24 = vld [vmem:[#allocation2 + $0xd9] sm:$0xff] }
 0xb73   :  { %v13973_v52 = vpop.f32.mrb[47].mxu1  ;;  %14409 = vmatmul.mubr.f32.gmra.mrb[152].mxu1 %v9026_v2  ;;  %14304 = vmatprep.mubr.msk.f32.mxu0 %vm15438_vm0, %v22254_v21 }
 0xb74   :  { %14411 = vmatprep.mubr.msk.f32.mxu1 %vm15438_vm0, %v22254_v21  ;;  %v21243_v53 = vadd.f32 %v7982_v29, %v7749_v17  ;;  %v9313_v17 = vld [vmem:[#allocation2 + $0x33] sm:$0xff] }
 0xb75   :  { %v7681_v63 = vpop.f32.mrb[16].mxu0 }
 0xb76   :  { %v7987_v40 = vpop.f32.mrb[48].mxu1  ;;  %v7750_v7 = vadd.f32 %v7681_v63, %v20993_v15  ;;  %v13869_v3 = vpop.f32.mrb[17].mxu0  ;;  %14305 = vmatmul.mubr.f32.gmra.mrb[122].mxu0 %v21006_v60 }
 0xb77   :  { %v13976_v57 = vpop.f32.mrb[49].mxu1  ;;  %14412 = vmatmul.mubr.f32.gmra.mrb[154].mxu1 %v9027_v9  ;;  %14307 = vmatprep.mubr.msk.f32.mxu0 %vm15438_vm0, %v22254_v21 }
 0xb78   :  { %14414 = vmatprep.mubr.msk.f32.mxu1 %vm15438_vm0, %v22254_v21  ;;  %v21251_v39 = vadd.f32 %v7987_v40, %v7750_v7  ;;  %v9314_v7 = vld [vmem:[#allocation2 + $0x3b] sm:$0xff] }
 0xb79   :  { %v7686_v20 = vpop.f32.mrb[18].mxu0 }
 0xb7a   :  { %v7992_v33 = vpop.f32.mrb[50].mxu1  ;;  %v7751_v25 = vadd.f32 %v7686_v20, %v21008_v48  ;;  %v13872_v15 = vpop.f32.mrb[19].mxu0  ;;  %14308 = vmatmul.mubr.f32.gmra.mrb[124].mxu0 %v8722_v24 }
 0xb7b   :  { %v13979_v36 = vpop.f32.mrb[51].mxu1  ;;  %14415 = vmatmul.mubr.f32.gmra.mrb[156].mxu1 %v9028_v38  ;;  %14449 = vmatprep.mubr.msk.f32.mxu0 %vm15438_vm0, %v22254_v21 }
 0xb7c   :  { %14556 = vmatprep.mubr.msk.f32.mxu1 %vm15438_vm0, %v22254_v21  ;;  %v21258_v60 = vadd.f32 %v7992_v33, %v7751_v25  ;;  %v9315_v33 = vld [vmem:[#allocation2 + $0x43] sm:$0xff] }
 0xb7d   :  { %v7691_v49 = vpop.f32.mrb[20].mxu0 }
 0xb7e   :  { %v7997_v35 = vpop.f32.mrb[52].mxu1  ;;  %v7752_v50 = vadd.f32 %v7691_v49, %v21021_v11  ;;  %v13875_v26 = vpop.f32.mrb[21].mxu0  ;;  %14450 = vmatmul.mubr.f32.vlgmr.msra.gmra.mrb[126].mxu0 %v9310_v47  ;;  %v9316_v47 = vld [vmem:[#allocation2 + $0x4b] sm:$0xff] }
 0xb7f   :  { %v13982_v4 = vpop.f32.mrb[53].mxu1  ;;  %14452 = vmatprep.mubr.msk.f32.mxu0 %vm15438_vm0, %v22254_v21 }
 0xb80   :  { %v21263_v48 = vadd.f32 %v7997_v35, %v7752_v50 }
 0xb81   :  { %v7696_v37 = vpop.f32.mrb[22].mxu0 }
 0xb82   :  { %v8002_v28 = vpop.f32.mrb[54].mxu1  ;;  %v7753_v8 = vadd.f32 %v7696_v37, %v21035_v59  ;;  %v13878_v5 = vpop.f32.mrb[23].mxu0  ;;  %14453 = vmatmul.mubr.f32.gmra.mrb[128].mxu0 %v9311_v10  ;;  %v9317_v10 = vld [vmem:[#allocation2 + $0x53] sm:$0xff] }
 0xb83   :  { %v13985_v0 = vpop.f32.mrb[55].mxu1  ;;  %14455 = vmatprep.mubr.msk.f32.mxu0 %vm15438_vm0, %v22254_v21 }
 0xb84   :  { %v21268_v11 = vadd.f32 %v8002_v28, %v7753_v8 }
 0xb85   :  { %v7701_v42 = vpop.f32.mrb[24].mxu0 }
 0xb86   :  { %v8007_v18 = vpop.f32.mrb[56].mxu1  ;;  %v7754_v61 = vadd.f32 %v7701_v42, %v21049_v23  ;;  %v13881_v32 = vpop.f32.mrb[25].mxu0  ;;  %14456 = vmatmul.mubr.f32.gmra.mrb[130].mxu0 %v9312_v62  ;;  %v9318_v62 = vld [vmem:[#allocation2 + $0x5b] sm:$0xff] }
 0xb87   :  { %v13988_v44 = vpop.f32.mrb[57].mxu1  ;;  %14458 = vmatprep.mubr.msk.f32.mxu0 %vm15438_vm0, %v22254_v21 }
 0xb88   :  { %v21273_v59 = vadd.f32 %v8007_v18, %v7754_v61 }
 0xb89   :  { %v8193_v29 = vpop.f32.mrb[26].mxu0 }
 0xb8a   :  { %v8499_v2 = vpop.f32.mrb[58].mxu1  ;;  %v8342_v22 = vadd.f32 %v8193_v29, %v21069_v19  ;;  %v14023_v52 = vpop.f32.mrb[27].mxu0  ;;  %14459 = vmatmul.mubr.f32.gmra.mrb[132].mxu0 %v9313_v17  ;;  %v9319_v17 = vld [vmem:[#allocation2 + $0x63] sm:$0xff] }
 0xb8b   :  { %v14130_v63 = vpop.f32.mrb[59].mxu1  ;;  %14461 = vmatprep.mubr.msk.f32.mxu0 %vm15438_vm0, %v22254_v21 }
 0xb8c   :  { %v21278_v23 = vadd.f32 %v8499_v2, %v8342_v22 }
 0xb8d   :  { %v8198_v40 = vpop.f32.mrb[28].mxu0 }
 0xb8e   :  { %v8504_v9 = vpop.f32.mrb[60].mxu1  ;;  %v8343_v3 = vadd.f32 %v8198_v40, %v21084_v45  ;;  %v14026_v57 = vpop.f32.mrb[29].mxu0  ;;  %14462 = vmatmul.mubr.f32.gmra.mrb[134].mxu0 %v9314_v7  ;;  %v9320_v7 = vld [vmem:[#allocation2 + $0x6b] sm:$0xff] }
 0xb8f   :  { %v14133_v24 = vpop.f32.mrb[61].mxu1  ;;  %14464 = vmatprep.mubr.msk.f32.mxu0 %vm15438_vm0, %v22254_v21 }
 0xb90   :  { %v21283_v19 = vadd.f32 %v8504_v9, %v8343_v3 }
 0xb91   :  { %v8203_v38 = vpop.f32.mrb[30].mxu0 }
 0xb92   :  { %v8509_v20 = vpop.f32.mrb[62].mxu1  ;;  %v8344_v25 = vadd.f32 %v8203_v38, %v21099_v16  ;;  %v14029_v15 = vpop.f32.mrb[31].mxu0  ;;  %14465 = vmatmul.mubr.f32.gmra.mrb[136].mxu0 %v9315_v33  ;;  %v9321_v33 = vld [vmem:[#allocation2 + $0x73] sm:$0xff] }
 0xb93   :  { %v14136_v36 = vpop.f32.mrb[63].mxu1  ;;  %14467 = vmatprep.mubr.msk.f32.mxu0 %vm15438_vm0, %v22254_v21 }
 0xb94   :  { %v21288_v45 = vadd.f32 %v8509_v20, %v8344_v25 }
 0xb95   :  { %v8208_v49 = vpop.f32.mrb[32].mxu0 }
 0xb96   :  { %v8514_v35 = vpop.f32.mrb[64].mxu1  ;;  %v8345_v50 = vadd.f32 %v8208_v49, %v21114_v6  ;;  %v14032_v26 = vpop.f32.mrb[33].mxu0  ;;  %14468 = vmatmul.mubr.f32.gmra.mrb[138].mxu0 %v9316_v47  ;;  %v9322_v47 = vld [vmem:[#allocation2 + $0x7b] sm:$0xff] }
 0xb97   :  { %v14139_v4 = vpop.f32.mrb[65].mxu1  ;;  %14470 = vmatprep.mubr.msk.f32.mxu0 %vm15438_vm0, %v22254_v21 }
 0xb98   :  { %v21293_v16 = vadd.f32 %v8514_v35, %v8345_v50 }
 0xb99   :  { %v8213_v37 = vpop.f32.mrb[34].mxu0 }
 0xb9a   :  { %v8519_v28 = vpop.f32.mrb[66].mxu1  ;;  %v8346_v8 = vadd.f32 %v8213_v37, %v21123_v31  ;;  %v14035_v5 = vpop.f32.mrb[35].mxu0  ;;  %14471 = vmatmul.mubr.f32.gmra.mrb[140].mxu0 %v9317_v10  ;;  %v9323_v10 = vld [vmem:[#allocation2 + $0x83] sm:$0xff] }
 0xb9b   :  { %v14142_v0 = vpop.f32.mrb[67].mxu1  ;;  %14473 = vmatprep.mubr.msk.f32.mxu0 %vm15438_vm0, %v22254_v21 }
 0xb9c   :  { %v21298_v6 = vadd.f32 %v8519_v28, %v8346_v8 }
 0xb9d   :  { %v8218_v42 = vpop.f32.mrb[36].mxu0 }
 0xb9e   :  { %v8524_v18 = vpop.f32.mrb[68].mxu1  ;;  %v8347_v61 = vadd.f32 %v8218_v42, %v21131_v54  ;;  %v14038_v32 = vpop.f32.mrb[37].mxu0  ;;  %14474 = vmatmul.mubr.f32.gmra.mrb[142].mxu0 %v9318_v62  ;;  %v9324_v62 = vld [vmem:[#allocation2 + $0x8b] sm:$0xff] }
 0xb9f   :  { %v14145_v44 = vpop.f32.mrb[69].mxu1  ;;  %14476 = vmatprep.mubr.msk.f32.mxu0 %vm15438_vm0, %v22254_v21 }
 0xba0   :  { %v21303_v31 = vadd.f32 %v8524_v18, %v8347_v61 }
 0xba1   :  { %v8223_v29 = vpop.f32.mrb[38].mxu0 }
 0xba2   :  { %v8529_v2 = vpop.f32.mrb[70].mxu1  ;;  %v8348_v22 = vadd.f32 %v8223_v29, %v21139_v55  ;;  %v14041_v52 = vpop.f32.mrb[39].mxu0  ;;  %14477 = vmatmul.mubr.f32.gmra.mrb[144].mxu0 %v9319_v17  ;;  %v9325_v17 = vld [vmem:[#allocation2 + $0x93] sm:$0xff] }
 0xba3   :  { %v14148_v63 = vpop.f32.mrb[71].mxu1  ;;  %14479 = vmatprep.mubr.msk.f32.mxu0 %vm15438_vm0, %v22254_v21 }
 0xba4   :  { %v21308_v54 = vadd.f32 %v8529_v2, %v8348_v22 }
 0xba5   :  { %v8228_v40 = vpop.f32.mrb[40].mxu0 }
 0xba6   :  { %v8534_v9 = vpop.f32.mrb[72].mxu1  ;;  %v8349_v3 = vadd.f32 %v8228_v40, %v21147_v51  ;;  %v14044_v57 = vpop.f32.mrb[41].mxu0  ;;  %14480 = vmatmul.mubr.f32.gmra.mrb[146].mxu0 %v9320_v7  ;;  %v9326_v7 = vld [vmem:[#allocation2 + $0x9b] sm:$0xff] }
 0xba7   :  { %v14151_v24 = vpop.f32.mrb[73].mxu1  ;;  %14482 = vmatprep.mubr.msk.f32.mxu0 %vm15438_vm0, %v22254_v21 }
 0xba8   :  { %v21313_v55 = vadd.f32 %v8534_v9, %v8349_v3 }
 0xba9   :  { %v8233_v38 = vpop.f32.mrb[42].mxu0 }
 0xbaa   :  { %v8539_v20 = vpop.f32.mrb[74].mxu1  ;;  %v8350_v25 = vadd.f32 %v8233_v38, %v21155_v13  ;;  %v14047_v15 = vpop.f32.mrb[43].mxu0  ;;  %14483 = vmatmul.mubr.f32.gmra.mrb[148].mxu0 %v9321_v33  ;;  %v9327_v33 = vld [vmem:[#allocation2 + $0xa3] sm:$0xff] }
 0xbab   :  { %v14154_v36 = vpop.f32.mrb[75].mxu1  ;;  %14485 = vmatprep.mubr.msk.f32.mxu0 %vm15438_vm0, %v22254_v21 }
 0xbac   :  { %v21318_v51 = vadd.f32 %v8539_v20, %v8350_v25 }
 0xbad   :  { %v8238_v49 = vpop.f32.mrb[44].mxu0 }
 0xbae   :  { %v8544_v35 = vpop.f32.mrb[76].mxu1  ;;  %v8351_v50 = vadd.f32 %v8238_v49, %v21163_v43  ;;  %v14050_v26 = vpop.f32.mrb[45].mxu0  ;;  %14486 = vmatmul.mubr.f32.gmra.mrb[150].mxu0 %v9322_v47  ;;  %v9328_v47 = vld [vmem:[#allocation2 + $0xab] sm:$0xff] }
 0xbaf   :  { %v14157_v4 = vpop.f32.mrb[77].mxu1  ;;  %14488 = vmatprep.mubr.msk.f32.mxu0 %vm15438_vm0, %v22254_v21 }
 0xbb0   :  { %v21323_v13 = vadd.f32 %v8544_v35, %v8351_v50 }
 0xbb1   :  { %v8243_v37 = vpop.f32.mrb[46].mxu0 }
 0xbb2   :  { %v8549_v28 = vpop.f32.mrb[78].mxu1  ;;  %v8352_v8 = vadd.f32 %v8243_v37, %v21171_v56  ;;  %v14053_v5 = vpop.f32.mrb[47].mxu0  ;;  %14489 = vmatmul.mubr.f32.gmra.mrb[152].mxu0 %v9323_v10  ;;  %v9329_v10 = vld [vmem:[#allocation2 + $0xb3] sm:$0xff] }
 0xbb3   :  { %v14160_v0 = vpop.f32.mrb[79].mxu1  ;;  %14491 = vmatprep.mubr.msk.f32.mxu0 %vm15438_vm0, %v22254_v21 }
 0xbb4   :  { %v21328_v43 = vadd.f32 %v8549_v28, %v8352_v8 }
 0xbb5   :  { %v8248_v42 = vpop.f32.mrb[48].mxu0 }
 0xbb6   :  { %v8554_v18 = vpop.f32.mrb[80].mxu1  ;;  %v8353_v61 = vadd.f32 %v8248_v42, %v21179_v27  ;;  %v14056_v32 = vpop.f32.mrb[49].mxu0  ;;  %14492 = vmatmul.mubr.f32.gmra.mrb[154].mxu0 %v9324_v62  ;;  %v9330_v62 = vld [vmem:[#allocation2 + $0xbb] sm:$0xff] }
 0xbb7   :  { %v14163_v44 = vpop.f32.mrb[81].mxu1  ;;  %14494 = vmatprep.mubr.msk.f32.mxu0 %vm15438_vm0, %v22254_v21 }
 0xbb8   :  { %v21333_v56 = vadd.f32 %v8554_v18, %v8353_v61 }
 0xbb9   :  { %v8253_v29 = vpop.f32.mrb[50].mxu0 }
 0xbba   :  { %v8559_v2 = vpop.f32.mrb[82].mxu1  ;;  %v8354_v22 = vadd.f32 %v8253_v29, %v21187_v30  ;;  %v14059_v52 = vpop.f32.mrb[51].mxu0  ;;  %14495 = vmatmul.mubr.f32.gmra.mrb[156].mxu0 %v9325_v17  ;;  %v9331_v17 = vld [vmem:[#allocation2 + $0xc3] sm:$0xff] }
 0xbbb   :  { %v14166_v63 = vpop.f32.mrb[83].mxu1  ;;  %14497 = vmatprep.mubr.msk.f32.mxu0 %vm15438_vm0, %v22254_v21 }
 0xbbc   :  { %v21338_v27 = vadd.f32 %v8559_v2, %v8354_v22 }
 0xbbd   :  { %v8258_v40 = vpop.f32.mrb[52].mxu0 }
 0xbbe   :  { %v8564_v9 = vpop.f32.mrb[84].mxu1  ;;  %v8355_v3 = vadd.f32 %v8258_v40, %v21195_v34  ;;  %v14062_v57 = vpop.f32.mrb[53].mxu0  ;;  %14498 = vmatmul.mubr.f32.gmra.mrb[158].mxu0 %v9326_v7  ;;  %v9332_v7 = vld [vmem:[#allocation2 + $0xcb] sm:$0xff] }
 0xbbf   :  { %v14169_v24 = vpop.f32.mrb[85].mxu1  ;;  %14500 = vmatprep.mubr.msk.f32.mxu0 %vm15438_vm0, %v22254_v21 }
 0xbc0   :  { %v21343_v30 = vadd.f32 %v8564_v9, %v8355_v3 }
 0xbc1   :  { %v8263_v38 = vpop.f32.mrb[54].mxu0 }
 0xbc2   :  { %v8569_v20 = vpop.f32.mrb[86].mxu1  ;;  %v8356_v25 = vadd.f32 %v8263_v38, %v21203_v41  ;;  %v14065_v15 = vpop.f32.mrb[55].mxu0  ;;  %14501 = vmatmul.mubr.f32.gmra.mrb[160].mxu0 %v9327_v33  ;;  %v9333_v33 = vld [vmem:[#allocation2 + $0xd3] sm:$0xff] }
 0xbc3   :  { %v14172_v36 = vpop.f32.mrb[87].mxu1  ;;  %14503 = vmatprep.mubr.msk.f32.mxu0 %vm15438_vm0, %v22254_v21 }
 0xbc4   :  { %v21348_v34 = vadd.f32 %v8569_v20, %v8356_v25 }
 0xbc5   :  { %v8268_v49 = vpop.f32.mrb[56].mxu0 }
 0xbc6   :  { %v8574_v35 = vpop.f32.mrb[88].mxu1  ;;  %v8357_v50 = vadd.f32 %v8268_v49, %v21211_v1  ;;  %v14068_v26 = vpop.f32.mrb[57].mxu0  ;;  %14504 = vmatmul.mubr.f32.gmra.mrb[162].mxu0 %v9328_v47 }
 0xbc7   :  { %v14175_v4 = vpop.f32.mrb[89].mxu1  ;;  %14506 = vmatprep.mubr.msk.f32.mxu0 %vm15438_vm0, %v22254_v21 }
 0xbc8   :  { %v21353_v41 = vadd.f32 %v8574_v35, %v8357_v50 }
 0xbc9   :  { %v8273_v37 = vpop.f32.mrb[58].mxu0 }
 0xbca   :  { %v8579_v28 = vpop.f32.mrb[90].mxu1  ;;  %v8358_v8 = vadd.f32 %v8273_v37, %v21219_v46  ;;  %v14071_v5 = vpop.f32.mrb[59].mxu0  ;;  %14507 = vmatmul.mubr.f32.gmra.mrb[164].mxu0 %v9329_v10 }
 0xbcb   :  { %v14178_v0 = vpop.f32.mrb[91].mxu1  ;;  %14509 = vmatprep.mubr.msk.f32.mxu0 %vm15438_vm0, %v22254_v21 }
 0xbcc   :  { %v21358_v1 = vadd.f32 %v8579_v28, %v8358_v8 }
 0xbcd   :  { %v8278_v42 = vpop.f32.mrb[60].mxu0 }
 0xbce   :  { %v8584_v18 = vpop.f32.mrb[92].mxu1  ;;  %v8359_v61 = vadd.f32 %v8278_v42, %v21227_v14  ;;  %v14074_v32 = vpop.f32.mrb[61].mxu0  ;;  %14510 = vmatmul.mubr.f32.gmra.mrb[166].mxu0 %v9330_v62 }
 0xbcf   :  { %v14181_v44 = vpop.f32.mrb[93].mxu1  ;;  %14512 = vmatprep.mubr.msk.f32.mxu0 %vm15438_vm0, %v22254_v21 }
 0xbd0   :  { %v21363_v46 = vadd.f32 %v8584_v18, %v8359_v61  ;;  %v9803_v44 = vld [vmem:[%s22138_s6] sm:$0xff] }
 0xbd1   :  { %v8283_v29 = vpop.f32.mrb[62].mxu0 }
 0xbd2   :  { %v8589_v2 = vpop.f32.mrb[94].mxu1  ;;  %v8360_v22 = vadd.f32 %v8283_v29, %v21235_v12  ;;  %v14077_v52 = vpop.f32.mrb[63].mxu0  ;;  %14513 = vmatmul.mubr.f32.gmra.mrb[168].mxu0 %v9331_v17 }
 0xbd3   :  { %v14184_v63 = vpop.f32.mrb[95].mxu1  ;;  %14515 = vmatprep.mubr.msk.f32.mxu0 %vm15438_vm0, %v22254_v21 }
 0xbd4   :  { %v21368_v14 = vadd.f32 %v8589_v2, %v8360_v22 }
 0xbd5   :  { %v8288_v40 = vpop.f32.mrb[64].mxu0 }
 0xbd6   :  { %v8594_v9 = vpop.f32.mrb[96].mxu1  ;;  %v8361_v3 = vadd.f32 %v8288_v40, %v21243_v53  ;;  %v14080_v57 = vpop.f32.mrb[65].mxu0  ;;  %14516 = vmatmul.mubr.f32.gmra.mrb[170].mxu0 %v9332_v7  ;;  %v9334_v53 = vld [vmem:[#allocation2 + $0xdb] sm:$0xff] }
 0xbd7   :  { %v14187_v24 = vpop.f32.mrb[97].mxu1  ;;  %14518 = vmatprep.mubr.msk.f32.mxu0 %vm15438_vm0, %v22254_v21 }
 0xbd8   :  { %v21373_v12 = vadd.f32 %v8594_v9, %v8361_v3 }
 0xbd9   :  { %v8293_v38 = vpop.f32.mrb[66].mxu0 }
 0xbda   :  { %v8599_v20 = vpop.f32.mrb[98].mxu1  ;;  %v8362_v25 = vadd.f32 %v8293_v38, %v21251_v39  ;;  %v14083_v15 = vpop.f32.mrb[67].mxu0  ;;  %14519 = vmatmul.mubr.f32.gmra.mrb[172].mxu0 %v9333_v33 }
 0xbdb   :  { %v14190_v36 = vpop.f32.mrb[99].mxu1  ;;  %14521 = vmatprep.mubr.msk.f32.mxu0 %vm15438_vm0, %v22254_v21 }
 0xbdc   :  { %v21378_v49 = vadd.f32 %v8599_v20, %v8362_v25  ;;  %v9805_v36 = vld [vmem:[%s22138_s6 + $0x10] sm:$0xff] }
 0xbdd   :  { %v8298_v35 = vpop.f32.mrb[68].mxu0 }
 0xbde   :  { %v8604_v47 = vpop.f32.mrb[100].mxu1  ;;  %v8363_v50 = vadd.f32 %v8298_v35, %v21258_v60  ;;  %v14086_v26 = vpop.f32.mrb[69].mxu0  ;;  %14522 = vmatmul.mubr.f32.gmra.mrb[174].mxu0 %v9334_v53 }
 0xbdf   :  { %v14193_v4 = vpop.f32.mrb[101].mxu1 }
 0xbe0   :  { %v21381_v37 = vadd.f32 %v8604_v47, %v8363_v50 }
 0xbe1   :  { %v8303_v28 = vpop.f32.mrb[70].mxu0 }
 0xbe2   :  { %v8609_v39 = vpop.f32.mrb[102].mxu1  ;;  %v8364_v10 = vadd.f32 %v8303_v28, %v21263_v48  ;;  %v14089_v8 = vpop.f32.mrb[71].mxu0  ;;  %v9804_v48 = vld [vmem:[%s22138_s6 + $0x8] sm:$0xff] }
 0xbe3   :  { %v14196_v5 = vpop.f32.mrb[103].mxu1  ;;  %v21395_v17 = vpack.c.bf16 %v9804_v48, %v9803_v44  ;;  %v9807_v48 = vld [vmem:[%s22138_s6 + $0x20] sm:$0xff] }
 0xbe4   :  { %v21384_v0 = vadd.f32 %v8609_v39, %v8364_v10 }
 0xbe5   :  { %v8308_v42 = vpop.f32.mrb[72].mxu0  ;;  %15340 = vmatpush3.bf16.msra.mxu1 %v21395_v17 }
 0xbe6   :  { %v8614_v18 = vpop.f32.mrb[104].mxu1  ;;  %v8365_v62 = vadd.f32 %v8308_v42, %v21268_v11  ;;  %v14092_v61 = vpop.f32.mrb[73].mxu0  ;;  %15341 = vmatprep.subr.bf16.mxu1 %v22252_v58 }
 0xbe7   :  { %v14199_v32 = vpop.f32.mrb[105].mxu1 }
 0xbe8   :  { %v21387_v60 = vadd.f32 %v8614_v18, %v8365_v62 }
 0xbe9   :  { %v8313_v29 = vpop.f32.mrb[74].mxu0 }
 0xbea   :  { %v8619_v2 = vpop.f32.mrb[106].mxu1  ;;  %v8366_v22 = vadd.f32 %v8313_v29, %v21273_v59  ;;  %v14095_v52 = vpop.f32.mrb[75].mxu0 }
 0xbeb   :  { %v14202_v11 = vpop.f32.mrb[107].mxu1 }
 0xbec   :  { %v21399_v63 = vadd.f32 %v8619_v2, %v8366_v22 }
 0xbed   :  { %v8805_v40 = vpop.f32.mrb[76].mxu0 }
 0xbee   :  { %v9111_v9 = vpop.f32.mrb[108].mxu1  ;;  %v8954_v7 = vadd.f32 %v8805_v40, %v21278_v23  ;;  %v14237_v3 = vpop.f32.mrb[77].mxu0  ;;  %v9806_v23 = vld [vmem:[%s22138_s6 + $0x18] sm:$0xff] }
 0xbef   :  { %v14344_v57 = vpop.f32.mrb[109].mxu1  ;;  %v21414_v47 = vpack.c.bf16 %v9806_v23, %v9805_v36 }
 0xbf0   :  { %v21403_v24 = vadd.f32 %v9111_v9, %v8954_v7 }
 0xbf1   :  { %v8810_v38 = vpop.f32.mrb[78].mxu0  ;;  %15343 = vmatpush3.bf16.msra.mxu1 %v21414_v47 }
 0xbf2   :  { %v9116_v20 = vpop.f32.mrb[110].mxu1  ;;  %v8955_v59 = vadd.f32 %v8810_v38, %v21283_v19  ;;  %v14240_v33 = vpop.f32.mrb[79].mxu0  ;;  %15344 = vmatprep.subr.bf16.mxu1 %v22252_v58 }
 0xbf3   :  { %v14347_v25 = vpop.f32.mrb[111].mxu1 }
 0xbf4   :  { %v21406_v15 = vadd.f32 %v9116_v20, %v8955_v59 }
 0xbf5   :  { %v8815_v53 = vpop.f32.mrb[80].mxu0 }
 0xbf6   :  { %v9121_v35 = vpop.f32.mrb[112].mxu1  ;;  %v8956_v50 = vadd.f32 %v8815_v53, %v21288_v45  ;;  %v14243_v26 = vpop.f32.mrb[81].mxu0 }
 0xbf7   :  { %v14350_v19 = vpop.f32.mrb[113].mxu1 }
 0xbf8   :  { %v21418_v4 = vadd.f32 %v9121_v35, %v8956_v50 }
 0xbf9   :  { %v8820_v28 = vpop.f32.mrb[82].mxu0 }
 0xbfa   :  { %v9126_v39 = vpop.f32.mrb[114].mxu1  ;;  %v8957_v10 = vadd.f32 %v8820_v28, %v21293_v16  ;;  %v14246_v8 = vpop.f32.mrb[83].mxu0  ;;  %v9808_v16 = vld [vmem:[%s22138_s6 + $0x28] sm:$0xff] }
 0xbfb   :  { %v14353_v5 = vpop.f32.mrb[115].mxu1  ;;  %v21433_v22 = vpack.c.bf16 %v9808_v16, %v9807_v48 }
 0xbfc   :  { %v21422_v42 = vadd.f32 %v9126_v39, %v8957_v10 }
 0xbfd   :  { %v8825_v18 = vpop.f32.mrb[84].mxu0  ;;  %15346 = vmatpush3.bf16.msra.mxu1 %v21433_v22 }
 0xbfe   :  { %v9131_v62 = vpop.f32.mrb[116].mxu1  ;;  %v8958_v45 = vadd.f32 %v8825_v18, %v21298_v6  ;;  %v14249_v61 = vpop.f32.mrb[85].mxu0  ;;  %15347 = vmatprep.subr.bf16.mxu1 %v22252_v58 }
 0xbff   :  { %v14356_v32 = vpop.f32.mrb[117].mxu1 }
 0xc00   :  { %v21425_v44 = vadd.f32 %v9131_v62, %v8958_v45 }
 0xc01   :  { %v8830_v29 = vpop.f32.mrb[86].mxu0 }
 0xc02   :  { %v9136_v2 = vpop.f32.mrb[118].mxu1  ;;  %v8959_v52 = vadd.f32 %v8830_v29, %v21303_v31  ;;  %v14252_v11 = vpop.f32.mrb[87].mxu0 }
 0xc03   :  { %v14359_v6 = vpop.f32.mrb[119].mxu1 }
 0xc04   :  { %v21437_v40 = vadd.f32 %v9136_v2, %v8959_v52 }
 0xc05   :  { %v8835_v9 = vpop.f32.mrb[88].mxu0 }
 0xc06   :  { %v9141_v7 = vpop.f32.mrb[120].mxu1  ;;  %v8960_v3 = vadd.f32 %v8835_v9, %v21308_v54  ;;  %v14255_v57 = vpop.f32.mrb[89].mxu0  ;;  %v9809_v54 = vld [vmem:[%s22138_s6 + $0x30] sm:$0xff] }
 0xc07   :  { %v14362_v38 = vpop.f32.mrb[121].mxu1 }
 0xc08   :  { %v21441_v20 = vadd.f32 %v9141_v7, %v8960_v3  ;;  %v9811_v7 = vld [vmem:[%s22138_s6 + $0x40] sm:$0xff] }
 0xc09   :  { %v8840_v59 = vpop.f32.mrb[90].mxu0 }
 0xc0a   :  { %v9146_v33 = vpop.f32.mrb[122].mxu1  ;;  %v8961_v31 = vadd.f32 %v8840_v59, %v21313_v55  ;;  %v14258_v25 = vpop.f32.mrb[91].mxu0  ;;  %v9810_v55 = vld [vmem:[%s22138_s6 + $0x38] sm:$0xff] }
 0xc0b   :  { %v14365_v36 = vpop.f32.mrb[123].mxu1  ;;  %v21455_v8 = vpack.c.bf16 %v9810_v55, %v9809_v54 }
 0xc0c   :  { %v21444_v23 = vadd.f32 %v9146_v33, %v8961_v31 }
 0xc0d   :  { %v8845_v53 = vpop.f32.mrb[92].mxu0  ;;  %15349 = vmatpush3.bf16.msra.mxu1 %v21455_v8 }
 0xc0e   :  { %v9151_v35 = vpop.f32.mrb[124].mxu1  ;;  %v8962_v50 = vadd.f32 %v8845_v53, %v21318_v51  ;;  %v14261_v26 = vpop.f32.mrb[93].mxu0  ;;  %15350 = vmatprep.subr.bf16.mxu1 %v22252_v58 }
 0xc0f   :  { %v14368_v19 = vpop.f32.mrb[125].mxu1 }
 0xc10   :  { %v21447_v28 = vadd.f32 %v9151_v35, %v8962_v50 }
 0xc11   :  { %v8850_v39 = vpop.f32.mrb[94].mxu0 }
 0xc12   :  { %v9156_v10 = vpop.f32.mrb[126].mxu1  ;;  %v8963_v5 = vadd.f32 %v8850_v39, %v21323_v13  ;;  %v14264_v18 = vpop.f32.mrb[95].mxu0 }
 0xc13   :  { %v14371_v51 = vpop.f32.mrb[127].mxu1 }
 0xc14   :  { %v21459_v62 = vadd.f32 %v9156_v10, %v8963_v5  ;;  %v9813_v5 = vld [vmem:[%s22138_s6 + $0x50] sm:$0xff] }
 0xc15   :  { %v8855_v45 = vpop.f32.mrb[96].mxu0 }
 0xc16   :  { %v9161_v61 = vpop.f32.mrb[128].mxu1  ;;  %v8964_v32 = vadd.f32 %v8855_v45, %v21328_v43  ;;  %v14267_v48 = vpop.f32.mrb[97].mxu0  ;;  %v9812_v43 = vld [vmem:[%s22138_s6 + $0x48] sm:$0xff] }
 0xc17   :  { %v14374_v16 = vpop.f32.mrb[129].mxu1  ;;  %v21474_v38 = vpack.c.bf16 %v9812_v43, %v9811_v7 }
 0xc18   :  { %v21463_v29 = vadd.f32 %v9161_v61, %v8964_v32 }
 0xc19   :  { %v8860_v2 = vpop.f32.mrb[98].mxu0  ;;  %15352 = vmatpush3.bf16.msra.mxu1 %v21474_v38 }
 0xc1a   :  { %v9166_v52 = vpop.f32.mrb[130].mxu1  ;;  %v8965_v13 = vadd.f32 %v8860_v2, %v21333_v56  ;;  %v14270_v11 = vpop.f32.mrb[99].mxu0  ;;  %15353 = vmatprep.subr.bf16.mxu1 %v22252_v58 }
 0xc1b   :  { %v14377_v6 = vpop.f32.mrb[131].mxu1 }
 0xc1c   :  { %v21466_v9 = vadd.f32 %v9166_v52, %v8965_v13 }
 0xc1d   :  { %v8865_v3 = vpop.f32.mrb[100].mxu0 }
 0xc1e   :  { %v9171_v57 = vpop.f32.mrb[132].mxu1  ;;  %v8966_v59 = vadd.f32 %v8865_v3, %v21338_v27  ;;  %v14273_v33 = vpop.f32.mrb[101].mxu0 }
 0xc1f   :  { %v14380_v56 = vpop.f32.mrb[133].mxu1  ;;  %v9815_v33 = vld [vmem:[%s22138_s6 + $0x60] sm:$0xff] }
 0xc20   :  { %v21478_v31 = vadd.f32 %v9171_v57, %v8966_v59 }
 0xc21   :  { %v8870_v25 = vpop.f32.mrb[102].mxu0 }
 0xc22   :  { %v9176_v36 = vpop.f32.mrb[134].mxu1  ;;  %v8967_v53 = vadd.f32 %v8870_v25, %v21343_v30  ;;  %v14276_v35 = vpop.f32.mrb[103].mxu0  ;;  %v9814_v30 = vld [vmem:[%s22138_s6 + $0x58] sm:$0xff] }
 0xc23   :  { %v14383_v50 = vpop.f32.mrb[135].mxu1  ;;  %v21493_v45 = vpack.c.bf16 %v9814_v30, %v9813_v5 }
 0xc24   :  { %v21482_v26 = vadd.f32 %v9176_v36, %v8967_v53 }
 0xc25   :  { %v8875_v19 = vpop.f32.mrb[104].mxu0  ;;  %15355 = vmatpush3.bf16.msra.mxu1 %v21493_v45 }
 0xc26   :  { %v9181_v54 = vpop.f32.mrb[136].mxu1  ;;  %v8968_v27 = vadd.f32 %v8875_v19, %v21348_v34  ;;  %v14279_v55 = vpop.f32.mrb[105].mxu0  ;;  %15356 = vmatprep.subr.bf16.mxu1 %v22252_v58 }
 0xc27   :  { %v14386_v39 = vpop.f32.mrb[137].mxu1 }
 0xc28   :  { %v21485_v10 = vadd.f32 %v9181_v54, %v8968_v27 }
 0xc29   :  { %v8880_v18 = vpop.f32.mrb[106].mxu0 }
 0xc2a   :  { %v9186_v51 = vpop.f32.mrb[138].mxu1  ;;  %v8969_v61 = vadd.f32 %v8880_v18, %v21353_v41  ;;  %v14282_v32 = vpop.f32.mrb[107].mxu0 }
 0xc2b   :  { %v14389_v34 = vpop.f32.mrb[139].mxu1 }
 0xc2c   :  { %v21497_v48 = vadd.f32 %v9186_v51, %v8969_v61 }
 0xc2d   :  { %v8885_v16 = vpop.f32.mrb[108].mxu0 }
 0xc2e   :  { %v9191_v2 = vpop.f32.mrb[140].mxu1  ;;  %v8970_v52 = vadd.f32 %v8885_v16, %v21358_v1  ;;  %v14285_v13 = vpop.f32.mrb[109].mxu0  ;;  %v9816_v1 = vld [vmem:[%s22138_s6 + $0x68] sm:$0xff] }
 0xc2f   :  { %v14392_v11 = vpop.f32.mrb[141].mxu1  ;;  %v21512_v36 = vpack.c.bf16 %v9816_v1, %v9815_v33 }
 0xc30   :  { %v21501_v6 = vadd.f32 %v9191_v2, %v8970_v52 }
 0xc31   :  { %v8890_v7 = vpop.f32.mrb[110].mxu0  ;;  %15358 = vmatpush3.bf16.msra.mxu1 %v21512_v36 }
 0xc32   :  { %v9196_v43 = vpop.f32.mrb[142].mxu1  ;;  %v8971_v41 = vadd.f32 %v8890_v7, %v21363_v46  ;;  %v14288_v3 = vpop.f32.mrb[111].mxu0  ;;  %15359 = vmatprep.subr.bf16.mxu1 %v22252_v58 }
 0xc33   :  { %v14395_v57 = vpop.f32.mrb[143].mxu1 }
 0xc34   :  { %v21504_v59 = vadd.f32 %v9196_v43, %v8971_v41 }
 0xc35   :  { %v8895_v56 = vpop.f32.mrb[112].mxu0 }
 0xc36   :  { %v9201_v25 = vpop.f32.mrb[144].mxu1  ;;  %v8972_v53 = vadd.f32 %v8895_v56, %v21368_v14  ;;  %v14291_v35 = vpop.f32.mrb[113].mxu0 }
 0xc37   :  { %v14398_v46 = vpop.f32.mrb[145].mxu1 }
 0xc38   :  { %v21516_v50 = vadd.f32 %v9201_v25, %v8972_v53 }
 0xc39   :  { %v8900_v19 = vpop.f32.mrb[114].mxu0 }
 0xc3a   :  { %v9206_v54 = vpop.f32.mrb[146].mxu1  ;;  %v8973_v27 = vadd.f32 %v8900_v19, %v21373_v12  ;;  %v14294_v55 = vpop.f32.mrb[115].mxu0  ;;  %v9817_v12 = vld [vmem:[%s22138_s6 + $0x70] sm:$0xff] }
 0xc3b   :  { %v14401_v39 = vpop.f32.mrb[147].mxu1 }
 0xc3c   :  { %v21520_v5 = vadd.f32 %v9206_v54, %v8973_v27 }
 0xc3d   :  { %v8905_v30 = vpop.f32.mrb[116].mxu0 }
 0xc3e   :  { %v9211_v18 = vpop.f32.mrb[148].mxu1  ;;  %v8974_v14 = vadd.f32 %v8905_v30, %v21378_v49  ;;  %v14297_v51 = vpop.f32.mrb[117].mxu0  ;;  %v9818_v49 = vld [vmem:[%s22138_s6 + $0x78] sm:$0xff] }
 0xc3f   :  { %v14404_v61 = vpop.f32.mrb[149].mxu1  ;;  %v21534_v41 = vpack.c.bf16 %v9818_v49, %v9817_v12 }
 0xc40   :  { %v21523_v32 = vadd.f32 %v9211_v18, %v8974_v14 }
 0xc41   :  { %v8910_v34 = vpop.f32.mrb[118].mxu0  ;;  %15361 = vmatpush3.bf16.msra.mxu1 %v21534_v41 }
 0xc42   :  { %v9216_v16 = vpop.f32.mrb[150].mxu1  ;;  %v8975_v2 = vadd.f32 %v8910_v34, %v21381_v37  ;;  %v14300_v52 = vpop.f32.mrb[119].mxu0  ;;  %15362 = vmatprep.subr.bf16.mxu1 %v22252_v58 }
 0xc43   :  { %v14407_v13 = vpop.f32.mrb[151].mxu1 }
 0xc44   :  { %v21526_v11 = vadd.f32 %v9216_v16, %v8975_v2 }
 0xc45   :  { %v8915_v7 = vpop.f32.mrb[120].mxu0 }
 0xc46   :  { %v9221_v43 = vpop.f32.mrb[152].mxu1  ;;  %v8976_v3 = vadd.f32 %v8915_v7, %v21384_v0  ;;  %v14303_v57 = vpop.f32.mrb[121].mxu0 }
 0xc47   :  { %v14410_v37 = vpop.f32.mrb[153].mxu1 }
 0xc48   :  { %v21538_v33 = vadd.f32 %v9221_v43, %v8976_v3 }
 0xc49   :  { %v8920_v1 = vpop.f32.mrb[122].mxu0 }
 0xc4a   :  { %v9226_v56 = vpop.f32.mrb[154].mxu1  ;;  %v8977_v25 = vadd.f32 %v8920_v1, %v21387_v60  ;;  %v14306_v53 = vpop.f32.mrb[123].mxu0 }
 0xc4b   :  { %v14413_v35 = vpop.f32.mrb[155].mxu1 }
 0xc4c   :  { %v21542_v46 = vadd.f32 %v9226_v56, %v8977_v25 }
 0xc4d   :  { %v8925_v19 = vpop.f32.mrb[124].mxu0 }
 0xc4e   :  { %v9231_v54 = vpop.f32.mrb[156].mxu1  ;;  %v8978_v0 = vadd.f32 %v8925_v19, %v21399_v63  ;;  %v14309_v27 = vpop.f32.mrb[125].mxu0 }
 0xc4f   :  { %v14416_v55 = vpop.f32.mrb[157].mxu1 }
 0xc50   :  { %v21545_v39 = vadd.f32 %v9231_v54, %v8978_v0 }
 0xc51   :  { %v9417_v30 = vpop.f32.mrb[126].mxu0 }
 0xc52   :  { %v9566_v18 = vadd.f32 %v9417_v30, %v21403_v24  ;;  %v14451_v14 = vpop.f32.mrb[127].mxu0 }
 0xc55   :  { %v9422_v51 = vpop.f32.mrb[128].mxu0 }
 0xc56   :  { %v9567_v61 = vadd.f32 %v9422_v51, %v21406_v15  ;;  %v14454_v60 = vpop.f32.mrb[129].mxu0 }
 0xc57   :  { %v21576_v60 = vld [vmem:[%s22140_s5] sm:$0xff] }
 0xc59   :  { %v9427_v34 = vpop.f32.mrb[130].mxu0 }
 0xc5a   :  { %v9568_v16 = vadd.f32 %v9427_v34, %v21418_v4  ;;  %v14457_v2 = vpop.f32.mrb[131].mxu0 }
 0xc5d   :  { %v9432_v52 = vpop.f32.mrb[132].mxu0 }
 0xc5e   :  { %v9569_v13 = vadd.f32 %v9432_v52, %v21422_v42  ;;  %v14460_v63 = vpop.f32.mrb[133].mxu0 }
 0xc61   :  { %v9437_v12 = vpop.f32.mrb[134].mxu0 }
 0xc62   :  { %v9570_v49 = vadd.f32 %v9437_v12, %v21425_v44  ;;  %v14463_v7 = vpop.f32.mrb[135].mxu0 }
 0xc65   :  { %v9442_v43 = vpop.f32.mrb[136].mxu0 }
 0xc66   :  { %v9571_v24 = vadd.f32 %v9442_v43, %v21437_v40  ;;  %v14466_v3 = vpop.f32.mrb[137].mxu0 }
 0xc69   :  { %v9447_v57 = vpop.f32.mrb[138].mxu0 }
 0xc6a   :  { %v9572_v15 = vadd.f32 %v9447_v57, %v21441_v20  ;;  %v14469_v37 = vpop.f32.mrb[139].mxu0 }
 0xc6d   :  { %v9452_v1 = vpop.f32.mrb[140].mxu0 }
 0xc6e   :  { %v9573_v4 = vadd.f32 %v9452_v1, %v21444_v23  ;;  %v14472_v56 = vpop.f32.mrb[141].mxu0  ;;  %v21562_v23 = vld [vmem:[%s22139_s2] ss:$0 sm:$0xff] }
 0xc6f   :  { %v9673_v51 = vadd.f32 %v21562_v23, %v9566_v18  ;;  %v9676_v2 = vadd.f32 %v21562_v23, %v9569_v13  ;;  %v9677_v7 = vadd.f32 %v21562_v23, %v9570_v49  ;;  %v21603_v13 = vld [vmem:[%s22140_s5 + $0x20] sm:$0xff]  ;;  %v9678_v57 = vadd.f32 %v21562_v23, %v9571_v24  ;;  %v21615_v49 = vld [vmem:[%s22140_s5 + $0x28] sm:$0xff] }
 0xc71   :  { %v9457_v25 = vpop.f32.mrb[142].mxu0  ;;  %v21594_v63 = vmul.f32 %v9673_v51, %v21576_v60 }
 0xc72   :  { %v9574_v42 = vadd.f32 %v9457_v25, %v21447_v28  ;;  %v14475_v53 = vpop.f32.mrb[143].mxu0  ;;  %v9674_v28 = vadd.f32 %v21562_v23, %v9567_v61  ;;  %v21581_v61 = vld [vmem:[%s22140_s5 + $0x10] sm:$0xff]  ;;  %v21619_v25 = vmul.f32 %v9677_v7, %v21603_v13 }
 0xc73   :  { %v9679_v53 = vadd.f32 %v21562_v23, %v9572_v15  ;;  %v21636_v15 = vld [vmem:[%s22140_s5 + $0x38] sm:$0xff] }
 0xc75   :  { %v9462_v35 = vpop.f32.mrb[144].mxu0 }
 0xc76   :  { %v9575_v44 = vadd.f32 %v9462_v35, %v21459_v62  ;;  %v14478_v19 = vpop.f32.mrb[145].mxu0  ;;  %v21625_v35 = vld [vmem:[%s22140_s5 + $0x30] sm:$0xff] }
 0xc77   :  { %v21629_v19 = vmul.f32 %v9678_v57, %v21615_v49 }
 0xc79   :  { %v9467_v54 = vpop.f32.mrb[146].mxu0 }
 0xc7a   :  { %v9576_v40 = vadd.f32 %v9467_v54, %v21463_v29  ;;  %v14481_v0 = vpop.f32.mrb[147].mxu0  ;;  %v21569_v29 = vld [vmem:[%s22140_s5 + $0x8] sm:$0xff]  ;;  %v9680_v54 = vadd.f32 %v21562_v23, %v9573_v4 }
 0xc7b   :  { %v21584_v34 = vmul.f32 %v9674_v28, %v21569_v29  ;;  %v9681_v28 = vadd.f32 %v21562_v23, %v9574_v42  ;;  %v21657_v42 = vld [vmem:[%s22140_s5 + $0x48] sm:$0xff] }
 0xc7c   :  { %v21650_v51 = vmul.f32 %v9680_v54, %v21636_v15 }
 0xc7d   :  { %v9472_v27 = vpop.f32.mrb[148].mxu0  ;;  %v9773_v43 = vadd.f32 %v21584_v34, %v21594_v63 }
 0xc7e   :  { %v9577_v20 = vadd.f32 %v9472_v27, %v21466_v9  ;;  %v14484_v55 = vpop.f32.mrb[149].mxu0  ;;  %v9675_v9 = vadd.f32 %v21562_v23, %v9568_v16  ;;  %v21591_v16 = vld [vmem:[%s22140_s5 + $0x18] sm:$0xff] }
 0xc7f   :  { %v21608_v3 = vmul.f32 %v9676_v2, %v21591_v16 }
 0xc80   :  { %v21597_v12 = vmul.f32 %v9675_v9, %v21581_v61  ;;  %v9682_v9 = vadd.f32 %v21562_v23, %v9575_v44 }
 0xc81   :  { %v9477_v30 = vpop.f32.mrb[150].mxu0 }
 0xc82   :  { %v9578_v14 = vadd.f32 %v9477_v30, %v21478_v31  ;;  %v14487_v62 = vpop.f32.mrb[151].mxu0  ;;  %v9774_v56 = vadd.f32 %v9773_v43, %v21597_v12  ;;  %v21640_v30 = vmul.f32 %v9679_v53, %v21625_v35  ;;  %v21667_v43 = vld [vmem:[%s22140_s5 + $0x50] sm:$0xff]  ;;  %v21671_v57 = vmul.f32 %v9682_v9, %v21657_v42 }
 0xc83   :  { %v21646_v62 = vld [vmem:[%s22140_s5 + $0x40] sm:$0xff] }
 0xc84   :  { %v21661_v7 = vmul.f32 %v9681_v28, %v21646_v62  ;;  %v9685_v54 = vadd.f32 %v21562_v23, %v9578_v14  ;;  %v21699_v14 = vld [vmem:[%s22140_s5 + $0x68] sm:$0xff] }
 0xc85   :  { %v9482_v31 = vpop.f32.mrb[152].mxu0 }
 0xc86   :  { %v9579_v18 = vadd.f32 %v9482_v31, %v21482_v26  ;;  %v14490_v52 = vpop.f32.mrb[153].mxu0 }
 0xc88   :  { %v9686_v28 = vadd.f32 %v21562_v23, %v9579_v18 }
 0xc89   :  { %v9487_v26 = vpop.f32.mrb[154].mxu0 }
 0xc8a   :  { %v9580_v37 = vadd.f32 %v9487_v26, %v21485_v10  ;;  %v14493_v1 = vpop.f32.mrb[155].mxu0  ;;  %v9775_v10 = vadd.f32 %v9774_v56, %v21608_v3  ;;  %v9683_v26 = vadd.f32 %v21562_v23, %v9576_v40  ;;  %v21678_v40 = vld [vmem:[%s22140_s5 + $0x58] sm:$0xff] }
 0xc8b   :  { %v9684_v1 = vadd.f32 %v21562_v23, %v9577_v20 }
 0xc8c   :  { %v9776_v55 = vadd.f32 %v9775_v10, %v21619_v25  ;;  %v21682_v10 = vmul.f32 %v9683_v26, %v21667_v43  ;;  %v21709_v26 = vld [vmem:[%s22140_s5 + $0x70] sm:$0xff] }
 0xc8d   :  { %v9492_v24 = vpop.f32.mrb[156].mxu0 }
 0xc8e   :  { %v9581_v0 = vadd.f32 %v9492_v24, %v21497_v48  ;;  %v14496_v27 = vpop.f32.mrb[157].mxu0  ;;  %v9777_v48 = vadd.f32 %v9776_v55, %v21629_v19  ;;  %v21692_v55 = vmul.f32 %v9684_v1, %v21678_v40 }
 0xc8f   :  { %v21688_v27 = vld [vmem:[%s22140_s5 + $0x60] sm:$0xff] }
 0xc90   :  { %v9778_v52 = vadd.f32 %v9777_v48, %v21640_v30 }
 0xc91   :  { %v9497_v4 = vpop.f32.mrb[158].mxu0 }
 0xc92   :  { %v9582_v31 = vadd.f32 %v9497_v4, %v21501_v6  ;;  %v14499_v2 = vpop.f32.mrb[159].mxu0  ;;  %v9779_v6 = vadd.f32 %v9778_v52, %v21650_v51  ;;  %v9687_v52 = vadd.f32 %v21562_v23, %v9580_v37  ;;  %v21720_v37 = vld [vmem:[%s22140_s5 + $0x78] sm:$0xff] }
 0xc93   :  { %v21703_v2 = vmul.f32 %v9685_v54, %v21688_v27  ;;  %22255 = vst [vmem:[#allocation5_spill] sm:$0xff] %v21720_v37 }
 0xc94   :  { %v9780_v24 = vadd.f32 %v9779_v6, %v21661_v7  ;;  %v9688_v6 = vadd.f32 %v21562_v23, %v9581_v0  ;;  %v21724_v54 = vmul.f32 %v9687_v52, %v21709_v26 }
 0xc95   :  { %v9502_v44 = vpop.f32.mrb[160].mxu0 }
 0xc96   :  { %v9583_v56 = vadd.f32 %v9502_v44, %v21504_v59  ;;  %v14502_v53 = vpop.f32.mrb[161].mxu0  ;;  %v9781_v59 = vadd.f32 %v9780_v24, %v21671_v57  ;;  %v21713_v44 = vmul.f32 %v9686_v28, %v21699_v14  ;;  %v21734_v28 = vmul.f32 %v9688_v6, %v21720_v37  ;;  %v21751_v6 = vld [vmem:[%s22140_s5 + $0x90] sm:$0xff] }
 0xc97   :  { %22258 = vst [vmem:[#allocation8_spill] sm:$0xff] %v21751_v6 }
 0xc98   :  { %v9782_v9 = vadd.f32 %v9781_v59, %v21682_v10  ;;  %v21730_v59 = vld [vmem:[%s22140_s5 + $0x80] sm:$0xff] }
 0xc99   :  { %v9507_v20 = vpop.f32.mrb[162].mxu0  ;;  %22256 = vst [vmem:[#allocation10_spill] sm:$0xff] %v21730_v59 }
 0xc9a   :  { %v9584_v4 = vadd.f32 %v9507_v20, %v21516_v50  ;;  %v14505_v48 = vpop.f32.mrb[163].mxu0  ;;  %v9783_v50 = vadd.f32 %v9782_v9, %v21692_v55  ;;  %v9689_v20 = vadd.f32 %v21562_v23, %v9582_v31  ;;  %v21741_v31 = vld [vmem:[%s22140_s5 + $0x88] sm:$0xff] }
 0xc9b   :  { %v9690_v48 = vadd.f32 %v21562_v23, %v9583_v56  ;;  %22257 = vst [vmem:[#allocation6_spill] sm:$0xff] %v21741_v31 }
 0xc9c   :  { %v9784_v24 = vadd.f32 %v9783_v50, %v21703_v2  ;;  %v21745_v50 = vmul.f32 %v9689_v20, %v21730_v59 }
 0xc9d   :  { %v9512_v18 = vpop.f32.mrb[164].mxu0 }
 0xc9e   :  { %v9585_v1 = vadd.f32 %v9512_v18, %v21520_v5  ;;  %v14508_v53 = vpop.f32.mrb[165].mxu0  ;;  %v9785_v5 = vadd.f32 %v9784_v24, %v21713_v44  ;;  %v21755_v24 = vmul.f32 %v9690_v48, %v21741_v31  ;;  %v21772_v48 = vld [vmem:[%s22140_s5 + $0xa0] sm:$0xff] }
 0xc9f   :  { %v9691_v53 = vadd.f32 %v21562_v23, %v9584_v4  ;;  %v21762_v4 = vld [vmem:[%s22140_s5 + $0x98] sm:$0xff]  ;;  %22261 = vst [vmem:[#allocation13_spill] sm:$0xff] %v21772_v48 }
 0xca0   :  { %v9786_v52 = vadd.f32 %v9785_v5, %v21724_v54  ;;  %22259 = vst [vmem:[#allocation9_spill] sm:$0xff] %v21762_v4 }
 0xca1   :  { %v9517_v0 = vpop.f32.mrb[166].mxu0  ;;  %v21766_v59 = vmul.f32 %v9691_v53, %v21751_v6 }
 0xca2   :  { %v9586_v9 = vadd.f32 %v9517_v0, %v21523_v32  ;;  %v14511_v18 = vpop.f32.mrb[167].mxu0  ;;  %v9787_v32 = vadd.f32 %v9786_v52, %v21734_v28  ;;  %v9692_v0 = vadd.f32 %v21562_v23, %v9585_v1 }
 0xca3   :  { %22260 = vst [vmem:[#allocation11_spill] sm:$0xff] %v21766_v59 }
 0xca4   :  { %v9788_v20 = vadd.f32 %v9787_v32, %v21745_v50  ;;  %v9693_v52 = vadd.f32 %v21562_v23, %v9586_v9  ;;  %v21783_v9 = vld [vmem:[%s22140_s5 + $0xa8] sm:$0xff] }
 0xca5   :  { %v9522_v56 = vpop.f32.mrb[168].mxu0  ;;  %22262 = vst [vmem:[#allocation15_spill] sm:$0xff] %v21783_v9 }
 0xca6   :  { %v9587_v5 = vadd.f32 %v9522_v56, %v21526_v11  ;;  %v14514_v18 = vpop.f32.mrb[169].mxu0  ;;  %v9789_v11 = vadd.f32 %v9788_v20, %v21755_v24  ;;  %v21776_v56 = vmul.f32 %v9692_v0, %v21762_v4  ;;  %v21787_v6 = vmul.f32 %v9693_v52, %v21772_v48  ;;  %v21793_v0 = vld [vmem:[%s22140_s5 + $0xb0] sm:$0xff]  ;;  %v21803_v52 = vld [vmem:[%s22140_s5 + $0xb8] sm:$0xff] }
 0xca7   :  { %22263 = vst [vmem:[#allocation4_spill] sm:$0xff] %v21793_v0  ;;  %22264 = vst [vmem:[#allocation7_spill] sm:$0xff] %v21803_v52 }
 0xca8   :  { %v9694_v18 = vadd.f32 %v21562_v23, %v9587_v5  ;;  %v9790_v53 = vadd.f32 %v9789_v11, %v21766_v59 }
 0xca9   :  { %v9527_v1 = vpop.f32.mrb[170].mxu0 }
 0xcaa   :  { %v9588_v32 = vadd.f32 %v9527_v1, %v21538_v33  ;;  %v14517_v31 = vpop.f32.mrb[171].mxu0  ;;  %v9791_v33 = vadd.f32 %v9790_v53, %v21776_v56 }
 0xcab   :  { %v21797_v31 = vmul.f32 %v9694_v18, %v21783_v9 }
 0xcac   :  { %v9695_v20 = vadd.f32 %v21562_v23, %v9588_v32  ;;  %v9792_v11 = vadd.f32 %v9791_v33, %v21787_v6 }
 0xcad   :  { %v9532_v5 = vpop.f32.mrb[172].mxu0 }
 0xcae   :  { %v9589_v1 = vadd.f32 %v9532_v5, %v21542_v46  ;;  %v14520_v4 = vpop.f32.mrb[173].mxu0  ;;  %v21807_v32 = vmul.f32 %v9695_v20, %v21793_v0  ;;  %v9793_v53 = vadd.f32 %v9792_v11, %v21797_v31  ;;  %v21818_v5 = vld [vmem:[%s22140_s5 + $0xc0] sm:$0xff] }
 0xcb0   :  { %v9696_v48 = vadd.f32 %v21562_v23, %v9589_v1  ;;  %v9794_v33 = vadd.f32 %v9793_v53, %v21807_v32 }
 0xcb1   :  { %v9537_v59 = vpop.f32.mrb[174].mxu0 }
 0xcb2   :  { %v21812_v18 = vmul.f32 %v9696_v48, %v21803_v52  ;;  %v9590_v46 = vadd.f32 %v9537_v59, %v21545_v39  ;;  %v14523_v4 = vpop.f32.mrb[175].mxu0 }
 0xcb4   :  { %v9697_v20 = vadd.f32 %v21562_v23, %v9590_v46  ;;  %v9795_v1 = vadd.f32 %v9794_v33, %v21812_v18 }
 0xcb6   :  { %v21824_v0 = vmul.f32 %v9697_v20, %v21818_v5 }
 0xcb8   :  { %v9796_v48 = vadd.f32 %v9795_v1, %v21824_v0 }
 0xcba   :  { %v9797_v11 = vrot.slane %v9796_v48, 4 }
 0xcbc   :  { %v9798_v52 = vadd.f32 %v9797_v11, %v9796_v48 }
 0xcbe   :  { %v9799_v39 = vrot.slane %v9798_v52, 2 }
 0xcc0   :  { %v9800_v59 = vadd.f32 %v9799_v39, %v9798_v52 }
 0xcc2   :  { %v9801_v4 = vrot.slane %v9800_v59, 1 }
 0xcc4   :  { %v9802_v9 = vadd.f32 %v9801_v4, %v9800_v59 }
 0xcc6   :  { %14557 = vmatmul.mubr.f32.vlgmr.msra.gmra.mrb[158].mxu1 %v9802_v9 }
 0xcc7   :  { %15364 = vmatpush3.bf16.msra.mxu1 %v21395_v17  ;;  %14591 = vmatprep.mubr.msk.f32.mxu1 %vm15438_vm0, %v22254_v21 }
 0xcc8   :  { %15365 = vmatprep.subr.bf16.mxu1 %v22252_v58 }
 0xccb   :  { %15367 = vmatpush3.bf16.msra.mxu1 %v21414_v47 }
 0xccc   :  { %15368 = vmatprep.subr.bf16.mxu1 %v22252_v58 }
 0xccf   :  { %15370 = vmatpush3.bf16.msra.mxu1 %v21433_v22  ;;  %v22265_v22 = vld [vmem:[#allocation12_spill] sm:$0xff] }
 0xcd0   :  { %15371 = vmatprep.subr.bf16.mxu1 %v22252_v58 }
 0xcd3   :  { %15373 = vmatpush3.bf16.msra.mxu1 %v21455_v8 }
 0xcd4   :  { %15374 = vmatprep.subr.bf16.mxu1 %v22252_v58 }
 0xcd7   :  { %15376 = vmatpush3.bf16.msra.mxu1 %v21474_v38 }
 0xcd8   :  { %15377 = vmatprep.subr.bf16.mxu1 %v22252_v58 }
 0xcdb   :  { %15379 = vmatpush3.bf16.msra.mxu1 %v21493_v45 }
 0xcdc   :  { %15380 = vmatprep.subr.bf16.mxu1 %v22252_v58 }
 0xcdf   :  { %15382 = vmatpush3.bf16.msra.mxu1 %v21512_v36 }
 0xce0   :  { %15383 = vmatprep.subr.bf16.mxu1 %v22252_v58 }
 0xce3   :  { %15385 = vmatpush3.bf16.msra.mxu1 %v21534_v41 }
 0xd99   :  { %v9885_v21 = vpop.f32.mrb[158].mxu1 }
 0xd9a   :  { %v14558_v17 = vpop.f32.mrb[159].mxu1  ;;  %v9889_v47 = vmul.f32 0.0009765625, %v9885_v21 }
 0xd9c   :  { %v21845_v8 = vrot.slane %v9889_v47, %v22265_v22 }
 0xd9e   :  { %v9894_v38 = vsub.f32 %v21594_v63, %v21845_v8  ;;  %v9895_v45 = vsub.f32 %v21584_v34, %v21845_v8  ;;  %v9896_v23 = vsub.f32 %v21597_v12, %v21845_v8  ;;  %v9897_v41 = vsub.f32 %v21608_v3, %v21845_v8 }
 0xd9f   :  { %v9898_v9 = vsub.f32 %v21619_v25, %v21845_v8  ;;  %v9899_v52 = vsub.f32 %v21629_v19, %v21845_v8  ;;  %v9900_v3 = vsub.f32 %v21640_v30, %v21845_v8  ;;  %v9901_v20 = vsub.f32 %v21650_v51, %v21845_v8 }
 0xda0   :  { %v21854_v36 = vmul.f32 %v9894_v38, %v21576_v60  ;;  %v21857_v58 = vmul.f32 %v9895_v45, %v21569_v29  ;;  %v21864_v63 = vmul.f32 %v9896_v23, %v21581_v61  ;;  %v21873_v53 = vmul.f32 %v9897_v41, %v21591_v16 }
 0xda1   :  { %v21878_v25 = vmul.f32 %v9898_v9, %v21603_v13  ;;  %v21885_v1 = vmul.f32 %v9899_v52, %v21615_v49  ;;  %v9902_v30 = vsub.f32 %v21661_v7, %v21845_v8  ;;  %v21892_v11 = vmul.f32 %v9900_v3, %v21625_v35 }
 0xda2   :  { %v9994_v34 = vmul.f32 %v21854_v36, %v21854_v36  ;;  %v9995_v12 = vmul.f32 %v21857_v58, %v21857_v58  ;;  %v9996_v46 = vmul.f32 %v21864_v63, %v21864_v63  ;;  %v9997_v19 = vmul.f32 %v21873_v53, %v21873_v53 }
 0xda3   :  { %v9998_v39 = vmul.f32 %v21878_v25, %v21878_v25  ;;  %v9903_v51 = vsub.f32 %v21671_v57, %v21845_v8  ;;  %v21899_v4 = vmul.f32 %v9901_v20, %v21636_v15  ;;  %v9999_v21 = vmul.f32 %v21885_v1, %v21885_v1 }
 0xda4   :  { %v10019_v33 = vadd.f32 %v9995_v12, %v9994_v34  ;;  %v9904_v7 = vsub.f32 %v21682_v10, %v21845_v8  ;;  %v21906_v47 = vmul.f32 %v9902_v30, %v21646_v62  ;;  %v10000_v38 = vmul.f32 %v21892_v11, %v21892_v11 }
 0xda5   :  { %v9905_v57 = vsub.f32 %v21692_v55, %v21845_v8  ;;  %v21913_v23 = vmul.f32 %v9903_v51, %v21657_v42  ;;  %v10001_v41 = vmul.f32 %v21899_v4, %v21899_v4  ;;  %v9906_v10 = vsub.f32 %v21703_v2, %v21845_v8 }
 0xda6   :  { %v10020_v48 = vadd.f32 %v10019_v33, %v9996_v46  ;;  %v21920_v34 = vmul.f32 %v9904_v7, %v21667_v43  ;;  %v10002_v12 = vmul.f32 %v21906_v47, %v21906_v47  ;;  %v9907_v55 = vsub.f32 %v21713_v44, %v21845_v8 }
 0xda7   :  { %v21927_v3 = vmul.f32 %v9905_v57, %v21678_v40  ;;  %v10003_v46 = vmul.f32 %v21913_v23, %v21913_v23  ;;  %v9908_v2 = vsub.f32 %v21724_v54, %v21845_v8  ;;  %v21934_v20 = vmul.f32 %v9906_v10, %v21688_v27  ;;  %v22266_v57 = vld [vmem:[#allocation11_spill] sm:$0xff] }
 0xda8   :  { %v10021_v59 = vadd.f32 %v10020_v48, %v9997_v19  ;;  %v10004_v19 = vmul.f32 %v21920_v34, %v21920_v34  ;;  %v9909_v44 = vsub.f32 %v21734_v28, %v21845_v8  ;;  %v21941_v30 = vmul.f32 %v9907_v55, %v21699_v14 }
 0xda9   :  { %v9910_v54 = vsub.f32 %v21745_v50, %v21845_v8  ;;  %v21948_v51 = vmul.f32 %v9908_v2, %v21709_v26  ;;  %v9911_v28 = vsub.f32 %v21755_v24, %v21845_v8  ;;  %v9912_v50 = vsub.f32 %v22266_v57, %v21845_v8 }
 0xdaa   :  { %v10022_v17 = vadd.f32 %v10021_v59, %v9998_v39  ;;  %v10005_v39 = vmul.f32 %v21927_v3, %v21927_v3  ;;  %v21955_v7 = vmul.f32 %v9909_v44, %v21720_v37  ;;  %v9913_v24 = vsub.f32 %v21776_v56, %v21845_v8 }
 0xdab   :  { %v10008_v10 = vmul.f32 %v21948_v51, %v21948_v51  ;;  %v9914_v2 = vsub.f32 %v21787_v6, %v21845_v8  ;;  %v9915_v56 = vsub.f32 %v21797_v31, %v21845_v8  ;;  %v22271_v6 = vld [vmem:[#allocation13_spill] sm:$0xff] }
 0xdac   :  { %v10023_v45 = vadd.f32 %v10022_v17, %v9999_v21  ;;  %v10006_v21 = vmul.f32 %v21934_v20, %v21934_v20 }
 0xdae   :  { %v10024_v9 = vadd.f32 %v10023_v45, %v10000_v38  ;;  %v10007_v38 = vmul.f32 %v21941_v30, %v21941_v30 }
 0xdb0   :  { %v10025_v52 = vadd.f32 %v10024_v9, %v10001_v41  ;;  %v22267_v41 = vld [vmem:[#allocation10_spill] sm:$0xff] }
 0xdb1   :  { %v21962_v9 = vmul.f32 %v9910_v54, %v22267_v41 }
 0xdb2   :  { %v10026_v33 = vadd.f32 %v10025_v52, %v10002_v12  ;;  %v22268_v52 = vld [vmem:[#allocation6_spill] sm:$0xff] }
 0xdb3   :  { %v21969_v55 = vmul.f32 %v9911_v28, %v22268_v52  ;;  %v10010_v44 = vmul.f32 %v21962_v9, %v21962_v9  ;;  %v9916_v28 = vsub.f32 %v21807_v32, %v21845_v8 }
 0xdb4   :  { %v10027_v48 = vadd.f32 %v10026_v33, %v10003_v46  ;;  %v10009_v46 = vmul.f32 %v21955_v7, %v21955_v7 }
 0xdb6   :  { %v10028_v59 = vadd.f32 %v10027_v48, %v10004_v19  ;;  %v22269_v19 = vld [vmem:[#allocation8_spill] sm:$0xff] }
 0xdb7   :  { %v21976_v48 = vmul.f32 %v9912_v50, %v22269_v19  ;;  %v9917_v50 = vsub.f32 %v21812_v18, %v21845_v8 }
 0xdb8   :  { %v10029_v17 = vadd.f32 %v10028_v59, %v10005_v39  ;;  %v22270_v59 = vld [vmem:[#allocation9_spill] sm:$0xff] }
 0xdb9   :  { %v9938_v54 = vmul.f32 %v9913_v24, %v22270_v59  ;;  %v22274_v59 = vld [vmem:[#allocation7_spill] sm:$0xff] }
 0xdba   :  { %v10030_v45 = vadd.f32 %v10029_v17, %v10006_v21  ;;  %v10011_v21 = vmul.f32 %v21969_v55, %v21969_v55 }
 0xdbc   :  { %v10031_v12 = vadd.f32 %v10030_v45, %v10007_v38  ;;  %v9939_v38 = vmul.f32 %v9914_v2, %v22271_v6  ;;  %v10012_v45 = vmul.f32 %v21976_v48, %v21976_v48  ;;  %v9942_v2 = vmul.f32 %v9917_v50, %v22274_v59 }
 0xdbe   :  { %v10032_v33 = vadd.f32 %v10031_v12, %v10008_v10  ;;  %v22272_v10 = vld [vmem:[#allocation15_spill] sm:$0xff]  ;;  %v10013_v12 = vmul.f32 %v9938_v54, %v9938_v54  ;;  %v10017_v18 = vmul.f32 %v9942_v2, %v9942_v2 }
 0xdbf   :  { %v9940_v31 = vmul.f32 %v9915_v56, %v22272_v10 }
 0xdc0   :  { %v10033_v39 = vadd.f32 %v10032_v33, %v10009_v46  ;;  %v9918_v46 = vsub.f32 %v21824_v0, %v21845_v8  ;;  %v22273_v33 = vld [vmem:[#allocation4_spill] sm:$0xff] }
 0xdc1   :  { %v10015_v6 = vmul.f32 %v9940_v31, %v9940_v31 }
 0xdc2   :  { %v10034_v17 = vadd.f32 %v10033_v39, %v10010_v44  ;;  %v9941_v44 = vmul.f32 %v9916_v28, %v22273_v33  ;;  %v10014_v39 = vmul.f32 %v9939_v38, %v9939_v38 }
 0xdc4   :  { %v10035_v57 = vadd.f32 %v10034_v17, %v10011_v21  ;;  %v9943_v21 = vmul.f32 %v9918_v46, %v21818_v5  ;;  %v10016_v17 = vmul.f32 %v9941_v44, %v9941_v44 }
 0xdc6   :  { %v10036_v24 = vadd.f32 %v10035_v57, %v10012_v45  ;;  %v10018_v56 = vmul.f32 %v9943_v21, %v9943_v21 }
 0xdc8   :  { %v10037_v32 = vadd.f32 %v10036_v24, %v10013_v12 }
 0xdca   :  { %v10038_v19 = vadd.f32 %v10037_v32, %v10014_v39 }
 0xdcc   :  { %v10039_v52 = vadd.f32 %v10038_v19, %v10015_v6  ;;  %v10138_v19 = vld [vmem:[%s22141_s3] sm:$0x1] }
 0xdce   :  { %v10040_v41 = vadd.f32 %v10039_v52, %v10016_v17 }
 0xdd0   :  { %v10041_v10 = vadd.f32 %v10040_v41, %v10017_v18 }
 0xdd2   :  { %v10042_v45 = vadd.f32 %v10041_v10, %v10018_v56 }
 0xdd4   :  { %v10043_v57 = vrot.slane %v10042_v45, 4 }
 0xdd6   :  { %v10044_v37 = vadd.f32 %v10043_v57, %v10042_v45 }
 0xdd8   :  { %v10045_v0 = vrot.slane %v10044_v37, 2 }
 0xdda   :  { %v10046_v8 = vadd.f32 %v10045_v0, %v10044_v37 }
 0xddc   :  { %v10047_v28 = vrot.slane %v10046_v8, 1 }
 0xdde   :  { %v10048_v33 = vadd.f32 %v10047_v28, %v10046_v8 }
 0xde0   :  { %14592 = vmatmul.mubr.f32.vlgmr.msra.gmra.mrb[160].mxu1 %v10048_v33 }
 0xeb3   :  { %v10131_v12 = vpop.f32.mrb[160].mxu1 }
 0xeb4   :  { %v10135_v50 = vmul.f32 0.0009765625, %v10131_v12  ;;  %v14593_v24 = vpop.f32.mrb[161].mxu1 }
 0xeb6   :  { %v10136_v39 = vadd.f32 1e-05, %v10135_v50 }
 0xeb8   :  { %15409 = vrsqrt.f32 %v10136_v39 }
 0xec2   :  { %v15410_v52 = vpop.eup %15409 }
 0xec3   :  { %v10139_v6 = vmul.f32 %v15410_v52, %v10138_v19 }
 0xec5   :  { %v10143_v41 = vrot.slane %v10139_v6, %v22265_v22 }
 0xec7   :  { %v10144_v10 = vmul.f32 %v10143_v41, %v21854_v36  ;;  %v10145_v37 = vmul.f32 %v10143_v41, %v21857_v58  ;;  %v10146_v46 = vmul.f32 %v10143_v41, %v21864_v63  ;;  %v10147_v33 = vmul.f32 %v10143_v41, %v21873_v53 }
 0xec8   :  { %v10148_v32 = vmul.f32 %v10143_v41, %v21878_v25  ;;  %v10149_v17 = vmul.f32 %v10143_v41, %v21885_v1  ;;  %v10150_v18 = vmul.f32 %v10143_v41, %v21892_v11  ;;  %v10151_v56 = vmul.f32 %v10143_v41, %v21899_v4 }
 0xec9   :  { %v10152_v45 = vmul.f32 %v10143_v41, %v21906_v47  ;;  %v10153_v22 = vmul.f32 %v10143_v41, %v21913_v23  ;;  %v10154_v36 = vmul.f32 %v10143_v41, %v21920_v34  ;;  %v10155_v58 = vmul.f32 %v10143_v41, %v21927_v3 }
 0xeca   :  { %v10156_v63 = vmul.f32 %v10143_v41, %v21934_v20  ;;  %v10157_v53 = vmul.f32 %v10143_v41, %v21941_v30  ;;  %v10158_v25 = vmul.f32 %v10143_v41, %v21948_v51  ;;  %v10159_v1 = vmul.f32 %v10143_v41, %v21955_v7  ;;  %v15436_v20 = vld [vmem:[%s22142_s4] ss:$0 sm:$0xff] }
 0xecb   :  { %v10160_v11 = vmul.f32 %v10143_v41, %v21962_v9  ;;  %v10161_v4 = vmul.f32 %v10143_v41, %v21969_v55  ;;  %v10162_v47 = vmul.f32 %v10143_v41, %v21976_v48  ;;  %v10163_v57 = vmul.f32 %v10143_v41, %v9938_v54 }
 0xecc   :  { %v10164_v23 = vmul.f32 %v10143_v41, %v9939_v38  ;;  %v10165_v0 = vmul.f32 %v10143_v41, %v9940_v31  ;;  %v10166_v34 = vmul.f32 %v10143_v41, %v9941_v44  ;;  %v10167_v8 = vmul.f32 %v10143_v41, %v9942_v2 }
 0xecd   :  { %v10168_v3 = vmul.f32 %v10143_v41, %v9943_v21  ;;  %v10176_v30 = vadd.f32 %v15436_v20, %v10144_v10  ;;  %v10177_v51 = vadd.f32 %v15436_v20, %v10145_v37  ;;  %v10178_v28 = vadd.f32 %v15436_v20, %v10146_v46 }
 0xece   :  { %v10179_v7 = vadd.f32 %v15436_v20, %v10147_v33  ;;  %v10180_v12 = vadd.f32 %v15436_v20, %v10148_v32  ;;  %v10181_v9 = vadd.f32 %v15436_v20, %v10149_v17  ;;  %v10182_v50 = vadd.f32 %v15436_v20, %v10150_v18 }
 0xecf   :  { %v10183_v55 = vadd.f32 %v15436_v20, %v10151_v56  ;;  %v10184_v24 = vadd.f32 %v15436_v20, %v10152_v45  ;;  %v10185_v48 = vadd.f32 %v15436_v20, %v10153_v22  ;;  %v10186_v54 = vadd.f32 %v15436_v20, %v10154_v36 }
 0xed0   :  { %v10187_v38 = vadd.f32 %v15436_v20, %v10155_v58  ;;  %v10188_v31 = vadd.f32 %v15436_v20, %v10156_v63  ;;  %v10189_v44 = vadd.f32 %v15436_v20, %v10157_v53  ;;  %v10190_v2 = vadd.f32 %v15436_v20, %v10158_v25 }
 0xed1   :  { %v10191_v21 = vadd.f32 %v15436_v20, %v10159_v1  ;;  %v10192_v39 = vadd.f32 %v15436_v20, %v10160_v11  ;;  %v10193_v19 = vadd.f32 %v15436_v20, %v10161_v4  ;;  %v10194_v52 = vadd.f32 %v15436_v20, %v10162_v47 }
 0xed2   :  { %v10195_v6 = vadd.f32 %v15436_v20, %v10163_v57  ;;  %v10196_v41 = vadd.f32 %v15436_v20, %v10164_v23  ;;  %v22024_v10 = vadd.f32 %v15436_v20, %v10165_v0  ;;  %v22026_v37 = vadd.f32 %v15436_v20, %v10166_v34 }
 0xed3   :  { %v22028_v46 = vadd.f32 %v15436_v20, %v10167_v8  ;;  %v22030_v33 = vadd.f32 %v15436_v20, %v10168_v3  ;;  %v10201_v32 = vmax.f32 %v10176_v30, 0.0  ;;  %v10202_v17 = vmax.f32 %v10177_v51, 0.0 }
 0xed4   :  { %v10203_v18 = vmax.f32 %v10178_v28, 0.0  ;;  %v10204_v56 = vmax.f32 %v10179_v7, 0.0  ;;  %v10205_v45 = vmax.f32 %v10180_v12, 0.0  ;;  %v10206_v22 = vmax.f32 %v10181_v9, 0.0 }
 0xed5   :  { %v10207_v36 = vmax.f32 %v10182_v50, 0.0  ;;  %v10208_v58 = vmax.f32 %v10183_v55, 0.0  ;;  %v10209_v63 = vmax.f32 %v10184_v24, 0.0  ;;  %v10210_v53 = vmax.f32 %v10185_v48, 0.0 }
 0xed6   :  { %v10211_v25 = vmax.f32 %v10186_v54, 0.0  ;;  %v10212_v1 = vmax.f32 %v10187_v38, 0.0  ;;  %v10213_v11 = vmax.f32 %v10188_v31, 0.0  ;;  %v10214_v4 = vmax.f32 %v10189_v44, 0.0  ;;  %v22280_v44 = vld [vmem:[#allocation13_spill] sm:$0xff] }
 0xed7   :  { %v10215_v47 = vmax.f32 %v10190_v2, 0.0  ;;  %v10216_v57 = vmax.f32 %v10191_v21, 0.0  ;;  %v10217_v23 = vmax.f32 %v10192_v39, 0.0  ;;  %v10218_v0 = vmax.f32 %v10193_v19, 0.0  ;;  %v22281_v21 = vld [vmem:[#allocation15_spill] sm:$0xff]  ;;  %v22282_v19 = vld [vmem:[#allocation4_spill] sm:$0xff] }
 0xed8   :  { %v10219_v34 = vmax.f32 %v10194_v52, 0.0  ;;  %v10220_v8 = vmax.f32 %v10195_v6, 0.0  ;;  %v10221_v3 = vmax.f32 %v10196_v41, 0.0  ;;  %v10222_v20 = vmax.f32 %v22024_v10, 0.0 }
 0xed9   :  { %v10223_v30 = vmax.f32 %v22026_v37, 0.0  ;;  %v10224_v51 = vmax.f32 %v22028_v46, 0.0  ;;  %v10225_v28 = vmax.f32 %v22030_v33, 0.0  ;;  %v10226_v7 = vmul.f32 %v10201_v32, %v21576_v60 }
 0xeda   :  { %v10227_v12 = vmul.f32 %v10202_v17, %v21569_v29  ;;  %v10228_v9 = vmul.f32 %v10203_v18, %v21581_v61  ;;  %v10229_v50 = vmul.f32 %v10204_v56, %v21591_v16  ;;  %v10230_v55 = vmul.f32 %v10205_v45, %v21603_v13 }
 0xedb   :  { %v10231_v24 = vmul.f32 %v10206_v22, %v21615_v49  ;;  %v10232_v48 = vmul.f32 %v10207_v36, %v21625_v35  ;;  %v10233_v54 = vmul.f32 %v10208_v58, %v21636_v15  ;;  %v10234_v38 = vmul.f32 %v10209_v63, %v21646_v62  ;;  %10251 = vst [vmem:[%s22143_s7] sm:$0xff] %v10226_v7  ;;  %v22275_v35 = vld [vmem:[#allocation5_spill] sm:$0xff]  ;;  %v22276_v62 = vld [vmem:[#allocation10_spill] sm:$0xff] }
 0xedc   :  { %v10235_v29 = vmul.f32 %v10210_v53, %v21657_v42  ;;  %v10236_v60 = vmul.f32 %v10211_v25, %v21667_v43  ;;  %v10237_v61 = vmul.f32 %v10212_v1, %v21678_v40  ;;  %v10238_v16 = vmul.f32 %v10213_v11, %v21688_v27  ;;  %10252 = vst [vmem:[%s22143_s7 + $0x8] sm:$0xff] %v10227_v12  ;;  %v22277_v43 = vld [vmem:[#allocation6_spill] sm:$0xff]  ;;  %v22278_v27 = vld [vmem:[#allocation8_spill] sm:$0xff] }
 0xedd   :  { %10253 = vst [vmem:[%s22143_s7 + $0x10] sm:$0xff] %v10228_v9  ;;  %10254 = vst [vmem:[%s22143_s7 + $0x18] sm:$0xff] %v10229_v50  ;;  %v10239_v13 = vmul.f32 %v10214_v4, %v21699_v14  ;;  %v10240_v49 = vmul.f32 %v10215_v47, %v21709_v26  ;;  %v10241_v15 = vmul.f32 %v10216_v57, %v22275_v35  ;;  %v22279_v26 = vld [vmem:[#allocation9_spill] sm:$0xff] }
 0xede   :  { %10255 = vst [vmem:[%s22143_s7 + $0x20] sm:$0xff] %v10230_v55  ;;  %v10242_v42 = vmul.f32 %v10217_v23, %v22276_v62  ;;  %10256 = vst [vmem:[%s22143_s7 + $0x28] sm:$0xff] %v10231_v24  ;;  %v10243_v40 = vmul.f32 %v10218_v0, %v22277_v43  ;;  %v10244_v14 = vmul.f32 %v10219_v34, %v22278_v27 }
 0xedf   :  { %10257 = vst [vmem:[%s22143_s7 + $0x30] sm:$0xff] %v10232_v48  ;;  %10258 = vst [vmem:[%s22143_s7 + $0x38] sm:$0xff] %v10233_v54  ;;  %v10245_v31 = vmul.f32 %v10220_v8, %v22279_v26  ;;  %v10246_v2 = vmul.f32 %v10221_v3, %v22280_v44  ;;  %v10247_v39 = vmul.f32 %v10222_v20, %v22281_v21 }
 0xee0   :  { %10259 = vst [vmem:[%s22143_s7 + $0x40] sm:$0xff] %v10234_v38  ;;  %10260 = vst [vmem:[%s22143_s7 + $0x48] sm:$0xff] %v10235_v29  ;;  %v10248_v52 = vmul.f32 %v10223_v30, %v22282_v19  ;;  %v10249_v6 = vmul.f32 %v10224_v51, %v22274_v59  ;;  %v10250_v41 = vmul.f32 %v10225_v28, %v21818_v5 }
 0xee1   :  { %10261 = vst [vmem:[%s22143_s7 + $0x50] sm:$0xff] %v10236_v60  ;;  %10262 = vst [vmem:[%s22143_s7 + $0x58] sm:$0xff] %v10237_v61 }
 0xee2   :  { %10263 = vst [vmem:[%s22143_s7 + $0x60] sm:$0xff] %v10238_v16  ;;  %10264 = vst [vmem:[%s22143_s7 + $0x68] sm:$0xff] %v10239_v13 }
 0xee3   :  { %10265 = vst [vmem:[%s22143_s7 + $0x70] sm:$0xff] %v10240_v49  ;;  %10266 = vst [vmem:[%s22143_s7 + $0x78] sm:$0xff] %v10241_v15 }
 0xee4   :  { %10267 = vst [vmem:[%s22143_s7 + $0x80] sm:$0xff] %v10242_v42  ;;  %10268 = vst [vmem:[%s22143_s7 + $0x88] sm:$0xff] %v10243_v40 }
 0xee5   :  { %10269 = vst [vmem:[%s22143_s7 + $0x90] sm:$0xff] %v10244_v14  ;;  %10270 = vst [vmem:[%s22143_s7 + $0x98] sm:$0xff] %v10245_v31 }
 0xee6   :  { %10271 = vst [vmem:[%s22143_s7 + $0xa0] sm:$0xff] %v10246_v2  ;;  %10272 = vst [vmem:[%s22143_s7 + $0xa8] sm:$0xff] %v10247_v39 }
 0xee7   :  { %10273 = vst [vmem:[%s22143_s7 + $0xb0] sm:$0xff] %v10248_v52  ;;  %10274 = vst [vmem:[%s22143_s7 + $0xb8] sm:$0xff] %v10249_v6 }
 0xee8   :  { %10275 = vst [vmem:[%s22143_s7 + $0xc0] sm:$0xff] %v10250_v41 }

</bundles_post_ra>
